<compile_context>
chip_gen: v7x
topology: tpu7x:2x2x1
jax: 0.10.0
libtpu: 0.0.40
codegen_flags: <defaults>
</compile_context>

<pallas_src>
import numpy as np
import jax
import jax.numpy as jnp
from jax import lax
from jax.experimental import pallas as pl
from jax.experimental.pallas import tpu as pltpu

# ---- small, module-consistent config -------------------------------------
MODES = 8          # SpectralConv1d modes1 (<= S//2 + 1)
WIDTH = 32         # lifting width
BATCH = 2
S = 128            # spatial size; S % 128 == 0 keeps torch.reshape([-1,128]) per-sample
FC1 = 128          # hard-coded in the module (fc1 -> 128, fc2 -> 1)
FC3 = 256          # ft_fc3 -> 256
LAYERS = 4

# synthetic transfer-learning scalars (see TODO above)
LAMBDA0, LAMBDA1, LAMBDA3, LAMBDA7 = 0.9, 0.8, 0.7, 0.6

_SQRT_HALF = 0.7071067811865476


def _erf(x):
    # Abramowitz & Stegun 7.1.26 (|err| <= 1.5e-7).  1/(1+p|x|) uses the EUP
    # approximate reciprocal plus one Newton step instead of a VPU divide.
    p = 0.3275911
    a1, a2, a3, a4, a5 = 0.254829592, -0.284496736, 1.421413741, -1.453152027, 1.061405429
    sgn = jnp.where(x < 0.0, -1.0, 1.0)
    ax = jnp.abs(x)
    d = 1.0 + p * ax
    r = pl.reciprocal(d, approx=True)
    t = r * (2.0 - d * r)                      # Newton refinement -> ~f32-exact
    poly = ((((a5 * t + a4) * t + a3) * t + a2) * t + a1) * t
    return sgn * (1.0 - poly * jnp.exp(-ax * ax))


def _gelu(x):  # F.gelu default (erf form)
    return 0.5 * x * (1.0 + _erf(x * _SQRT_HALF))


# ---------------------------------------------------------------------------
# Fused Pallas kernel: one grid step == one batch sample (S spatial rows).
# fc0 -> 4 Fourier layers -> fc1 -> fc2 -> ft_fc3 head, all in VMEM.
# ---------------------------------------------------------------------------
def fno_fused_kernel(xin_ref, dft_ref, idri_ref,
                     fc0w_ref, fc0b_ref, wr_ref, wi_ref, cw_ref, cb_ref,
                     fc1w_ref, fc1b_ref, fc2w_ref, fc2b_ref, fc3w_ref, fc3b_ref,
                     out_ref):
    M = dft_ref.shape[0] // 2            # retained Fourier modes
    C = fc0w_ref.shape[1]                # width
    MC = M * C
    K3 = fc3w_ref.shape[0]               # 128 (ft_fc3 input width)
    n_rows = out_ref.shape[1]            # S // 128 output rows for this sample

    xin = xin_ref[0]                     # (S, 2) = [a(x), grid]
    w0 = fc0w_ref[...]                   # (2, C)
    # fc0: Linear(2 -> width) as two broadcast MACs (K = 2)
    h0 = xin[:, 0:1] * w0[0:1, :] + xin[:, 1:2] * w0[1:2, :] + fc0b_ref[...]   # (S, C)

    dft = dft_ref[...]                   # (2M, S): [cos ; -sin] forward rDFT rows
    idri = idri_ref[...]                 # (S, 2M): [coef*cos | -coef*sin] inverse rDFT

    # Block-diagonal selection mask, generated in-kernel (no constant DMA).
    col = lax.broadcasted_iota(jnp.int32, (M, MC), 1)
    row = lax.broadcasted_iota(jnp.int32, (M, MC), 0)
    lo = row * C
    sel = jnp.where((col >= lo) & (col < lo + C), 1.0, 0.0)        # (M, M*C)

    def fourier_layer(h, l):
        # rfft restricted to the first M bins: one (2M,S)@(S,C) matmul
        F = jnp.dot(dft, h, preferred_element_type=jnp.float32)    # (2M, C)
        fr = F[:M, :]                                              # (M, C) real
        fi = F[M:, :]                                              # (M, C) imag
        # lane-replicate + mask -> block-diag: row k holds f[k,:] in column block k
        FDr = jnp.concatenate([fr] * M, axis=1) * sel              # (M, M*C)
        FDi = jnp.concatenate([fi] * M, axis=1) * sel
        wr = wr_ref[l]                                             # (M*C, C)
        wi = wi_ref[l]
        o_r = (jnp.dot(FDr, wr, preferred_element_type=jnp.float32)
               - jnp.dot(FDi, wi, preferred_element_type=jnp.float32))   # (M, C)
        o_i = (jnp.dot(FDr, wi, preferred_element_type=jnp.float32)
               + jnp.dot(FDi, wr, preferred_element_type=jnp.float32))   # (M, C)
        o_stack = jnp.concatenate([o_r, o_i], axis=0)              # (2M, C)
        # fused inverse rDFT (real+imag in one matmul) + pointwise Conv1d(width,width,1)
        return (jnp.dot(idri, o_stack, preferred_element_type=jnp.float32)
                + jnp.dot(h, cw_ref[l], preferred_element_type=jnp.float32)
                + cb_ref[l])                                       # (S, C)

    f1 = fourier_layer(h0, 0)
    h1 = _gelu(f1 + LAMBDA0 * h0)
    f2 = fourier_layer(h1, 1)
    h2 = _gelu(f2 + LAMBDA1 * f1)
    f3 = fourier_layer(h2, 2)
    h3 = _gelu(f3 + LAMBDA3 * f2)
    f4 = fourier_layer(h3, 3)
    h4 = _gelu(f4 + LAMBDA7 * f2)        # skip uses x_f2, exactly as the torch code does

    p1 = _gelu(jnp.dot(h4, fc1w_ref[...], preferred_element_type=jnp.float32)
               + fc1b_ref[...])                                          # (S, 128)
    # fc2 (128 -> 1) as a lane reduction instead of an N=1 MXU matmul
    p2 = _gelu(jnp.sum(p1 * fc2w_ref[...], axis=-1, keepdims=True) + fc2b_ref[...])  # (S, 1)

    # ft_fc3 head: torch.reshape(x, [-1, 128]) @ fc3w.  Each chunk of 128 spatial
    # points of this sample is one output row (n_rows == 1 for the default config),
    # computed as a sublane reduction.
    fc3w = fc3w_ref[...]                                                 # (128, 256)
    rows = [jnp.sum(p2[j * K3:(j + 1) * K3, :] * fc3w, axis=0, keepdims=True)
            for j in range(n_rows)]
    z = rows[0] if n_rows == 1 else jnp.concatenate(rows, axis=0)
    out_ref[0] = z + fc3b_ref[...]                                       # (n_rows, 256)


# ---------------------------------------------------------------------------
# Host-side constants (per-sample DFT bases; O(1) in batch) and weights.
# ---------------------------------------------------------------------------
def make_consts():
    assert MODES <= S // 2 + 1
    n = np.arange(S)
    k = np.arange(MODES)
    ang = 2.0 * np.pi * np.outer(k, n) / S                        # (M, S)
    cosM = np.cos(ang).astype(np.float32)
    nsinM = (-np.sin(ang)).astype(np.float32)
    dft = np.concatenate([cosM, nsinM], axis=0).astype(np.float32)   # (2M, S)

    coef = np.full((MODES, 1), 2.0 / S, dtype=np.float32)         # irfft scaling
    coef[0, 0] = 1.0 / S                                          # DC bin
    if S % 2 == 0 and MODES - 1 == S // 2:
        coef[-1, 0] = 1.0 / S                                     # Nyquist bin (if retained)
    idr = (coef * cosM).T                                         # (S, M)
    idi = (coef * nsinM).T                                        # (S, M)
    idri = np.concatenate([idr, idi], axis=1).astype(np.float32)  # (S, 2M)
    return jnp.asarray(dft), jnp.asarray(idri)


def init_params(key):
    ks = jax.random.split(key, 12)
    u = lambda k, shape, bound: jax.random.uniform(k, shape, jnp.float32, -bound, bound)
    fc0w = u(ks[0], (2, WIDTH), 1.0 / np.sqrt(2.0))               # Linear(2, width), (in, out)
    fc0b = u(ks[1], (1, WIDTH), 1.0 / np.sqrt(2.0))
    scale = 1.0 / (WIDTH * WIDTH)                                 # SpectralConv1d scale
    wr = scale * jax.random.uniform(ks[2], (LAYERS, MODES, WIDTH, WIDTH), jnp.float32)
    wi = scale * jax.random.uniform(ks[3], (LAYERS, MODES, WIDTH, WIDTH), jnp.float32)
    kb = 1.0 / np.sqrt(WIDTH)
    cw = u(ks[4], (LAYERS, WIDTH, WIDTH), kb)                     # Conv1d(w,w,1), (layer,in,out)
    cb = u(ks[5], (LAYERS, 1, WIDTH), kb)
    fc1w = u(ks[6], (WIDTH, FC1), 1.0 / np.sqrt(WIDTH))
    fc1b = u(ks[7], (1, FC1), 1.0 / np.sqrt(WIDTH))
    fc2w = u(ks[8], (FC1, 1), 1.0 / np.sqrt(FC1))
    fc2b = u(ks[9], (1, 1), 1.0 / np.sqrt(FC1))
    fc3w = u(ks[10], (FC1, FC3), 1.0 / np.sqrt(FC1))
    fc3b = u(ks[11], (1, FC3), 1.0 / np.sqrt(FC1))
    return (fc0w, fc0b, wr, wi, cw, cb, fc1w, fc1b, fc2w, fc2b, fc3w, fc3b)


# ---------------------------------------------------------------------------
# Forward wrapper (single pallas_call, batch == parallel grid axis) + reference.
# ---------------------------------------------------------------------------
def fno1d_forward(x, params, consts):
    # x: (B, S, 1) float32, like the torch input (batchsize, x=s, c=1)
    (fc0w, fc0b, wr, wi, cw, cb, fc1w, fc1b, fc2w, fc2b, fc3w, fc3b) = params
    dft, idri = consts
    B = x.shape[0]
    assert S % FC1 == 0, "per-sample grid requires reshape([-1,128]) rows not to cross samples"
    n_per = S // FC1

    gridx = jnp.broadcast_to(
        jnp.linspace(0.0, 1.0, S, dtype=jnp.float32).reshape(1, S, 1), (B, S, 1))
    xin = jnp.concatenate([x, gridx], axis=-1)                    # (B, S, 2)

    wr_blk = wr.reshape(LAYERS, MODES * WIDTH, WIDTH)             # mode-major row blocks
    wi_blk = wi.reshape(LAYERS, MODES * WIDTH, WIDTH)
    fc2w_row = fc2w.reshape(1, FC1)

    weights = (dft, idri, fc0w, fc0b, wr_blk, wi_blk, cw, cb,
               fc1w, fc1b, fc2w_row, fc2b, fc3w, fc3b)

    def resident(a):                      # constant index_map: stays in VMEM across the grid
        nd = a.ndim
        return pl.BlockSpec(a.shape, lambda b, _nd=nd: (0,) * _nd)

    out = pl.pallas_call(
        fno_fused_kernel,
        out_shape=jax.ShapeDtypeStruct((B, n_per, FC3), jnp.float32),
        grid=(B,),
        in_specs=[pl.BlockSpec((1, S, 2), lambda b: (b, 0, 0))]
                 + [resident(a) for a in weights],
        out_specs=pl.BlockSpec((1, n_per, FC3), lambda b: (b, 0, 0)),
        compiler_params=pltpu.CompilerParams(
            dimension_semantics=("parallel",)),
    )(xin, *weights)
    return out.reshape(B * n_per, FC3)


def reference_forward(x, params):
    (fc0w, fc0b, wr, wi, cw, cb, fc1w, fc1b, fc2w, fc2b, fc3w, fc3b) = params
    B = x.shape[0]
    gridx = jnp.broadcast_to(
        jnp.linspace(0.0, 1.0, S, dtype=jnp.float32).reshape(1, S, 1), (B, S, 1))
    h = jnp.concatenate([x, gridx], axis=-1) @ fc0w + fc0b        # (B, S, C)
    h = jnp.transpose(h, (0, 2, 1))                               # (B, C, S) channels-first
    gelu = lambda v: jax.nn.gelu(v, approximate=False)

    def spec(hcf, l):
        x_ft = jnp.fft.rfft(hcf, axis=-1)
        w = (wr[l] + 1j * wi[l]).astype(jnp.complex64)            # (M, in, out)
        out_m = jnp.einsum('bik,kio->bok', x_ft[:, :, :MODES], w)
        out_ft = jnp.zeros((B, WIDTH, S // 2 + 1), jnp.complex64).at[:, :, :MODES].set(out_m)
        return jnp.fft.irfft(out_ft, n=S, axis=-1)

    def pw(hcf, l):
        return jnp.einsum('bis,io->bos', hcf, cw[l]) + cb[l].reshape(1, WIDTH, 1)

    f1 = spec(h, 0) + pw(h, 0)
    h1 = gelu(f1 + LAMBDA0 * h)
    f2 = spec(h1, 1) + pw(h1, 1)
    h2 = gelu(f2 + LAMBDA1 * f1)
    f3 = spec(h2, 2) + pw(h2, 2)
    h3 = gelu(f3 + LAMBDA3 * f2)
    f4 = spec(h3, 3) + pw(h3, 3)
    h4 = gelu(f4 + LAMBDA7 * f2)

    h4 = jnp.transpose(h4, (0, 2, 1))                             # (B, S, C)
    p1 = gelu(h4 @ fc1w + fc1b)
    p2 = gelu(p1 @ fc2w + fc2b)                                   # (B, S, 1)
    return p2.reshape(-1, FC1) @ fc3w + fc3b


if __name__ == "__main__":
    key = jax.random.PRNGKey(0)
    kx, kp = jax.random.split(key)
    x = jax.random.normal(kx, (BATCH, S, 1), dtype=jnp.float32)
    params = init_params(kp)
    consts = make_consts()

    out = jax.block_until_ready(jax.jit(fno1d_forward)(x, params, consts))
    ref = jax.block_until_ready(reference_forward(x, params))

    assert out.shape == (BATCH * S // FC1, FC3), out.shape
    if not np.allclose(np.asarray(out), np.asarray(ref), atol=2e-3, rtol=2e-2):
        max_err = float(np.max(np.abs(np.asarray(out) - np.asarray(ref))))
        raise AssertionError(f"mismatch vs reference, max abs err = {max_err}")
    print("KERNEL_OK")
</pallas_src>

<mosaic_0001>
module attributes {stable_mosaic.version = 11 : i64} {
  func.func @fno_fused_kernel(%arg0: i32, %arg1: memref<1x128x2xf32, #tpu.memory_space<vmem>>, %arg2: memref<16x128xf32, #tpu.memory_space<vmem>>, %arg3: memref<128x16xf32, #tpu.memory_space<vmem>>, %arg4: memref<2x32xf32, #tpu.memory_space<vmem>>, %arg5: memref<1x32xf32, #tpu.memory_space<vmem>>, %arg6: memref<4x256x32xf32, #tpu.memory_space<vmem>>, %arg7: memref<4x256x32xf32, #tpu.memory_space<vmem>>, %arg8: memref<4x32x32xf32, #tpu.memory_space<vmem>>, %arg9: memref<4x1x32xf32, #tpu.memory_space<vmem>>, %arg10: memref<32x128xf32, #tpu.memory_space<vmem>>, %arg11: memref<1x128xf32, #tpu.memory_space<vmem>>, %arg12: memref<1x128xf32, #tpu.memory_space<vmem>>, %arg13: memref<1x1xf32, #tpu.memory_space<vmem>>, %arg14: memref<128x256xf32, #tpu.memory_space<vmem>>, %arg15: memref<1x256xf32, #tpu.memory_space<vmem>>, %arg16: memref<1x1x256xf32, #tpu.memory_space<vmem>>) attributes {dimension_semantics = [#tpu.dimension_semantics<parallel>], iteration_bounds = array<i64: 2>, scalar_prefetch = 0 : i64, scratch_operands = 0 : i64, tpu.core_type = #tpu.core_type<tc>, window_params = [{transform_indices = @transform_0, window_bounds = array<i64: 1, 128, 2>}, {pipeline_mode = #tpu.pipeline_mode<synchronous>, transform_indices = @transform_1, window_bounds = array<i64: 16, 128>}, {pipeline_mode = #tpu.pipeline_mode<synchronous>, transform_indices = @transform_2, window_bounds = array<i64: 128, 16>}, {pipeline_mode = #tpu.pipeline_mode<synchronous>, transform_indices = @transform_3, window_bounds = array<i64: 2, 32>}, {pipeline_mode = #tpu.pipeline_mode<synchronous>, transform_indices = @transform_4, window_bounds = array<i64: 1, 32>}, {pipeline_mode = #tpu.pipeline_mode<synchronous>, transform_indices = @transform_5, window_bounds = array<i64: 4, 256, 32>}, {pipeline_mode = #tpu.pipeline_mode<synchronous>, transform_indices = @transform_6, window_bounds = array<i64: 4, 256, 32>}, {pipeline_mode = #tpu.pipeline_mode<synchronous>, transform_indices = @transform_7, window_bounds = array<i64: 4, 32, 32>}, {pipeline_mode = #tpu.pipeline_mode<synchronous>, transform_indices = @transform_8, window_bounds = array<i64: 4, 1, 32>}, {pipeline_mode = #tpu.pipeline_mode<synchronous>, transform_indices = @transform_9, window_bounds = array<i64: 32, 128>}, {pipeline_mode = #tpu.pipeline_mode<synchronous>, transform_indices = @transform_10, window_bounds = array<i64: 1, 128>}, {pipeline_mode = #tpu.pipeline_mode<synchronous>, transform_indices = @transform_11, window_bounds = array<i64: 1, 128>}, {pipeline_mode = #tpu.pipeline_mode<synchronous>, transform_indices = @transform_12, window_bounds = array<i64: 1, 1>}, {pipeline_mode = #tpu.pipeline_mode<synchronous>, transform_indices = @transform_13, window_bounds = array<i64: 128, 256>}, {pipeline_mode = #tpu.pipeline_mode<synchronous>, transform_indices = @transform_14, window_bounds = array<i64: 1, 256>}, {transform_indices = @transform_15, window_bounds = array<i64: 1, 1, 256>}]} {
    %c0 = arith.constant 0 : index
    %c0_0 = arith.constant 0 : index
    %c0_1 = arith.constant 0 : index
    %0 = vector.load %arg1[%c0, %c0_0, %c0_1] : memref<1x128x2xf32, #tpu.memory_space<vmem>>, vector<1x128x2xf32>
    %1 = vector.shape_cast %0 : vector<1x128x2xf32> to vector<128x2xf32>
    %c0_2 = arith.constant 0 : index
    %c0_3 = arith.constant 0 : index
    %2 = vector.load %arg4[%c0_2, %c0_3] : memref<2x32xf32, #tpu.memory_space<vmem>>, vector<2x32xf32>
    %3 = vector.extract_strided_slice %1 {offsets = [0, 0], sizes = [128, 1], strides = [1, 1]} : vector<128x2xf32> to vector<128x1xf32>
    %4 = vector.extract_strided_slice %2 {offsets = [0, 0], sizes = [1, 32], strides = [1, 1]} : vector<2x32xf32> to vector<1x32xf32>
    %5 = vector.broadcast %3 : vector<128x1xf32> to vector<128x32xf32>
    %6 = vector.broadcast %4 : vector<1x32xf32> to vector<128x32xf32>
    %7 = arith.mulf %5, %6 : vector<128x32xf32>
    %8 = vector.extract_strided_slice %1 {offsets = [0, 1], sizes = [128, 1], strides = [1, 1]} : vector<128x2xf32> to vector<128x1xf32>
    %9 = vector.extract_strided_slice %2 {offsets = [1, 0], sizes = [1, 32], strides = [1, 1]} : vector<2x32xf32> to vector<1x32xf32>
    %10 = vector.broadcast %8 : vector<128x1xf32> to vector<128x32xf32>
    %11 = vector.broadcast %9 : vector<1x32xf32> to vector<128x32xf32>
    %12 = arith.mulf %10, %11 : vector<128x32xf32>
    %13 = arith.addf %7, %12 : vector<128x32xf32>
    %c0_4 = arith.constant 0 : index
    %c0_5 = arith.constant 0 : index
    %14 = vector.load %arg5[%c0_4, %c0_5] : memref<1x32xf32, #tpu.memory_space<vmem>>, vector<1x32xf32>
    %15 = vector.broadcast %14 : vector<1x32xf32> to vector<128x32xf32>
    %16 = arith.addf %13, %15 : vector<128x32xf32>
    %c0_6 = arith.constant 0 : index
    %c0_7 = arith.constant 0 : index
    %17 = vector.load %arg2[%c0_6, %c0_7] : memref<16x128xf32, #tpu.memory_space<vmem>>, vector<16x128xf32>
    %c0_8 = arith.constant 0 : index
    %c0_9 = arith.constant 0 : index
    %18 = vector.load %arg3[%c0_8, %c0_9] : memref<128x16xf32, #tpu.memory_space<vmem>>, vector<128x16xf32>
    %19 = tpu.iota {dimensions = array<i32: 1>} : vector<8x256xi32>
    %20 = tpu.iota {dimensions = array<i32: 0>} : vector<8x256xi32>
    %c32_i32 = arith.constant 32 : i32
    %21 = vector.broadcast %c32_i32 : i32 to vector<8x256xi32>
    %22 = arith.muli %20, %21 : vector<8x256xi32>
    %23 = arith.cmpi sge, %19, %22 : vector<8x256xi32>
    %c32_i32_10 = arith.constant 32 : i32
    %24 = vector.broadcast %c32_i32_10 : i32 to vector<8x256xi32>
    %25 = arith.addi %22, %24 : vector<8x256xi32>
    %26 = arith.cmpi slt, %19, %25 : vector<8x256xi32>
    %27 = arith.andi %23, %26 : vector<8x256xi1>
    %cst = arith.constant 1.000000e+00 : f32
    %cst_11 = arith.constant 0.000000e+00 : f32
    %28 = vector.broadcast %cst : f32 to vector<8x256xf32>
    %29 = vector.broadcast %cst_11 : f32 to vector<8x256xf32>
    %30 = arith.select %27, %28, %29 : vector<8x256xi1>, vector<8x256xf32>
    %cst_12 = arith.constant dense<0.000000e+00> : vector<16x32xf32>
    %31 = tpu.matmul %17, %16, %cst_12 {dimension_numbers = #tpu.dot_dimension_numbers<[1], [0], [0], [1], [0, 0, 1, 1], [], []>} : vector<16x128xf32>, vector<128x32xf32>, vector<16x32xf32> -> vector<16x32xf32>
    %32 = vector.extract_strided_slice %31 {offsets = [0, 0], sizes = [8, 32], strides = [1, 1]} : vector<16x32xf32> to vector<8x32xf32>
    %33 = vector.extract_strided_slice %31 {offsets = [8, 0], sizes = [8, 32], strides = [1, 1]} : vector<16x32xf32> to vector<8x32xf32>
    %34 = tpu.concatenate %32, %32, %32, %32, %32, %32, %32, %32 in 1 : vector<8x32xf32>, vector<8x32xf32>, vector<8x32xf32>, vector<8x32xf32>, vector<8x32xf32>, vector<8x32xf32>, vector<8x32xf32>, vector<8x32xf32> -> vector<8x256xf32>
    %35 = arith.mulf %34, %30 : vector<8x256xf32>
    %36 = tpu.concatenate %33, %33, %33, %33, %33, %33, %33, %33 in 1 : vector<8x32xf32>, vector<8x32xf32>, vector<8x32xf32>, vector<8x32xf32>, vector<8x32xf32>, vector<8x32xf32>, vector<8x32xf32>, vector<8x32xf32> -> vector<8x256xf32>
    %37 = arith.mulf %36, %30 : vector<8x256xf32>
    %c0_13 = arith.constant 0 : index
    %c0_14 = arith.constant 0 : index
    %c0_15 = arith.constant 0 : index
    %38 = vector.load %arg6[%c0_13, %c0_14, %c0_15] : memref<4x256x32xf32, #tpu.memory_space<vmem>>, vector<1x256x32xf32>
    %39 = vector.shape_cast %38 : vector<1x256x32xf32> to vector<256x32xf32>
    %c0_16 = arith.constant 0 : index
    %c0_17 = arith.constant 0 : index
    %c0_18 = arith.constant 0 : index
    %40 = vector.load %arg7[%c0_16, %c0_17, %c0_18] : memref<4x256x32xf32, #tpu.memory_space<vmem>>, vector<1x256x32xf32>
    %41 = vector.shape_cast %40 : vector<1x256x32xf32> to vector<256x32xf32>
    %cst_19 = arith.constant dense<0.000000e+00> : vector<8x32xf32>
    %42 = tpu.matmul %35, %39, %cst_19 {dimension_numbers = #tpu.dot_dimension_numbers<[1], [0], [0], [1], [0, 0, 1, 1], [], []>} : vector<8x256xf32>, vector<256x32xf32>, vector<8x32xf32> -> vector<8x32xf32>
    %cst_20 = arith.constant dense<0.000000e+00> : vector<8x32xf32>
    %43 = tpu.matmul %37, %41, %cst_20 {dimension_numbers = #tpu.dot_dimension_numbers<[1], [0], [0], [1], [0, 0, 1, 1], [], []>} : vector<8x256xf32>, vector<256x32xf32>, vector<8x32xf32> -> vector<8x32xf32>
    %44 = arith.subf %42, %43 : vector<8x32xf32>
    %cst_21 = arith.constant dense<0.000000e+00> : vector<8x32xf32>
    %45 = tpu.matmul %35, %41, %cst_21 {dimension_numbers = #tpu.dot_dimension_numbers<[1], [0], [0], [1], [0, 0, 1, 1], [], []>} : vector<8x256xf32>, vector<256x32xf32>, vector<8x32xf32> -> vector<8x32xf32>
    %cst_22 = arith.constant dense<0.000000e+00> : vector<8x32xf32>
    %46 = tpu.matmul %37, %39, %cst_22 {dimension_numbers = #tpu.dot_dimension_numbers<[1], [0], [0], [1], [0, 0, 1, 1], [], []>} : vector<8x256xf32>, vector<256x32xf32>, vector<8x32xf32> -> vector<8x32xf32>
    %47 = arith.addf %45, %46 : vector<8x32xf32>
    %48 = tpu.concatenate %44, %47 in 0 : vector<8x32xf32>, vector<8x32xf32> -> vector<16x32xf32>
    %cst_23 = arith.constant dense<0.000000e+00> : vector<128x32xf32>
    %49 = tpu.matmul %18, %48, %cst_23 {dimension_numbers = #tpu.dot_dimension_numbers<[1], [0], [0], [1], [0, 0, 1, 1], [], []>} : vector<128x16xf32>, vector<16x32xf32>, vector<128x32xf32> -> vector<128x32xf32>
    %c0_24 = arith.constant 0 : index
    %c0_25 = arith.constant 0 : index
    %c0_26 = arith.constant 0 : index
    %50 = vector.load %arg8[%c0_24, %c0_25, %c0_26] : memref<4x32x32xf32, #tpu.memory_space<vmem>>, vector<1x32x32xf32>
    %51 = vector.shape_cast %50 : vector<1x32x32xf32> to vector<32x32xf32>
    %cst_27 = arith.constant dense<0.000000e+00> : vector<128x32xf32>
    %52 = tpu.matmul %16, %51, %cst_27 {dimension_numbers = #tpu.dot_dimension_numbers<[1], [0], [0], [1], [0, 0, 1, 1], [], []>} : vector<128x32xf32>, vector<32x32xf32>, vector<128x32xf32> -> vector<128x32xf32>
    %53 = arith.addf %49, %52 : vector<128x32xf32>
    %c0_28 = arith.constant 0 : index
    %c0_29 = arith.constant 0 : index
    %c0_30 = arith.constant 0 : index
    %54 = vector.load %arg9[%c0_28, %c0_29, %c0_30] : memref<4x1x32xf32, #tpu.memory_space<vmem>>, vector<1x1x32xf32>
    %55 = vector.shape_cast %54 : vector<1x1x32xf32> to vector<1x32xf32>
    %56 = vector.broadcast %55 : vector<1x32xf32> to vector<128x32xf32>
    %57 = arith.addf %53, %56 : vector<128x32xf32>
    %cst_31 = arith.constant 0.899999976 : f32
    %58 = vector.broadcast %cst_31 : f32 to vector<128x32xf32>
    %59 = arith.mulf %58, %16 : vector<128x32xf32>
    %60 = arith.addf %57, %59 : vector<128x32xf32>
    %cst_32 = arith.constant 5.000000e-01 : f32
    %61 = vector.broadcast %cst_32 : f32 to vector<128x32xf32>
    %62 = arith.mulf %61, %60 : vector<128x32xf32>
    %cst_33 = arith.constant 0.707106769 : f32
    %63 = vector.broadcast %cst_33 : f32 to vector<128x32xf32>
    %64 = arith.mulf %60, %63 : vector<128x32xf32>
    %cst_34 = arith.constant 0.000000e+00 : f32
    %65 = vector.broadcast %cst_34 : f32 to vector<128x32xf32>
    %66 = arith.cmpf olt, %64, %65 : vector<128x32xf32>
    %cst_35 = arith.constant -1.000000e+00 : f32
    %cst_36 = arith.constant 1.000000e+00 : f32
    %67 = vector.broadcast %cst_35 : f32 to vector<128x32xf32>
    %68 = vector.broadcast %cst_36 : f32 to vector<128x32xf32>
    %69 = arith.select %66, %67, %68 : vector<128x32xi1>, vector<128x32xf32>
    %70 = math.absf %64 : vector<128x32xf32>
    %cst_37 = arith.constant 0.327591091 : f32
    %71 = vector.broadcast %cst_37 : f32 to vector<128x32xf32>
    %72 = arith.mulf %71, %70 : vector<128x32xf32>
    %cst_38 = arith.constant 1.000000e+00 : f32
    %73 = vector.broadcast %cst_38 : f32 to vector<128x32xf32>
    %74 = arith.addf %73, %72 : vector<128x32xf32>
    %75 = tpu.reciprocal %74 {approx = true} : vector<128x32xf32> -> vector<128x32xf32>
    %76 = arith.mulf %74, %75 : vector<128x32xf32>
    %cst_39 = arith.constant 2.000000e+00 : f32
    %77 = vector.broadcast %cst_39 : f32 to vector<128x32xf32>
    %78 = arith.subf %77, %76 : vector<128x32xf32>
    %79 = arith.mulf %75, %78 : vector<128x32xf32>
    %cst_40 = arith.constant 1.06140542 : f32
    %80 = vector.broadcast %cst_40 : f32 to vector<128x32xf32>
    %81 = arith.mulf %80, %79 : vector<128x32xf32>
    %cst_41 = arith.constant -1.45315206 : f32
    %82 = vector.broadcast %cst_41 : f32 to vector<128x32xf32>
    %83 = arith.addf %81, %82 : vector<128x32xf32>
    %84 = arith.mulf %83, %79 : vector<128x32xf32>
    %cst_42 = arith.constant 1.42141378 : f32
    %85 = vector.broadcast %cst_42 : f32 to vector<128x32xf32>
    %86 = arith.addf %84, %85 : vector<128x32xf32>
    %87 = arith.mulf %86, %79 : vector<128x32xf32>
    %cst_43 = arith.constant -0.284496725 : f32
    %88 = vector.broadcast %cst_43 : f32 to vector<128x32xf32>
    %89 = arith.addf %87, %88 : vector<128x32xf32>
    %90 = arith.mulf %89, %79 : vector<128x32xf32>
    %cst_44 = arith.constant 0.254829586 : f32
    %91 = vector.broadcast %cst_44 : f32 to vector<128x32xf32>
    %92 = arith.addf %90, %91 : vector<128x32xf32>
    %93 = arith.mulf %92, %79 : vector<128x32xf32>
    %cst_45 = arith.constant 0.000000e+00 : f32
    %94 = vector.broadcast %cst_45 : f32 to vector<128x32xf32>
    %95 = arith.subf %94, %70 : vector<128x32xf32>
    %96 = arith.mulf %95, %70 : vector<128x32xf32>
    %97 = math.exp %96 : vector<128x32xf32>
    %98 = arith.mulf %93, %97 : vector<128x32xf32>
    %cst_46 = arith.constant 1.000000e+00 : f32
    %99 = vector.broadcast %cst_46 : f32 to vector<128x32xf32>
    %100 = arith.subf %99, %98 : vector<128x32xf32>
    %101 = arith.mulf %69, %100 : vector<128x32xf32>
    %cst_47 = arith.constant 1.000000e+00 : f32
    %102 = vector.broadcast %cst_47 : f32 to vector<128x32xf32>
    %103 = arith.addf %102, %101 : vector<128x32xf32>
    %104 = arith.mulf %62, %103 : vector<128x32xf32>
    %cst_48 = arith.constant dense<0.000000e+00> : vector<16x32xf32>
    %105 = tpu.matmul %17, %104, %cst_48 {dimension_numbers = #tpu.dot_dimension_numbers<[1], [0], [0], [1], [0, 0, 1, 1], [], []>} : vector<16x128xf32>, vector<128x32xf32>, vector<16x32xf32> -> vector<16x32xf32>
    %106 = vector.extract_strided_slice %105 {offsets = [0, 0], sizes = [8, 32], strides = [1, 1]} : vector<16x32xf32> to vector<8x32xf32>
    %107 = vector.extract_strided_slice %105 {offsets = [8, 0], sizes = [8, 32], strides = [1, 1]} : vector<16x32xf32> to vector<8x32xf32>
    %108 = tpu.concatenate %106, %106, %106, %106, %106, %106, %106, %106 in 1 : vector<8x32xf32>, vector<8x32xf32>, vector<8x32xf32>, vector<8x32xf32>, vector<8x32xf32>, vector<8x32xf32>, vector<8x32xf32>, vector<8x32xf32> -> vector<8x256xf32>
    %109 = arith.mulf %108, %30 : vector<8x256xf32>
    %110 = tpu.concatenate %107, %107, %107, %107, %107, %107, %107, %107 in 1 : vector<8x32xf32>, vector<8x32xf32>, vector<8x32xf32>, vector<8x32xf32>, vector<8x32xf32>, vector<8x32xf32>, vector<8x32xf32>, vector<8x32xf32> -> vector<8x256xf32>
    %111 = arith.mulf %110, %30 : vector<8x256xf32>
    %c1 = arith.constant 1 : index
    %c0_49 = arith.constant 0 : index
    %c0_50 = arith.constant 0 : index
    %112 = vector.load %arg6[%c1, %c0_49, %c0_50] : memref<4x256x32xf32, #tpu.memory_space<vmem>>, vector<1x256x32xf32>
    %113 = vector.shape_cast %112 : vector<1x256x32xf32> to vector<256x32xf32>
    %c1_51 = arith.constant 1 : index
    %c0_52 = arith.constant 0 : index
    %c0_53 = arith.constant 0 : index
    %114 = vector.load %arg7[%c1_51, %c0_52, %c0_53] : memref<4x256x32xf32, #tpu.memory_space<vmem>>, vector<1x256x32xf32>
    %115 = vector.shape_cast %114 : vector<1x256x32xf32> to vector<256x32xf32>
    %cst_54 = arith.constant dense<0.000000e+00> : vector<8x32xf32>
    %116 = tpu.matmul %109, %113, %cst_54 {dimension_numbers = #tpu.dot_dimension_numbers<[1], [0], [0], [1], [0, 0, 1, 1], [], []>} : vector<8x256xf32>, vector<256x32xf32>, vector<8x32xf32> -> vector<8x32xf32>
    %cst_55 = arith.constant dense<0.000000e+00> : vector<8x32xf32>
    %117 = tpu.matmul %111, %115, %cst_55 {dimension_numbers = #tpu.dot_dimension_numbers<[1], [0], [0], [1], [0, 0, 1, 1], [], []>} : vector<8x256xf32>, vector<256x32xf32>, vector<8x32xf32> -> vector<8x32xf32>
    %118 = arith.subf %116, %117 : vector<8x32xf32>
    %cst_56 = arith.constant dense<0.000000e+00> : vector<8x32xf32>
    %119 = tpu.matmul %109, %115, %cst_56 {dimension_numbers = #tpu.dot_dimension_numbers<[1], [0], [0], [1], [0, 0, 1, 1], [], []>} : vector<8x256xf32>, vector<256x32xf32>, vector<8x32xf32> -> vector<8x32xf32>
    %cst_57 = arith.constant dense<0.000000e+00> : vector<8x32xf32>
    %120 = tpu.matmul %111, %113, %cst_57 {dimension_numbers = #tpu.dot_dimension_numbers<[1], [0], [0], [1], [0, 0, 1, 1], [], []>} : vector<8x256xf32>, vector<256x32xf32>, vector<8x32xf32> -> vector<8x32xf32>
    %121 = arith.addf %119, %120 : vector<8x32xf32>
    %122 = tpu.concatenate %118, %121 in 0 : vector<8x32xf32>, vector<8x32xf32> -> vector<16x32xf32>
    %cst_58 = arith.constant dense<0.000000e+00> : vector<128x32xf32>
    %123 = tpu.matmul %18, %122, %cst_58 {dimension_numbers = #tpu.dot_dimension_numbers<[1], [0], [0], [1], [0, 0, 1, 1], [], []>} : vector<128x16xf32>, vector<16x32xf32>, vector<128x32xf32> -> vector<128x32xf32>
    %c1_59 = arith.constant 1 : index
    %c0_60 = arith.constant 0 : index
    %c0_61 = arith.constant 0 : index
    %124 = vector.load %arg8[%c1_59, %c0_60, %c0_61] : memref<4x32x32xf32, #tpu.memory_space<vmem>>, vector<1x32x32xf32>
    %125 = vector.shape_cast %124 : vector<1x32x32xf32> to vector<32x32xf32>
    %cst_62 = arith.constant dense<0.000000e+00> : vector<128x32xf32>
    %126 = tpu.matmul %104, %125, %cst_62 {dimension_numbers = #tpu.dot_dimension_numbers<[1], [0], [0], [1], [0, 0, 1, 1], [], []>} : vector<128x32xf32>, vector<32x32xf32>, vector<128x32xf32> -> vector<128x32xf32>
    %127 = arith.addf %123, %126 : vector<128x32xf32>
    %c1_63 = arith.constant 1 : index
    %c0_64 = arith.constant 0 : index
    %c0_65 = arith.constant 0 : index
    %128 = vector.load %arg9[%c1_63, %c0_64, %c0_65] : memref<4x1x32xf32, #tpu.memory_space<vmem>>, vector<1x1x32xf32>
    %129 = vector.shape_cast %128 : vector<1x1x32xf32> to vector<1x32xf32>
    %130 = vector.broadcast %129 : vector<1x32xf32> to vector<128x32xf32>
    %131 = arith.addf %127, %130 : vector<128x32xf32>
    %cst_66 = arith.constant 8.000000e-01 : f32
    %132 = vector.broadcast %cst_66 : f32 to vector<128x32xf32>
    %133 = arith.mulf %132, %57 : vector<128x32xf32>
    %134 = arith.addf %131, %133 : vector<128x32xf32>
    %cst_67 = arith.constant 5.000000e-01 : f32
    %135 = vector.broadcast %cst_67 : f32 to vector<128x32xf32>
    %136 = arith.mulf %135, %134 : vector<128x32xf32>
    %cst_68 = arith.constant 0.707106769 : f32
    %137 = vector.broadcast %cst_68 : f32 to vector<128x32xf32>
    %138 = arith.mulf %134, %137 : vector<128x32xf32>
    %cst_69 = arith.constant 0.000000e+00 : f32
    %139 = vector.broadcast %cst_69 : f32 to vector<128x32xf32>
    %140 = arith.cmpf olt, %138, %139 : vector<128x32xf32>
    %cst_70 = arith.constant -1.000000e+00 : f32
    %cst_71 = arith.constant 1.000000e+00 : f32
    %141 = vector.broadcast %cst_70 : f32 to vector<128x32xf32>
    %142 = vector.broadcast %cst_71 : f32 to vector<128x32xf32>
    %143 = arith.select %140, %141, %142 : vector<128x32xi1>, vector<128x32xf32>
    %144 = math.absf %138 : vector<128x32xf32>
    %cst_72 = arith.constant 0.327591091 : f32
    %145 = vector.broadcast %cst_72 : f32 to vector<128x32xf32>
    %146 = arith.mulf %145, %144 : vector<128x32xf32>
    %cst_73 = arith.constant 1.000000e+00 : f32
    %147 = vector.broadcast %cst_73 : f32 to vector<128x32xf32>
    %148 = arith.addf %147, %146 : vector<128x32xf32>
    %149 = tpu.reciprocal %148 {approx = true} : vector<128x32xf32> -> vector<128x32xf32>
    %150 = arith.mulf %148, %149 : vector<128x32xf32>
    %cst_74 = arith.constant 2.000000e+00 : f32
    %151 = vector.broadcast %cst_74 : f32 to vector<128x32xf32>
    %152 = arith.subf %151, %150 : vector<128x32xf32>
    %153 = arith.mulf %149, %152 : vector<128x32xf32>
    %cst_75 = arith.constant 1.06140542 : f32
    %154 = vector.broadcast %cst_75 : f32 to vector<128x32xf32>
    %155 = arith.mulf %154, %153 : vector<128x32xf32>
    %cst_76 = arith.constant -1.45315206 : f32
    %156 = vector.broadcast %cst_76 : f32 to vector<128x32xf32>
    %157 = arith.addf %155, %156 : vector<128x32xf32>
    %158 = arith.mulf %157, %153 : vector<128x32xf32>
    %cst_77 = arith.constant 1.42141378 : f32
    %159 = vector.broadcast %cst_77 : f32 to vector<128x32xf32>
    %160 = arith.addf %158, %159 : vector<128x32xf32>
    %161 = arith.mulf %160, %153 : vector<128x32xf32>
    %cst_78 = arith.constant -0.284496725 : f32
    %162 = vector.broadcast %cst_78 : f32 to vector<128x32xf32>
    %163 = arith.addf %161, %162 : vector<128x32xf32>
    %164 = arith.mulf %163, %153 : vector<128x32xf32>
    %cst_79 = arith.constant 0.254829586 : f32
    %165 = vector.broadcast %cst_79 : f32 to vector<128x32xf32>
    %166 = arith.addf %164, %165 : vector<128x32xf32>
    %167 = arith.mulf %166, %153 : vector<128x32xf32>
    %cst_80 = arith.constant 0.000000e+00 : f32
    %168 = vector.broadcast %cst_80 : f32 to vector<128x32xf32>
    %169 = arith.subf %168, %144 : vector<128x32xf32>
    %170 = arith.mulf %169, %144 : vector<128x32xf32>
    %171 = math.exp %170 : vector<128x32xf32>
    %172 = arith.mulf %167, %171 : vector<128x32xf32>
    %cst_81 = arith.constant 1.000000e+00 : f32
    %173 = vector.broadcast %cst_81 : f32 to vector<128x32xf32>
    %174 = arith.subf %173, %172 : vector<128x32xf32>
    %175 = arith.mulf %143, %174 : vector<128x32xf32>
    %cst_82 = arith.constant 1.000000e+00 : f32
    %176 = vector.broadcast %cst_82 : f32 to vector<128x32xf32>
    %177 = arith.addf %176, %175 : vector<128x32xf32>
    %178 = arith.mulf %136, %177 : vector<128x32xf32>
    %cst_83 = arith.constant dense<0.000000e+00> : vector<16x32xf32>
    %179 = tpu.matmul %17, %178, %cst_83 {dimension_numbers = #tpu.dot_dimension_numbers<[1], [0], [0], [1], [0, 0, 1, 1], [], []>} : vector<16x128xf32>, vector<128x32xf32>, vector<16x32xf32> -> vector<16x32xf32>
    %180 = vector.extract_strided_slice %179 {offsets = [0, 0], sizes = [8, 32], strides = [1, 1]} : vector<16x32xf32> to vector<8x32xf32>
    %181 = vector.extract_strided_slice %179 {offsets = [8, 0], sizes = [8, 32], strides = [1, 1]} : vector<16x32xf32> to vector<8x32xf32>
    %182 = tpu.concatenate %180, %180, %180, %180, %180, %180, %180, %180 in 1 : vector<8x32xf32>, vector<8x32xf32>, vector<8x32xf32>, vector<8x32xf32>, vector<8x32xf32>, vector<8x32xf32>, vector<8x32xf32>, vector<8x32xf32> -> vector<8x256xf32>
    %183 = arith.mulf %182, %30 : vector<8x256xf32>
    %184 = tpu.concatenate %181, %181, %181, %181, %181, %181, %181, %181 in 1 : vector<8x32xf32>, vector<8x32xf32>, vector<8x32xf32>, vector<8x32xf32>, vector<8x32xf32>, vector<8x32xf32>, vector<8x32xf32>, vector<8x32xf32> -> vector<8x256xf32>
    %185 = arith.mulf %184, %30 : vector<8x256xf32>
    %c2 = arith.constant 2 : index
    %c0_84 = arith.constant 0 : index
    %c0_85 = arith.constant 0 : index
    %186 = vector.load %arg6[%c2, %c0_84, %c0_85] : memref<4x256x32xf32, #tpu.memory_space<vmem>>, vector<1x256x32xf32>
    %187 = vector.shape_cast %186 : vector<1x256x32xf32> to vector<256x32xf32>
    %c2_86 = arith.constant 2 : index
    %c0_87 = arith.constant 0 : index
    %c0_88 = arith.constant 0 : index
    %188 = vector.load %arg7[%c2_86, %c0_87, %c0_88] : memref<4x256x32xf32, #tpu.memory_space<vmem>>, vector<1x256x32xf32>
    %189 = vector.shape_cast %188 : vector<1x256x32xf32> to vector<256x32xf32>
    %cst_89 = arith.constant dense<0.000000e+00> : vector<8x32xf32>
    %190 = tpu.matmul %183, %187, %cst_89 {dimension_numbers = #tpu.dot_dimension_numbers<[1], [0], [0], [1], [0, 0, 1, 1], [], []>} : vector<8x256xf32>, vector<256x32xf32>, vector<8x32xf32> -> vector<8x32xf32>
    %cst_90 = arith.constant dense<0.000000e+00> : vector<8x32xf32>
    %191 = tpu.matmul %185, %189, %cst_90 {dimension_numbers = #tpu.dot_dimension_numbers<[1], [0], [0], [1], [0, 0, 1, 1], [], []>} : vector<8x256xf32>, vector<256x32xf32>, vector<8x32xf32> -> vector<8x32xf32>
    %192 = arith.subf %190, %191 : vector<8x32xf32>
    %cst_91 = arith.constant dense<0.000000e+00> : vector<8x32xf32>
    %193 = tpu.matmul %183, %189, %cst_91 {dimension_numbers = #tpu.dot_dimension_numbers<[1], [0], [0], [1], [0, 0, 1, 1], [], []>} : vector<8x256xf32>, vector<256x32xf32>, vector<8x32xf32> -> vector<8x32xf32>
    %cst_92 = arith.constant dense<0.000000e+00> : vector<8x32xf32>
    %194 = tpu.matmul %185, %187, %cst_92 {dimension_numbers = #tpu.dot_dimension_numbers<[1], [0], [0], [1], [0, 0, 1, 1], [], []>} : vector<8x256xf32>, vector<256x32xf32>, vector<8x32xf32> -> vector<8x32xf32>
    %195 = arith.addf %193, %194 : vector<8x32xf32>
    %196 = tpu.concatenate %192, %195 in 0 : vector<8x32xf32>, vector<8x32xf32> -> vector<16x32xf32>
    %cst_93 = arith.constant dense<0.000000e+00> : vector<128x32xf32>
    %197 = tpu.matmul %18, %196, %cst_93 {dimension_numbers = #tpu.dot_dimension_numbers<[1], [0], [0], [1], [0, 0, 1, 1], [], []>} : vector<128x16xf32>, vector<16x32xf32>, vector<128x32xf32> -> vector<128x32xf32>
    %c2_94 = arith.constant 2 : index
    %c0_95 = arith.constant 0 : index
    %c0_96 = arith.constant 0 : index
    %198 = vector.load %arg8[%c2_94, %c0_95, %c0_96] : memref<4x32x32xf32, #tpu.memory_space<vmem>>, vector<1x32x32xf32>
    %199 = vector.shape_cast %198 : vector<1x32x32xf32> to vector<32x32xf32>
    %cst_97 = arith.constant dense<0.000000e+00> : vector<128x32xf32>
    %200 = tpu.matmul %178, %199, %cst_97 {dimension_numbers = #tpu.dot_dimension_numbers<[1], [0], [0], [1], [0, 0, 1, 1], [], []>} : vector<128x32xf32>, vector<32x32xf32>, vector<128x32xf32> -> vector<128x32xf32>
    %201 = arith.addf %197, %200 : vector<128x32xf32>
    %c2_98 = arith.constant 2 : index
    %c0_99 = arith.constant 0 : index
    %c0_100 = arith.constant 0 : index
    %202 = vector.load %arg9[%c2_98, %c0_99, %c0_100] : memref<4x1x32xf32, #tpu.memory_space<vmem>>, vector<1x1x32xf32>
    %203 = vector.shape_cast %202 : vector<1x1x32xf32> to vector<1x32xf32>
    %204 = vector.broadcast %203 : vector<1x32xf32> to vector<128x32xf32>
    %205 = arith.addf %201, %204 : vector<128x32xf32>
    %cst_101 = arith.constant 0.699999988 : f32
    %206 = vector.broadcast %cst_101 : f32 to vector<128x32xf32>
    %207 = arith.mulf %206, %131 : vector<128x32xf32>
    %208 = arith.addf %205, %207 : vector<128x32xf32>
    %cst_102 = arith.constant 5.000000e-01 : f32
    %209 = vector.broadcast %cst_102 : f32 to vector<128x32xf32>
    %210 = arith.mulf %209, %208 : vector<128x32xf32>
    %cst_103 = arith.constant 0.707106769 : f32
    %211 = vector.broadcast %cst_103 : f32 to vector<128x32xf32>
    %212 = arith.mulf %208, %211 : vector<128x32xf32>
    %cst_104 = arith.constant 0.000000e+00 : f32
    %213 = vector.broadcast %cst_104 : f32 to vector<128x32xf32>
    %214 = arith.cmpf olt, %212, %213 : vector<128x32xf32>
    %cst_105 = arith.constant -1.000000e+00 : f32
    %cst_106 = arith.constant 1.000000e+00 : f32
    %215 = vector.broadcast %cst_105 : f32 to vector<128x32xf32>
    %216 = vector.broadcast %cst_106 : f32 to vector<128x32xf32>
    %217 = arith.select %214, %215, %216 : vector<128x32xi1>, vector<128x32xf32>
    %218 = math.absf %212 : vector<128x32xf32>
    %cst_107 = arith.constant 0.327591091 : f32
    %219 = vector.broadcast %cst_107 : f32 to vector<128x32xf32>
    %220 = arith.mulf %219, %218 : vector<128x32xf32>
    %cst_108 = arith.constant 1.000000e+00 : f32
    %221 = vector.broadcast %cst_108 : f32 to vector<128x32xf32>
    %222 = arith.addf %221, %220 : vector<128x32xf32>
    %223 = tpu.reciprocal %222 {approx = true} : vector<128x32xf32> -> vector<128x32xf32>
    %224 = arith.mulf %222, %223 : vector<128x32xf32>
    %cst_109 = arith.constant 2.000000e+00 : f32
    %225 = vector.broadcast %cst_109 : f32 to vector<128x32xf32>
    %226 = arith.subf %225, %224 : vector<128x32xf32>
    %227 = arith.mulf %223, %226 : vector<128x32xf32>
    %cst_110 = arith.constant 1.06140542 : f32
    %228 = vector.broadcast %cst_110 : f32 to vector<128x32xf32>
    %229 = arith.mulf %228, %227 : vector<128x32xf32>
    %cst_111 = arith.constant -1.45315206 : f32
    %230 = vector.broadcast %cst_111 : f32 to vector<128x32xf32>
    %231 = arith.addf %229, %230 : vector<128x32xf32>
    %232 = arith.mulf %231, %227 : vector<128x32xf32>
    %cst_112 = arith.constant 1.42141378 : f32
    %233 = vector.broadcast %cst_112 : f32 to vector<128x32xf32>
    %234 = arith.addf %232, %233 : vector<128x32xf32>
    %235 = arith.mulf %234, %227 : vector<128x32xf32>
    %cst_113 = arith.constant -0.284496725 : f32
    %236 = vector.broadcast %cst_113 : f32 to vector<128x32xf32>
    %237 = arith.addf %235, %236 : vector<128x32xf32>
    %238 = arith.mulf %237, %227 : vector<128x32xf32>
    %cst_114 = arith.constant 0.254829586 : f32
    %239 = vector.broadcast %cst_114 : f32 to vector<128x32xf32>
    %240 = arith.addf %238, %239 : vector<128x32xf32>
    %241 = arith.mulf %240, %227 : vector<128x32xf32>
    %cst_115 = arith.constant 0.000000e+00 : f32
    %242 = vector.broadcast %cst_115 : f32 to vector<128x32xf32>
    %243 = arith.subf %242, %218 : vector<128x32xf32>
    %244 = arith.mulf %243, %218 : vector<128x32xf32>
    %245 = math.exp %244 : vector<128x32xf32>
    %246 = arith.mulf %241, %245 : vector<128x32xf32>
    %cst_116 = arith.constant 1.000000e+00 : f32
    %247 = vector.broadcast %cst_116 : f32 to vector<128x32xf32>
    %248 = arith.subf %247, %246 : vector<128x32xf32>
    %249 = arith.mulf %217, %248 : vector<128x32xf32>
    %cst_117 = arith.constant 1.000000e+00 : f32
    %250 = vector.broadcast %cst_117 : f32 to vector<128x32xf32>
    %251 = arith.addf %250, %249 : vector<128x32xf32>
    %252 = arith.mulf %210, %251 : vector<128x32xf32>
    %cst_118 = arith.constant dense<0.000000e+00> : vector<16x32xf32>
    %253 = tpu.matmul %17, %252, %cst_118 {dimension_numbers = #tpu.dot_dimension_numbers<[1], [0], [0], [1], [0, 0, 1, 1], [], []>} : vector<16x128xf32>, vector<128x32xf32>, vector<16x32xf32> -> vector<16x32xf32>
    %254 = vector.extract_strided_slice %253 {offsets = [0, 0], sizes = [8, 32], strides = [1, 1]} : vector<16x32xf32> to vector<8x32xf32>
    %255 = vector.extract_strided_slice %253 {offsets = [8, 0], sizes = [8, 32], strides = [1, 1]} : vector<16x32xf32> to vector<8x32xf32>
    %256 = tpu.concatenate %254, %254, %254, %254, %254, %254, %254, %254 in 1 : vector<8x32xf32>, vector<8x32xf32>, vector<8x32xf32>, vector<8x32xf32>, vector<8x32xf32>, vector<8x32xf32>, vector<8x32xf32>, vector<8x32xf32> -> vector<8x256xf32>
    %257 = arith.mulf %256, %30 : vector<8x256xf32>
    %258 = tpu.concatenate %255, %255, %255, %255, %255, %255, %255, %255 in 1 : vector<8x32xf32>, vector<8x32xf32>, vector<8x32xf32>, vector<8x32xf32>, vector<8x32xf32>, vector<8x32xf32>, vector<8x32xf32>, vector<8x32xf32> -> vector<8x256xf32>
    %259 = arith.mulf %258, %30 : vector<8x256xf32>
    %c3 = arith.constant 3 : index
    %c0_119 = arith.constant 0 : index
    %c0_120 = arith.constant 0 : index
    %260 = vector.load %arg6[%c3, %c0_119, %c0_120] : memref<4x256x32xf32, #tpu.memory_space<vmem>>, vector<1x256x32xf32>
    %261 = vector.shape_cast %260 : vector<1x256x32xf32> to vector<256x32xf32>
    %c3_121 = arith.constant 3 : index
    %c0_122 = arith.constant 0 : index
    %c0_123 = arith.constant 0 : index
    %262 = vector.load %arg7[%c3_121, %c0_122, %c0_123] : memref<4x256x32xf32, #tpu.memory_space<vmem>>, vector<1x256x32xf32>
    %263 = vector.shape_cast %262 : vector<1x256x32xf32> to vector<256x32xf32>
    %cst_124 = arith.constant dense<0.000000e+00> : vector<8x32xf32>
    %264 = tpu.matmul %257, %261, %cst_124 {dimension_numbers = #tpu.dot_dimension_numbers<[1], [0], [0], [1], [0, 0, 1, 1], [], []>} : vector<8x256xf32>, vector<256x32xf32>, vector<8x32xf32> -> vector<8x32xf32>
    %cst_125 = arith.constant dense<0.000000e+00> : vector<8x32xf32>
    %265 = tpu.matmul %259, %263, %cst_125 {dimension_numbers = #tpu.dot_dimension_numbers<[1], [0], [0], [1], [0, 0, 1, 1], [], []>} : vector<8x256xf32>, vector<256x32xf32>, vector<8x32xf32> -> vector<8x32xf32>
    %266 = arith.subf %264, %265 : vector<8x32xf32>
    %cst_126 = arith.constant dense<0.000000e+00> : vector<8x32xf32>
    %267 = tpu.matmul %257, %263, %cst_126 {dimension_numbers = #tpu.dot_dimension_numbers<[1], [0], [0], [1], [0, 0, 1, 1], [], []>} : vector<8x256xf32>, vector<256x32xf32>, vector<8x32xf32> -> vector<8x32xf32>
    %cst_127 = arith.constant dense<0.000000e+00> : vector<8x32xf32>
    %268 = tpu.matmul %259, %261, %cst_127 {dimension_numbers = #tpu.dot_dimension_numbers<[1], [0], [0], [1], [0, 0, 1, 1], [], []>} : vector<8x256xf32>, vector<256x32xf32>, vector<8x32xf32> -> vector<8x32xf32>
    %269 = arith.addf %267, %268 : vector<8x32xf32>
    %270 = tpu.concatenate %266, %269 in 0 : vector<8x32xf32>, vector<8x32xf32> -> vector<16x32xf32>
    %cst_128 = arith.constant dense<0.000000e+00> : vector<128x32xf32>
    %271 = tpu.matmul %18, %270, %cst_128 {dimension_numbers = #tpu.dot_dimension_numbers<[1], [0], [0], [1], [0, 0, 1, 1], [], []>} : vector<128x16xf32>, vector<16x32xf32>, vector<128x32xf32> -> vector<128x32xf32>
    %c3_129 = arith.constant 3 : index
    %c0_130 = arith.constant 0 : index
    %c0_131 = arith.constant 0 : index
    %272 = vector.load %arg8[%c3_129, %c0_130, %c0_131] : memref<4x32x32xf32, #tpu.memory_space<vmem>>, vector<1x32x32xf32>
    %273 = vector.shape_cast %272 : vector<1x32x32xf32> to vector<32x32xf32>
    %cst_132 = arith.constant dense<0.000000e+00> : vector<128x32xf32>
    %274 = tpu.matmul %252, %273, %cst_132 {dimension_numbers = #tpu.dot_dimension_numbers<[1], [0], [0], [1], [0, 0, 1, 1], [], []>} : vector<128x32xf32>, vector<32x32xf32>, vector<128x32xf32> -> vector<128x32xf32>
    %275 = arith.addf %271, %274 : vector<128x32xf32>
    %c3_133 = arith.constant 3 : index
    %c0_134 = arith.constant 0 : index
    %c0_135 = arith.constant 0 : index
    %276 = vector.load %arg9[%c3_133, %c0_134, %c0_135] : memref<4x1x32xf32, #tpu.memory_space<vmem>>, vector<1x1x32xf32>
    %277 = vector.shape_cast %276 : vector<1x1x32xf32> to vector<1x32xf32>
    %278 = vector.broadcast %277 : vector<1x32xf32> to vector<128x32xf32>
    %279 = arith.addf %275, %278 : vector<128x32xf32>
    %cst_136 = arith.constant 6.000000e-01 : f32
    %280 = vector.broadcast %cst_136 : f32 to vector<128x32xf32>
    %281 = arith.mulf %280, %131 : vector<128x32xf32>
    %282 = arith.addf %279, %281 : vector<128x32xf32>
    %cst_137 = arith.constant 5.000000e-01 : f32
    %283 = vector.broadcast %cst_137 : f32 to vector<128x32xf32>
    %284 = arith.mulf %283, %282 : vector<128x32xf32>
    %cst_138 = arith.constant 0.707106769 : f32
    %285 = vector.broadcast %cst_138 : f32 to vector<128x32xf32>
    %286 = arith.mulf %282, %285 : vector<128x32xf32>
    %cst_139 = arith.constant 0.000000e+00 : f32
    %287 = vector.broadcast %cst_139 : f32 to vector<128x32xf32>
    %288 = arith.cmpf olt, %286, %287 : vector<128x32xf32>
    %cst_140 = arith.constant -1.000000e+00 : f32
    %cst_141 = arith.constant 1.000000e+00 : f32
    %289 = vector.broadcast %cst_140 : f32 to vector<128x32xf32>
    %290 = vector.broadcast %cst_141 : f32 to vector<128x32xf32>
    %291 = arith.select %288, %289, %290 : vector<128x32xi1>, vector<128x32xf32>
    %292 = math.absf %286 : vector<128x32xf32>
    %cst_142 = arith.constant 0.327591091 : f32
    %293 = vector.broadcast %cst_142 : f32 to vector<128x32xf32>
    %294 = arith.mulf %293, %292 : vector<128x32xf32>
    %cst_143 = arith.constant 1.000000e+00 : f32
    %295 = vector.broadcast %cst_143 : f32 to vector<128x32xf32>
    %296 = arith.addf %295, %294 : vector<128x32xf32>
    %297 = tpu.reciprocal %296 {approx = true} : vector<128x32xf32> -> vector<128x32xf32>
    %298 = arith.mulf %296, %297 : vector<128x32xf32>
    %cst_144 = arith.constant 2.000000e+00 : f32
    %299 = vector.broadcast %cst_144 : f32 to vector<128x32xf32>
    %300 = arith.subf %299, %298 : vector<128x32xf32>
    %301 = arith.mulf %297, %300 : vector<128x32xf32>
    %cst_145 = arith.constant 1.06140542 : f32
    %302 = vector.broadcast %cst_145 : f32 to vector<128x32xf32>
    %303 = arith.mulf %302, %301 : vector<128x32xf32>
    %cst_146 = arith.constant -1.45315206 : f32
    %304 = vector.broadcast %cst_146 : f32 to vector<128x32xf32>
    %305 = arith.addf %303, %304 : vector<128x32xf32>
    %306 = arith.mulf %305, %301 : vector<128x32xf32>
    %cst_147 = arith.constant 1.42141378 : f32
    %307 = vector.broadcast %cst_147 : f32 to vector<128x32xf32>
    %308 = arith.addf %306, %307 : vector<128x32xf32>
    %309 = arith.mulf %308, %301 : vector<128x32xf32>
    %cst_148 = arith.constant -0.284496725 : f32
    %310 = vector.broadcast %cst_148 : f32 to vector<128x32xf32>
    %311 = arith.addf %309, %310 : vector<128x32xf32>
    %312 = arith.mulf %311, %301 : vector<128x32xf32>
    %cst_149 = arith.constant 0.254829586 : f32
    %313 = vector.broadcast %cst_149 : f32 to vector<128x32xf32>
    %314 = arith.addf %312, %313 : vector<128x32xf32>
    %315 = arith.mulf %314, %301 : vector<128x32xf32>
    %cst_150 = arith.constant 0.000000e+00 : f32
    %316 = vector.broadcast %cst_150 : f32 to vector<128x32xf32>
    %317 = arith.subf %316, %292 : vector<128x32xf32>
    %318 = arith.mulf %317, %292 : vector<128x32xf32>
    %319 = math.exp %318 : vector<128x32xf32>
    %320 = arith.mulf %315, %319 : vector<128x32xf32>
    %cst_151 = arith.constant 1.000000e+00 : f32
    %321 = vector.broadcast %cst_151 : f32 to vector<128x32xf32>
    %322 = arith.subf %321, %320 : vector<128x32xf32>
    %323 = arith.mulf %291, %322 : vector<128x32xf32>
    %cst_152 = arith.constant 1.000000e+00 : f32
    %324 = vector.broadcast %cst_152 : f32 to vector<128x32xf32>
    %325 = arith.addf %324, %323 : vector<128x32xf32>
    %326 = arith.mulf %284, %325 : vector<128x32xf32>
    %c0_153 = arith.constant 0 : index
    %c0_154 = arith.constant 0 : index
    %327 = vector.load %arg10[%c0_153, %c0_154] : memref<32x128xf32, #tpu.memory_space<vmem>>, vector<32x128xf32>
    %cst_155 = arith.constant dense<0.000000e+00> : vector<128x128xf32>
    %328 = tpu.matmul %326, %327, %cst_155 {dimension_numbers = #tpu.dot_dimension_numbers<[1], [0], [0], [1], [0, 0, 1, 1], [], []>} : vector<128x32xf32>, vector<32x128xf32>, vector<128x128xf32> -> vector<128x128xf32>
    %c0_156 = arith.constant 0 : index
    %c0_157 = arith.constant 0 : index
    %329 = vector.load %arg11[%c0_156, %c0_157] : memref<1x128xf32, #tpu.memory_space<vmem>>, vector<1x128xf32>
    %330 = vector.broadcast %329 : vector<1x128xf32> to vector<128x128xf32>
    %331 = arith.addf %328, %330 : vector<128x128xf32>
    %cst_158 = arith.constant 5.000000e-01 : f32
    %332 = vector.broadcast %cst_158 : f32 to vector<128x128xf32>
    %333 = arith.mulf %332, %331 : vector<128x128xf32>
    %cst_159 = arith.constant 0.707106769 : f32
    %334 = vector.broadcast %cst_159 : f32 to vector<128x128xf32>
    %335 = arith.mulf %331, %334 : vector<128x128xf32>
    %cst_160 = arith.constant 0.000000e+00 : f32
    %336 = vector.broadcast %cst_160 : f32 to vector<128x128xf32>
    %337 = arith.cmpf olt, %335, %336 : vector<128x128xf32>
    %cst_161 = arith.constant -1.000000e+00 : f32
    %cst_162 = arith.constant 1.000000e+00 : f32
    %338 = vector.broadcast %cst_161 : f32 to vector<128x128xf32>
    %339 = vector.broadcast %cst_162 : f32 to vector<128x128xf32>
    %340 = arith.select %337, %338, %339 : vector<128x128xi1>, vector<128x128xf32>
    %341 = math.absf %335 : vector<128x128xf32>
    %cst_163 = arith.constant 0.327591091 : f32
    %342 = vector.broadcast %cst_163 : f32 to vector<128x128xf32>
    %343 = arith.mulf %342, %341 : vector<128x128xf32>
    %cst_164 = arith.constant 1.000000e+00 : f32
    %344 = vector.broadcast %cst_164 : f32 to vector<128x128xf32>
    %345 = arith.addf %344, %343 : vector<128x128xf32>
    %346 = tpu.reciprocal %345 {approx = true} : vector<128x128xf32> -> vector<128x128xf32>
    %347 = arith.mulf %345, %346 : vector<128x128xf32>
    %cst_165 = arith.constant 2.000000e+00 : f32
    %348 = vector.broadcast %cst_165 : f32 to vector<128x128xf32>
    %349 = arith.subf %348, %347 : vector<128x128xf32>
    %350 = arith.mulf %346, %349 : vector<128x128xf32>
    %cst_166 = arith.constant 1.06140542 : f32
    %351 = vector.broadcast %cst_166 : f32 to vector<128x128xf32>
    %352 = arith.mulf %351, %350 : vector<128x128xf32>
    %cst_167 = arith.constant -1.45315206 : f32
    %353 = vector.broadcast %cst_167 : f32 to vector<128x128xf32>
    %354 = arith.addf %352, %353 : vector<128x128xf32>
    %355 = arith.mulf %354, %350 : vector<128x128xf32>
    %cst_168 = arith.constant 1.42141378 : f32
    %356 = vector.broadcast %cst_168 : f32 to vector<128x128xf32>
    %357 = arith.addf %355, %356 : vector<128x128xf32>
    %358 = arith.mulf %357, %350 : vector<128x128xf32>
    %cst_169 = arith.constant -0.284496725 : f32
    %359 = vector.broadcast %cst_169 : f32 to vector<128x128xf32>
    %360 = arith.addf %358, %359 : vector<128x128xf32>
    %361 = arith.mulf %360, %350 : vector<128x128xf32>
    %cst_170 = arith.constant 0.254829586 : f32
    %362 = vector.broadcast %cst_170 : f32 to vector<128x128xf32>
    %363 = arith.addf %361, %362 : vector<128x128xf32>
    %364 = arith.mulf %363, %350 : vector<128x128xf32>
    %cst_171 = arith.constant 0.000000e+00 : f32
    %365 = vector.broadcast %cst_171 : f32 to vector<128x128xf32>
    %366 = arith.subf %365, %341 : vector<128x128xf32>
    %367 = arith.mulf %366, %341 : vector<128x128xf32>
    %368 = math.exp %367 : vector<128x128xf32>
    %369 = arith.mulf %364, %368 : vector<128x128xf32>
    %cst_172 = arith.constant 1.000000e+00 : f32
    %370 = vector.broadcast %cst_172 : f32 to vector<128x128xf32>
    %371 = arith.subf %370, %369 : vector<128x128xf32>
    %372 = arith.mulf %340, %371 : vector<128x128xf32>
    %cst_173 = arith.constant 1.000000e+00 : f32
    %373 = vector.broadcast %cst_173 : f32 to vector<128x128xf32>
    %374 = arith.addf %373, %372 : vector<128x128xf32>
    %375 = arith.mulf %333, %374 : vector<128x128xf32>
    %c0_174 = arith.constant 0 : index
    %c0_175 = arith.constant 0 : index
    %376 = vector.load %arg12[%c0_174, %c0_175] : memref<1x128xf32, #tpu.memory_space<vmem>>, vector<1x128xf32>
    %377 = vector.broadcast %376 : vector<1x128xf32> to vector<128x128xf32>
    %378 = arith.mulf %375, %377 : vector<128x128xf32>
    %cst_176 = arith.constant dense<0.000000e+00> : vector<128xf32>
    %379 = vector.multi_reduction <add>, %378, %cst_176 [1] : vector<128x128xf32> to vector<128xf32>
    %380 = vector.shape_cast %379 : vector<128xf32> to vector<128x1xf32>
    %c0_177 = arith.constant 0 : index
    %c0_178 = arith.constant 0 : index
    %381 = vector.load %arg13[%c0_177, %c0_178] : memref<1x1xf32, #tpu.memory_space<vmem>>, vector<1x1xf32>
    %382 = vector.broadcast %381 : vector<1x1xf32> to vector<128x1xf32>
    %383 = arith.addf %380, %382 : vector<128x1xf32>
    %cst_179 = arith.constant 5.000000e-01 : f32
    %384 = vector.broadcast %cst_179 : f32 to vector<128x1xf32>
    %385 = arith.mulf %384, %383 : vector<128x1xf32>
    %cst_180 = arith.constant 0.707106769 : f32
    %386 = vector.broadcast %cst_180 : f32 to vector<128x1xf32>
    %387 = arith.mulf %383, %386 : vector<128x1xf32>
    %cst_181 = arith.constant 0.000000e+00 : f32
    %388 = vector.broadcast %cst_181 : f32 to vector<128x1xf32>
    %389 = arith.cmpf olt, %387, %388 : vector<128x1xf32>
    %cst_182 = arith.constant -1.000000e+00 : f32
    %cst_183 = arith.constant 1.000000e+00 : f32
    %390 = vector.broadcast %cst_182 : f32 to vector<128x1xf32>
    %391 = vector.broadcast %cst_183 : f32 to vector<128x1xf32>
    %392 = arith.select %389, %390, %391 : vector<128x1xi1>, vector<128x1xf32>
    %393 = math.absf %387 : vector<128x1xf32>
    %cst_184 = arith.constant 0.327591091 : f32
    %394 = vector.broadcast %cst_184 : f32 to vector<128x1xf32>
    %395 = arith.mulf %394, %393 : vector<128x1xf32>
    %cst_185 = arith.constant 1.000000e+00 : f32
    %396 = vector.broadcast %cst_185 : f32 to vector<128x1xf32>
    %397 = arith.addf %396, %395 : vector<128x1xf32>
    %398 = tpu.reciprocal %397 {approx = true} : vector<128x1xf32> -> vector<128x1xf32>
    %399 = arith.mulf %397, %398 : vector<128x1xf32>
    %cst_186 = arith.constant 2.000000e+00 : f32
    %400 = vector.broadcast %cst_186 : f32 to vector<128x1xf32>
    %401 = arith.subf %400, %399 : vector<128x1xf32>
    %402 = arith.mulf %398, %401 : vector<128x1xf32>
    %cst_187 = arith.constant 1.06140542 : f32
    %403 = vector.broadcast %cst_187 : f32 to vector<128x1xf32>
    %404 = arith.mulf %403, %402 : vector<128x1xf32>
    %cst_188 = arith.constant -1.45315206 : f32
    %405 = vector.broadcast %cst_188 : f32 to vector<128x1xf32>
    %406 = arith.addf %404, %405 : vector<128x1xf32>
    %407 = arith.mulf %406, %402 : vector<128x1xf32>
    %cst_189 = arith.constant 1.42141378 : f32
    %408 = vector.broadcast %cst_189 : f32 to vector<128x1xf32>
    %409 = arith.addf %407, %408 : vector<128x1xf32>
    %410 = arith.mulf %409, %402 : vector<128x1xf32>
    %cst_190 = arith.constant -0.284496725 : f32
    %411 = vector.broadcast %cst_190 : f32 to vector<128x1xf32>
    %412 = arith.addf %410, %411 : vector<128x1xf32>
    %413 = arith.mulf %412, %402 : vector<128x1xf32>
    %cst_191 = arith.constant 0.254829586 : f32
    %414 = vector.broadcast %cst_191 : f32 to vector<128x1xf32>
    %415 = arith.addf %413, %414 : vector<128x1xf32>
    %416 = arith.mulf %415, %402 : vector<128x1xf32>
    %cst_192 = arith.constant 0.000000e+00 : f32
    %417 = vector.broadcast %cst_192 : f32 to vector<128x1xf32>
    %418 = arith.subf %417, %393 : vector<128x1xf32>
    %419 = arith.mulf %418, %393 : vector<128x1xf32>
    %420 = math.exp %419 : vector<128x1xf32>
    %421 = arith.mulf %416, %420 : vector<128x1xf32>
    %cst_193 = arith.constant 1.000000e+00 : f32
    %422 = vector.broadcast %cst_193 : f32 to vector<128x1xf32>
    %423 = arith.subf %422, %421 : vector<128x1xf32>
    %424 = arith.mulf %392, %423 : vector<128x1xf32>
    %cst_194 = arith.constant 1.000000e+00 : f32
    %425 = vector.broadcast %cst_194 : f32 to vector<128x1xf32>
    %426 = arith.addf %425, %424 : vector<128x1xf32>
    %427 = arith.mulf %385, %426 : vector<128x1xf32>
    %c0_195 = arith.constant 0 : index
    %c0_196 = arith.constant 0 : index
    %428 = vector.load %arg14[%c0_195, %c0_196] : memref<128x256xf32, #tpu.memory_space<vmem>>, vector<128x256xf32>
    %429 = vector.broadcast %427 : vector<128x1xf32> to vector<128x256xf32>
    %430 = arith.mulf %429, %428 : vector<128x256xf32>
    %cst_197 = arith.constant dense<0.000000e+00> : vector<256xf32>
    %431 = vector.multi_reduction <add>, %430, %cst_197 [0] : vector<128x256xf32> to vector<256xf32>
    %432 = vector.shape_cast %431 : vector<256xf32> to vector<1x256xf32>
    %c0_198 = arith.constant 0 : index
    %c0_199 = arith.constant 0 : index
    %433 = vector.load %arg15[%c0_198, %c0_199] : memref<1x256xf32, #tpu.memory_space<vmem>>, vector<1x256xf32>
    %434 = arith.addf %432, %433 : vector<1x256xf32>
    %c0_200 = arith.constant 0 : index
    %c0_201 = arith.constant 0 : index
    %c0_202 = arith.constant 0 : index
    %435 = vector.load %arg16[%c0_200, %c0_201, %c0_202] : memref<1x1x256xf32, #tpu.memory_space<vmem>>, vector<1x1x256xf32>
    %436 = vector.shape_cast %435 : vector<1x1x256xf32> to vector<1x256xf32>
    %437 = vector.shape_cast %434 : vector<1x256xf32> to vector<1x1x256xf32>
    tpu.vector_store %arg16[%c0_200, %c0_201, %c0_202], %437 {strides = array<i32>} : memref<1x1x256xf32, #tpu.memory_space<vmem>>, vector<1x1x256xf32>,
    return
  }
  func.func @transform_0(%arg0: i32) -> (i32, i32, i32) {
    %c0_i32 = arith.constant 0 : i32
    %c0_i32_0 = arith.constant 0 : i32
    %c0_i32_1 = arith.constant 0 : i32
    return %arg0, %c0_i32, %c0_i32_0 : i32, i32, i32
  }
  func.func @transform_1(%arg0: i32) -> (i32, i32) {
    %c0_i32 = arith.constant 0 : i32
    %c0_i32_0 = arith.constant 0 : i32
    %c0_i32_1 = arith.constant 0 : i32
    return %c0_i32, %c0_i32_0 : i32, i32
  }
  func.func @transform_2(%arg0: i32) -> (i32, i32) {
    %c0_i32 = arith.constant 0 : i32
    %c0_i32_0 = arith.constant 0 : i32
    %c0_i32_1 = arith.constant 0 : i32
    return %c0_i32, %c0_i32_0 : i32, i32
  }
  func.func @transform_3(%arg0: i32) -> (i32, i32) {
    %c0_i32 = arith.constant 0 : i32
    %c0_i32_0 = arith.constant 0 : i32
    %c0_i32_1 = arith.constant 0 : i32
    return %c0_i32, %c0_i32_0 : i32, i32
  }
  func.func @transform_4(%arg0: i32) -> (i32, i32) {
    %c0_i32 = arith.constant 0 : i32
    %c0_i32_0 = arith.constant 0 : i32
    %c0_i32_1 = arith.constant 0 : i32
    return %c0_i32, %c0_i32_0 : i32, i32
  }
  func.func @transform_5(%arg0: i32) -> (i32, i32, i32) {
    %c0_i32 = arith.constant 0 : i32
    %c0_i32_0 = arith.constant 0 : i32
    %c0_i32_1 = arith.constant 0 : i32
    %c0_i32_2 = arith.constant 0 : i32
    return %c0_i32, %c0_i32_0, %c0_i32_1 : i32, i32, i32
  }
  func.func @transform_6(%arg0: i32) -> (i32, i32, i32) {
    %c0_i32 = arith.constant 0 : i32
    %c0_i32_0 = arith.constant 0 : i32
    %c0_i32_1 = arith.constant 0 : i32
    %c0_i32_2 = arith.constant 0 : i32
    return %c0_i32, %c0_i32_0, %c0_i32_1 : i32, i32, i32
  }
  func.func @transform_7(%arg0: i32) -> (i32, i32, i32) {
    %c0_i32 = arith.constant 0 : i32
    %c0_i32_0 = arith.constant 0 : i32
    %c0_i32_1 = arith.constant 0 : i32
    %c0_i32_2 = arith.constant 0 : i32
    return %c0_i32, %c0_i32_0, %c0_i32_1 : i32, i32, i32
  }
  func.func @transform_8(%arg0: i32) -> (i32, i32, i32) {
    %c0_i32 = arith.constant 0 : i32
    %c0_i32_0 = arith.constant 0 : i32
    %c0_i32_1 = arith.constant 0 : i32
    %c0_i32_2 = arith.constant 0 : i32
    return %c0_i32, %c0_i32_0, %c0_i32_1 : i32, i32, i32
  }
  func.func @transform_9(%arg0: i32) -> (i32, i32) {
    %c0_i32 = arith.constant 0 : i32
    %c0_i32_0 = arith.constant 0 : i32
    %c0_i32_1 = arith.constant 0 : i32
    return %c0_i32, %c0_i32_0 : i32, i32
  }
  func.func @transform_10(%arg0: i32) -> (i32, i32) {
    %c0_i32 = arith.constant 0 : i32
    %c0_i32_0 = arith.constant 0 : i32
    %c0_i32_1 = arith.constant 0 : i32
    return %c0_i32, %c0_i32_0 : i32, i32
  }
  func.func @transform_11(%arg0: i32) -> (i32, i32) {
    %c0_i32 = arith.constant 0 : i32
    %c0_i32_0 = arith.constant 0 : i32
    %c0_i32_1 = arith.constant 0 : i32
    return %c0_i32, %c0_i32_0 : i32, i32
  }
  func.func @transform_12(%arg0: i32) -> (i32, i32) {
    %c0_i32 = arith.constant 0 : i32
    %c0_i32_0 = arith.constant 0 : i32
    %c0_i32_1 = arith.constant 0 : i32
    return %c0_i32, %c0_i32_0 : i32, i32
  }
  func.func @transform_13(%arg0: i32) -> (i32, i32) {
    %c0_i32 = arith.constant 0 : i32
    %c0_i32_0 = arith.constant 0 : i32
    %c0_i32_1 = arith.constant 0 : i32
    return %c0_i32, %c0_i32_0 : i32, i32
  }
  func.func @transform_14(%arg0: i32) -> (i32, i32) {
    %c0_i32 = arith.constant 0 : i32
    %c0_i32_0 = arith.constant 0 : i32
    %c0_i32_1 = arith.constant 0 : i32
    return %c0_i32, %c0_i32_0 : i32, i32
  }
  func.func @transform_15(%arg0: i32) -> (i32, i32, i32) {
    %c0_i32 = arith.constant 0 : i32
    %c0_i32_0 = arith.constant 0 : i32
    %c0_i32_1 = arith.constant 0 : i32
    return %arg0, %c0_i32, %c0_i32_0 : i32, i32, i32
  }
}

</mosaic_0001>

<bundles_post_ra>
// kernel: fno1d_forward.1
= control target key start
LH: loop header
LB: loop body
LE: loop exit
PB: predicated region body
PF: predicated region fallthrough
CT: control target
= control target key end

     0   :  { %s14838_s0 = inlined_call_operand.vmem [shape: f32[2,128,2], index: 0, kind: input, shape index: {}]   ;;  %s14839_s1 = inlined_call_operand.vmem [shape: f32[16,128], index: 1, kind: input, shape index: {}]   ;;  %s14840_s2 = inlined_call_operand.vmem [shape: f32[128,16], index: 2, kind: input, shape index: {}]   ;;  %s14841_s3 = inlined_call_operand.vmem [shape: f32[2,32], index: 3, kind: input, shape index: {}]   ;;  %s14842_s4 = inlined_call_operand.vmem [shape: f32[1,32], index: 4, kind: input, shape index: {}]   ;;  %s14843_s5 = inlined_call_operand.hbm [shape: f32[4,256,32], index: 5, kind: input, shape index: {}]   ;;  %s14844_s6 = inlined_call_operand.hbm [shape: f32[4,256,32], index: 6, kind: input, shape index: {}]   ;;  %s14845_s7 = inlined_call_operand.vmem [shape: f32[4,32,32], index: 7, kind: input, shape index: {}]   ;;  %s14846_s8 = inlined_call_operand.vmem [shape: f32[4,1,32], index: 8, kind: input, shape index: {}]   ;;  %s14847_s9 = inlined_call_operand.vmem [shape: f32[32,128], index: 9, kind: input, shape index: {}]   ;;  %s14848_s10 = inlined_call_operand.vmem [shape: f32[1,128], index: 10, kind: input, shape index: {}]   ;;  %s14849_s11 = inlined_call_operand.vmem [shape: f32[1,128], index: 11, kind: input, shape index: {}]   ;;  %s14850_s12 = inlined_call_operand.<no memory space> [shape: f32[1,1], index: 12, kind: input, shape index: {}]   ;;  %s14851_s13 = inlined_call_operand.vmem [shape: f32[128,256], index: 13, kind: input, shape index: {}]   ;;  %s14852_s14 = inlined_call_operand.vmem [shape: f32[1,256], index: 14, kind: input, shape index: {}]   ;;  %s14853_s15 = inlined_call_operand.vmem [shape: f32[2,1,256], index: 15, kind: output, shape index: {}]  }
   0x1   :  { %v20_v0 = vstv %s14850_s12 }
   0x2   :  { %21 = vst [vmem:[#allocation2] sm:$0x1] %v20_v0 }
   0x3   :  { %22 = vsyncpa [#allocation4], 0 }
   0x4   :  { %23 = vsyncpa [#allocation6], 0  ;;  %s10439_s20 = smov 0  }
   0x5 LB: > { %14957 = sst [smem:[#allocation9_spill]] %s10342_s20  ;;  %s10445_s21 = sadd.s32 4294967295, %s10342_s20   ;;  %s10342_s20 = sphi %s10439_s20, %s29_s20  }
   0x6   : > { %p7616_p0 = scmp.ge.s32.totalorder %s10342_s20, 1  ;;  %p380_p1 = scmp.lt.s32.totalorder %s10342_s20, 3 }
   0x7   : > { %s10344_s12 = smov [#allocation3]   ;;  %p14854_p3 = scmp.eq.s32.totalorder %s10445_s21, 0 }
   0x8   : > { %s404_s22 = sshll.u32 %s10344_s12, 4  ;;  %p10449_p2 = pnand %p7616_p0, %p380_p1  ;;  %s405_s22 = int_to_ptr.vmem [resolvable:$true] %s404_s22 }
   0x9   : > { %s10345_s24 = smov [#allocation5]   ;;  %s10272_s29 = scalar_lea.hbm %s14843_s5, 16384 }
   0xa   : > { %s14958_s23 = scalar_select %p10449_p2, 1, 0 }
   0xb   : > { %p9784_p4 = pneg %p10449_p2  ;;  %s417_s25 = sshll.u32 %s10345_s24, 4  ;;  %s10462_s25 = int_to_ptr.vmem [resolvable:$true] %s417_s25 }
   0xc   : > { %p10273_p6 = scmp.ne.s32.totalorder %s14843_s5, %s10272_s29  ;;  %p10279_p10 = scmp.lt.u32.totalorder %s10272_s29, %s14843_s5 }
   0xd   : > { %p10458_p5 = pnand %p14854_p3, %p9784_p4 }
   0xf   : > { %p10274_p7 = pneg %p10458_p5 }
  0x11   : > { %p10275_p8 = pnand %p10274_p7, %p10273_p6 }
  0x13   : > { %p10276_p9 = pneg %p10275_p8 }
  0x15   : > { %p10281_p11 = pnand %p10279_p10, %p10276_p9 }
  0x17   : > { %10284 = shalt.err (!%p10281_p11)
}
  0x18   : > { %s10285_s19 = scalar_lea.vmem %s405_s22, 16384  ;;  %p10293_p1 = scmp.lt.s32.totalorder %s405_s22, %s405_s22 }
  0x19   : > { %p10286_p12 = scmp.ne.s32.totalorder %s405_s22, %s10285_s19  ;;  %p10294_p4 = scmp.lt.s32.totalorder %s10285_s19, %s10285_s19 }
  0x1b   : > { %p10288_p13 = pnand %p10286_p12, %p10274_p7  ;;  %p10295_p3 = por %p10294_p4, %p10293_p1 }
  0x1d   : > { %p10289_p0 = pneg %p10288_p13 }
  0x1f   : > { %p10296_p2 = pnand %p10295_p3, %p10289_p0 }
  0x21   : > { %10299 = shalt.err (!%p10296_p2)
}
  0x22   : > { %s10346_s12 = smov 128   ;;  %s10347_s24 = smov 8  }
  0x23   : > { %9787 = dma.hbm_to_vmem [thread:$0]  (!%p10458_p5), %s14843_s5, 16384, %s405_s22, [#allocation4], %s10346_s12, %s10346_s12, %s10347_s24  }
  0x24   : > { %s10300_s16 = scalar_lea.hbm %s14844_s6, 16384 }
  0x25   : > { %p10301_p6 = scmp.ne.s32.totalorder %s14844_s6, %s10300_s16  ;;  %p10307_p8 = scmp.lt.u32.totalorder %s10300_s16, %s14844_s6 }
  0x27   : > { %p10303_p2 = pnand %p10301_p6, %p10274_p7 }
  0x29   : > { %p10304_p3 = pneg %p10303_p2 }
  0x2b   : > { %p10309_p9 = pnand %p10307_p8, %p10304_p3 }
  0x2d   : > { %10312 = shalt.err (!%p10309_p9)
}
  0x2e   : > { %s10313_s22 = scalar_lea.vmem %s10462_s25, 16384  ;;  %p10321_p13 = scmp.lt.s32.totalorder %s10462_s25, %s10462_s25 }
  0x2f   : > { %p10314_p10 = scmp.ne.s32.totalorder %s10462_s25, %s10313_s22  ;;  %p10322_p0 = scmp.lt.s32.totalorder %s10313_s22, %s10313_s22 }
  0x31   : > { %p10316_p11 = pnand %p10314_p10, %p10274_p7  ;;  %p10323_p1 = por %p10322_p0, %p10321_p13 }
  0x33   : > { %p10317_p12 = pneg %p10316_p11 }
  0x35   : > { %p10324_p4 = pnand %p10323_p1, %p10317_p12 }
  0x37   : > { %10327 = shalt.err (!%p10324_p4)
}
  0x38   : > { %9790 = dma.hbm_to_vmem [thread:$0]  (!%p10458_p5), %s14844_s6, 16384, %s10462_s25, [#allocation6], %s10346_s12, %s10346_s12, %s10347_s24  }
  0x39   : > { %p14960_p6 = scmp.ne.s32.totalorder %s14958_s23, 0 }
  0x3b   : > { %465 = sbr.rel (%p14960_p6) target bundleno = 4742 (0x1286), region = 80 }
  0x42   : > { %p14961_p2 = scmp.eq.s32.totalorder %s10445_s21, 0 }
  0x44   : > { %10333 = dma.done.wait (%p14961_p2), [#allocation4], 16384   ;;  %p14962_p7 = pmov %p14961_p2 }
  0x45   : > { %p14963_p3 = pmov %p14961_p2 }
  0x46   : > { %10335 = vsyncadd (%p14962_p7), [#allocation4], 4294950912 }
  0x47   : > { %10337 = dma.done.wait (%p14963_p3), [#allocation6], 16384   ;;  %p14964_p8 = pmov %p14961_p2 }
  0x48   : > { %p516_p9 = scmp.lt.s32.totalorder %s10445_s21, 1  ;;  %v10348_v1 = vmov 1   ;;  %v10349_v8 = vmov 0   ;;  %v10560_v19 = vld [vmem:[%s14839_s1] sm:$0xff]  ;;  %v14857_v20 = vlaneseq  ;;  %s10350_s22 = smov 32   ;;  %vm883_vm5 = vcmask 261120  }
  0x49   : > { %10339 = vsyncadd (%p14964_p8), [#allocation6], 4294950912  ;;  %9817 = vset.pattern.permute.xlu0 %v10348_v1  ;;  %9815 = vset.pattern.permute.xlu1 %v10348_v1  ;;  %14965 = vst [vmem:[#allocation10_spill] sm:$0xff] %v10560_v19  ;;  %v541_v29 = vld [vmem:[%s14841_s3] sm:$0x3]  ;;  %s10351_s20 = smov 64  }
  0x4a   : > { %s15205_s21 = smov (!%p516_p9, %s10445_s21), 1  ;;  %8632 = vmatprep.mubr.f32.mxu0 %v10560_v19  ;;  %v10564_v23 = vshrl.u32 %v14857_v20, 7  ;;  %v10589_v42 = vld [vmem:[%s14842_s4] ss:$0 sm:$0xff]  ;;  %s10352_s27 = smov 96   ;;  %vm885_vm7 = vcmask 523264  }
  0x4b   : > { %s7795_s23 = sshll.u32 %s15205_s21, 7  ;;  %vm887_vm8 = vcmask 785408   ;;  %vm1448_vm9 = vcmask 130048  }
  0x4c   : > { %s10531_s12 = scalar_lea.vmem %s14838_s0, %s7795_s23  ;;  %14966 = vst [vmem:[#allocation11_spill] sm:$0xff] %v10564_v23  ;;  %v14858_v26 = vsub.s32 1, %v10564_v23  ;;  %v14859_v28 = vsub.s32 0, %v10564_v23 }
  0x4d   : > { %v527_v2 = vld [vmem:[%s10531_s12 + $0x10] sm:$0xff]  ;;  %v525_v3 = vld [vmem:[%s10531_s12] sm:$0xff]  ;;  %v526_v5 = vld [vmem:[%s10531_s12 + $0x8] sm:$0xff] }
  0x4e   : > { %651 = vperm.xlu0 %9817, %v527_v2   ;;  %643 = vperm.xlu1 %9815, %v525_v3   ;;  %v531_v4 = vld [vmem:[%s10531_s12 + $0x30] sm:$0xff]  ;;  %v528_v7 = vld [vmem:[%s10531_s12 + $0x18] sm:$0xff]  ;;  %v529_v9 = vld [vmem:[%s10531_s12 + $0x20] sm:$0xff]  ;;  %v10575_v31 = vrot.slane %v541_v29, %v14858_v26  ;;  %v10579_v32 = vrot.slane %v541_v29, %v14859_v28 }
  0x4f   : > { %v535_v6 = vld [vmem:[%s10531_s12 + $0x50] sm:$0xff]  ;;  %v530_v10 = vld [vmem:[%s10531_s12 + $0x28] sm:$0xff]  ;;  %v532_v12 = vld [vmem:[%s10531_s12 + $0x38] sm:$0xff] }
  0x50   : > { %v534_v11 = vld [vmem:[%s10531_s12 + $0x48] sm:$0xff]  ;;  %v533_v14 = vld [vmem:[%s10531_s12 + $0x40] sm:$0xff]  ;;  %v539_v15 = vld [vmem:[%s10531_s12 + $0x70] sm:$0xff] }
  0x51   : > { %v538_v13 = vld [vmem:[%s10531_s12 + $0x68] sm:$0xff]  ;;  %v536_v16 = vld [vmem:[%s10531_s12 + $0x58] sm:$0xff]  ;;  %v537_v17 = vld [vmem:[%s10531_s12 + $0x60] sm:$0xff] }
  0x52   : > { %667 = vperm.xlu0 %9817, %v531_v4   ;;  %647 = vperm.xlu1 %9815, %v526_v5   ;;  %v540_v18 = vld [vmem:[%s10531_s12 + $0x78] sm:$0xff] }
  0x56   : > { %683 = vperm.xlu0 %9817, %v535_v6   ;;  %9816 = vset.pattern.permute.xlu1 %v10349_v8 }
  0x57   : > { %559 = vperm.xlu1 %9816, %v528_v7  }
  0x5a   : > { %9826 = vset.pattern.permute.xlu0 %v10349_v8 }
  0x5b   : > { %544 = vperm.xlu0 %9826, %v525_v3   ;;  %9818 = vset.pattern.permute.xlu1 %v10348_v1 }
  0x5c   : > { %655 = vperm.xlu1 %9818, %v528_v7  }
  0x5f   : > { %549 = vperm.xlu0 %9826, %v526_v5  }
  0x60   : > { %9819 = vset.pattern.permute.xlu1 %v10349_v8 }
  0x61   : > { %564 = vperm.xlu1 %9819, %v529_v9  }
  0x63   : > { %554 = vperm.xlu0 %9826, %v527_v2  }
  0x65   : > { %9820 = vset.pattern.permute.xlu1 %v10348_v1 }
  0x66   : > { %659 = vperm.xlu1 %9820, %v529_v9  }
  0x67   : > { %569 = vperm.xlu0 %9826, %v530_v10  }
  0x6a   : > { %663 = vperm.xlu1 %9820, %v530_v10  }
  0x6b   : > { %574 = vperm.xlu0 %9826, %v531_v4  }
  0x6e   : > { %9821 = vset.pattern.permute.xlu1 %v10349_v8 }
  0x6f   : > { %589 = vperm.xlu0 %9826, %v534_v11   ;;  %579 = vperm.xlu1 %9821, %v532_v12  }
  0x73   : > { %594 = vperm.xlu0 %9826, %v535_v6   ;;  %9822 = vset.pattern.permute.xlu1 %v10348_v1 }
  0x74   : > { %671 = vperm.xlu1 %9822, %v532_v12  }
  0x77   : > { %609 = vperm.xlu0 %9826, %v538_v13  }
  0x78   : > { %9823 = vset.pattern.permute.xlu1 %v10349_v8 }
  0x79   : > { %584 = vperm.xlu1 %9823, %v533_v14  }
  0x7b   : > { %614 = vperm.xlu0 %9826, %v539_v15  }
  0x7d   : > { %9824 = vset.pattern.permute.xlu1 %v10348_v1 }
  0x7e   : > { %675 = vperm.xlu1 %9824, %v533_v14  }
  0x7f   : > { %9831 = vset.pattern.permute.xlu0 %v10348_v1 }
  0x80   : > { %699 = vperm.xlu0 %9831, %v539_v15  }
  0x82   : > { %679 = vperm.xlu1 %9824, %v534_v11  }
  0x84   : > { %9833 = vset.pattern.permute.xlu0 %v10349_v8 }
  0x86   : > { %9825 = vset.pattern.permute.xlu1 %v10349_v8 }
  0x87   : > { %599 = vperm.xlu1 %9825, %v536_v16  }
  0x8b   : > { %9827 = vset.pattern.permute.xlu1 %v10348_v1 }
  0x8c   : > { %687 = vperm.xlu1 %9827, %v536_v16  }
  0x90   : > { %9828 = vset.pattern.permute.xlu1 %v10349_v8 }
  0x91   : > { %604 = vperm.xlu1 %9828, %v537_v17  }
  0x95   : > { %9829 = vset.pattern.permute.xlu1 %v10348_v1 }
  0x96   : > { %691 = vperm.xlu1 %9829, %v537_v17  }
  0x9a   : > { %695 = vperm.xlu1 %9829, %v538_v13  }
  0x9e   : > { %9830 = vset.pattern.permute.xlu1 %v10349_v8 }
  0x9f   : > { %619 = vperm.xlu1 %9830, %v540_v18  }
  0xa3   : > { %9832 = vset.pattern.permute.xlu1 %v10348_v1 }
  0xa4   : > { %703 = vperm.xlu1 %9832, %v540_v18  }
  0xa8   : > { %9834 = vset.pattern.permute.xlu1 %v10349_v8 }
  0xcd   : > { %v644_v21 = vpop.permute.xlu1 %643  ;;  %v652_v22 = vpop.permute.xlu0 %651 }
  0xce   : > { %v710_v36 = vmul.f32 %v10575_v31, %v644_v21  ;;  %v712_v44 = vmul.f32 %v10575_v31, %v652_v22 }
  0xd1   : > { %v648_v24 = vpop.permute.xlu1 %647  ;;  %v668_v25 = vpop.permute.xlu0 %667 }
  0xd2   : > { %v711_v38 = vmul.f32 %v10575_v31, %v648_v24  ;;  %v716_v6 = vmul.f32 %v10575_v31, %v668_v25 }
  0xd5   : > { %v10567_v27 = vpop.permute.xlu0 %683 }
  0xd6   : > { %v560_v30 = vpop.permute.xlu1 %559 }
  0xd7   : > { %v629_v45 = vmul.f32 %v10579_v32, %v560_v30 }
  0xda   : > { %v545_v33 = vpop.permute.xlu0 %544 }
  0xdb   : > { %v626_v34 = vmul.f32 %v10579_v32, %v545_v33  ;;  %v656_v35 = vpop.permute.xlu1 %655 }
  0xdc   : > { %v713_v40 = vmul.f32 %v10575_v31, %v656_v35 }
  0xdd   : > { %v726_v39 = vadd.f32 %v710_v36, %v626_v34 }
  0xde   : > { %v550_v37 = vpop.permute.xlu0 %549  ;;  %v729_v49 = vadd.f32 %v713_v40, %v629_v45 }
  0xdf   : > { %v627_v41 = vmul.f32 %v10579_v32, %v550_v37  ;;  %v10594_v48 = vadd.f32 %v10589_v42, %v726_v39  ;;  %v720_v39 = vmul.f32 %v10575_v31, %v10567_v27 }
  0xe0   : > { %v565_v43 = vpop.permute.xlu1 %564  ;;  %v10604_v56 = vadd.f32 %v10589_v42, %v729_v49 }
  0xe1   : > { %v727_v46 = vadd.f32 %v711_v38, %v627_v41  ;;  %v630_v59 = vmul.f32 %v10579_v32, %v565_v43 }
  0xe2   : > { %v555_v47 = vpop.permute.xlu0 %554 }
  0xe3   : > { %v10597_v50 = vadd.f32 %v10589_v42, %v727_v46  ;;  %v628_v51 = vmul.f32 %v10579_v32, %v555_v47 }
  0xe5   : > { %v728_v52 = vadd.f32 %v712_v44, %v628_v51  ;;  %v660_v53 = vpop.permute.xlu1 %659  ;;  %v9012_v54 = vpack.c.bf16 %v10597_v50, %v10594_v48 }
  0xe6   : > { %v714_v55 = vmul.f32 %v10575_v31, %v660_v53  ;;  %v570_v58 = vpop.permute.xlu0 %569 }
  0xe7   : > { %v10607_v57 = vadd.f32 %v10589_v42, %v728_v52  ;;  %9013 = vmatprep.subr.bf16.mxu0 %v9012_v54  ;;  %v631_v60 = vmul.f32 %v10579_v32, %v570_v58 }
  0xe8   : > { %9015 = vmatpush3.bf16.msra.mxu0 %v9012_v54  ;;  %v730_v63 = vadd.f32 %v714_v55, %v630_v59 }
  0xe9   : > { %v664_v61 = vpop.permute.xlu1 %663  ;;  %v9016_v62 = vpack.c.bf16 %v10604_v56, %v10607_v57 }
  0xea   : > { %v715_v0 = vmul.f32 %v10575_v31, %v664_v61  ;;  %v10615_v2 = vadd.f32 %v10589_v42, %v730_v63  ;;  %v575_v5 = vpop.permute.xlu0 %574 }
  0xeb   : > { %9017 = vmatprep.subr.bf16.mxu0 %v9016_v62  ;;  %v632_v7 = vmul.f32 %v10579_v32, %v575_v5 }
  0xec   : > { %v731_v1 = vadd.f32 %v715_v0, %v631_v60  ;;  %9019 = vmatpush3.bf16.msra.mxu0 %v9016_v62 }
  0xed   : > { %v732_v10 = vadd.f32 %v716_v6, %v632_v7 }
  0xee   : > { %v10618_v3 = vadd.f32 %v10589_v42, %v731_v1  ;;  %v580_v4 = vpop.permute.xlu1 %579  ;;  %v590_v22 = vpop.permute.xlu0 %589 }
  0xef   : > { %v633_v11 = vmul.f32 %v10579_v32, %v580_v4  ;;  %v10627_v14 = vadd.f32 %v10589_v42, %v732_v10  ;;  %v635_v29 = vmul.f32 %v10579_v32, %v590_v22  ;;  %v766_v22 = vld [vmem:[%s14839_s1 + $0x8] sm:$0xff] }
  0xf0   : > { %v9020_v8 = vpack.c.bf16 %v10618_v3, %v10615_v2 }
  0xf2   : > { %9021 = vmatprep.subr.bf16.mxu0 %v9020_v8  ;;  %v595_v35 = vpop.permute.xlu0 %594 }
  0xf3   : > { %9023 = vmatpush3.bf16.msra.mxu0 %v9020_v8  ;;  %v672_v9 = vpop.permute.xlu1 %671  ;;  %v636_v40 = vmul.f32 %v10579_v32, %v595_v35  ;;  %v906_v35 = vld [vmem:[#allocation3] sm:$0xff] }
  0xf4   : > { %v717_v12 = vmul.f32 %v10575_v31, %v672_v9 }
  0xf5   : > { %v736_v44 = vadd.f32 %v720_v39, %v636_v40  ;;  %v956_v39 = vld [vmem:[#allocation5 + $0x90] sm:$0xff] }
  0xf6   : > { %v733_v13 = vadd.f32 %v717_v12, %v633_v11  ;;  %v610_v52 = vpop.permute.xlu0 %609 }
  0xf7   : > { %v10652_v49 = vadd.f32 %v10589_v42, %v736_v44  ;;  %v639_v61 = vmul.f32 %v10579_v32, %v610_v52  ;;  %v925_v44 = vld [vmem:[#allocation3 + $0x98] sm:$0xff]  ;;  %v908_v52 = vld [vmem:[#allocation3 + $0x10] sm:$0xff] }
  0xf8   : > { %v10630_v15 = vadd.f32 %v10589_v42, %v733_v13  ;;  %v585_v16 = vpop.permute.xlu1 %584 }
  0xf9   : > { %v634_v24 = vmul.f32 %v10579_v32, %v585_v16 }
  0xfa   : > { %v9024_v17 = vpack.c.bf16 %v10630_v15, %v10627_v14  ;;  %v615_v58 = vpop.permute.xlu0 %614 }
  0xfb   : > { %v640_v7 = vmul.f32 %v10579_v32, %v615_v58  ;;  %v959_v58 = vld [vmem:[#allocation5 + $0xa8] sm:$0xff] }
  0xfc   : > { %9025 = vmatprep.subr.bf16.mxu0 %v9024_v17 }
  0xfd   : > { %9027 = vmatpush3.bf16.msra.mxu0 %v9024_v17  ;;  %v676_v18 = vpop.permute.xlu1 %675 }
  0xfe   : > { %v718_v21 = vmul.f32 %v10575_v31, %v676_v18 }
  0xff   : > { %v700_v1 = vpop.permute.xlu0 %699 }
 0x100   : > { %v734_v30 = vadd.f32 %v718_v21, %v634_v24  ;;  %v724_v8 = vmul.f32 %v10575_v31, %v700_v1  ;;  %v955_v24 = vld [vmem:[#allocation5 + $0x88] sm:$0xff] }
 0x101   : > { %v680_v25 = vpop.permute.xlu1 %679  ;;  %v943_v1 = vld [vmem:[#allocation5 + $0x28] sm:$0xff] }
 0x102   : > { %v719_v33 = vmul.f32 %v10575_v31, %v680_v25  ;;  %v10639_v36 = vadd.f32 %v10589_v42, %v734_v30  ;;  %v740_v11 = vadd.f32 %v724_v8, %v640_v7  ;;  %v938_v30 = vld [vmem:[#allocation5] sm:$0xff]  ;;  %v911_v7 = vld [vmem:[#allocation3 + $0x28] sm:$0xff] }
 0x104   : > { %v735_v34 = vadd.f32 %v719_v33, %v635_v29  ;;  %v10676_v17 = vadd.f32 %v10589_v42, %v740_v11  ;;  %v923_v29 = vld [vmem:[#allocation3 + $0x88] sm:$0xff]  ;;  %v928_v11 = vld [vmem:[#allocation3 + $0xb0] sm:$0xff] }
 0x105   : > { %v939_v33 = vld [vmem:[#allocation5 + $0x8] sm:$0xff] }
 0x106   : > { %v10642_v37 = vadd.f32 %v10589_v42, %v735_v34  ;;  %v600_v38 = vpop.permute.xlu1 %599  ;;  %v10690_v34 = vpack.c.bf16 %v939_v33, %v938_v30  ;;  %v963_v30 = vld [vmem:[#allocation5 + $0xc8] sm:$0xff]  ;;  %v930_v33 = vld [vmem:[#allocation3 + $0xc0] sm:$0xff] }
 0x107   : > { %v637_v45 = vmul.f32 %v10579_v32, %v600_v38  ;;  %v907_v38 = vld [vmem:[#allocation3 + $0x8] sm:$0xff] }
 0x108   : > { %v9028_v41 = vpack.c.bf16 %v10642_v37, %v10639_v36  ;;  %v10693_v40 = vpack.c.bf16 %v907_v38, %v906_v35  ;;  %v931_v35 = vld [vmem:[#allocation3 + $0xc8] sm:$0xff] }
 0x10a   : > { %9029 = vmatprep.subr.bf16.mxu0 %v9028_v41 }
 0x10b   : > { %9031 = vmatpush3.bf16.msra.mxu0 %v9028_v41  ;;  %v688_v43 = vpop.permute.xlu1 %687  ;;  %v957_v41 = vld [vmem:[#allocation5 + $0x98] sm:$0xff] }
 0x10c   : > { %v721_v46 = vmul.f32 %v10575_v31, %v688_v43  ;;  %v924_v43 = vld [vmem:[#allocation3 + $0x90] sm:$0xff] }
 0x10e   : > { %v737_v47 = vadd.f32 %v721_v46, %v637_v45  ;;  %v10697_v45 = vpack.c.bf16 %v957_v41, %v956_v39  ;;  %v10699_v46 = vpack.c.bf16 %v925_v44, %v924_v43  ;;  %v946_v43 = vld [vmem:[#allocation5 + $0x40] sm:$0xff]  ;;  %v947_v44 = vld [vmem:[#allocation5 + $0x48] sm:$0xff] }
 0x110   : > { %v10655_v51 = vadd.f32 %v10589_v42, %v737_v47  ;;  %v605_v27 = vpop.permute.xlu1 %604  ;;  %v940_v47 = vld [vmem:[#allocation5 + $0x10] sm:$0xff] }
 0x111   : > { %v638_v59 = vmul.f32 %v10579_v32, %v605_v27  ;;  %v941_v27 = vld [vmem:[#allocation5 + $0x18] sm:$0xff] }
 0x112   : > { %v9032_v53 = vpack.c.bf16 %v10655_v51, %v10652_v49 }
 0x114   : > { %9033 = vmatprep.subr.bf16.mxu0 %v9032_v53 }
 0x115   : > { %9035 = vmatpush3.bf16.msra.mxu0 %v9032_v53  ;;  %v692_v54 = vpop.permute.xlu1 %691  ;;  %v10702_v53 = vpack.c.bf16 %v941_v27, %v940_v47  ;;  %v914_v47 = vld [vmem:[#allocation3 + $0x40] sm:$0xff]  ;;  %v10734_v27 = vpack.c.bf16 %v931_v35, %v930_v33 }
 0x116   : > { %v722_v55 = vmul.f32 %v10575_v31, %v692_v54  ;;  %v909_v54 = vld [vmem:[#allocation3 + $0x18] sm:$0xff]  ;;  %v950_v33 = vld [vmem:[#allocation5 + $0x60] sm:$0xff] }
 0x118   : > { %v738_v62 = vadd.f32 %v722_v55, %v638_v59  ;;  %v958_v55 = vld [vmem:[#allocation5 + $0xa0] sm:$0xff]  ;;  %v10706_v59 = vpack.c.bf16 %v909_v54, %v908_v52  ;;  %v915_v52 = vld [vmem:[#allocation3 + $0x48] sm:$0xff]  ;;  %v964_v54 = vld [vmem:[#allocation5 + $0xd0] sm:$0xff] }
 0x119   : > { %v696_v60 = vpop.permute.xlu1 %695 }
 0x11a   : > { %v723_v63 = vmul.f32 %v10575_v31, %v696_v60  ;;  %v10664_v4 = vadd.f32 %v10589_v42, %v738_v62  ;;  %v10708_v60 = vpack.c.bf16 %v959_v58, %v958_v55  ;;  %v927_v62 = vld [vmem:[#allocation3 + $0xa8] sm:$0xff]  ;;  %v965_v55 = vld [vmem:[#allocation5 + $0xd8] sm:$0xff]  ;;  %v10737_v58 = vpack.c.bf16 %v947_v44, %v946_v43  ;;  %v918_v44 = vld [vmem:[#allocation3 + $0x60] sm:$0xff] }
 0x11b   : > { %v951_v43 = vld [vmem:[#allocation5 + $0x68] sm:$0xff] }
 0x11c   : > { %v739_v0 = vadd.f32 %v723_v63, %v639_v61  ;;  %v926_v61 = vld [vmem:[#allocation3 + $0xa0] sm:$0xff] }
 0x11d   : > { %v942_v63 = vld [vmem:[#allocation5 + $0x20] sm:$0xff] }
 0x11e   : > { %v10667_v5 = vadd.f32 %v10589_v42, %v739_v0  ;;  %v620_v6 = vpop.permute.xlu1 %619  ;;  %v10710_v0 = vpack.c.bf16 %v927_v62, %v926_v61  ;;  %v10713_v8 = vpack.c.bf16 %v943_v1, %v942_v63  ;;  %v10741_v61 = vpack.c.bf16 %v915_v52, %v914_v47  ;;  %v932_v63 = vld [vmem:[#allocation3 + $0xd0] sm:$0xff]  ;;  %v933_v1 = vld [vmem:[#allocation3 + $0xd8] sm:$0xff]  ;;  %v919_v47 = vld [vmem:[#allocation3 + $0x68] sm:$0xff] }
 0x11f   : > { %v641_v12 = vmul.f32 %v10579_v32, %v620_v6  ;;  %v954_v32 = vld [vmem:[#allocation5 + $0x80] sm:$0xff]  ;;  %v10743_v62 = vpack.c.bf16 %v965_v55, %v964_v54  ;;  %v10763_v52 = vpack.c.bf16 %v951_v43, %v950_v33  ;;  %v10765_v54 = vpack.c.bf16 %v919_v47, %v918_v44  ;;  %v968_v55 = vld [vmem:[#allocation5 + $0xf0] sm:$0xff] }
 0x120   : > { %v9036_v9 = vpack.c.bf16 %v10667_v5, %v10664_v4  ;;  %v10686_v25 = vpack.c.bf16 %v955_v24, %v954_v32  ;;  %v910_v6 = vld [vmem:[#allocation3 + $0x20] sm:$0xff]  ;;  %v912_v24 = vld [vmem:[#allocation3 + $0x30] sm:$0xff] }
 0x122   : > { %9037 = vmatprep.subr.bf16.mxu0 %v9036_v9 }
 0x123   : > { %9039 = vmatpush3.bf16.msra.mxu0 %v9036_v9  ;;  %v704_v10 = vpop.permute.xlu1 %703  ;;  %v960_v9 = vld [vmem:[#allocation5 + $0xb0] sm:$0xff] }
 0x124   : > { %v725_v13 = vmul.f32 %v10575_v31, %v704_v10  ;;  %v922_v31 = vld [vmem:[#allocation3 + $0x80] sm:$0xff]  ;;  %v961_v10 = vld [vmem:[#allocation5 + $0xb8] sm:$0xff] }
 0x126   : > { %v741_v16 = vadd.f32 %v725_v13, %v641_v12  ;;  %v10717_v12 = vpack.c.bf16 %v911_v7, %v910_v6  ;;  %v10719_v13 = vpack.c.bf16 %v961_v10, %v960_v9  ;;  %v948_v6 = vld [vmem:[#allocation5 + $0x50] sm:$0xff]  ;;  %v10749_v7 = vpack.c.bf16 %v933_v1, %v932_v63  ;;  %v949_v9 = vld [vmem:[#allocation5 + $0x58] sm:$0xff] }
 0x127   : > { %v916_v10 = vld [vmem:[#allocation3 + $0x50] sm:$0xff]  ;;  %v969_v63 = vld [vmem:[#allocation5 + $0xf8] sm:$0xff] }
 0x128   : > { %v10679_v18 = vadd.f32 %v10589_v42, %v741_v16  ;;  %v10688_v42 = vpack.c.bf16 %v923_v29, %v922_v31  ;;  %v929_v16 = vld [vmem:[#allocation3 + $0xb8] sm:$0xff]  ;;  %v962_v29 = vld [vmem:[#allocation5 + $0xc0] sm:$0xff]  ;;  %v10770_v1 = vpack.c.bf16 %v969_v63, %v968_v55 }
 0x129   : > { %v10722_v32 = vpack.c.bf16 %v929_v16, %v928_v11  ;;  %v913_v31 = vld [vmem:[#allocation3 + $0x38] sm:$0xff]  ;;  %v10731_v41 = vpack.c.bf16 %v963_v30, %v962_v29  ;;  %v10751_v16 = vpack.c.bf16 %v949_v9, %v948_v6  ;;  %v934_v29 = vld [vmem:[#allocation3 + $0xe0] sm:$0xff]  ;;  %v935_v30 = vld [vmem:[#allocation3 + $0xe8] sm:$0xff] }
 0x12a   : > { %v9040_v21 = vpack.c.bf16 %v10679_v18, %v10676_v17  ;;  %9045 = vmatprep.subr.bf16.mxu1 %v10688_v42  ;;  %v10729_v39 = vpack.c.bf16 %v913_v31, %v912_v24  ;;  %v917_v11 = vld [vmem:[#allocation3 + $0x58] sm:$0xff]  ;;  %v967_v24 = vld [vmem:[#allocation5 + $0xe8] sm:$0xff]  ;;  %v10760_v35 = vpack.c.bf16 %v935_v30, %v934_v29  ;;  %v936_v6 = vld [vmem:[#allocation3 + $0xf0] sm:$0xff] }
 0x12b   : > { %9047 = vmatpush3.bf16.msra.mxu1 %v10693_v40  ;;  %v937_v9 = vld [vmem:[#allocation3 + $0xf8] sm:$0xff] }
 0x12c   : > { %9041 = vmatprep.subr.bf16.mxu0 %v9040_v21  ;;  %9049 = vmatprep.subr.bf16.mxu1 %v10699_v46  ;;  %v921_v29 = vld [vmem:[#allocation3 + $0x78] sm:$0xff] }
 0x12d   : > { %9043 = vmatpush3.bf16.msra.mxu0 %v9040_v21  ;;  %v944_v21 = vld [vmem:[#allocation5 + $0x30] sm:$0xff] }
 0x12e   : > { %9077 = vmatprep.subr.bf16.mxu0 %v10686_v25 }
 0x12f   : > { %9051 = vmatpush3.bf16.msra.mxu1 %v10706_v59 }
 0x130   : > { %8633 = vmatmul.mubr.f32.vlgmr.msra.gmra.mrb[0].mxu0 %v766_v22  ;;  %v945_v22 = vld [vmem:[#allocation5 + $0x38] sm:$0xff]  ;;  %9053 = vmatprep.subr.bf16.mxu1 %v10710_v0 }
 0x131   : > { %9079 = vmatpush3.bf16.msra.mxu0 %v10690_v34  ;;  %v10725_v38 = vpack.c.bf16 %v945_v22, %v944_v21  ;;  %v10753_v21 = vpack.c.bf16 %v917_v11, %v916_v10  ;;  %v966_v22 = vld [vmem:[#allocation5 + $0xe0] sm:$0xff]  ;;  %v952_v10 = vld [vmem:[#allocation5 + $0x70] sm:$0xff]  ;;  %v10772_v11 = vpack.c.bf16 %v937_v9, %v936_v6 }
 0x132   : > { %9081 = vmatprep.subr.bf16.mxu0 %v10697_v45  ;;  %v10758_v31 = vpack.c.bf16 %v967_v24, %v966_v22  ;;  %v953_v22 = vld [vmem:[#allocation5 + $0x78] sm:$0xff]  ;;  %v920_v24 = vld [vmem:[#allocation3 + $0x70] sm:$0xff] }
 0x133   : > { %9055 = vmatpush3.bf16.msra.mxu1 %v10717_v12  ;;  %v10775_v30 = vpack.c.bf16 %v953_v22, %v952_v10  ;;  %v10777_v33 = vpack.c.bf16 %v921_v29, %v920_v24  ;;  %v10353_v24 = vmov 0.0  }
 0x134   : > { %9057 = vmatprep.subr.bf16.mxu1 %v10722_v32 }
 0x135   : > { %9083 = vmatpush3.bf16.msra.mxu0 %v10702_v53 }
 0x136   : > { %9085 = vmatprep.subr.bf16.mxu0 %v10708_v60 }
 0x137   : > { %9059 = vmatpush3.bf16.msra.mxu1 %v10729_v39 }
 0x138   : > { %9061 = vmatprep.subr.bf16.mxu1 %v10734_v27 }
 0x139   : > { %9087 = vmatpush3.bf16.msra.mxu0 %v10713_v8 }
 0x13a   : > { %9089 = vmatprep.subr.bf16.mxu0 %v10719_v13 }
 0x13b   : > { %9063 = vmatpush3.bf16.msra.mxu1 %v10741_v61 }
 0x13c   : > { %9065 = vmatprep.subr.bf16.mxu1 %v10749_v7 }
 0x13d   : > { %9091 = vmatpush3.bf16.msra.mxu0 %v10725_v38 }
 0x13e   : > { %9093 = vmatprep.subr.bf16.mxu0 %v10731_v41 }
 0x13f   : > { %9067 = vmatpush3.bf16.msra.mxu1 %v10753_v21 }
 0x140   : > { %9069 = vmatprep.subr.bf16.mxu1 %v10760_v35 }
 0x141   : > { %9095 = vmatpush3.bf16.msra.mxu0 %v10737_v58 }
 0x142   : > { %9097 = vmatprep.subr.bf16.mxu0 %v10743_v62 }
 0x143   : > { %9071 = vmatpush3.bf16.msra.mxu1 %v10765_v54 }
 0x144   : > { %9073 = vmatprep.subr.bf16.mxu1 %v10772_v11 }
 0x145   : > { %9099 = vmatpush3.bf16.msra.mxu0 %v10751_v16 }
 0x146   : > { %9101 = vmatprep.subr.bf16.mxu0 %v10758_v31 }
 0x147   : > { %9075 = vmatpush3.bf16.msra.mxu1 %v10777_v33 }
 0x148   : > { %9109 = vmatprep.subr.bf16.mxu1 %v10688_v42  ;;  %v784_v42 = vand.u32 127, %v14857_v20 }
 0x149   : > { %9103 = vmatpush3.bf16.msra.mxu0 %v10763_v52 }
 0x14a   : > { %9105 = vmatprep.subr.bf16.mxu0 %v10770_v1  ;;  %v785_v55 = vadd.s32 128, %v784_v42 }
 0x14d   : > { %9107 = vmatpush3.bf16.msra.mxu0 %v10775_v30 }
 0x14e   : > { %9141 = vmatprep.subr.bf16.mxu0 %v10686_v25  ;;  %v788_v25 = vmul.u32 32, %v10564_v23 }
 0x150   : > { %v791_v47 = vadd.s32 32, %v788_v25  ;;  %vm789_vm0 = vcmp.ge.s32.totalorder %v784_v42, %v788_v25  ;;  %vm790_vm2 = vcmp.ge.s32.totalorder %v785_v55, %v788_v25 }
 0x152   : > { %vm792_vm1 = vcmp.lt.s32.totalorder %v784_v42, %v791_v47  ;;  %vm793_vm3 = vcmp.lt.s32.totalorder %v785_v55, %v791_v47 }
 0x153   : > { %vm794_vm4 = vmand %vm789_vm0, %vm792_vm1 }
 0x154   : > { %vm795_vm6 = vmand %vm790_vm2, %vm793_vm3  ;;  %v10793_v29 = vsel %vm794_vm4, 1.0, %v10353_v24 }
 0x155   : > { %14967 = vst [vmem:[#allocation12_spill] sm:$0xff] %v10793_v29  ;;  %v10795_v20 = vsel %vm795_vm6, 1.0, %v10353_v24 }
 0x156   : > { %14968 = vst [vmem:[#allocation13_spill] sm:$0xff] %v10795_v20 }
 0x203   : > { %v8634_v43 = vpop.f32.mrb[0].mxu0 }
 0x204   : > { %892 = vrot.lane.b32.xlu0 %v8634_v43, %s10350_s22  ;;  %v864_v44 = vpop.f32.mrb[1].mxu0 }
 0x205   : > { %874 = vrot.lane.b32.xlu1 %v864_v44, %s10350_s22 }
 0x208   : > { %895 = vrot.lane.b32.xlu0 %v8634_v43, %s10351_s20 }
 0x209   : > { %877 = vrot.lane.b32.xlu1 %v864_v44, %s10351_s20 }
 0x20c   : > { %898 = vrot.lane.b32.xlu0 %v8634_v43, %s10352_s27 }
 0x20d   : > { %880 = vrot.lane.b32.xlu1 %v864_v44, %s10352_s27 }
 0x276   : > { %v893_v63 = vpop.permute.xlu0 %892 }
 0x277   : > { %v875_v6 = vpop.permute.xlu1 %874  ;;  %v901_v22 = vsel %vm883_vm5, %v8634_v43, %v893_v63 }
 0x278   : > { %v884_v26 = vsel %vm883_vm5, %v864_v44, %v875_v6 }
 0x27a   : > { %v896_v9 = vpop.permute.xlu0 %895 }
 0x27b   : > { %v878_v10 = vpop.permute.xlu1 %877  ;;  %v902_v42 = vsel %vm885_vm7, %v901_v22, %v896_v9  ;;  %v774_v9 = vld [vmem:[%s14840_s2 + $0x38] sm:$0xff] }
 0x27c   : > { %v886_v47 = vsel %vm885_vm7, %v884_v26, %v878_v10  ;;  %v1252_v26 = vld [vmem:[%s14845_s7 + $0x8] sm:$0xff]  ;;  %v775_v10 = vld [vmem:[%s14840_s2 + $0x40] sm:$0xff] }
 0x27e   : > { %v899_v25 = vpop.permute.xlu0 %898 }
 0x27f   : > { %v903_v55 = vsel %vm887_vm8, %v902_v42, %v899_v25  ;;  %v881_v28 = vpop.permute.xlu1 %880  ;;  %v776_v25 = vld [vmem:[%s14840_s2 + $0x48] sm:$0xff] }
 0x280   : > { %v904_v23 = vmul.f32 %v903_v55, %v10793_v29  ;;  %v905_v19 = vmul.f32 %v903_v55, %v10795_v20  ;;  %v888_v43 = vsel %vm887_vm8, %v886_v47, %v881_v28  ;;  %v777_v47 = vld [vmem:[%s14840_s2 + $0x50] sm:$0xff] }
 0x281   : > { %v889_v63 = vmul.f32 %v888_v43, %v10793_v29  ;;  %v890_v24 = vmul.f32 %v888_v43, %v10795_v20 }
 0x282   : > { %1104 = vmatprep.mubr.f32.mxu0 %v905_v19 }
 0x283   : > { %1034 = vmatprep.mubr.f32.mxu1 %v890_v24  ;;  %1105 = vmatmul.mubr.f32.vlgmr.msra.gmra.mrb[2].mxu0 %v904_v23 }
 0x284   : > { %9143 = vmatpush3.bf16.msra.mxu0 %v10690_v34  ;;  %1035 = vmatmul.mubr.f32.vlgmr.msra.gmra.mrb[0].mxu1 %v889_v63  ;;  %v1253_v34 = vld [vmem:[%s14845_s7 + $0x10] sm:$0xff] }
 0x285   : > { %9111 = vmatpush3.bf16.msra.mxu1 %v10693_v40  ;;  %1245 = vmatprep.mubr.f32.mxu0 %v890_v24  ;;  %v1254_v40 = vld [vmem:[%s14845_s7 + $0x18] sm:$0xff]  ;;  %v779_v24 = vld [vmem:[%s14840_s2 + $0x60] sm:$0xff] }
 0x286   : > { %1175 = vmatprep.mubr.f32.mxu1 %v905_v19  ;;  %9145 = vmatprep.subr.bf16.mxu0 %v10697_v45  ;;  %v1251_v19 = vld [vmem:[%s14845_s7] sm:$0xff]  ;;  %v9176_v45 = vpack.c.bf16 %v1254_v40, %v1253_v34  ;;  %v781_v34 = vld [vmem:[%s14840_s2 + $0x70] sm:$0xff] }
 0x287   : > { %9113 = vmatprep.subr.bf16.mxu1 %v10699_v46  ;;  %v9172_v28 = vpack.c.bf16 %v1252_v26, %v1251_v19 }
 0x288   : > { %9147 = vmatpush3.bf16.msra.mxu0 %v10702_v53 }
 0x289   : > { %9115 = vmatpush3.bf16.msra.mxu1 %v10706_v59  ;;  %9149 = vmatprep.subr.bf16.mxu0 %v10708_v60 }
 0x28a   : > { %9117 = vmatprep.subr.bf16.mxu1 %v10710_v0 }
 0x28c   : > { %9151 = vmatpush3.bf16.msra.mxu0 %v10713_v8 }
 0x28d   : > { %9119 = vmatpush3.bf16.msra.mxu1 %v10717_v12  ;;  %9153 = vmatprep.subr.bf16.mxu0 %v10719_v13 }
 0x28e   : > { %9121 = vmatprep.subr.bf16.mxu1 %v10722_v32 }
 0x290   : > { %9155 = vmatpush3.bf16.msra.mxu0 %v10725_v38 }
 0x291   : > { %9123 = vmatpush3.bf16.msra.mxu1 %v10729_v39  ;;  %9157 = vmatprep.subr.bf16.mxu0 %v10731_v41 }
 0x292   : > { %9125 = vmatprep.subr.bf16.mxu1 %v10734_v27 }
 0x294   : > { %9159 = vmatpush3.bf16.msra.mxu0 %v10737_v58 }
 0x295   : > { %9127 = vmatpush3.bf16.msra.mxu1 %v10741_v61  ;;  %9161 = vmatprep.subr.bf16.mxu0 %v10743_v62 }
 0x296   : > { %9129 = vmatprep.subr.bf16.mxu1 %v10749_v7 }
 0x298   : > { %9163 = vmatpush3.bf16.msra.mxu0 %v10751_v16  ;;  %v768_v16 = vld [vmem:[%s14840_s2 + $0x8] sm:$0xff] }
 0x299   : > { %9131 = vmatpush3.bf16.msra.mxu1 %v10753_v21  ;;  %9165 = vmatprep.subr.bf16.mxu0 %v10758_v31  ;;  %v769_v21 = vld [vmem:[%s14840_s2 + $0x10] sm:$0xff] }
 0x29a   : > { %9133 = vmatprep.subr.bf16.mxu1 %v10760_v35 }
 0x29c   : > { %9167 = vmatpush3.bf16.msra.mxu0 %v10763_v52  ;;  %v770_v52 = vld [vmem:[%s14840_s2 + $0x18] sm:$0xff] }
 0x29d   : > { %9135 = vmatpush3.bf16.msra.mxu1 %v10765_v54  ;;  %9169 = vmatprep.subr.bf16.mxu0 %v10770_v1  ;;  %v771_v54 = vld [vmem:[%s14840_s2 + $0x20] sm:$0xff] }
 0x29e   : > { %9137 = vmatprep.subr.bf16.mxu1 %v10772_v11 }
 0x2a0   : > { %9171 = vmatpush3.bf16.msra.mxu0 %v10775_v30  ;;  %v772_v30 = vld [vmem:[%s14840_s2 + $0x28] sm:$0xff] }
 0x2a1   : > { %9139 = vmatpush3.bf16.msra.mxu1 %v10777_v33  ;;  %v773_v33 = vld [vmem:[%s14840_s2 + $0x30] sm:$0xff] }
 0x2a2   : > { %9173 = vmatprep.subr.bf16.mxu1 %v9172_v28 }
 0x2a3   : > { %1246 = vmatmul.mubr.f32.vlgmr.msra.gmra.mrb[4].mxu0 %v889_v63  ;;  %v778_v63 = vld [vmem:[%s14840_s2 + $0x58] sm:$0xff] }
 0x2a4   : > { %1176 = vmatmul.mubr.f32.vlgmr.msra.gmra.mrb[2].mxu1 %v904_v23  ;;  %v767_v23 = vld [vmem:[%s14840_s2] sm:$0xff] }
 0x2a5   : > { %9175 = vmatpush3.bf16.msra.mxu1 %v9172_v28  ;;  %8643 = vmatprep.mubr.msk.f32.mxu1 %vm883_vm5, %v10594_v48  ;;  %v780_v28 = vld [vmem:[%s14840_s2 + $0x68] sm:$0xff] }
 0x2a6   : > { %9177 = vmatprep.subr.bf16.mxu1 %v9176_v45  ;;  %8671 = vmatprep.mubr.msk.f32.mxu0 %vm1448_vm9, %v767_v23  ;;  %v782_v23 = vld [vmem:[%s14840_s2 + $0x78] sm:$0xff] }
 0x2a9   : > { %9179 = vmatpush3.bf16.msra.mxu1 %v9176_v45 }
 0x2ac   : > { %8644 = vmatmul.mubr.msk.f32.vlgmr.msra.gmra.mrb[4].mxu1 %vm883_vm5, %v10597_v50 }
 0x2ad   : > { %8646 = vmatprep.mubr.msk.f32.mxu1 %vm883_vm5, %v10607_v57 }
 0x2b0   : > { %8647 = vmatmul.mubr.msk.f32.gmra.mrb[6].mxu1 %vm883_vm5, %v10604_v56 }
 0x2b1   : > { %8649 = vmatprep.mubr.msk.f32.mxu1 %vm883_vm5, %v10615_v2 }
 0x2b4   : > { %8650 = vmatmul.mubr.msk.f32.gmra.mrb[8].mxu1 %vm883_vm5, %v10618_v3 }
 0x2b5   : > { %8652 = vmatprep.mubr.msk.f32.mxu1 %vm883_vm5, %v10627_v14 }
 0x2b8   : > { %8653 = vmatmul.mubr.msk.f32.gmra.mrb[10].mxu1 %vm883_vm5, %v10630_v15 }
 0x2b9   : > { %8655 = vmatprep.mubr.msk.f32.mxu1 %vm883_vm5, %v10639_v36 }
 0x2bc   : > { %8656 = vmatmul.mubr.msk.f32.gmra.mrb[12].mxu1 %vm883_vm5, %v10642_v37 }
 0x2bd   : > { %8658 = vmatprep.mubr.msk.f32.mxu1 %vm883_vm5, %v10652_v49 }
 0x2c0   : > { %8659 = vmatmul.mubr.msk.f32.gmra.mrb[14].mxu1 %vm883_vm5, %v10655_v51 }
 0x2c1   : > { %8661 = vmatprep.mubr.msk.f32.mxu1 %vm883_vm5, %v10664_v4 }
 0x2c4   : > { %8662 = vmatmul.mubr.msk.f32.gmra.mrb[16].mxu1 %vm883_vm5, %v10667_v5 }
 0x2c5   : > { %8664 = vmatprep.mubr.msk.f32.mxu1 %vm883_vm5, %v10676_v17 }
 0x2c8   : > { %8665 = vmatmul.mubr.msk.f32.gmra.mrb[18].mxu1 %vm883_vm5, %v10679_v18 }
 0x356   : > { %v7881_v46 = vpop.f32.mrb[2].mxu0 }
 0x357   : > { %v7846_v53 = vpop.f32.mrb[0].mxu1  ;;  %v7882_v59 = vpop.f32.mrb[3].mxu0 }
 0x358   : > { %v7883_v60 = vadd.f32 %v7882_v59, %v7881_v46  ;;  %v7847_v0 = vpop.f32.mrb[1].mxu1  ;;  %v14969_v46 = vld [vmem:[#allocation10_spill] sm:$0xff]  ;;  %v10972_v59 = vld [vmem:[%s14846_s8] ss:$0 sm:$0xff] }
 0x359   : > { %v7848_v8 = vadd.f32 %v7847_v0, %v7846_v53 }
 0x35b   : > { %v1110_v12 = vsub.f32 %v7848_v8, %v7883_v60 }
 0x376   : > { %v7951_v13 = vpop.f32.mrb[4].mxu0 }
 0x377   : > { %v7916_v32 = vpop.f32.mrb[2].mxu1  ;;  %v7952_v38 = vpop.f32.mrb[5].mxu0 }
 0x378   : > { %v7953_v39 = vadd.f32 %v7952_v38, %v7951_v13  ;;  %v7917_v41 = vpop.f32.mrb[3].mxu1  ;;  %v1666_v13 = vmul.f32 0.9, %v10597_v50  ;;  %v1665_v38 = vmul.f32 0.9, %v10594_v48 }
 0x379   : > { %v7918_v27 = vadd.f32 %v7917_v41, %v7916_v32 }
 0x37b   : > { %v1248_v58 = vadd.f32 %v7953_v39, %v7918_v27 }
 0x37d   : > { %v9180_v61 = vpack.c.bf16 %v1248_v58, %v1110_v12 }
 0x37f   : > { %v8645_v62 = vpop.f32.mrb[4].mxu1  ;;  %9181 = vmatprep.subr.bf16.mxu0 %v9180_v61 }
 0x380   : > { %v1369_v7 = vpop.f32.mrb[5].mxu1  ;;  %9183 = vmatpush3.bf16.msra.mxu0 %v9180_v61 }
 0x383   : > { %v8648_v31 = vpop.f32.mrb[6].mxu1  ;;  %8672 = vmatmul.mubr.msk.f32.vlgmr.msra.gmra.mrb[6].mxu0 %vm1448_vm9, %v768_v16  ;;  %v1668_v16 = vmul.f32 0.9, %v10604_v56 }
 0x384   : > { %v1379_v35 = vpop.f32.mrb[7].mxu1  ;;  %8674 = vmatprep.mubr.msk.f32.mxu0 %vm1448_vm9, %v769_v21 }
 0x387   : > { %v10898_v1 = vpop.f32.mrb[8].mxu1  ;;  %8675 = vmatmul.mubr.msk.f32.gmra.mrb[8].mxu0 %vm1448_vm9, %v770_v52 }
 0x388   : > { %v10901_v11 = vpop.f32.mrb[9].mxu1  ;;  %8677 = vmatprep.mubr.msk.f32.mxu0 %vm1448_vm9, %v771_v54 }
 0x38b   : > { %v10910_v44 = vpop.f32.mrb[10].mxu1  ;;  %8678 = vmatmul.mubr.msk.f32.gmra.mrb[10].mxu0 %vm1448_vm9, %v772_v30 }
 0x38c   : > { %v10913_v6 = vpop.f32.mrb[11].mxu1  ;;  %8680 = vmatprep.mubr.msk.f32.mxu0 %vm1448_vm9, %v773_v33 }
 0x38f   : > { %v10922_v22 = vpop.f32.mrb[12].mxu1  ;;  %8681 = vmatmul.mubr.msk.f32.gmra.mrb[12].mxu0 %vm1448_vm9, %v774_v9 }
 0x390   : > { %v10925_v42 = vpop.f32.mrb[13].mxu1  ;;  %8683 = vmatprep.mubr.msk.f32.mxu0 %vm1448_vm9, %v775_v10 }
 0x393   : > { %v10934_v55 = vpop.f32.mrb[14].mxu1  ;;  %8684 = vmatmul.mubr.msk.f32.gmra.mrb[14].mxu0 %vm1448_vm9, %v776_v25 }
 0x394   : > { %v10937_v43 = vpop.f32.mrb[15].mxu1  ;;  %8686 = vmatprep.mubr.msk.f32.mxu0 %vm1448_vm9, %v777_v47 }
 0x397   : > { %v10946_v19 = vpop.f32.mrb[16].mxu1  ;;  %8687 = vmatmul.mubr.msk.f32.gmra.mrb[16].mxu0 %vm1448_vm9, %v778_v63  ;;  %v1670_v63 = vmul.f32 0.9, %v10618_v3 }
 0x398   : > { %v10949_v26 = vpop.f32.mrb[17].mxu1  ;;  %8689 = vmatprep.mubr.msk.f32.mxu0 %vm1448_vm9, %v779_v24  ;;  %v1669_v24 = vmul.f32 0.9, %v10615_v2  ;;  %v1672_v2 = vmul.f32 0.9, %v10630_v15 }
 0x39b   : > { %v10958_v40 = vpop.f32.mrb[18].mxu1  ;;  %8690 = vmatmul.mubr.msk.f32.gmra.mrb[18].mxu0 %vm1448_vm9, %v780_v28 }
 0x39c   : > { %v10961_v45 = vpop.f32.mrb[19].mxu1  ;;  %8692 = vmatprep.mubr.msk.f32.mxu0 %vm1448_vm9, %v781_v34  ;;  %v1671_v34 = vmul.f32 0.9, %v10627_v14 }
 0x39f   : > { %8693 = vmatmul.mubr.msk.f32.gmra.mrb[20].mxu0 %vm1448_vm9, %v782_v23 }
 0x3a0   : > { %8727 = vmatprep.mubr.f32.mxu0 %v14969_v46 }
 0x456   : > { %v8673_v53 = vpop.f32.mrb[6].mxu0 }
 0x457   : > { %v1569_v60 = vadd.f32 %v8673_v53, %v8645_v62  ;;  %v1563_v0 = vpop.f32.mrb[7].mxu0 }
 0x458   : > { %v1564_v8 = vadd.f32 %v1563_v0, %v1369_v7  ;;  %v11026_v0 = vmul.f32 0.9, %v10652_v49 }
 0x459   : > { %v10975_v12 = vadd.f32 %v10972_v59, %v1569_v60 }
 0x45a   : > { %v10979_v32 = vadd.f32 %v10972_v59, %v1564_v8  ;;  %v8676_v39 = vpop.f32.mrb[8].mxu0 }
 0x45b   : > { %14970 = vst [vmem:[#allocation10_spill] sm:$0xff] %v10975_v12  ;;  %v10983_v41 = vadd.f32 %v1666_v13, %v10975_v12  ;;  %v1579_v27 = vadd.f32 %v8676_v39, %v8648_v31  ;;  %v1573_v58 = vpop.f32.mrb[9].mxu0  ;;  %v1667_v31 = vmul.f32 0.9, %v10607_v57 }
 0x45c   : > { %14971 = vst [vmem:[#allocation14_spill] sm:$0xff] %v10979_v32  ;;  %v10986_v61 = vadd.f32 %v1665_v38, %v10979_v32  ;;  %v1574_v62 = vadd.f32 %v1573_v58, %v1379_v35 }
 0x45d   : > { %v10989_v7 = vmul.f32 0.70710677, %v10983_v41  ;;  %v10992_v50 = vadd.f32 %v10972_v59, %v1579_v27 }
 0x45e   : > { %v10996_v48 = vmul.f32 0.70710677, %v10986_v61  ;;  %v10999_v21 = vadd.f32 %v10972_v59, %v1574_v62  ;;  %v8679_v52 = vpop.f32.mrb[10].mxu0 }
 0x45f   : > { %14972 = vst [vmem:[#allocation15_spill] sm:$0xff] %v10992_v50  ;;  %v11003_v54 = vadd.f32 %v1668_v16, %v10992_v50  ;;  %v1583_v35 = vpop.f32.mrb[11].mxu0  ;;  %v1762_v33 = vand.u32 2147483647, %v10989_v7  ;;  %v1589_v53 = vadd.f32 %v8679_v52, %v10898_v1  ;;  %v11038_v1 = vmul.f32 0.9, %v10639_v36 }
 0x460   : > { %14973 = vst [vmem:[#allocation16_spill] sm:$0xff] %v10999_v21  ;;  %v11006_v30 = vadd.f32 %v1667_v31, %v10999_v21  ;;  %v1761_v56 = vand.u32 2147483647, %v10996_v48  ;;  %v1584_v3 = vadd.f32 %v1583_v35, %v10901_v11  ;;  %v11090_v50 = vmul.f32 0.9, %v10664_v4 }
 0x461   : > { %v11011_v9 = vmul.f32 0.70710677, %v11003_v54  ;;  %v1778_v47 = vmul.f32 0.3275911, %v1762_v33  ;;  %v2018_v8 = vsub.f32 0.0, %v1762_v33  ;;  %v11034_v14 = vadd.f32 %v10972_v59, %v1589_v53 }
 0x462   : > { %v8682_v10 = vpop.f32.mrb[12].mxu0  ;;  %v11014_v25 = vmul.f32 0.70710677, %v11006_v30  ;;  %v1777_v28 = vmul.f32 0.3275911, %v1761_v56  ;;  %v2017_v49 = vsub.f32 0.0, %v1761_v56  ;;  %v11043_v58 = vadd.f32 %v10972_v59, %v1584_v3 }
 0x463   : > { %v1593_v57 = vpop.f32.mrb[13].mxu0  ;;  %v1764_v46 = vand.u32 2147483647, %v11011_v9  ;;  %v11031_v38 = vadd.f32 1.0, %v1778_v47  ;;  %14974 = vst [vmem:[#allocation17_spill] sm:$0xff] %v11034_v14  ;;  %v1599_v39 = vadd.f32 %v8682_v10, %v10910_v44  ;;  %v1686_v31 = vadd.f32 %v1670_v63, %v11034_v14 }
 0x464   : > { %v1763_v13 = vand.u32 2147483647, %v11014_v25  ;;  %v11040_v27 = vadd.f32 1.0, %v1777_v28  ;;  %14975 = vst [vmem:[#allocation18_spill] sm:$0xff] %v11043_v58  ;;  %v1594_v11 = vadd.f32 %v1593_v57, %v10913_v6  ;;  %v2034_v36 = vmul.f32 %v2018_v8, %v1762_v33 }
 0x465   : > { %v1780_v15 = vmul.f32 0.3275911, %v1764_v46  ;;  %v2020_v16 = vsub.f32 0.0, %v1764_v46  ;;  %v11050_v52 = vadd.f32 %v10972_v59, %v1599_v39  ;;  %v11055_v47 = vadd.f32 %v1669_v24, %v11043_v58 }
 0x466   : > { %v11019_v23 = vpop.f32.mrb[14].mxu0  ;;  %v1779_v35 = vmul.f32 0.3275911, %v1763_v13  ;;  %v2019_v10 = vsub.f32 0.0, %v1763_v13  ;;  %9835 = vrcp.f32 %v11031_v38  ;;  %v11058_v6 = vmul.f32 0.70710677, %v1686_v31 }
 0x467   : > { %v11023_v60 = vpop.f32.mrb[15].mxu0  ;;  %14976 = vst [vmem:[#allocation19_spill] sm:$0xff] %v11050_v52  ;;  %v11061_v57 = vadd.f32 %v1672_v2, %v11050_v52  ;;  %v11064_v63 = vadd.f32 %v10972_v59, %v1594_v11  ;;  %9837 = vrcp.f32 %v11040_v27  ;;  %v2033_v28 = vmul.f32 %v2017_v49, %v1761_v56 }
 0x468   : > { %v11068_v33 = vmul.f32 0.70710677, %v11055_v47  ;;  %v11071_v24 = vmul.f32 0.9, %v10676_v17  ;;  %v11073_v8 = vadd.f32 1.0, %v1780_v15  ;;  %v2036_v3 = vmul.f32 %v2020_v16, %v1764_v46 }
 0x469   : > { %14977 = vst [vmem:[#allocation20_spill] sm:$0xff] %v11064_v63  ;;  %v1766_v39 = vand.u32 2147483647, %v11058_v6  ;;  %v11077_v2 = vmul.f32 0.70710677, %v11061_v57  ;;  %v11079_v11 = vadd.f32 1.0, %v1779_v35  ;;  %v2035_v52 = vmul.f32 %v2019_v10, %v1763_v13 }
 0x46a   : > { %v11046_v62 = vpop.f32.mrb[16].mxu0  ;;  %v1765_v56 = vand.u32 2147483647, %v11068_v33  ;;  %v1674_v49 = vmul.f32 0.9, %v10642_v37  ;;  %v11086_v15 = vadd.f32 %v1671_v34, %v11064_v63  ;;  %9839 = vrcp.f32 %v11073_v8 }
 0x46b   : > { %v11052_v44 = vpop.f32.mrb[17].mxu0  ;;  %v2051_v14 = vmul.f32 1.442695, %v2034_v36  ;;  %v1782_v17 = vmul.f32 0.3275911, %v1766_v39  ;;  %9841 = vrcp.f32 %v11079_v11  ;;  %v11122_v12 = vmul.f32 0.5, %v11006_v30 }
 0x46c   : > { %v1676_v46 = vmul.f32 0.9, %v10655_v51  ;;  %v2049_v16 = vmul.f32 1.442695, %v2033_v28  ;;  %v1781_v21 = vmul.f32 0.3275911, %v1765_v56 }
 0x46d   : > { %v2055_v13 = vmul.f32 1.442695, %v2036_v3  ;;  %v1768_v35 = vand.u32 2147483647, %v11077_v2  ;;  %v2053_v36 = vmul.f32 1.442695, %v2035_v52  ;;  %9843 = vpow2.f32 %v2051_v14 }
 0x46e   : > { %v8691_v53 = vpop.f32.mrb[18].mxu0  ;;  %v11098_v34 = vmul.f32 0.9, %v10667_v5  ;;  %v11102_v51 = vadd.f32 1.0, %v1782_v17  ;;  %v11105_v4 = vmul.f32 0.70710677, %v11086_v15  ;;  %9845 = vpow2.f32 %v2049_v16 }
 0x46f   : > { %v11083_v58 = vpop.f32.mrb[19].mxu0  ;;  %v11108_v28 = vmul.f32 0.9, %v10679_v18  ;;  %v11111_v3 = vmul.f32 0.5, %v10983_v41  ;;  %v11113_v63 = vadd.f32 1.0, %v1781_v21  ;;  %v11116_v5 = vmul.f32 0.5, %v10986_v61 }
 0x470   : > { %v9836_v52 = vpop.eup %9835  ;;  %v11119_v14 = vmul.f32 0.5, %v11003_v54  ;;  %9847 = vpow2.f32 %v2055_v13  ;;  %v1784_v17 = vmul.f32 0.3275911, %v1768_v35  ;;  %14980 = vst [vmem:[#allocation23_spill] sm:$0xff] %v11122_v12  ;;  %v11124_v18 = vmul.f32 0.5, %v1686_v31 }
 0x471   : > { %14978 = vst [vmem:[#allocation21_spill] sm:$0xff] %v11111_v3  ;;  %v9838_v32 = vpop.eup %9837  ;;  %9849 = vpow2.f32 %v2053_v36  ;;  %v2022_v41 = vsub.f32 0.0, %v1766_v39  ;;  %v1767_v21 = vand.u32 2147483647, %v11105_v4  ;;  %v1609_v61 = vadd.f32 %v11019_v23, %v10922_v22 }
 0x472   : > { %v11094_v37 = vpop.f32.mrb[20].mxu0  ;;  %14979 = vst [vmem:[#allocation22_spill] sm:$0xff] %v11119_v14  ;;  %14981 = vst [vmem:[#allocation24_spill] sm:$0xff] %v11124_v18  ;;  %9851 = vrcp.f32 %v11102_v51  ;;  %v1604_v54 = vadd.f32 %v11023_v60, %v10925_v42  ;;  %v1826_v16 = vmul.f32 %v9836_v52, %v11031_v38  ;;  %v2021_v30 = vsub.f32 0.0, %v1765_v56 }
 0x473   : > { %v11100_v10 = vpop.f32.mrb[21].mxu0  ;;  %9853 = vrcp.f32 %v11113_v63  ;;  %v1619_v31 = vadd.f32 %v11046_v62, %v10934_v55  ;;  %v11136_v13 = vadd.f32 1.0, %v1784_v17  ;;  %v11139_v36 = vadd.f32 %v10972_v59, %v1609_v61 }
 0x474   : > { %v11142_v20 = vadd.f32 %v10972_v59, %v1604_v54  ;;  %v1614_v22 = vadd.f32 %v11052_v44, %v10937_v43  ;;  %v1825_v42 = vmul.f32 %v9838_v32, %v11040_v27  ;;  %v2038_v23 = vmul.f32 %v2022_v41, %v1766_v39  ;;  %v9840_v55 = vpop.eup %9839 }
 0x475   : > { %14982 = vst [vmem:[#allocation25_spill] sm:$0xff] %v11139_v36  ;;  %v11148_v60 = vadd.f32 %v10972_v59, %v1619_v31  ;;  %v1629_v38 = vadd.f32 %v8691_v53, %v10946_v19  ;;  %v2024_v62 = vsub.f32 0.0, %v1768_v35  ;;  %v1783_v17 = vmul.f32 0.3275911, %v1767_v21  ;;  %v9842_v29 = vpop.eup %9841 }
 0x476   : > { %14983 = vst [vmem:[#allocation26_spill] sm:$0xff] %v11142_v20  ;;  %v1690_v61 = vadd.f32 %v1674_v49, %v11139_v36  ;;  %v1689_v54 = vadd.f32 %v11038_v1, %v11142_v20  ;;  %v11155_v18 = vmul.f32 0.5, %v11055_v47  ;;  %v2037_v43 = vmul.f32 %v2021_v30, %v1765_v56 }
 0x477   : > { %14984 = vst [vmem:[#allocation27_spill] sm:$0xff] %v11148_v60  ;;  %v2023_v27 = vsub.f32 0.0, %v1767_v21  ;;  %v1692_v44 = vadd.f32 %v1676_v46, %v11148_v60  ;;  %v11158_v39 = vpop.eup %9843  ;;  %v1842_v41 = vsub.f32 2.0, %v1826_v16  ;;  %9855 = vrcp.f32 %v11136_v13 }
 0x478   : > { %14985 = vst [vmem:[#allocation28_spill] sm:$0xff] %v11155_v18  ;;  %v11161_v19 = vmul.f32 0.70710677, %v1690_v61  ;;  %v11163_v53 = vmul.f32 0.70710677, %v1689_v54  ;;  %v11165_v49 = vpop.eup %9845  ;;  %v1841_v1 = vsub.f32 2.0, %v1825_v42  ;;  %v1828_v31 = vmul.f32 %v9840_v55, %v11073_v8 }
 0x479   : > { %v2059_v47 = vmul.f32 1.442695, %v2038_v23  ;;  %v11168_v20 = vmul.f32 0.70710677, %v1692_v44  ;;  %v1827_v46 = vmul.f32 %v9842_v29, %v11079_v11  ;;  %v2040_v30 = vmul.f32 %v2024_v62, %v1768_v35 }
 0x47a   : > { %v11170_v56 = vpop.eup %9847  ;;  %v11173_v16 = vadd.f32 1.0, %v1783_v17  ;;  %v1770_v60 = vand.u32 2147483647, %v11161_v19  ;;  %v2057_v18 = vmul.f32 1.442695, %v2037_v43  ;;  %v2039_v14 = vmul.f32 %v2023_v27, %v1767_v21 }
 0x47b   : > { %14986 = vst [vmem:[#allocation29_spill] sm:$0xff] %v11168_v20  ;;  %v11176_v36 = vpop.eup %9849  ;;  %v1769_v42 = vand.u32 2147483647, %v11163_v53  ;;  %v11180_v8 = vand.u32 2147483647, %v11168_v20  ;;  %v11182_v12 = vmul.f32 %v9836_v52, %v1842_v41  ;;  %v11185_v3 = vmul.f32 0.5, %v11061_v57 }
 0x47c   : > { %v9852_v23 = vpop.eup %9851  ;;  %v11188_v11 = vmul.f32 0.5, %v11086_v15  ;;  %v1786_v35 = vmul.f32 0.3275911, %v1770_v60  ;;  %v1844_v17 = vsub.f32 2.0, %v1828_v31  ;;  %9857 = vpow2.f32 %v2059_v47 }
 0x47d   : > { %14987 = vst [vmem:[#allocation30_spill] sm:$0xff] %v11185_v3  ;;  %v11190_v62 = vpop.eup %9853  ;;  %v1785_v21 = vmul.f32 0.3275911, %v1769_v42  ;;  %v1788_v43 = vmul.f32 0.3275911, %v11180_v8  ;;  %v11193_v27 = vmul.f32 %v9838_v32, %v1841_v1  ;;  %9859 = vrcp.f32 %v11173_v16 }
 0x47e   : > { %14988 = vst [vmem:[#allocation31_spill] sm:$0xff] %v11188_v11  ;;  %v2063_v20 = vmul.f32 1.442695, %v2040_v30  ;;  %v1802_v52 = vadd.f32 1.0, %v1786_v35  ;;  %v1843_v41 = vsub.f32 2.0, %v1827_v46  ;;  %9861 = vpow2.f32 %v2057_v18 }
 0x47f   : > { %v2061_v57 = vmul.f32 1.442695, %v2039_v14  ;;  %v1801_v3 = vadd.f32 1.0, %v1785_v21  ;;  %v1830_v15 = vmul.f32 %v9852_v23, %v11102_v51  ;;  %v11197_v11 = vadd.f32 1.0, %v1788_v43 }
 0x480   : > { %9863 = vrcp.f32 %v1802_v52  ;;  %v11200_v31 = vadd.f32 %v10972_v59, %v1614_v22  ;;  %v11202_v47 = vmul.f32 %v9840_v55, %v1844_v17  ;;  %v11206_v32 = vmul.f32 %v11190_v62, %v11113_v63 }
 0x481   : > { %9865 = vrcp.f32 %v1801_v3  ;;  %v11209_v1 = vadd.f32 %v10972_v59, %v1629_v38  ;;  %v9856_v14 = vpop.eup %9855  ;;  %v2026_v18 = vsub.f32 0.0, %v1770_v60  ;;  %v2025_v51 = vsub.f32 0.0, %v1769_v42 }
 0x482   : > { %14989 = vst [vmem:[#allocation32_spill] sm:$0xff] %v11200_v31  ;;  %9867 = vpow2.f32 %v2063_v20  ;;  %v1691_v46 = vadd.f32 %v11026_v0, %v11200_v31  ;;  %v11213_v30 = vmul.f32 %v9842_v29, %v1843_v41  ;;  %v11215_v22 = vmul.f32 0.5, %v1690_v61 }
 0x483   : > { %14990 = vst [vmem:[#allocation33_spill] sm:$0xff] %v11209_v1  ;;  %9869 = vpow2.f32 %v2061_v57  ;;  %v11219_v63 = vadd.f32 %v11098_v34, %v11209_v1  ;;  %v1846_v55 = vsub.f32 2.0, %v1830_v15  ;;  %v11221_v35 = vmul.f32 0.5, %v1689_v54 }
 0x484   : > { %14991 = vst [vmem:[#allocation34_spill] sm:$0xff] %v11215_v22  ;;  %9871 = vrcp.f32 %v11197_v11  ;;  %v11224_v20 = vmul.f32 0.70710677, %v1691_v46  ;;  %v1845_v38 = vsub.f32 2.0, %v11206_v32  ;;  %v1832_v0 = vmul.f32 %v9856_v14, %v11136_v13 }
 0x485   : > { %14992 = vst [vmem:[#allocation35_spill] sm:$0xff] %v11219_v63  ;;  %14993 = vst [vmem:[#allocation36_spill] sm:$0xff] %v11221_v35  ;;  %v11228_v29 = vmul.f32 0.5, %v1692_v44  ;;  %v11231_v61 = vmul.f32 0.70710677, %v11219_v63  ;;  %v2042_v17 = vmul.f32 %v2026_v18, %v1770_v60  ;;  %v2041_v21 = vmul.f32 %v2025_v51, %v1769_v42 }
 0x486   : > { %v1771_v34 = vand.u32 2147483647, %v11224_v20  ;;  %v1624_v54 = vadd.f32 %v11083_v58, %v10949_v26  ;;  %v11236_v43 = vpop.eup %9857  ;;  %v2028_v41 = vsub.f32 0.0, %v11180_v8  ;;  %v1639_v13 = vadd.f32 %v11094_v37, %v10958_v40 }
 0x487   : > { %14994 = vst [vmem:[#allocation37_spill] sm:$0xff] %v11228_v29  ;;  %14995 = vst [vmem:[#allocation38_spill] sm:$0xff] %v11231_v61  ;;  %v1774_v57 = vand.u32 2147483647, %v11231_v61  ;;  %v1634_v44 = vadd.f32 %v11100_v10, %v10961_v45  ;;  %v9860_v15 = vpop.eup %9859  ;;  %vm1729_vm10 = vcmp.lt.f32.partialorder %v10996_v48, 0.0  ;;  %v11245_v60 = vmul.f32 %v9852_v23, %v1846_v55 }
 0x488   : > { %v1787_v42 = vmul.f32 0.3275911, %v1771_v34  ;;  %v2027_v32 = vsub.f32 0.0, %v1771_v34  ;;  %v11248_v26 = vadd.f32 %v10972_v59, %v1624_v54  ;;  %v11250_v58 = vpop.eup %9861  ;;  %v1848_v18 = vsub.f32 2.0, %v1832_v0 }
 0x489   : > { %v1790_v51 = vmul.f32 0.3275911, %v1774_v57  ;;  %v2030_v1 = vsub.f32 0.0, %v1774_v57  ;;  %v11253_v40 = vadd.f32 %v10972_v59, %v1639_v13  ;;  %v2067_v45 = vmul.f32 1.442695, %v2042_v17 }
 0x48a   : > { %14996 = vst [vmem:[#allocation39_spill] sm:$0xff] %v11248_v26  ;;  %v9864_v37 = vpop.eup %9863  ;;  %v2065_v10 = vmul.f32 1.442695, %v2041_v21  ;;  %v1803_v31 = vadd.f32 1.0, %v1787_v42  ;;  %v11257_v23 = vadd.f32 %v11090_v50, %v11248_v26  ;;  %v1831_v54 = vmul.f32 %v9860_v15, %v11173_v16 }
 0x48b   : > { %14997 = vst [vmem:[#allocation40_spill] sm:$0xff] %v11253_v40  ;;  %v9866_v55 = vpop.eup %9865  ;;  %v2044_v63 = vmul.f32 %v2028_v41, %v11180_v8  ;;  %v11261_v29 = vadd.f32 1.0, %v1790_v51  ;;  %v11265_v0 = vadd.f32 %v11108_v28, %v11253_v40  ;;  %v1834_v17 = vmul.f32 %v9864_v37, %v1802_v52 }
 0x48c   : > { %14998 = vst [vmem:[#allocation41_spill] sm:$0xff] %v11257_v23  ;;  %v11267_v13 = vpop.eup %9867  ;;  %9873 = vrcp.f32 %v1803_v31  ;;  %v2043_v21 = vmul.f32 %v2027_v32, %v1771_v34  ;;  %v11270_v42 = vadd.f32 %v10972_v59, %v1634_v44  ;;  %v1833_v26 = vmul.f32 %v9866_v55, %v1801_v3 }
 0x48d   : > { %14999 = vst [vmem:[#allocation42_spill] sm:$0xff] %v11265_v0  ;;  %v11272_v50 = vpop.eup %9869  ;;  %9875 = vrcp.f32 %v11261_v29  ;;  %v2046_v16 = vmul.f32 %v2030_v1, %v1774_v57  ;;  %v11276_v8 = vmul.f32 0.70710677, %v11257_v23  ;;  %vm1730_vm11 = vcmp.lt.f32.partialorder %v10989_v7, 0.0 }
 0x48e   : > { %15000 = vst [vmem:[#allocation43_spill] sm:$0xff] %v11270_v42  ;;  %v9872_v41 = vpop.eup %9871  ;;  %v11280_v28 = vmul.f32 %v11190_v62, %v1845_v38  ;;  %v11282_v52 = vmul.f32 %v9856_v14, %v1848_v18  ;;  %9877 = vpow2.f32 %v2067_v45  ;;  %v11285_v59 = vmul.f32 0.70710677, %v11265_v0 }
 0x48f   : > { %vm1731_vm12 = vcmp.lt.f32.partialorder %v11014_v25, 0.0  ;;  %v1847_v3 = vsub.f32 2.0, %v1831_v54  ;;  %9879 = vpow2.f32 %v2065_v10  ;;  %v2071_v1 = vmul.f32 1.442695, %v2044_v63 }
 0x490   : > { %15001 = vst [vmem:[#allocation44_spill] sm:$0xff] %v11285_v59  ;;  %v11288_v34 = vmul.f32 0.5, %v1691_v46  ;;  %v1836_v57 = vmul.f32 %v9872_v41, %v11197_v11  ;;  %v2069_v44 = vmul.f32 1.442695, %v2043_v21  ;;  %v1773_v32 = vand.u32 2147483647, %v11276_v8 }
 0x491   : > { %v1776_v62 = vand.u32 2147483647, %v11285_v59  ;;  %v1850_v14 = vsub.f32 2.0, %v1834_v17  ;;  %v1849_v38 = vsub.f32 2.0, %v1833_v26  ;;  %v2075_v18 = vmul.f32 1.442695, %v2046_v16 }
 0x492   : > { %15002 = vst [vmem:[#allocation45_spill] sm:$0xff] %v11288_v34  ;;  %v11295_v51 = vadd.f32 %v11071_v24, %v11270_v42  ;;  %vm1732_vm13 = vcmp.lt.f32.partialorder %v11011_v9, 0.0  ;;  %v1789_v45 = vmul.f32 0.3275911, %v1773_v32  ;;  %v2029_v63 = vsub.f32 0.0, %v1773_v32 }
 0x493   : > { %v1792_v46 = vmul.f32 0.3275911, %v1776_v62  ;;  %v2032_v10 = vsub.f32 0.0, %v1776_v62  ;;  %v11298_v54 = vmul.f32 %v9860_v15, %v1847_v3  ;;  %9881 = vpow2.f32 %v2071_v1 }
 0x494   : > { %15003 = vst [vmem:[#allocation46_spill] sm:$0xff] %v11295_v51  ;;  %v11301_v11 = vmul.f32 0.70710677, %v11295_v51  ;;  %v14887_v21 = vmov 1.0   ;;  %v1852_v24 = vsub.f32 2.0, %v1836_v57  ;;  %9883 = vpow2.f32 %v2069_v44 }
 0x495   : > { %v11306_v26 = vsel %vm1729_vm10, -1.0, %v14887_v21  ;;  %v2045_v17 = vmul.f32 %v2029_v63, %v1773_v32  ;;  %v2048_v16 = vmul.f32 %v2032_v10, %v1776_v62  ;;  %v11308_v42 = vmul.f32 %v9864_v37, %v1850_v14 }
 0x496   : > { %15004 = vst [vmem:[#allocation47_spill] sm:$0xff] %v11301_v11  ;;  %v11310_v40 = vadd.f32 1.0, %v1789_v45  ;;  %v1775_v15 = vand.u32 2147483647, %v11301_v11  ;;  %v1873_v3 = vmul.f32 1.0614054, %v11193_v27  ;;  %v9874_v1 = vpop.eup %9873  ;;  %v11315_v0 = vmul.f32 %v9866_v55, %v1849_v38 }
 0x497   : > { %vm1733_vm14 = vcmp.lt.f32.partialorder %v11068_v33, 0.0  ;;  %9885 = vpow2.f32 %v2075_v18  ;;  %v11317_v48 = vadd.f32 1.0, %v1792_v46  ;;  %v1874_v57 = vmul.f32 1.0614054, %v11182_v12  ;;  %v9876_v44 = vpop.eup %9875 }
 0x498   : > { %vm1734_vm15 = vcmp.lt.f32.partialorder %v11058_v6, 0.0  ;;  %v1835_v37 = vmul.f32 %v9874_v1, %v1803_v31  ;;  %v2073_v32 = vmul.f32 1.442695, %v2045_v17  ;;  %v1791_v62 = vmul.f32 0.3275911, %v1775_v15  ;;  %v11321_v45 = vpop.eup %9877 }
 0x499   : > { %v2031_v14 = vsub.f32 0.0, %v1775_v15  ;;  %vm1735_vm0 = vcmp.lt.f32.partialorder %v11105_v4, 0.0  ;;  %v11324_v63 = vmul.f32 %v9872_v41, %v1852_v24  ;;  %v2079_v55 = vmul.f32 1.442695, %v2048_v16  ;;  %v11326_v46 = vpop.eup %9879 }
 0x49a   : > { %v1889_v38 = vadd.f32 -1.4531521, %v1873_v3  ;;  %v1890_v18 = vadd.f32 -1.4531521, %v1874_v57  ;;  %vm1736_vm1 = vcmp.lt.f32.partialorder %v11077_v2, 0.0  ;;  %v1851_v10 = vsub.f32 2.0, %v1835_v37 }
 0x49b   : > { %v1838_v21 = vmul.f32 %v9876_v44, %v11261_v29  ;;  %9887 = vrcp.f32 %v11310_v40  ;;  %v15005_v31 = vmov 1.0   ;;  %v11344_v29 = vadd.f32 1.0, %v1791_v62 }
 0x49c   : > { %v11334_v17 = vsel %vm1730_vm11, -1.0, %v15005_v31  ;;  %9889 = vrcp.f32 %v11317_v48  ;;  %v1905_v41 = vmul.f32 %v1889_v38, %v11193_v27  ;;  %v1906_v24 = vmul.f32 %v1890_v18, %v11182_v12 }
 0x49d   : > { %v11342_v16 = vsel %vm1731_vm12, -1.0, %v15005_v31  ;;  %9891 = vpow2.f32 %v2073_v32  ;;  %v2047_v3 = vmul.f32 %v2031_v14, %v1775_v15  ;;  %v1875_v57 = vmul.f32 1.0614054, %v11213_v30  ;;  %v11348_v59 = vpop.eup %9881 }
 0x49e   : > { %9893 = vpow2.f32 %v2079_v55  ;;  %v1921_v7 = vadd.f32 1.4214138, %v1905_v41  ;;  %v1922_v37 = vadd.f32 1.4214138, %v1906_v24  ;;  %v1876_v51 = vmul.f32 1.0614054, %v11202_v47  ;;  %v11357_v62 = vpop.eup %9883 }
 0x49f   : > { %v11350_v38 = vmul.f32 %v9874_v1, %v1851_v10  ;;  %v1854_v18 = vsub.f32 2.0, %v1838_v21  ;;  %v11355_v25 = vsel %vm1732_vm13, -1.0, %v15005_v31  ;;  %v1891_v32 = vadd.f32 -1.4531521, %v1875_v57 }
 0x4a0   : > { %v1937_v15 = vmul.f32 %v1921_v7, %v11193_v27  ;;  %v1938_v14 = vmul.f32 %v1922_v37, %v11182_v12  ;;  %v1892_v55 = vadd.f32 -1.4531521, %v1876_v51  ;;  %v1877_v41 = vmul.f32 1.0614054, %v11280_v28 }
 0x4a1   : > { %9895 = vrcp.f32 %v11344_v29  ;;  %v2077_v1 = vmul.f32 1.442695, %v2047_v3  ;;  %v1907_v21 = vmul.f32 %v1891_v32, %v11213_v30  ;;  %v1878_v10 = vmul.f32 1.0614054, %v11245_v60  ;;  %v11365_v9 = vpop.eup %9885 }
 0x4a2   : > { %15006 = vst [vmem:[#allocation48_spill] sm:$0xff] %v11365_v9  ;;  %v1953_v24 = vadd.f32 -0.28449672, %v1937_v15  ;;  %v1954_v57 = vadd.f32 -0.28449672, %v1938_v14  ;;  %v1908_v11 = vmul.f32 %v1892_v55, %v11202_v47  ;;  %v11368_v7 = vmul.f32 %v9876_v44, %v1854_v18 }
 0x4a3   : > { %v1893_v23 = vadd.f32 -1.4531521, %v1877_v41  ;;  %v1923_v37 = vadd.f32 1.4214138, %v1907_v21  ;;  %v11373_v51 = vsel %vm1733_vm14, -1.0, %v15005_v31  ;;  %v11380_v15 = vsel %vm1734_vm15, -1.0, %v15005_v31 }
 0x4a4   : > { %v1894_v3 = vadd.f32 -1.4531521, %v1878_v10  ;;  %v1969_v32 = vmul.f32 %v1953_v24, %v11193_v27  ;;  %v1970_v34 = vmul.f32 %v1954_v57, %v11182_v12  ;;  %v1924_v61 = vadd.f32 1.4214138, %v1908_v11 }
 0x4a5   : > { %v11382_v14 = vpop.eup %9887  ;;  %v1939_v44 = vmul.f32 %v1923_v37, %v11213_v30  ;;  %v1909_v18 = vmul.f32 %v1893_v23, %v11280_v28  ;;  %v11390_v55 = vsel %vm1735_vm0, -1.0, %v15005_v31  ;;  %v11398_v10 = vsel %vm1736_vm1, -1.0, %v15005_v31 }
 0x4a6   : > { %v1910_v33 = vmul.f32 %v1894_v3, %v11245_v60  ;;  %v11392_v41 = vpop.eup %9889  ;;  %v1985_v11 = vadd.f32 0.2548296, %v1969_v32  ;;  %v1986_v21 = vadd.f32 0.2548296, %v1970_v34  ;;  %v1940_v6 = vmul.f32 %v1924_v61, %v11202_v47 }
 0x4a7   : > { %v11400_v24 = vpop.eup %9891  ;;  %9897 = vpow2.f32 %v2077_v1  ;;  %v1955_v23 = vadd.f32 -0.28449672, %v1939_v44  ;;  %v1925_v57 = vadd.f32 1.4214138, %v1909_v18  ;;  %v1837_v3 = vmul.f32 %v11382_v14, %v11310_v40 }
 0x4a8   : > { %15007 = vst [vmem:[#allocation49_spill] sm:$0xff] %v11400_v24  ;;  %v1926_v37 = vadd.f32 1.4214138, %v1910_v33  ;;  %v11402_v4 = vpop.eup %9893  ;;  %v2001_v34 = vmul.f32 %v1985_v11, %v11193_v27  ;;  %v2002_v61 = vmul.f32 %v1986_v21, %v11182_v12  ;;  %v1879_v32 = vmul.f32 1.0614054, %v11298_v54 }
 0x4a9   : > { %15008 = vst [vmem:[#allocation50_spill] sm:$0xff] %v11402_v4  ;;  %v1956_v2 = vadd.f32 -0.28449672, %v1940_v6  ;;  %v1971_v9 = vmul.f32 %v1955_v23, %v11213_v30  ;;  %v1941_v24 = vmul.f32 %v1925_v57, %v11280_v28  ;;  %v11414_v44 = vmul.f32 %v11392_v41, %v11317_v48 }
 0x4aa   : > { %v1942_v1 = vmul.f32 %v1926_v37, %v11245_v60  ;;  %v2081_v18 = vmul.f32 %v11165_v49, %v2001_v34  ;;  %v2082_v40 = vmul.f32 %v11158_v39, %v2002_v61  ;;  %v1880_v27 = vmul.f32 1.0614054, %v11282_v52 }
 0x4ab   : > { %v11419_v12 = vpop.eup %9895  ;;  %v1972_v33 = vmul.f32 %v1956_v2, %v11202_v47  ;;  %v1987_v11 = vadd.f32 0.2548296, %v1971_v9  ;;  %v1957_v21 = vadd.f32 -0.28449672, %v1941_v24  ;;  %v1853_v23 = vsub.f32 2.0, %v1837_v3 }
 0x4ac   : > { %v1958_v6 = vadd.f32 -0.28449672, %v1942_v1  ;;  %v2097_v57 = vsub.f32 1.0, %v2081_v18  ;;  %v2098_v37 = vsub.f32 1.0, %v2082_v40  ;;  %v1895_v4 = vadd.f32 -1.4531521, %v1879_v32 }
 0x4ad   : > { %v1988_v22 = vadd.f32 0.2548296, %v1972_v33  ;;  %v2003_v48 = vmul.f32 %v1987_v11, %v11213_v30  ;;  %v1973_v49 = vmul.f32 %v1957_v21, %v11280_v28  ;;  %v1896_v35 = vadd.f32 -1.4531521, %v1880_v27 }
 0x4ae   : > { %v1974_v39 = vmul.f32 %v1958_v6, %v11245_v60  ;;  %v2113_v34 = vmul.f32 %v2097_v57, %v11306_v26  ;;  %v2114_v61 = vmul.f32 %v2098_v37, %v11334_v17  ;;  %v1911_v9 = vmul.f32 %v1895_v4, %v11298_v54 }
 0x4af   : > { %v2004_v24 = vmul.f32 %v1988_v22, %v11202_v47  ;;  %v2083_v3 = vmul.f32 %v11176_v36, %v2003_v48  ;;  %v1989_v2 = vadd.f32 0.2548296, %v1973_v49  ;;  %v1912_v30 = vmul.f32 %v1896_v35, %v11282_v52  ;;  %v15009_v36 = vld [vmem:[#allocation21_spill] sm:$0xff] }
 0x4b0   : > { %v1990_v32 = vadd.f32 0.2548296, %v1974_v39  ;;  %v2129_v1 = vadd.f32 1.0, %v2113_v34  ;;  %v2130_v18 = vadd.f32 1.0, %v2114_v61  ;;  %v1927_v40 = vadd.f32 1.4214138, %v1911_v9 }
 0x4b1   : > { %v11431_v33 = vpop.eup %9897  ;;  %v2084_v26 = vmul.f32 %v11170_v56, %v2004_v24  ;;  %v2099_v11 = vsub.f32 1.0, %v2083_v3  ;;  %v2005_v17 = vmul.f32 %v1989_v2, %v11280_v28  ;;  %v1928_v27 = vadd.f32 1.4214138, %v1912_v30  ;;  %v15010_v9 = vld [vmem:[#allocation23_spill] sm:$0xff] }
 0x4b2   : > { %v2006_v4 = vmul.f32 %v1990_v32, %v11245_v60  ;;  %v11437_v47 = vmul.f32 %v2129_v1, %v11116_v5  ;;  %v11440_v22 = vmul.f32 %v2130_v18, %v15009_v36  ;;  %v1943_v21 = vmul.f32 %v1927_v40, %v11298_v54  ;;  %v15011_v18 = vld [vmem:[#allocation22_spill] sm:$0xff] }
 0x4b3   : > { %v2100_v35 = vsub.f32 1.0, %v2084_v26  ;;  %v2115_v6 = vmul.f32 %v2099_v11, %v11342_v16  ;;  %v2085_v57 = vmul.f32 %v11250_v58, %v2005_v17  ;;  %vm1738_vm2 = vcmp.lt.f32.partialorder %v11161_v19, 0.0 }
 0x4b4   : > { %v2086_v56 = vmul.f32 %v11236_v43, %v2006_v4  ;;  %vm1737_vm3 = vcmp.lt.f32.partialorder %v11163_v53, 0.0  ;;  %v1856_v5 = vsub.f32 2.0, %v11414_v44  ;;  %v9184_v60 = vpack.c.bf16 %v11440_v22, %v11437_v47 }
 0x4b5   : > { %v1944_v28 = vmul.f32 %v1928_v27, %v11282_v52  ;;  %v1959_v37 = vadd.f32 -0.28449672, %v1943_v21  ;;  %v2116_v48 = vmul.f32 %v2100_v35, %v11355_v25  ;;  %v2131_v49 = vadd.f32 1.0, %v2115_v6  ;;  %v15013_v21 = vld [vmem:[#allocation24_spill] sm:$0xff] }
 0x4b6   : > { %v2101_v16 = vsub.f32 1.0, %v2085_v57  ;;  %v2102_v39 = vsub.f32 1.0, %v2086_v56  ;;  %v11454_v58 = vmul.f32 %v11382_v14, %v1853_v23  ;;  %9185 = vmatprep.subr.bf16.mxu0 %v9184_v60  ;;  %v1881_v44 = vmul.f32 1.0614054, %v11315_v0 }
 0x4b7   : > { %v1960_v43 = vadd.f32 -0.28449672, %v1944_v28  ;;  %v1975_v34 = vmul.f32 %v1959_v37, %v11298_v54  ;;  %9187 = vmatpush3.bf16.msra.mxu0 %v9184_v60  ;;  %v2132_v61 = vadd.f32 1.0, %v2116_v48  ;;  %v11459_v24 = vmul.f32 %v2131_v49, %v15010_v9 }
 0x4b8   : > { %v2117_v3 = vmul.f32 %v2101_v16, %v11373_v51  ;;  %v2118_v25 = vmul.f32 %v2102_v39, %v11380_v15  ;;  %v1882_v14 = vmul.f32 1.0614054, %v11308_v42  ;;  %v1897_v23 = vadd.f32 -1.4531521, %v1881_v44 }
 0x4b9   : > { %v1976_v2 = vmul.f32 %v1960_v43, %v11282_v52  ;;  %v1991_v32 = vadd.f32 0.2548296, %v1975_v34  ;;  %v1839_v1 = vmul.f32 %v11419_v12, %v11344_v29  ;;  %v11468_v30 = vmul.f32 %v2132_v61, %v15011_v18  ;;  %v15012_v29 = vld [vmem:[#allocation28_spill] sm:$0xff] }
 0x4ba   : > { %v2133_v40 = vadd.f32 1.0, %v2117_v3  ;;  %v2134_v26 = vadd.f32 1.0, %v2118_v25  ;;  %v1898_v51 = vadd.f32 -1.4531521, %v1882_v14  ;;  %v1913_v15 = vmul.f32 %v1897_v23, %v11315_v0 }
 0x4bb   : > { %v1992_v11 = vadd.f32 0.2548296, %v1976_v2  ;;  %v2007_v17 = vmul.f32 %v1991_v32, %v11298_v54  ;;  %vm1739_vm4 = vcmp.lt.f32.partialorder %v11224_v20, 0.0  ;;  %v11474_v4 = vmul.f32 %v11392_v41, %v1856_v5 }
 0x4bc   : > { %v9188_v36 = vpack.c.bf16 %v11468_v30, %v11459_v24  ;;  %v11479_v27 = vmul.f32 %v2133_v40, %v15012_v29  ;;  %v11482_v35 = vmul.f32 %v2134_v26, %v15013_v21  ;;  %v1914_v57 = vmul.f32 %v1898_v51, %v11308_v42  ;;  %v15014_v26 = vld [vmem:[#allocation31_spill] sm:$0xff]  ;;  %v15015_v21 = vld [vmem:[#allocation30_spill] sm:$0xff] }
 0x4bd   : > { %v2008_v6 = vmul.f32 %v1992_v11, %v11282_v52  ;;  %v2087_v54 = vmul.f32 %v11272_v50, %v2007_v17  ;;  %v1929_v56 = vadd.f32 1.4214138, %v1913_v15  ;;  %v1855_v60 = vsub.f32 2.0, %v1839_v1 }
 0x4be   : > { %9189 = vmatprep.subr.bf16.mxu0 %v9188_v36  ;;  %v9192_v41 = vpack.c.bf16 %v11482_v35, %v11479_v27  ;;  %v1883_v5 = vmul.f32 1.0614054, %v11350_v38  ;;  %v1884_v28 = vmul.f32 1.0614054, %v11324_v63  ;;  %v1930_v49 = vadd.f32 1.4214138, %v1914_v57 }
 0x4bf   : > { %9191 = vmatpush3.bf16.msra.mxu0 %v9188_v36  ;;  %v2088_v37 = vmul.f32 %v11267_v13, %v2008_v6  ;;  %v2103_v48 = vsub.f32 1.0, %v2087_v54  ;;  %v1945_v52 = vmul.f32 %v1929_v56, %v11315_v0  ;;  %v1753_v50 = vsel %vm1737_vm3, -1.0, %v15005_v31  ;;  %v15016_v56 = vld [vmem:[#allocation29_spill] sm:$0xff] }
 0x4c0   : > { %9193 = vmatprep.subr.bf16.mxu0 %v9192_v41  ;;  %v11499_v16 = vsel %vm1738_vm2, -1.0, %v15005_v31  ;;  %v1899_v39 = vadd.f32 -1.4531521, %v1883_v5  ;;  %v1900_v43 = vadd.f32 -1.4531521, %v1884_v28  ;;  %v1946_v13 = vmul.f32 %v1930_v49, %v11308_v42 }
 0x4c1   : > { %v2104_v34 = vsub.f32 1.0, %v2088_v37  ;;  %v2119_v44 = vmul.f32 %v2103_v48, %v11390_v55  ;;  %v1961_v61 = vadd.f32 -0.28449672, %v1945_v52  ;;  %v1885_v53 = vmul.f32 1.0614054, %v11454_v58 }
 0x4c2   : > { %v1915_v9 = vmul.f32 %v1899_v39, %v11350_v38  ;;  %v1916_v3 = vmul.f32 %v1900_v43, %v11324_v63  ;;  %v1886_v25 = vmul.f32 1.0614054, %v11368_v7  ;;  %v1962_v32 = vadd.f32 -0.28449672, %v1946_v13 }
 0x4c3   : > { %9195 = vmatpush3.bf16.msra.mxu0 %v9192_v41  ;;  %v2120_v19 = vmul.f32 %v2104_v34, %v11398_v10  ;;  %v2135_v2 = vadd.f32 1.0, %v2119_v44  ;;  %v1977_v14 = vmul.f32 %v1961_v61, %v11315_v0  ;;  %v11510_v55 = vmul.f32 %v11419_v12, %v1855_v60 }
 0x4c4   : > { %v1931_v23 = vadd.f32 1.4214138, %v1915_v9  ;;  %v1932_v1 = vadd.f32 1.4214138, %v1916_v3  ;;  %v1901_v18 = vadd.f32 -1.4531521, %v1885_v53  ;;  %v1978_v17 = vmul.f32 %v1962_v32, %v11308_v42 }
 0x4c5   : > { %v2136_v40 = vadd.f32 1.0, %v2120_v19  ;;  %v11513_v11 = vmul.f32 %v2135_v2, %v15014_v26  ;;  %v1993_v51 = vadd.f32 0.2548296, %v1977_v14  ;;  %v1902_v36 = vadd.f32 -1.4531521, %v1886_v25 }
 0x4c6   : > { %v1947_v15 = vmul.f32 %v1931_v23, %v11350_v38  ;;  %v1948_v10 = vmul.f32 %v1932_v1, %v11324_v63  ;;  %v1917_v29 = vmul.f32 %v1901_v18, %v11454_v58  ;;  %v1994_v6 = vadd.f32 0.2548296, %v1978_v17 }
 0x4c7   : > { %v11520_v12 = vmul.f32 %v2136_v40, %v15015_v21  ;;  %v2009_v54 = vmul.f32 %v1993_v51, %v11315_v0  ;;  %v1755_v57 = vsel %vm1739_vm4, -1.0, %v15005_v31  ;;  %vm1740_vm6 = vcmp.lt.f32.partialorder %v15016_v56, 0.0 }
 0x4c8   : > { %v1963_v60 = vadd.f32 -0.28449672, %v1947_v15  ;;  %v1964_v41 = vadd.f32 -0.28449672, %v1948_v10  ;;  %v1918_v5 = vmul.f32 %v1902_v36, %v11368_v7  ;;  %v1933_v28 = vadd.f32 1.4214138, %v1917_v29 }
 0x4c9   : > { %v9196_v37 = vpack.c.bf16 %v11520_v12, %v11513_v11  ;;  %v2010_v48 = vmul.f32 %v1994_v6, %v11308_v42  ;;  %v2089_v49 = vmul.f32 %v11326_v46, %v2009_v54  ;;  %v1887_v0 = vmul.f32 1.0614054, %v11510_v55 }
 0x4ca   : > { %v1979_v52 = vmul.f32 %v1963_v60, %v11350_v38  ;;  %v1980_v20 = vmul.f32 %v1964_v41, %v11324_v63  ;;  %v1934_v39 = vadd.f32 1.4214138, %v1918_v5  ;;  %v1949_v43 = vmul.f32 %v1933_v28, %v11454_v58  ;;  %v15018_v60 = vld [vmem:[#allocation34_spill] sm:$0xff] }
 0x4cb   : > { %9197 = vmatprep.subr.bf16.mxu0 %v9196_v37  ;;  %v2090_v34 = vmul.f32 %v11321_v45, %v2010_v48  ;;  %v2105_v44 = vsub.f32 1.0, %v2089_v49  ;;  %v1888_v13 = vmul.f32 1.0614054, %v11474_v4  ;;  %v1903_v61 = vadd.f32 -1.4531521, %v1887_v0  ;;  %v15019_v49 = vld [vmem:[#allocation49_spill] sm:$0xff] }
 0x4cc   : > { %vm1741_vm10 = vcmp.lt.f32.partialorder %v11276_v8, 0.0  ;;  %9199 = vmatpush3.bf16.msra.mxu0 %v9196_v37  ;;  %v1995_v42 = vadd.f32 0.2548296, %v1979_v52  ;;  %v1996_v46 = vadd.f32 0.2548296, %v1980_v20  ;;  %v1950_v9 = vmul.f32 %v1934_v39, %v11368_v7  ;;  %v15020_v52 = vld [vmem:[#allocation38_spill] sm:$0xff] }
 0x4cd   : > { %v1965_v3 = vadd.f32 -0.28449672, %v1949_v43  ;;  %v2106_v53 = vsub.f32 1.0, %v2090_v34  ;;  %v2121_v25 = vmul.f32 %v2105_v44, %v1753_v50  ;;  %v1904_v19 = vadd.f32 -1.4531521, %v1888_v13  ;;  %v15021_v34 = vld [vmem:[#allocation48_spill] sm:$0xff] }
 0x4ce   : > { %v1919_v2 = vmul.f32 %v1903_v61, %v11510_v55  ;;  %v2011_v32 = vmul.f32 %v1995_v42, %v11350_v38  ;;  %v2012_v45 = vmul.f32 %v1996_v46, %v11324_v63  ;;  %v1966_v14 = vadd.f32 -0.28449672, %v1950_v9  ;;  %v15017_v38 = vld [vmem:[#allocation36_spill] sm:$0xff]  ;;  %v15022_v42 = vld [vmem:[#allocation45_spill] sm:$0xff] }
 0x4cf   : > { %v1981_v23 = vmul.f32 %v1965_v3, %v11454_v58  ;;  %v2122_v1 = vmul.f32 %v2106_v53, %v11499_v16  ;;  %v2137_v18 = vadd.f32 1.0, %v2121_v25  ;;  %v1920_v40 = vmul.f32 %v1904_v19, %v11474_v4  ;;  %v15023_v9 = vld [vmem:[#allocation37_spill] sm:$0xff] }
 0x4d0   : > { %v1935_v26 = vadd.f32 1.4214138, %v1919_v2  ;;  %v2091_v17 = vmul.f32 %v11357_v62, %v2011_v32  ;;  %v2092_v50 = vmul.f32 %v11348_v59, %v2012_v45  ;;  %v1982_v51 = vmul.f32 %v1966_v14, %v11368_v7  ;;  %v15024_v32 = vld [vmem:[#allocation41_spill] sm:$0xff] }
 0x4d1   : > { %v1997_v15 = vadd.f32 0.2548296, %v1981_v23  ;;  %v2138_v10 = vadd.f32 1.0, %v2122_v1  ;;  %v11550_v36 = vmul.f32 %v2137_v18, %v15017_v38  ;;  %v1936_v63 = vadd.f32 1.4214138, %v1920_v40  ;;  %v15025_v18 = vld [vmem:[#allocation47_spill] sm:$0xff] }
 0x4d2   : > { %v1951_v29 = vmul.f32 %v1935_v26, %v11510_v55  ;;  %v2107_v21 = vsub.f32 1.0, %v2091_v17  ;;  %v2108_v16 = vsub.f32 1.0, %v2092_v50  ;;  %v1998_v6 = vadd.f32 0.2548296, %v1982_v51  ;;  %v15026_v17 = vld [vmem:[#allocation35_spill] sm:$0xff] }
 0x4d3   : > { %v2013_v54 = vmul.f32 %v1997_v15, %v11454_v58  ;;  %v11555_v41 = vmul.f32 %v2138_v10, %v15018_v60  ;;  %v1756_v59 = vsel %vm1740_vm6, -1.0, %v15005_v31  ;;  %v1952_v62 = vmul.f32 %v1936_v63, %v11474_v4  ;;  %v15028_v10 = vld [vmem:[#allocation50_spill] sm:$0xff] }
 0x4d4   : > { %v1967_v5 = vadd.f32 -0.28449672, %v1951_v29  ;;  %v2123_v28 = vmul.f32 %v2107_v21, %v1755_v57  ;;  %v2124_v37 = vmul.f32 %v2108_v16, %v1756_v59  ;;  %v2014_v48 = vmul.f32 %v1998_v6, %v11368_v7 }
 0x4d5   : > { %v2093_v0 = vmul.f32 %v15019_v49, %v2013_v54  ;;  %vm1742_vm11 = vcmp.lt.f32.partialorder %v15020_v52, 0.0  ;;  %v9200_v58 = vpack.c.bf16 %v11555_v41, %v11550_v36  ;;  %v1968_v20 = vadd.f32 -0.28449672, %v1952_v62  ;;  %v15029_v54 = vld [vmem:[#allocation46_spill] sm:$0xff] }
 0x4d6   : > { %v1983_v39 = vmul.f32 %v1967_v5, %v11510_v55  ;;  %v2139_v43 = vadd.f32 1.0, %v2123_v28  ;;  %v2140_v56 = vadd.f32 1.0, %v2124_v37  ;;  %v2094_v44 = vmul.f32 %v15021_v34, %v2014_v48  ;;  %v15030_v5 = vld [vmem:[#allocation42_spill] sm:$0xff] }
 0x4d7   : > { %v2109_v13 = vsub.f32 1.0, %v2093_v0  ;;  %9201 = vmatprep.subr.bf16.mxu0 %v9200_v58  ;;  %v1757_v7 = vsel %vm1741_vm10, -1.0, %v15005_v31  ;;  %v1984_v57 = vmul.f32 %v1968_v20, %v11474_v4  ;;  %v1758_v19 = vsel %vm1742_vm11, -1.0, %v15005_v31  ;;  %v10219_v52 = vld [vmem:[%s14839_s1 + $0x8] sm:$0xff] }
 0x4d8   : > { %v1999_v61 = vadd.f32 0.2548296, %v1983_v39  ;;  %9203 = vmatpush3.bf16.msra.mxu0 %v9200_v58  ;;  %v11573_v46 = vmul.f32 %v2139_v43, %v15022_v42  ;;  %v11576_v3 = vmul.f32 %v2140_v56, %v15023_v9  ;;  %v2110_v53 = vsub.f32 1.0, %v2094_v44  ;;  %v2316_v58 = vld [vmem:[#allocation5 + $0x180] sm:$0xff]  ;;  %v2317_v20 = vld [vmem:[#allocation5 + $0x188] sm:$0xff]  ;;  %v2318_v42 = vld [vmem:[#allocation5 + $0x190] sm:$0xff] }
 0x4d9   : > { %v2125_v25 = vmul.f32 %v2109_v13, %v1757_v7  ;;  %v2000_v2 = vadd.f32 0.2548296, %v1984_v57  ;;  %v1709_v45 = vmul.f32 0.5, %v15024_v32  ;;  %vm1743_vm12 = vcmp.lt.f32.partialorder %v15025_v18, 0.0  ;;  %v2283_v39 = vld [vmem:[#allocation3 + $0x180] sm:$0xff]  ;;  %v2284_v56 = vld [vmem:[#allocation3 + $0x188] sm:$0xff] }
 0x4da   : > { %v2015_v8 = vmul.f32 %v1999_v61, %v11510_v55  ;;  %v9204_v14 = vpack.c.bf16 %v11576_v3, %v11573_v46  ;;  %v2126_v23 = vmul.f32 %v2110_v53, %v1758_v19  ;;  %v1710_v50 = vmul.f32 0.5, %v15026_v17  ;;  %v15027_v55 = vld [vmem:[#allocation44_spill] sm:$0xff]  ;;  %v2300_v34 = vld [vmem:[#allocation5 + $0x100] sm:$0xff]  ;;  %v2301_v44 = vld [vmem:[#allocation5 + $0x108] sm:$0xff] }
 0x4db   : > { %v2141_v1 = vadd.f32 1.0, %v2125_v25  ;;  %v2016_v40 = vmul.f32 %v2000_v2, %v11474_v4  ;;  %vm1744_vm13 = vcmp.lt.f32.partialorder %v15027_v55, 0.0  ;;  %v1759_v21 = vsel %vm1743_vm12, -1.0, %v15005_v31  ;;  %v2267_v57 = vld [vmem:[#allocation3 + $0x100] sm:$0xff]  ;;  %v2268_v61 = vld [vmem:[#allocation3 + $0x108] sm:$0xff]  ;;  %v2319_v53 = vld [vmem:[#allocation5 + $0x198] sm:$0xff] }
 0x4dc   : > { %v2095_v26 = vmul.f32 %v11431_v33, %v2015_v8  ;;  %9205 = vmatprep.subr.bf16.mxu0 %v9204_v14  ;;  %v2142_v51 = vadd.f32 1.0, %v2126_v23  ;;  %v1760_v6 = vsel %vm1744_vm13, -1.0, %v15005_v31  ;;  %v1711_v60 = vmul.f32 0.5, %v15029_v54  ;;  %v2285_v25 = vld [vmem:[#allocation3 + $0x190] sm:$0xff]  ;;  %v2286_v19 = vld [vmem:[#allocation3 + $0x198] sm:$0xff]  ;;  %v2320_v18 = vld [vmem:[#allocation5 + $0x1a0] sm:$0xff] }
 0x4dd   : > { %v11589_v15 = vmul.f32 %v2141_v1, %v1709_v45  ;;  %9207 = vmatpush3.bf16.msra.mxu0 %v9204_v14  ;;  %v2096_v38 = vmul.f32 %v15028_v10, %v2016_v40  ;;  %v1712_v28 = vmul.f32 0.5, %v15030_v5  ;;  %v11610_v43 = vpack.c.bf16 %v2317_v20, %v2316_v58  ;;  %v2302_v32 = vld [vmem:[#allocation5 + $0x110] sm:$0xff]  ;;  %v2303_v45 = vld [vmem:[#allocation5 + $0x118] sm:$0xff]  ;;  %v2321_v40 = vld [vmem:[#allocation5 + $0x1a8] sm:$0xff] }
 0x4de   : > { %v2111_v63 = vsub.f32 1.0, %v2095_v26  ;;  %v11593_v29 = vmul.f32 %v2142_v51, %v1710_v50  ;;  %v11612_v13 = vpack.c.bf16 %v2284_v56, %v2283_v39  ;;  %v11614_v7 = vpack.c.bf16 %v2301_v44, %v2300_v34  ;;  %v2269_v14 = vld [vmem:[#allocation3 + $0x110] sm:$0xff]  ;;  %v2270_v1 = vld [vmem:[#allocation3 + $0x118] sm:$0xff]  ;;  %v2287_v50 = vld [vmem:[#allocation3 + $0x1a0] sm:$0xff] }
 0x4df   : > { %v2112_v16 = vsub.f32 1.0, %v2096_v38  ;;  %v11617_v9 = vpack.c.bf16 %v2268_v61, %v2267_v57  ;;  %v11621_v2 = vpack.c.bf16 %v2319_v53, %v2318_v42  ;;  %v11623_v8 = vpack.c.bf16 %v2286_v19, %v2285_v25  ;;  %v2288_v51 = vld [vmem:[#allocation3 + $0x1a8] sm:$0xff]  ;;  %v2304_v55 = vld [vmem:[#allocation5 + $0x120] sm:$0xff]  ;;  %v2307_v5 = vld [vmem:[#allocation5 + $0x138] sm:$0xff] }
 0x4e0   : > { %v2127_v4 = vmul.f32 %v2111_v63, %v1759_v21  ;;  %v9208_v33 = vpack.c.bf16 %v11593_v29, %v11589_v15  ;;  %9217 = vmatprep.subr.bf16.mxu1 %v11612_v13  ;;  %v11626_v23 = vpack.c.bf16 %v2303_v45, %v2302_v32  ;;  %v11630_v26 = vpack.c.bf16 %v2270_v1, %v2269_v14  ;;  %v2305_v38 = vld [vmem:[#allocation5 + $0x128] sm:$0xff]  ;;  %v2271_v63 = vld [vmem:[#allocation3 + $0x120] sm:$0xff]  ;;  %v2326_v19 = vld [vmem:[#allocation5 + $0x1d0] sm:$0xff] }
 0x4e1   : > { %v2128_v59 = vmul.f32 %v2112_v16, %v1760_v6  ;;  %9219 = vmatpush3.bf16.msra.mxu1 %v11617_v9  ;;  %v11632_v17 = vpack.c.bf16 %v2321_v40, %v2320_v18  ;;  %v11634_v10 = vpack.c.bf16 %v2288_v51, %v2287_v50  ;;  %v2272_v21 = vld [vmem:[#allocation3 + $0x128] sm:$0xff]  ;;  %v11637_v16 = vpack.c.bf16 %v2305_v38, %v2304_v55  ;;  %v2289_v6 = vld [vmem:[#allocation3 + $0x1b0] sm:$0xff]  ;;  %v2291_v20 = vld [vmem:[#allocation3 + $0x1c0] sm:$0xff] }
 0x4e2   : > { %v2143_v62 = vadd.f32 1.0, %v2127_v4  ;;  %9209 = vmatprep.subr.bf16.mxu0 %v9208_v33  ;;  %9221 = vmatprep.subr.bf16.mxu1 %v11623_v8  ;;  %v2322_v4 = vld [vmem:[#allocation5 + $0x1b0] sm:$0xff]  ;;  %v11641_v54 = vpack.c.bf16 %v2272_v21, %v2271_v63  ;;  %v2325_v58 = vld [vmem:[#allocation5 + $0x1c8] sm:$0xff]  ;;  %v2308_v57 = vld [vmem:[#allocation5 + $0x140] sm:$0xff] }
 0x4e3   : > { %9211 = vmatpush3.bf16.msra.mxu0 %v9208_v33  ;;  %v2144_v37 = vadd.f32 1.0, %v2128_v59  ;;  %v2323_v33 = vld [vmem:[#allocation5 + $0x1b8] sm:$0xff]  ;;  %v2292_v39 = vld [vmem:[#allocation3 + $0x1c8] sm:$0xff]  ;;  %v2275_v42 = vld [vmem:[#allocation3 + $0x140] sm:$0xff] }
 0x4e4   : > { %v11601_v48 = vmul.f32 %v2143_v62, %v1711_v60  ;;  %v11643_v60 = vpack.c.bf16 %v2323_v33, %v2322_v4  ;;  %v2290_v59 = vld [vmem:[#allocation3 + $0x1b8] sm:$0xff]  ;;  %v2306_v62 = vld [vmem:[#allocation5 + $0x130] sm:$0xff]  ;;  %v2309_v61 = vld [vmem:[#allocation5 + $0x148] sm:$0xff]  ;;  %v11658_v53 = vpack.c.bf16 %v2292_v39, %v2291_v20 }
 0x4e5   : > { %v11603_v49 = vmul.f32 %v2144_v37, %v1712_v28  ;;  %9223 = vmatpush3.bf16.msra.mxu1 %v11630_v26  ;;  %v11646_v28 = vpack.c.bf16 %v2290_v59, %v2289_v6  ;;  %v2273_v37 = vld [vmem:[#allocation3 + $0x130] sm:$0xff]  ;;  %v11649_v56 = vpack.c.bf16 %v2307_v5, %v2306_v62  ;;  %v2276_v25 = vld [vmem:[#allocation3 + $0x148] sm:$0xff]  ;;  %v2327_v32 = vld [vmem:[#allocation5 + $0x1d8] sm:$0xff]  ;;  %v11661_v45 = vpack.c.bf16 %v2309_v61, %v2308_v57 }
 0x4e6   : > { %9225 = vmatprep.subr.bf16.mxu1 %v11634_v10  ;;  %v11665_v14 = vpack.c.bf16 %v2276_v25, %v2275_v42  ;;  %v11667_v1 = vpack.c.bf16 %v2327_v32, %v2326_v19  ;;  %v2293_v18 = vld [vmem:[#allocation3 + $0x1d0] sm:$0xff]  ;;  %v2294_v40 = vld [vmem:[#allocation3 + $0x1d8] sm:$0xff]  ;;  %v2328_v33 = vld [vmem:[#allocation5 + $0x1e0] sm:$0xff] }
 0x4e7   : > { %15031 = vst [vmem:[#allocation21_spill] sm:$0xff] %v11603_v49  ;;  %v9212_v0 = vpack.c.bf16 %v11603_v49, %v11601_v48  ;;  %v2310_v50 = vld [vmem:[#allocation5 + $0x150] sm:$0xff]  ;;  %v11673_v51 = vpack.c.bf16 %v2294_v40, %v2293_v18  ;;  %v2311_v55 = vld [vmem:[#allocation5 + $0x158] sm:$0xff]  ;;  %v2329_v6 = vld [vmem:[#allocation5 + $0x1e8] sm:$0xff] }
 0x4e8   : > { %v2277_v38 = vld [vmem:[#allocation3 + $0x150] sm:$0xff]  ;;  %v2278_v63 = vld [vmem:[#allocation3 + $0x158] sm:$0xff]  ;;  %v11675_v21 = vpack.c.bf16 %v2311_v55, %v2310_v50  ;;  %v11680_v59 = vpack.c.bf16 %v2329_v6, %v2328_v33  ;;  %v2295_v62 = vld [vmem:[#allocation3 + $0x1e0] sm:$0xff] }
 0x4e9   : > { %9213 = vmatprep.subr.bf16.mxu0 %v9212_v0  ;;  %9227 = vmatpush3.bf16.msra.mxu1 %v11641_v54  ;;  %v11677_v4 = vpack.c.bf16 %v2278_v63, %v2277_v38  ;;  %v2296_v5 = vld [vmem:[#allocation3 + $0x1e8] sm:$0xff]  ;;  %v2330_v61 = vld [vmem:[#allocation5 + $0x1f0] sm:$0xff]  ;;  %v2331_v42 = vld [vmem:[#allocation5 + $0x1f8] sm:$0xff] }
 0x4ea   : > { %9215 = vmatpush3.bf16.msra.mxu0 %v9212_v0  ;;  %v2274_v0 = vld [vmem:[#allocation3 + $0x138] sm:$0xff]  ;;  %9229 = vmatprep.subr.bf16.mxu1 %v11646_v28  ;;  %v2280_v20 = vld [vmem:[#allocation3 + $0x168] sm:$0xff]  ;;  %v11692_v25 = vpack.c.bf16 %v2331_v42, %v2330_v61  ;;  %v2297_v19 = vld [vmem:[#allocation3 + $0x1f0] sm:$0xff] }
 0x4eb   : > { %9249 = vmatprep.subr.bf16.mxu0 %v11610_v43  ;;  %v11653_v34 = vpack.c.bf16 %v2274_v0, %v2273_v37  ;;  %v2312_v37 = vld [vmem:[#allocation5 + $0x160] sm:$0xff]  ;;  %v11685_v0 = vpack.c.bf16 %v2296_v5, %v2295_v62  ;;  %v2298_v32 = vld [vmem:[#allocation3 + $0x1f8] sm:$0xff]  ;;  %v2314_v18 = vld [vmem:[#allocation5 + $0x170] sm:$0xff] }
 0x4ec   : > { %v11697_v40 = vpack.c.bf16 %v2298_v32, %v2297_v19  ;;  %v2315_v50 = vld [vmem:[#allocation5 + $0x178] sm:$0xff]  ;;  %v2281_v55 = vld [vmem:[#allocation3 + $0x170] sm:$0xff] }
 0x4ed   : > { %8728 = vmatmul.mubr.f32.vlgmr.msra.gmra.mrb[22].mxu0 %v10219_v52  ;;  %v2324_v52 = vld [vmem:[#allocation5 + $0x1c0] sm:$0xff]  ;;  %9231 = vmatpush3.bf16.msra.mxu1 %v11653_v34  ;;  %v2282_v38 = vld [vmem:[#allocation3 + $0x178] sm:$0xff]  ;;  %v11699_v63 = vpack.c.bf16 %v2315_v50, %v2314_v18  ;;  %v15032_v18 = vld [vmem:[#allocation12_spill] sm:$0xff] }
 0x4ee   : > { %9251 = vmatpush3.bf16.msra.mxu0 %v11614_v7  ;;  %v11655_v44 = vpack.c.bf16 %v2325_v58, %v2324_v52  ;;  %9233 = vmatprep.subr.bf16.mxu1 %v11658_v53  ;;  %v2313_v52 = vld [vmem:[#allocation5 + $0x168] sm:$0xff]  ;;  %v2279_v58 = vld [vmem:[#allocation3 + $0x160] sm:$0xff]  ;;  %v11701_v33 = vpack.c.bf16 %v2282_v38, %v2281_v55  ;;  %v15033_v55 = vld [vmem:[#allocation13_spill] sm:$0xff] }
 0x4ef   : > { %9253 = vmatprep.subr.bf16.mxu0 %v11621_v2  ;;  %v11687_v39 = vpack.c.bf16 %v2313_v52, %v2312_v37  ;;  %v11689_v57 = vpack.c.bf16 %v2280_v20, %v2279_v58 }
 0x4f1   : > { %9235 = vmatpush3.bf16.msra.mxu1 %v11665_v14 }
 0x4f2   : > { %9255 = vmatpush3.bf16.msra.mxu0 %v11626_v23  ;;  %9237 = vmatprep.subr.bf16.mxu1 %v11673_v51 }
 0x4f3   : > { %9257 = vmatprep.subr.bf16.mxu0 %v11632_v17 }
 0x4f5   : > { %9239 = vmatpush3.bf16.msra.mxu1 %v11677_v4 }
 0x4f6   : > { %9259 = vmatpush3.bf16.msra.mxu0 %v11637_v16  ;;  %9241 = vmatprep.subr.bf16.mxu1 %v11685_v0 }
 0x4f7   : > { %9261 = vmatprep.subr.bf16.mxu0 %v11643_v60 }
 0x4f9   : > { %9243 = vmatpush3.bf16.msra.mxu1 %v11689_v57 }
 0x4fa   : > { %9263 = vmatpush3.bf16.msra.mxu0 %v11649_v56  ;;  %9245 = vmatprep.subr.bf16.mxu1 %v11697_v40 }
 0x4fb   : > { %9265 = vmatprep.subr.bf16.mxu0 %v11655_v44 }
 0x4fd   : > { %9247 = vmatpush3.bf16.msra.mxu1 %v11701_v33 }
 0x4fe   : > { %9267 = vmatpush3.bf16.msra.mxu0 %v11661_v45  ;;  %9281 = vmatprep.subr.bf16.mxu1 %v11612_v13 }
 0x4ff   : > { %9269 = vmatprep.subr.bf16.mxu0 %v11667_v1 }
 0x502   : > { %9271 = vmatpush3.bf16.msra.mxu0 %v11675_v21 }
 0x503   : > { %9273 = vmatprep.subr.bf16.mxu0 %v11680_v59 }
 0x506   : > { %9275 = vmatpush3.bf16.msra.mxu0 %v11687_v39 }
 0x507   : > { %9277 = vmatprep.subr.bf16.mxu0 %v11692_v25 }
 0x50a   : > { %9279 = vmatpush3.bf16.msra.mxu0 %v11699_v63 }
 0x50b   : > { %9313 = vmatprep.subr.bf16.mxu0 %v11610_v43 }
 0x5c0   : > { %v8729_v6 = vpop.f32.mrb[22].mxu0 }
 0x5c1   : > { %2252 = vrot.lane.b32.xlu0 %v8729_v6, %s10350_s22  ;;  %v2227_v62 = vpop.f32.mrb[23].mxu0 }
 0x5c2   : > { %2237 = vrot.lane.b32.xlu1 %v2227_v62, %s10350_s22 }
 0x5c5   : > { %2255 = vrot.lane.b32.xlu0 %v8729_v6, %s10351_s20 }
 0x5c6   : > { %2240 = vrot.lane.b32.xlu1 %v2227_v62, %s10351_s20 }
 0x5c9   : > { %2258 = vrot.lane.b32.xlu0 %v8729_v6, %s10352_s27 }
 0x5ca   : > { %2243 = vrot.lane.b32.xlu1 %v2227_v62, %s10352_s27 }
 0x633   : > { %v2253_v5 = vpop.permute.xlu0 %2252 }
 0x634   : > { %v2238_v37 = vpop.permute.xlu1 %2237  ;;  %v2261_v20 = vsel %vm883_vm5, %v8729_v6, %v2253_v5 }
 0x635   : > { %v2246_v61 = vsel %vm883_vm5, %v2227_v62, %v2238_v37 }
 0x637   : > { %v2256_v52 = vpop.permute.xlu0 %2255 }
 0x638   : > { %v2241_v58 = vpop.permute.xlu1 %2240  ;;  %v2262_v43 = vsel %vm885_vm7, %v2261_v20, %v2256_v52 }
 0x639   : > { %v2247_v13 = vsel %vm885_vm7, %v2246_v61, %v2241_v58  ;;  %v15039_v58 = vld [vmem:[#allocation15_spill] sm:$0xff] }
 0x63a   : > { %v2983_v20 = vmul.f32 0.8, %v15039_v58 }
 0x63b   : > { %v2259_v42 = vpop.permute.xlu0 %2258 }
 0x63c   : > { %v2263_v19 = vsel %vm887_vm8, %v2262_v43, %v2259_v42  ;;  %v2244_v32 = vpop.permute.xlu1 %2243 }
 0x63d   : > { %v2264_v50 = vmul.f32 %v2263_v19, %v15032_v18  ;;  %v2265_v38 = vmul.f32 %v2263_v19, %v15033_v55  ;;  %v2248_v31 = vsel %vm887_vm8, %v2247_v13, %v2244_v32  ;;  %v15041_v13 = vld [vmem:[#allocation16_spill] sm:$0xff] }
 0x63e   : > { %v2249_v49 = vmul.f32 %v2248_v31, %v15032_v18  ;;  %v2250_v6 = vmul.f32 %v2248_v31, %v15033_v55  ;;  %v7660_v31 = vld [vmem:[%s14845_s7 + $0x20] sm:$0xff]  ;;  %v2982_v19 = vmul.f32 0.8, %v15041_v13 }
 0x63f   : > { %2466 = vmatprep.mubr.f32.mxu0 %v2265_v38 }
 0x640   : > { %2396 = vmatprep.mubr.f32.mxu1 %v2250_v6  ;;  %2467 = vmatmul.mubr.f32.vlgmr.msra.gmra.mrb[24].mxu0 %v2264_v50 }
 0x641   : > { %9315 = vmatpush3.bf16.msra.mxu0 %v11614_v7  ;;  %2397 = vmatmul.mubr.f32.vlgmr.msra.gmra.mrb[20].mxu1 %v2249_v49  ;;  %v7661_v7 = vld [vmem:[%s14845_s7 + $0x28] sm:$0xff] }
 0x642   : > { %9283 = vmatpush3.bf16.msra.mxu1 %v11617_v9  ;;  %2607 = vmatprep.mubr.f32.mxu0 %v2250_v6  ;;  %v9344_v9 = vpack.c.bf16 %v7661_v7, %v7660_v31  ;;  %v15043_v31 = vld [vmem:[#allocation17_spill] sm:$0xff] }
 0x643   : > { %2537 = vmatprep.mubr.f32.mxu1 %v2265_v38  ;;  %9317 = vmatprep.subr.bf16.mxu0 %v11621_v2  ;;  %v7662_v2 = vld [vmem:[%s14845_s7 + $0x30] sm:$0xff]  ;;  %v2985_v7 = vmul.f32 0.8, %v15043_v31 }
 0x644   : > { %9285 = vmatprep.subr.bf16.mxu1 %v11623_v8  ;;  %v7663_v8 = vld [vmem:[%s14845_s7 + $0x38] sm:$0xff] }
 0x645   : > { %9319 = vmatpush3.bf16.msra.mxu0 %v11626_v23  ;;  %v9348_v23 = vpack.c.bf16 %v7663_v8, %v7662_v2 }
 0x646   : > { %9287 = vmatpush3.bf16.msra.mxu1 %v11630_v26  ;;  %9321 = vmatprep.subr.bf16.mxu0 %v11632_v17  ;;  %v10220_v26 = vld [vmem:[%s14839_s1] sm:$0xff] }
 0x647   : > { %9289 = vmatprep.subr.bf16.mxu1 %v11634_v10  ;;  %v10222_v10 = vld [vmem:[%s14840_s2 + $0x8] sm:$0xff] }
 0x649   : > { %9323 = vmatpush3.bf16.msra.mxu0 %v11637_v16  ;;  %v10223_v16 = vld [vmem:[%s14840_s2 + $0x10] sm:$0xff] }
 0x64a   : > { %9291 = vmatpush3.bf16.msra.mxu1 %v11641_v54  ;;  %9325 = vmatprep.subr.bf16.mxu0 %v11643_v60  ;;  %v10224_v54 = vld [vmem:[%s14840_s2 + $0x18] sm:$0xff]  ;;  %v10225_v60 = vld [vmem:[%s14840_s2 + $0x20] sm:$0xff] }
 0x64b   : > { %9293 = vmatprep.subr.bf16.mxu1 %v11646_v28  ;;  %v10226_v28 = vld [vmem:[%s14840_s2 + $0x28] sm:$0xff] }
 0x64d   : > { %9327 = vmatpush3.bf16.msra.mxu0 %v11649_v56  ;;  %v10227_v56 = vld [vmem:[%s14840_s2 + $0x30] sm:$0xff] }
 0x64e   : > { %9295 = vmatpush3.bf16.msra.mxu1 %v11653_v34  ;;  %9329 = vmatprep.subr.bf16.mxu0 %v11655_v44  ;;  %v10228_v34 = vld [vmem:[%s14840_s2 + $0x38] sm:$0xff]  ;;  %v10229_v44 = vld [vmem:[%s14840_s2 + $0x40] sm:$0xff] }
 0x64f   : > { %9297 = vmatprep.subr.bf16.mxu1 %v11658_v53  ;;  %v10230_v53 = vld [vmem:[%s14840_s2 + $0x48] sm:$0xff] }
 0x651   : > { %9331 = vmatpush3.bf16.msra.mxu0 %v11661_v45  ;;  %v10231_v45 = vld [vmem:[%s14840_s2 + $0x50] sm:$0xff] }
 0x652   : > { %9299 = vmatpush3.bf16.msra.mxu1 %v11665_v14  ;;  %9333 = vmatprep.subr.bf16.mxu0 %v11667_v1  ;;  %v10232_v14 = vld [vmem:[%s14840_s2 + $0x58] sm:$0xff]  ;;  %v10233_v1 = vld [vmem:[%s14840_s2 + $0x60] sm:$0xff] }
 0x653   : > { %9301 = vmatprep.subr.bf16.mxu1 %v11673_v51  ;;  %v10234_v51 = vld [vmem:[%s14840_s2 + $0x68] sm:$0xff] }
 0x655   : > { %9335 = vmatpush3.bf16.msra.mxu0 %v11675_v21  ;;  %v10235_v21 = vld [vmem:[%s14840_s2 + $0x70] sm:$0xff] }
 0x656   : > { %9303 = vmatpush3.bf16.msra.mxu1 %v11677_v4  ;;  %9337 = vmatprep.subr.bf16.mxu0 %v11680_v59  ;;  %v10236_v4 = vld [vmem:[%s14840_s2 + $0x78] sm:$0xff]  ;;  %v11868_v59 = vld [vmem:[%s14846_s8 + $0x1] ss:$0 sm:$0xff] }
 0x657   : > { %9305 = vmatprep.subr.bf16.mxu1 %v11685_v0 }
 0x659   : > { %9339 = vmatpush3.bf16.msra.mxu0 %v11687_v39  ;;  %v15035_v39 = vld [vmem:[#allocation10_spill] sm:$0xff] }
 0x65a   : > { %9307 = vmatpush3.bf16.msra.mxu1 %v11689_v57  ;;  %9341 = vmatprep.subr.bf16.mxu0 %v11692_v25  ;;  %v2981_v57 = vmul.f32 0.8, %v15035_v39 }
 0x65b   : > { %9309 = vmatprep.subr.bf16.mxu1 %v11697_v40 }
 0x65d   : > { %9343 = vmatpush3.bf16.msra.mxu0 %v11699_v63  ;;  %v15037_v63 = vld [vmem:[#allocation14_spill] sm:$0xff] }
 0x65e   : > { %9311 = vmatpush3.bf16.msra.mxu1 %v11701_v33  ;;  %v2980_v33 = vmul.f32 0.8, %v15037_v63 }
 0x65f   : > { %9345 = vmatprep.subr.bf16.mxu1 %v9344_v9 }
 0x660   : > { %2608 = vmatmul.mubr.f32.vlgmr.msra.gmra.mrb[26].mxu0 %v2249_v49 }
 0x661   : > { %2538 = vmatmul.mubr.f32.vlgmr.msra.gmra.mrb[22].mxu1 %v2264_v50  ;;  %8822 = vmatprep.mubr.f32.mxu0 %v10220_v26 }
 0x662   : > { %9347 = vmatpush3.bf16.msra.mxu1 %v9344_v9  ;;  %8738 = vmatprep.mubr.msk.f32.mxu1 %vm883_vm5, %v11437_v47  ;;  %v15034_v47 = vld [vmem:[#allocation21_spill] sm:$0xff] }
 0x663   : > { %9349 = vmatprep.subr.bf16.mxu1 %v9348_v23 }
 0x666   : > { %9351 = vmatpush3.bf16.msra.mxu1 %v9348_v23  ;;  %v15044_v23 = vld [vmem:[#allocation18_spill] sm:$0xff] }
 0x667   : > { %v2984_v26 = vmul.f32 0.8, %v15044_v23 }
 0x669   : > { %8739 = vmatmul.mubr.msk.f32.vlgmr.msra.gmra.mrb[24].mxu1 %vm883_vm5, %v11440_v22  ;;  %v10221_v22 = vld [vmem:[%s14840_s2] sm:$0xff] }
 0x66a   : > { %8741 = vmatprep.mubr.msk.f32.mxu1 %vm883_vm5, %v11459_v24 }
 0x66d   : > { %8742 = vmatmul.mubr.msk.f32.gmra.mrb[26].mxu1 %vm883_vm5, %v11468_v30 }
 0x66e   : > { %8744 = vmatprep.mubr.msk.f32.mxu1 %vm883_vm5, %v11479_v27 }
 0x671   : > { %8745 = vmatmul.mubr.msk.f32.gmra.mrb[28].mxu1 %vm883_vm5, %v11482_v35 }
 0x672   : > { %8747 = vmatprep.mubr.msk.f32.mxu1 %vm883_vm5, %v11513_v11 }
 0x675   : > { %8748 = vmatmul.mubr.msk.f32.gmra.mrb[30].mxu1 %vm883_vm5, %v11520_v12 }
 0x676   : > { %8750 = vmatprep.mubr.msk.f32.mxu1 %vm883_vm5, %v11550_v36 }
 0x679   : > { %8751 = vmatmul.mubr.msk.f32.gmra.mrb[32].mxu1 %vm883_vm5, %v11555_v41 }
 0x67a   : > { %8753 = vmatprep.mubr.msk.f32.mxu1 %vm883_vm5, %v11573_v46 }
 0x67d   : > { %8754 = vmatmul.mubr.msk.f32.gmra.mrb[34].mxu1 %vm883_vm5, %v11576_v3 }
 0x67e   : > { %8756 = vmatprep.mubr.msk.f32.mxu1 %vm883_vm5, %v11589_v15 }
 0x681   : > { %8757 = vmatmul.mubr.msk.f32.gmra.mrb[36].mxu1 %vm883_vm5, %v11593_v29 }
 0x682   : > { %8759 = vmatprep.mubr.msk.f32.mxu1 %vm883_vm5, %v11601_v48 }
 0x685   : > { %8760 = vmatmul.mubr.msk.f32.gmra.mrb[38].mxu1 %vm883_vm5, %v15034_v47 }
 0x686   : > { %8766 = vmatprep.mubr.msk.f32.mxu1 %vm1448_vm9, %v10221_v22 }
 0x713   : > { %v8077_v24 = vpop.f32.mrb[24].mxu0 }
 0x714   : > { %v8042_v30 = vpop.f32.mrb[20].mxu1  ;;  %v8078_v27 = vpop.f32.mrb[25].mxu0 }
 0x715   : > { %v8079_v35 = vadd.f32 %v8078_v27, %v8077_v24  ;;  %v8043_v11 = vpop.f32.mrb[21].mxu1  ;;  %v15045_v24 = vld [vmem:[#allocation19_spill] sm:$0xff]  ;;  %v15046_v27 = vld [vmem:[#allocation20_spill] sm:$0xff] }
 0x716   : > { %v8044_v12 = vadd.f32 %v8043_v11, %v8042_v30  ;;  %v2987_v30 = vmul.f32 0.8, %v15045_v24 }
 0x718   : > { %v2472_v36 = vsub.f32 %v8044_v12, %v8079_v35  ;;  %v2986_v35 = vmul.f32 0.8, %v15046_v27 }
 0x733   : > { %v8147_v41 = vpop.f32.mrb[26].mxu0 }
 0x734   : > { %v8112_v46 = vpop.f32.mrb[22].mxu1  ;;  %v8148_v3 = vpop.f32.mrb[27].mxu0 }
 0x735   : > { %v8149_v15 = vadd.f32 %v8148_v3, %v8147_v41  ;;  %v8113_v29 = vpop.f32.mrb[23].mxu1  ;;  %v15047_v3 = vld [vmem:[#allocation25_spill] sm:$0xff] }
 0x736   : > { %v8114_v48 = vadd.f32 %v8113_v29, %v8112_v46 }
 0x738   : > { %v2610_v49 = vadd.f32 %v8149_v15, %v8114_v48  ;;  %v11920_v15 = vmul.f32 0.8, %v15047_v3 }
 0x73a   : > { %v9352_v17 = vpack.c.bf16 %v2610_v49, %v2472_v36  ;;  %v15048_v49 = vld [vmem:[#allocation26_spill] sm:$0xff] }
 0x73c   : > { %9353 = vmatprep.subr.bf16.mxu1 %v9352_v17 }
 0x73d   : > { %9355 = vmatpush3.bf16.msra.mxu1 %v9352_v17  ;;  %v11924_v17 = vmul.f32 0.8, %v15048_v49 }
 0x740   : > { %8767 = vmatmul.mubr.msk.f32.vlgmr.msra.gmra.mrb[24].mxu1 %vm1448_vm9, %v10222_v10 }
 0x741   : > { %8769 = vmatprep.mubr.msk.f32.mxu1 %vm1448_vm9, %v10223_v16 }
 0x744   : > { %8770 = vmatmul.mubr.msk.f32.gmra.mrb[26].mxu1 %vm1448_vm9, %v10224_v54 }
 0x745   : > { %8772 = vmatprep.mubr.msk.f32.mxu1 %vm1448_vm9, %v10225_v60  ;;  %v15049_v60 = vld [vmem:[#allocation27_spill] sm:$0xff] }
 0x748   : > { %8773 = vmatmul.mubr.msk.f32.gmra.mrb[28].mxu1 %vm1448_vm9, %v10226_v28  ;;  %v11927_v28 = vmul.f32 0.8, %v15049_v60 }
 0x749   : > { %8775 = vmatprep.mubr.msk.f32.mxu1 %vm1448_vm9, %v10227_v56 }
 0x74c   : > { %8776 = vmatmul.mubr.msk.f32.gmra.mrb[30].mxu1 %vm1448_vm9, %v10228_v34 }
 0x74d   : > { %8778 = vmatprep.mubr.msk.f32.mxu1 %vm1448_vm9, %v10229_v44 }
 0x750   : > { %8779 = vmatmul.mubr.msk.f32.gmra.mrb[32].mxu1 %vm1448_vm9, %v10230_v53 }
 0x751   : > { %8781 = vmatprep.mubr.msk.f32.mxu1 %vm1448_vm9, %v10231_v45 }
 0x754   : > { %8782 = vmatmul.mubr.msk.f32.gmra.mrb[34].mxu1 %vm1448_vm9, %v10232_v14  ;;  %v15051_v14 = vld [vmem:[#allocation32_spill] sm:$0xff] }
 0x755   : > { %8784 = vmatprep.mubr.msk.f32.mxu1 %vm1448_vm9, %v10233_v1  ;;  %v11936_v1 = vmul.f32 0.8, %v15051_v14 }
 0x758   : > { %8785 = vmatmul.mubr.msk.f32.gmra.mrb[36].mxu1 %vm1448_vm9, %v10234_v51 }
 0x759   : > { %8787 = vmatprep.mubr.msk.f32.mxu1 %vm1448_vm9, %v10235_v21 }
 0x75c   : > { %8788 = vmatmul.mubr.msk.f32.gmra.mrb[38].mxu1 %vm1448_vm9, %v10236_v4 }
 0x813   : > { %v8768_v0 = vpop.f32.mrb[24].mxu1 }
 0x814   : > { %v11872_v25 = vadd.f32 %v8768_v0, %v11868_v59  ;;  %v2877_v40 = vpop.f32.mrb[25].mxu1 }
 0x815   : > { %v11876_v62 = vadd.f32 %v11868_v59, %v2877_v40 }
 0x816   : > { %15036 = vst [vmem:[#allocation23_spill] sm:$0xff] %v11872_v25  ;;  %v11879_v5 = vadd.f32 %v2981_v57, %v11872_v25 }
 0x817   : > { %15038 = vst [vmem:[#allocation22_spill] sm:$0xff] %v11876_v62  ;;  %v11882_v37 = vadd.f32 %v2980_v33, %v11876_v62  ;;  %v8771_v52 = vpop.f32.mrb[26].mxu1 }
 0x818   : > { %v11886_v61 = vmul.f32 0.70710677, %v11879_v5  ;;  %v11889_v43 = vadd.f32 %v8771_v52, %v11868_v59  ;;  %v2887_v42 = vpop.f32.mrb[27].mxu1  ;;  %v15054_v52 = vld [vmem:[#allocation33_spill] sm:$0xff] }
 0x819   : > { %v11893_v32 = vmul.f32 0.70710677, %v11882_v37  ;;  %v11896_v50 = vadd.f32 %v11868_v59, %v2887_v42  ;;  %v11954_v58 = vmul.f32 0.8, %v15054_v52 }
 0x81a   : > { %15040 = vst [vmem:[#allocation28_spill] sm:$0xff] %v11889_v43  ;;  %v3077_v38 = vand.u32 2147483647, %v11886_v61  ;;  %v11900_v6 = vadd.f32 %v2983_v20, %v11889_v43  ;;  %vm3045_vm14 = vcmp.lt.f32.partialorder %v11886_v61, 0.0 }
 0x81b   : > { %15042 = vst [vmem:[#allocation24_spill] sm:$0xff] %v11896_v50  ;;  %v3076_v9 = vand.u32 2147483647, %v11893_v32  ;;  %v11905_v2 = vadd.f32 %v2982_v19, %v11896_v50  ;;  %v8774_v8 = vpop.f32.mrb[28].mxu1  ;;  %vm3044_vm15 = vcmp.lt.f32.partialorder %v11893_v32, 0.0 }
 0x81c   : > { %v3093_v47 = vmul.f32 0.3275911, %v3077_v38  ;;  %v11909_v22 = vmul.f32 0.70710677, %v11900_v6  ;;  %v2897_v46 = vpop.f32.mrb[29].mxu1  ;;  %v3333_v10 = vsub.f32 0.0, %v3077_v38  ;;  %v11933_v45 = vadd.f32 %v8774_v8, %v11868_v59 }
 0x81d   : > { %v11914_v11 = vmul.f32 0.70710677, %v11905_v2  ;;  %v3092_v36 = vmul.f32 0.3275911, %v3076_v9  ;;  %v3332_v56 = vsub.f32 0.0, %v3076_v9  ;;  %v11941_v4 = vadd.f32 %v11868_v59, %v2897_v46 }
 0x81e   : > { %v11916_v12 = vadd.f32 1.0, %v3093_v47  ;;  %v3079_v41 = vand.u32 2147483647, %v11909_v22  ;;  %15050 = vst [vmem:[#allocation31_spill] sm:$0xff] %v11933_v45  ;;  %v3349_v39 = vmul.f32 %v3333_v10, %v3077_v38  ;;  %v3001_v40 = vadd.f32 %v2985_v7, %v11933_v45  ;;  %v15056_v7 = vld [vmem:[#allocation39_spill] sm:$0xff] }
 0x81f   : > { %v3078_v29 = vand.u32 2147483647, %v11914_v11  ;;  %v8777_v48 = vpop.f32.mrb[30].mxu1  ;;  %v11930_v44 = vadd.f32 1.0, %v3092_v36  ;;  %15052 = vst [vmem:[#allocation30_spill] sm:$0xff] %v11941_v4  ;;  %v3348_v20 = vmul.f32 %v3332_v56, %v3076_v9  ;;  %v3000_v42 = vadd.f32 %v2984_v26, %v11941_v4  ;;  %v15057_v36 = vld [vmem:[#allocation40_spill] sm:$0xff] }
 0x820   : > { %v3095_v16 = vmul.f32 0.3275911, %v3079_v41  ;;  %v2907_v54 = vpop.f32.mrb[31].mxu1  ;;  %9899 = vrcp.f32 %v11916_v12  ;;  %v3335_v53 = vsub.f32 0.0, %v3079_v41  ;;  %v11949_v63 = vadd.f32 %v8777_v48, %v11868_v59  ;;  %v15058_v56 = vld [vmem:[#allocation43_spill] sm:$0xff] }
 0x821   : > { %v3094_v34 = vmul.f32 0.3275911, %v3078_v29  ;;  %v3334_v21 = vsub.f32 0.0, %v3078_v29  ;;  %v11958_v13 = vadd.f32 %v11868_v59, %v2907_v54  ;;  %9901 = vrcp.f32 %v11930_v44 }
 0x822   : > { %v11938_v51 = vadd.f32 1.0, %v3095_v16  ;;  %15053 = vst [vmem:[#allocation29_spill] sm:$0xff] %v11949_v63  ;;  %v3351_v19 = vmul.f32 %v3335_v53, %v3079_v41  ;;  %v11961_v38 = vmul.f32 0.70710677, %v3001_v40  ;;  %v3003_v31 = vadd.f32 %v2987_v30, %v11949_v63 }
 0x823   : > { %v11943_v0 = vpop.f32.mrb[32].mxu1  ;;  %v11945_v57 = vadd.f32 1.0, %v3094_v34  ;;  %15055 = vst [vmem:[#allocation36_spill] sm:$0xff] %v11958_v13  ;;  %v11965_v8 = vmul.f32 0.8, %v15056_v7  ;;  %v3350_v23 = vmul.f32 %v3334_v21, %v3078_v29  ;;  %v11979_v3 = vadd.f32 %v2986_v35, %v11958_v13 }
 0x824   : > { %v11951_v33 = vpop.f32.mrb[33].mxu1  ;;  %9903 = vrcp.f32 %v11938_v51  ;;  %v11968_v47 = vmul.f32 0.70710677, %v3000_v42  ;;  %v3366_v26 = vmul.f32 1.442695, %v3349_v39  ;;  %v12003_v7 = vmul.f32 0.5, %v11882_v37 }
 0x825   : > { %9905 = vrcp.f32 %v11945_v57  ;;  %v3081_v24 = vand.u32 2147483647, %v11961_v38  ;;  %v11972_v27 = vmul.f32 0.70710677, %v3003_v31  ;;  %v11975_v41 = vmul.f32 0.8, %v15057_v36 }
 0x826   : > { %v3364_v30 = vmul.f32 1.442695, %v3348_v20  ;;  %v3080_v46 = vand.u32 2147483647, %v11968_v47  ;;  %v3370_v29 = vmul.f32 1.442695, %v3351_v19  ;;  %9907 = vpow2.f32 %v3366_v26 }
 0x827   : > { %v8783_v9 = vpop.f32.mrb[34].mxu1  ;;  %v3097_v48 = vmul.f32 0.3275911, %v3081_v24  ;;  %v3083_v49 = vand.u32 2147483647, %v11972_v27  ;;  %v3337_v14 = vsub.f32 0.0, %v3081_v24 }
 0x828   : > { %v3368_v10 = vmul.f32 1.442695, %v3350_v23  ;;  %v3096_v16 = vmul.f32 0.3275911, %v3080_v46  ;;  %v11983_v54 = vpop.f32.mrb[35].mxu1  ;;  %9909 = vpow2.f32 %v3364_v30  ;;  %v12000_v19 = vmul.f32 0.5, %v11879_v5 }
 0x829   : > { %v11986_v34 = vmul.f32 0.8, %v15058_v56  ;;  %v11988_v53 = vadd.f32 1.0, %v3097_v48  ;;  %v3099_v39 = vmul.f32 0.3275911, %v3083_v49  ;;  %9911 = vpow2.f32 %v3370_v29 }
 0x82a   : > { %v9900_v60 = vpop.eup %9899  ;;  %v11992_v21 = vadd.f32 1.0, %v3096_v16  ;;  %v11995_v52 = vmul.f32 0.70710677, %v11979_v3  ;;  %v15059_v23 = vmov 1.0   ;;  %v12012_v30 = vmul.f32 0.5, %v11900_v6 }
 0x82b   : > { %v11990_v35 = vpop.f32.mrb[36].mxu1  ;;  %v12008_v26 = vsel %vm3045_vm14, -1.0, %v15059_v23  ;;  %v3141_v36 = vmul.f32 %v9900_v60, %v11916_v12  ;;  %v12015_v48 = vmul.f32 0.5, %v11905_v2  ;;  %9913 = vpow2.f32 %v3368_v10  ;;  %v9902_v16 = vpop.eup %9901 }
 0x82c   : > { %v11997_v20 = vpop.f32.mrb[37].mxu1  ;;  %15060 = vst [vmem:[#allocation34_spill] sm:$0xff] %v12012_v30  ;;  %v12019_v37 = vmul.f32 0.5, %v3001_v40  ;;  %9915 = vrcp.f32 %v11988_v53  ;;  %v3353_v29 = vmul.f32 %v3337_v14, %v3081_v24  ;;  %v3336_v61 = vsub.f32 0.0, %v3080_v46 }
 0x82d   : > { %9917 = vrcp.f32 %v11992_v21  ;;  %v12025_v6 = vadd.f32 1.0, %v3099_v39  ;;  %v3082_v2 = vand.u32 2147483647, %v11995_v52  ;;  %v12030_v12 = vadd.f32 %v11943_v0, %v11868_v59 }
 0x82e   : > { %15061 = vst [vmem:[#allocation49_spill] sm:$0xff] %v12019_v37  ;;  %v9904_v13 = vpop.eup %9903  ;;  %v12032_v40 = vmul.f32 0.5, %v3000_v42  ;;  %v12034_v63 = vmul.f32 0.5, %v3003_v31  ;;  %v3339_v24 = vsub.f32 0.0, %v3083_v49  ;;  %v12038_v14 = vadd.f32 %v11868_v59, %v11951_v33 }
 0x82f   : > { %v12017_v5 = vpop.f32.mrb[38].mxu1  ;;  %15062 = vst [vmem:[#allocation38_spill] sm:$0xff] %v12030_v12  ;;  %v9906_v10 = vpop.eup %9905  ;;  %v3157_v4 = vsub.f32 2.0, %v3141_v36  ;;  %v3140_v39 = vmul.f32 %v9902_v16, %v11930_v44  ;;  %v3098_v45 = vmul.f32 0.3275911, %v3082_v2  ;;  %v3005_v50 = vadd.f32 %v11920_v15, %v12030_v12 }
 0x830   : > { %v12022_v56 = vpop.f32.mrb[39].mxu1  ;;  %15063 = vst [vmem:[#allocation48_spill] sm:$0xff] %v12032_v40  ;;  %15064 = vst [vmem:[#allocation45_spill] sm:$0xff] %v12034_v63  ;;  %v3374_v43 = vmul.f32 1.442695, %v3353_v29  ;;  %v3352_v0 = vmul.f32 %v3336_v61, %v3080_v46  ;;  %v12045_v42 = vadd.f32 %v11924_v17, %v12038_v14  ;;  %v12048_v31 = vadd.f32 %v8783_v9, %v11868_v59  ;;  %v12055_v36 = vpop.eup %9907 }
 0x831   : > { %15065 = vst [vmem:[#allocation37_spill] sm:$0xff] %v12038_v14  ;;  %v3143_v62 = vmul.f32 %v9904_v13, %v11938_v51  ;;  %v3142_v33 = vmul.f32 %v9906_v10, %v11945_v57  ;;  %9919 = vrcp.f32 %v12025_v6  ;;  %v12053_v44 = vmul.f32 0.70710677, %v3005_v50 }
 0x832   : > { %15066 = vst [vmem:[#allocation41_spill] sm:$0xff] %v12048_v31  ;;  %v3355_v15 = vmul.f32 %v3339_v24, %v3083_v49  ;;  %v12057_v29 = vadd.f32 1.0, %v3098_v45  ;;  %v12060_v46 = vmul.f32 0.70710677, %v12045_v42  ;;  %v12064_v17 = vadd.f32 %v11927_v28, %v12048_v31  ;;  %v12066_v9 = vpop.eup %9909 }
 0x833   : > { %v12068_v51 = vmul.f32 %v9900_v60, %v3157_v4  ;;  %v3156_v57 = vsub.f32 2.0, %v3140_v39  ;;  %v12071_v61 = vmul.f32 0.5, %v11979_v3  ;;  %v3085_v14 = vand.u32 2147483647, %v12053_v44  ;;  %v12074_v49 = vpop.eup %9911 }
 0x834   : > { %v3372_v45 = vmul.f32 1.442695, %v3352_v0  ;;  %v3084_v24 = vand.u32 2147483647, %v12060_v46  ;;  %v12078_v12 = vmul.f32 0.70710677, %v12064_v17  ;;  %v12082_v28 = vadd.f32 %v11868_v59, %v11983_v54 }
 0x835   : > { %15067 = vst [vmem:[#allocation47_spill] sm:$0xff] %v12071_v61  ;;  %v12084_v4 = vpop.eup %9913  ;;  %v3159_v60 = vsub.f32 2.0, %v3143_v62  ;;  %9921 = vpow2.f32 %v3374_v43  ;;  %v3338_v3 = vsub.f32 0.0, %v3082_v2  ;;  %v3101_v39 = vmul.f32 0.3275911, %v3085_v14 }
 0x836   : > { %15068 = vst [vmem:[#allocation35_spill] sm:$0xff] %v12078_v12  ;;  %15069 = vst [vmem:[#allocation44_spill] sm:$0xff] %v12082_v28  ;;  %v9916_v31 = vpop.eup %9915  ;;  %v3158_v25 = vsub.f32 2.0, %v3142_v33  ;;  %v3378_v55 = vmul.f32 1.442695, %v3355_v15  ;;  %9923 = vrcp.f32 %v12057_v29  ;;  %v3341_v61 = vsub.f32 0.0, %v3085_v14 }
 0x837   : > { %v3100_v0 = vmul.f32 0.3275911, %v3084_v24  ;;  %v9918_v18 = vpop.eup %9917  ;;  %v12087_v63 = vadd.f32 1.0, %v3101_v39  ;;  %v3340_v37 = vsub.f32 0.0, %v3084_v24  ;;  %v3087_v54 = vand.u32 2147483647, %v12078_v12 }
 0x838   : > { %v12090_v40 = vmul.f32 %v9902_v16, %v3156_v57  ;;  %9925 = vpow2.f32 %v3372_v45  ;;  %v12096_v43 = vadd.f32 %v11936_v1, %v12082_v28  ;;  %v12098_v33 = vmul.f32 %v9904_v13, %v3159_v60 }
 0x839   : > { %v12092_v62 = vadd.f32 1.0, %v3100_v0  ;;  %v3145_v15 = vmul.f32 %v9916_v31, %v11988_v53  ;;  %v3354_v30 = vmul.f32 %v3338_v3, %v3082_v2  ;;  %9927 = vrcp.f32 %v12087_v63 }
 0x83a   : > { %v12102_v39 = vmul.f32 %v9906_v10, %v3158_v25  ;;  %v3144_v12 = vmul.f32 %v9918_v18, %v11992_v21  ;;  %v3103_v16 = vmul.f32 0.3275911, %v3087_v54  ;;  %v12108_v45 = vmul.f32 0.5, %v3005_v50 }
 0x83b   : > { %9929 = vrcp.f32 %v12092_v62  ;;  %v12106_v57 = vpop.eup %9919  ;;  %v3357_v1 = vmul.f32 %v3341_v61, %v3085_v14  ;;  %v3356_v13 = vmul.f32 %v3340_v37, %v3084_v24  ;;  %v3343_v0 = vsub.f32 0.0, %v3087_v54 }
 0x83c   : > { %9931 = vpow2.f32 %v3378_v55  ;;  %15070 = vst [vmem:[#allocation50_spill] sm:$0xff] %v12108_v45  ;;  %v3119_v60 = vadd.f32 1.0, %v3103_v16  ;;  %v12111_v53 = vmul.f32 0.70710677, %v12096_v43  ;;  %v12115_v25 = vadd.f32 %v11990_v35, %v11868_v59 }
 0x83d   : > { %v3161_v21 = vsub.f32 2.0, %v3145_v15  ;;  %v3376_v2 = vmul.f32 1.442695, %v3354_v30  ;;  %v12119_v10 = vadd.f32 %v11868_v59, %v11997_v20  ;;  %v12123_v55 = vadd.f32 %v12017_v5, %v11868_v59 }
 0x83e   : > { %15071 = vst [vmem:[#allocation46_spill] sm:$0xff] %v12115_v25  ;;  %v3160_v50 = vsub.f32 2.0, %v3144_v12  ;;  %v12127_v37 = vmul.f32 %v12106_v57, %v12025_v6  ;;  %9933 = vrcp.f32 %v3119_v60  ;;  %v3086_v14 = vand.u32 2147483647, %v12111_v53 }
 0x83f   : > { %15072 = vst [vmem:[#allocation42_spill] sm:$0xff] %v12119_v10  ;;  %15073 = vst [vmem:[#allocation21_spill] sm:$0xff] %v12123_v55  ;;  %v12130_v35 = vpop.eup %9921  ;;  %v3382_v61 = vmul.f32 1.442695, %v3357_v1  ;;  %v12134_v30 = vadd.f32 %v11954_v58, %v12115_v25  ;;  %v12138_v20 = vadd.f32 %v11965_v8, %v12119_v10  ;;  %v12142_v5 = vadd.f32 %v11975_v41, %v12123_v55 }
 0x840   : > { %v12144_v6 = vpop.eup %9923  ;;  %v3380_v12 = vmul.f32 1.442695, %v3356_v13  ;;  %v3359_v24 = vmul.f32 %v3343_v0, %v3087_v54  ;;  %v3102_v3 = vmul.f32 0.3275911, %v3086_v14  ;;  %v3342_v15 = vsub.f32 0.0, %v3086_v14 }
 0x841   : > { %15074 = vst [vmem:[#allocation10_spill] sm:$0xff] %v12134_v30  ;;  %15075 = vst [vmem:[#allocation14_spill] sm:$0xff] %v12138_v20  ;;  %9935 = vpow2.f32 %v3376_v2  ;;  %v12147_v16 = vmul.f32 0.5, %v12045_v42  ;;  %v12150_v58 = vmul.f32 0.5, %v12064_v17  ;;  %v12153_v8 = vmul.f32 0.70710677, %v12134_v30 }
 0x842   : > { %15076 = vst [vmem:[#allocation15_spill] sm:$0xff] %v12142_v5  ;;  %v12155_v1 = vpop.eup %9925  ;;  %v12157_v41 = vmul.f32 %v9916_v31, %v3161_v21  ;;  %v12159_v55 = vmul.f32 %v9918_v18, %v3160_v50  ;;  %v12161_v13 = vadd.f32 1.0, %v3102_v3  ;;  %v12164_v54 = vmul.f32 0.70710677, %v12138_v20 }
 0x843   : > { %15077 = vst [vmem:[#allocation16_spill] sm:$0xff] %v12147_v16  ;;  %15078 = vst [vmem:[#allocation17_spill] sm:$0xff] %v12150_v58  ;;  %v9928_v0 = vpop.eup %9927  ;;  %9937 = vpow2.f32 %v3382_v61  ;;  %v3358_v42 = vmul.f32 %v3342_v15, %v3086_v14  ;;  %v3089_v17 = vand.u32 2147483647, %v12153_v8  ;;  %v12168_v2 = vmul.f32 0.70710677, %v12142_v5 }
 0x844   : > { %15079 = vst [vmem:[#allocation18_spill] sm:$0xff] %v12153_v8  ;;  %15080 = vst [vmem:[#allocation19_spill] sm:$0xff] %v12164_v54  ;;  %v3163_v31 = vsub.f32 2.0, %v12127_v37  ;;  %v3146_v18 = vmul.f32 %v12144_v6, %v12057_v29  ;;  %9939 = vpow2.f32 %v3380_v12  ;;  %v3386_v21 = vmul.f32 1.442695, %v3359_v24 }
 0x845   : > { %15081 = vst [vmem:[#allocation20_spill] sm:$0xff] %v12168_v2  ;;  %v9930_v10 = vpop.eup %9929  ;;  %9941 = vrcp.f32 %v12161_v13  ;;  %v3105_v14 = vmul.f32 0.3275911, %v3089_v17  ;;  %v3345_v61 = vsub.f32 0.0, %v3089_v17  ;;  %v3088_v3 = vand.u32 2147483647, %v12164_v54 }
 0x846   : > { %v12174_v50 = vpop.eup %9931  ;;  %v3149_v15 = vmul.f32 %v9928_v0, %v12087_v63  ;;  %v3148_v25 = vmul.f32 %v9930_v10, %v12092_v62  ;;  %v3091_v28 = vand.u32 2147483647, %v12168_v2  ;;  %v12183_v37 = vadd.f32 %v11868_v59, %v12022_v56 }
 0x847   : > { %v3384_v29 = vmul.f32 1.442695, %v3358_v42  ;;  %v12185_v12 = vadd.f32 1.0, %v3105_v14  ;;  %v3361_v24 = vmul.f32 %v3345_v61, %v3089_v17  ;;  %v3104_v5 = vmul.f32 0.3275911, %v3088_v3 }
 0x848   : > { %15082 = vst [vmem:[#allocation25_spill] sm:$0xff] %v12183_v37  ;;  %v9934_v30 = vpop.eup %9933  ;;  %vm3046_vm0 = vcmp.lt.f32.partialorder %v11914_v11, 0.0  ;;  %9943 = vpow2.f32 %v3386_v21  ;;  %v3344_v20 = vsub.f32 0.0, %v3088_v3  ;;  %v3107_v58 = vmul.f32 0.3275911, %v3091_v28 }
 0x849   : > { %v3347_v63 = vsub.f32 0.0, %v3091_v28  ;;  %v3162_v8 = vsub.f32 2.0, %v3146_v18  ;;  %v3151_v62 = vmul.f32 %v9934_v30, %v3119_v60  ;;  %v12189_v2 = vmul.f32 0.5, %v12096_v43 }
 0x84a   : > { %9945 = vrcp.f32 %v12185_v12  ;;  %vm3047_vm1 = vcmp.lt.f32.partialorder %v11909_v22, 0.0  ;;  %v3165_v59 = vsub.f32 2.0, %v3149_v15  ;;  %v3164_v56 = vsub.f32 2.0, %v3148_v25 }
 0x84b   : > { %15083 = vst [vmem:[#allocation26_spill] sm:$0xff] %v12189_v2  ;;  %v12193_v42 = vadd.f32 1.0, %v3104_v5  ;;  %v12195_v17 = vadd.f32 1.0, %v3107_v58  ;;  %v12197_v14 = vpop.eup %9935  ;;  %9947 = vpow2.f32 %v3384_v29  ;;  %v3390_v21 = vmul.f32 1.442695, %v3361_v24 }
 0x84c   : > { %v3360_v61 = vmul.f32 %v3344_v20, %v3088_v3  ;;  %v12201_v60 = vadd.f32 %v11986_v34, %v12183_v37  ;;  %vm3048_vm2 = vcmp.lt.f32.partialorder %v11968_v47, 0.0  ;;  %v12205_v43 = vmul.f32 %v12106_v57, %v3163_v31 }
 0x84d   : > { %9949 = vrcp.f32 %v12193_v42  ;;  %v3363_v25 = vmul.f32 %v3347_v63, %v3091_v28  ;;  %v3188_v5 = vmul.f32 1.0614054, %v12090_v40  ;;  %v12209_v58 = vpop.eup %9937  ;;  %v12212_v18 = vmul.f32 %v12144_v6, %v3162_v8 }
 0x84e   : > { %15084 = vst [vmem:[#allocation27_spill] sm:$0xff] %v12201_v60  ;;  %v3167_v20 = vsub.f32 2.0, %v3151_v62  ;;  %9951 = vrcp.f32 %v12195_v17  ;;  %v12216_v34 = vmul.f32 0.70710677, %v12201_v60  ;;  %v12218_v3 = vpop.eup %9939  ;;  %v12220_v57 = vmul.f32 %v9928_v0, %v3165_v59 }
 0x84f   : > { %v12222_v31 = vmul.f32 %v9930_v10, %v3164_v56  ;;  %v3189_v28 = vmul.f32 1.0614054, %v12068_v51  ;;  %v3204_v15 = vadd.f32 -1.4531521, %v3188_v5  ;;  %v9942_v29 = vpop.eup %9941  ;;  %9953 = vpow2.f32 %v3390_v21 }
 0x850   : > { %15085 = vst [vmem:[#allocation32_spill] sm:$0xff] %v12216_v34  ;;  %v3388_v24 = vmul.f32 1.442695, %v3360_v61  ;;  %v3090_v6 = vand.u32 2147483647, %v12216_v34  ;;  %v12229_v8 = vsel %vm3044_vm15, -1.0, %v15059_v23  ;;  %v12233_v59 = vmul.f32 %v9934_v30, %v3167_v20 }
 0x851   : > { %v3394_v63 = vmul.f32 1.442695, %v3363_v25  ;;  %v3205_v62 = vadd.f32 -1.4531521, %v3189_v28  ;;  %v3220_v0 = vmul.f32 %v3204_v15, %v12090_v40  ;;  %v3190_v10 = vmul.f32 1.0614054, %v12102_v39 }
 0x852   : > { %v3106_v56 = vmul.f32 0.3275911, %v3090_v6  ;;  %v3346_v5 = vsub.f32 0.0, %v3090_v6  ;;  %v3191_v21 = vmul.f32 1.0614054, %v12098_v33  ;;  %v12236_v61 = vpop.eup %9943  ;;  %vm3049_vm3 = vcmp.lt.f32.partialorder %v11961_v38, 0.0 }
 0x853   : > { %15086 = vst [vmem:[#allocation33_spill] sm:$0xff] %v12236_v61  ;;  %v3150_v32 = vmul.f32 %v9942_v29, %v12161_v13  ;;  %v3221_v37 = vmul.f32 %v3205_v62, %v12068_v51  ;;  %v3236_v25 = vadd.f32 1.4214138, %v3220_v0  ;;  %v3206_v28 = vadd.f32 -1.4531521, %v3190_v10 }
 0x854   : > { %v9946_v60 = vpop.eup %9945  ;;  %9955 = vpow2.f32 %v3388_v24  ;;  %v12241_v15 = vadd.f32 1.0, %v3106_v56  ;;  %v12246_v30 = vsel %vm3046_vm0, -1.0, %v15059_v23  ;;  %v3207_v20 = vadd.f32 -1.4531521, %v3191_v21 }
 0x855   : > { %v3362_v34 = vmul.f32 %v3346_v5, %v3090_v6  ;;  %v3237_v2 = vadd.f32 1.4214138, %v3221_v37  ;;  %v3252_v45 = vmul.f32 %v3236_v25, %v12090_v40  ;;  %v3222_v13 = vmul.f32 %v3206_v28, %v12102_v39  ;;  %v12250_v16 = vpop.eup %9947 }
 0x856   : > { %15087 = vst [vmem:[#allocation39_spill] sm:$0xff] %v12250_v16  ;;  %v3153_v62 = vmul.f32 %v9946_v60, %v12185_v12  ;;  %9957 = vpow2.f32 %v3394_v63  ;;  %v12256_v24 = vsel %vm3047_vm1, -1.0, %v15059_v23  ;;  %v3223_v11 = vmul.f32 %v3207_v20, %v12098_v33 }
 0x857   : > { %v9950_v0 = vpop.eup %9949  ;;  %v3166_v10 = vsub.f32 2.0, %v3150_v32  ;;  %v3253_v37 = vmul.f32 %v3237_v2, %v12068_v51  ;;  %v3268_v6 = vadd.f32 -0.28449672, %v3252_v45  ;;  %v3238_v56 = vadd.f32 1.4214138, %v3222_v13 }
 0x858   : > { %v9952_v5 = vpop.eup %9951  ;;  %9959 = vrcp.f32 %v12241_v15  ;;  %v3239_v21 = vadd.f32 1.4214138, %v3223_v11  ;;  %v12264_v12 = vsel %vm3048_vm2, -1.0, %v15059_v23  ;;  %v3192_v22 = vmul.f32 1.0614054, %v12159_v55 }
 0x859   : > { %v3152_v63 = vmul.f32 %v9950_v0, %v12193_v42  ;;  %v12268_v25 = vmul.f32 1.442695, %v3362_v34  ;;  %v3269_v32 = vadd.f32 -0.28449672, %v3253_v37  ;;  %v3284_v2 = vmul.f32 %v3268_v6, %v12090_v40  ;;  %v12271_v45 = vpop.eup %9953 }
 0x85a   : > { %15089 = vst [vmem:[#allocation43_spill] sm:$0xff] %v12271_v45  ;;  %v3169_v28 = vsub.f32 2.0, %v3153_v62  ;;  %v3254_v20 = vmul.f32 %v3238_v56, %v12102_v39  ;;  %v3255_v13 = vmul.f32 %v3239_v21, %v12098_v33  ;;  %v3193_v47 = vmul.f32 1.0614054, %v12157_v41 }
 0x85b   : > { %15088 = vst [vmem:[#allocation40_spill] sm:$0xff] %v12268_v25  ;;  %v3155_v11 = vmul.f32 %v9952_v5, %v12195_v17  ;;  %v3285_v61 = vmul.f32 %v3269_v32, %v12068_v51  ;;  %v3300_v16 = vadd.f32 0.2548296, %v3284_v2  ;;  %v3208_v42 = vadd.f32 -1.4531521, %v3192_v22 }
 0x85c   : > { %v12278_v34 = vmul.f32 %v9942_v29, %v3166_v10  ;;  %v3270_v37 = vadd.f32 -0.28449672, %v3254_v20  ;;  %v3271_v25 = vadd.f32 -0.28449672, %v3255_v13  ;;  %v3209_v6 = vadd.f32 -1.4531521, %v3193_v47 }
 0x85d   : > { %v3168_v54 = vsub.f32 2.0, %v3152_v63  ;;  %v3301_v45 = vadd.f32 0.2548296, %v3285_v61  ;;  %v3316_v62 = vmul.f32 %v3300_v16, %v12090_v40  ;;  %v3224_v56 = vmul.f32 %v3208_v42, %v12159_v55 }
 0x85e   : > { %v12282_v21 = vpop.eup %9955  ;;  %vm3050_vm4 = vcmp.lt.f32.partialorder %v11995_v52, 0.0  ;;  %v3286_v17 = vmul.f32 %v3270_v37, %v12102_v39  ;;  %v3287_v32 = vmul.f32 %v3271_v25, %v12098_v33  ;;  %v12290_v29 = vsel %vm3049_vm3, -1.0, %v15059_v23 }
 0x85f   : > { %v3225_v10 = vmul.f32 %v3209_v6, %v12157_v41  ;;  %v3171_v61 = vsub.f32 2.0, %v3155_v11  ;;  %v3317_v40 = vmul.f32 %v3301_v45, %v12068_v51  ;;  %v3396_v16 = vmul.f32 %v12066_v9, %v3316_v62 }
 0x860   : > { %v3240_v22 = vadd.f32 1.4214138, %v3224_v56  ;;  %v12295_v63 = vpop.eup %9957  ;;  %v12297_v2 = vmul.f32 %v9946_v60, %v3169_v28  ;;  %v3302_v20 = vadd.f32 0.2548296, %v3286_v17  ;;  %v3303_v13 = vadd.f32 0.2548296, %v3287_v32 }
 0x861   : > { %v3241_v25 = vadd.f32 1.4214138, %v3225_v10  ;;  %v12299_v47 = vmul.f32 %v9950_v0, %v3168_v54  ;;  %v3397_v38 = vmul.f32 %v12055_v36, %v3317_v40  ;;  %v3412_v42 = vsub.f32 1.0, %v3396_v16 }
 0x862   : > { %v3256_v37 = vmul.f32 %v3240_v22, %v12159_v55  ;;  %v12303_v11 = vpop.eup %9959  ;;  %v3318_v51 = vmul.f32 %v3302_v20, %v12102_v39  ;;  %v3319_v9 = vmul.f32 %v3303_v13, %v12098_v33  ;;  %v3194_v60 = vmul.f32 1.0614054, %v12212_v18 }
 0x863   : > { %v3257_v45 = vmul.f32 %v3241_v25, %v12157_v41  ;;  %vm3051_vm6 = vcmp.lt.f32.partialorder %v11972_v27, 0.0  ;;  %v12310_v28 = vmul.f32 %v9952_v5, %v3171_v61  ;;  %v3413_v54 = vsub.f32 1.0, %v3397_v38 }
 0x864   : > { %v3428_v36 = vmul.f32 %v3412_v42, %v12229_v8  ;;  %v3272_v0 = vadd.f32 -0.28449672, %v3256_v37  ;;  %v3398_v6 = vmul.f32 %v12084_v4, %v3318_v51  ;;  %v3399_v62 = vmul.f32 %v12074_v49, %v3319_v9 }
 0x865   : > { %v3273_v56 = vadd.f32 -0.28449672, %v3257_v45  ;;  %v3195_v39 = vmul.f32 1.0614054, %v12205_v43  ;;  %v3154_v33 = vmul.f32 %v12303_v11, %v12241_v15  ;;  %v3429_v17 = vmul.f32 %v3413_v54, %v12008_v26 }
 0x866   : > { %v3444_v32 = vadd.f32 1.0, %v3428_v36  ;;  %v3288_v5 = vmul.f32 %v3272_v0, %v12159_v55  ;;  %v3414_v10 = vsub.f32 1.0, %v3398_v6  ;;  %v3415_v61 = vsub.f32 1.0, %v3399_v62 }
 0x867   : > { %v3289_v8 = vmul.f32 %v3273_v56, %v12157_v41  ;;  %v3210_v40 = vadd.f32 -1.4531521, %v3194_v60  ;;  %vm3052_vm10 = vcmp.lt.f32.partialorder %v12060_v46, 0.0  ;;  %v3445_v4 = vadd.f32 1.0, %v3429_v17  ;;  %v15090_v60 = vld [vmem:[#allocation34_spill] sm:$0xff] }
 0x868   : > { %v12323_v49 = vmul.f32 %v3444_v32, %v12003_v7  ;;  %v3304_v16 = vadd.f32 0.2548296, %v3288_v5  ;;  %v3211_v22 = vadd.f32 -1.4531521, %v3195_v39  ;;  %v3430_v15 = vmul.f32 %v3414_v10, %v12246_v30 }
 0x869   : > { %v3431_v26 = vmul.f32 %v3415_v61, %v12256_v24  ;;  %v3305_v20 = vadd.f32 0.2548296, %v3289_v8  ;;  %v3226_v13 = vmul.f32 %v3210_v40, %v12212_v18  ;;  %v12329_v25 = vmul.f32 %v3445_v4, %v12000_v19 }
 0x86a   : > { %v3320_v38 = vmul.f32 %v3304_v16, %v12159_v55  ;;  %v12335_v42 = vsel %vm3050_vm4, -1.0, %v15059_v23  ;;  %v3227_v7 = vmul.f32 %v3211_v22, %v12205_v43  ;;  %vm3053_vm11 = vcmp.lt.f32.partialorder %v12053_v44, 0.0 }
 0x86b   : > { %v3446_v30 = vadd.f32 1.0, %v3430_v15  ;;  %v3447_v37 = vadd.f32 1.0, %v3431_v26  ;;  %v3321_v24 = vmul.f32 %v3305_v20, %v12157_v41  ;;  %v3242_v51 = vadd.f32 1.4214138, %v3226_v13  ;;  %v15091_v26 = vld [vmem:[#allocation48_spill] sm:$0xff] }
 0x86c   : > { %v3170_v9 = vsub.f32 2.0, %v3154_v33  ;;  %v9356_v19 = vpack.c.bf16 %v12329_v25, %v12323_v49  ;;  %v3400_v55 = vmul.f32 %v12155_v1, %v3320_v38  ;;  %v3243_v45 = vadd.f32 1.4214138, %v3227_v7 }
 0x86d   : > { %v12344_v52 = vmul.f32 %v3446_v30, %v12015_v48  ;;  %v12347_v54 = vmul.f32 %v3447_v37, %v15090_v60  ;;  %v3401_v36 = vmul.f32 %v12130_v35, %v3321_v24  ;;  %v3258_v0 = vmul.f32 %v3242_v51, %v12212_v18  ;;  %v15092_v30 = vld [vmem:[#allocation49_spill] sm:$0xff] }
 0x86e   : > { %vm3054_vm12 = vcmp.lt.f32.partialorder %v12111_v53, 0.0  ;;  %9357 = vmatprep.subr.bf16.mxu0 %v9356_v19  ;;  %v3416_v41 = vsub.f32 1.0, %v3400_v55  ;;  %v3259_v6 = vmul.f32 %v3243_v45, %v12205_v43  ;;  %v3196_v62 = vmul.f32 1.0614054, %v12222_v31 }
 0x86f   : > { %v3197_v1 = vmul.f32 1.0614054, %v12220_v57  ;;  %9359 = vmatpush3.bf16.msra.mxu0 %v9356_v19  ;;  %v9360_v48 = vpack.c.bf16 %v12347_v54, %v12344_v52  ;;  %v3417_v56 = vsub.f32 1.0, %v3401_v36  ;;  %v3067_v35 = vsel %vm3051_vm6, -1.0, %v15059_v23  ;;  %v15093_v19 = vld [vmem:[#allocation35_spill] sm:$0xff] }
 0x870   : > { %v3274_v39 = vadd.f32 -0.28449672, %v3258_v0  ;;  %v3432_v33 = vmul.f32 %v3416_v41, %v12264_v12  ;;  %v3275_v17 = vadd.f32 -0.28449672, %v3259_v6  ;;  %v3212_v32 = vadd.f32 -1.4531521, %v3196_v62 }
 0x871   : > { %v3213_v5 = vadd.f32 -1.4531521, %v3197_v1  ;;  %v12362_v10 = vmul.f32 %v12303_v11, %v3170_v9  ;;  %9361 = vmatprep.subr.bf16.mxu0 %v9360_v48  ;;  %v3433_v61 = vmul.f32 %v3417_v56, %v12290_v29  ;;  %v3198_v40 = vmul.f32 1.0614054, %v12278_v34 }
 0x872   : > { %v3290_v8 = vmul.f32 %v3274_v39, %v12212_v18  ;;  %v3448_v4 = vadd.f32 1.0, %v3432_v33  ;;  %v3291_v27 = vmul.f32 %v3275_v17, %v12205_v43  ;;  %v3228_v16 = vmul.f32 %v3212_v32, %v12222_v31 }
 0x873   : > { %v3229_v12 = vmul.f32 %v3213_v5, %v12220_v57  ;;  %9363 = vmatpush3.bf16.msra.mxu0 %v9360_v48  ;;  %v3449_v22 = vadd.f32 1.0, %v3433_v61  ;;  %v12373_v11 = vsel %vm3052_vm10, -1.0, %v15059_v23  ;;  %v3199_v29 = vmul.f32 1.0614054, %v12233_v59 }
 0x874   : > { %v3306_v15 = vadd.f32 0.2548296, %v3290_v8  ;;  %v12377_v20 = vmul.f32 %v3448_v4, %v15091_v26  ;;  %v3307_v13 = vadd.f32 0.2548296, %v3291_v27  ;;  %v3244_v38 = vadd.f32 1.4214138, %v3228_v16 }
 0x875   : > { %v3245_v7 = vadd.f32 1.4214138, %v3229_v12  ;;  %v12380_v37 = vmul.f32 %v3449_v22, %v15092_v30  ;;  %v3214_v51 = vadd.f32 -1.4531521, %v3198_v40  ;;  %v3215_v9 = vadd.f32 -1.4531521, %v3199_v29 }
 0x876   : > { %v3322_v24 = vmul.f32 %v3306_v15, %v12212_v18  ;;  %vm3055_vm13 = vcmp.lt.f32.partialorder %v15093_v19, 0.0  ;;  %v3323_v46 = vmul.f32 %v3307_v13, %v12205_v43  ;;  %v3069_v55 = vsel %vm3053_vm11, -1.0, %v15059_v23 }
 0x877   : > { %v3260_v45 = vmul.f32 %v3244_v38, %v12222_v31  ;;  %v3261_v60 = vmul.f32 %v3245_v7, %v12220_v57  ;;  %v9364_v36 = vpack.c.bf16 %v12380_v37, %v12377_v20  ;;  %v3230_v18 = vmul.f32 %v3214_v51, %v12278_v34  ;;  %v15094_v38 = vld [vmem:[#allocation47_spill] sm:$0xff]  ;;  %v15095_v51 = vld [vmem:[#allocation45_spill] sm:$0xff] }
 0x878   : > { %v3402_v0 = vmul.f32 %v12197_v14, %v3322_v24  ;;  %v3231_v41 = vmul.f32 %v3215_v9, %v12233_v59  ;;  %v3403_v6 = vmul.f32 %v12174_v50, %v3323_v46  ;;  %v3200_v44 = vmul.f32 1.0614054, %v12299_v47 }
 0x879   : > { %v3276_v43 = vadd.f32 -0.28449672, %v3260_v45  ;;  %v3277_v62 = vadd.f32 -0.28449672, %v3261_v60  ;;  %9365 = vmatprep.subr.bf16.mxu0 %v9364_v36  ;;  %v12400_v48 = vsel %vm3054_vm12, -1.0, %v15059_v23 }
 0x87a   : > { %v3418_v1 = vsub.f32 1.0, %v3402_v0  ;;  %v3246_v56 = vadd.f32 1.4214138, %v3230_v18  ;;  %v3247_v39 = vadd.f32 1.4214138, %v3231_v41  ;;  %9367 = vmatpush3.bf16.msra.mxu0 %v9364_v36  ;;  %v3419_v14 = vsub.f32 1.0, %v3403_v6 }
 0x87b   : > { %v3292_v33 = vmul.f32 %v3276_v43, %v12222_v31  ;;  %v3293_v17 = vmul.f32 %v3277_v62, %v12220_v57  ;;  %v3201_v50 = vmul.f32 1.0614054, %v12297_v2  ;;  %v3216_v8 = vadd.f32 -1.4531521, %v3200_v44  ;;  %v15096_v62 = vld [vmem:[#allocation19_spill] sm:$0xff] }
 0x87c   : > { %v3434_v32 = vmul.f32 %v3418_v1, %v12335_v42  ;;  %v3262_v5 = vmul.f32 %v3246_v56, %v12278_v34  ;;  %v3263_v61 = vmul.f32 %v3247_v39, %v12233_v59  ;;  %v3435_v53 = vmul.f32 %v3419_v14, %v3067_v35 }
 0x87d   : > { %v3308_v40 = vadd.f32 0.2548296, %v3292_v33  ;;  %v3309_v4 = vadd.f32 0.2548296, %v3293_v17  ;;  %v3217_v27 = vadd.f32 -1.4531521, %v3201_v50  ;;  %v3232_v15 = vmul.f32 %v3216_v8, %v12299_v47 }
 0x87e   : > { %v3450_v16 = vadd.f32 1.0, %v3434_v32  ;;  %v3278_v12 = vadd.f32 -0.28449672, %v3262_v5  ;;  %v3279_v22 = vadd.f32 -0.28449672, %v3263_v61  ;;  %v3451_v29 = vadd.f32 1.0, %v3435_v53 }
 0x87f   : > { %v3324_v26 = vmul.f32 %v3308_v40, %v12222_v31  ;;  %v3325_v13 = vmul.f32 %v3309_v4, %v12220_v57  ;;  %v3233_v42 = vmul.f32 %v3217_v27, %v12297_v2  ;;  %v3248_v24 = vadd.f32 1.4214138, %v3232_v15  ;;  %v15097_v33 = vld [vmem:[#allocation39_spill] sm:$0xff]  ;;  %v15098_v50 = vld [vmem:[#allocation33_spill] sm:$0xff]  ;;  %v15099_v27 = vld [vmem:[#allocation16_spill] sm:$0xff] }
 0x880   : > { %v12413_v7 = vmul.f32 %v3450_v16, %v15094_v38  ;;  %v3294_v35 = vmul.f32 %v3278_v12, %v12278_v34  ;;  %v3295_v30 = vmul.f32 %v3279_v22, %v12233_v59  ;;  %v12418_v9 = vmul.f32 %v3451_v29, %v15095_v51  ;;  %v15100_v12 = vld [vmem:[#allocation50_spill] sm:$0xff] }
 0x881   : > { %v3404_v46 = vmul.f32 %v12218_v3, %v3324_v26  ;;  %v3405_v45 = vmul.f32 %v12209_v58, %v3325_v13  ;;  %v3249_v31 = vadd.f32 1.4214138, %v3233_v42  ;;  %v3071_v57 = vsel %vm3055_vm13, -1.0, %v15059_v23 }
 0x882   : > { %v3310_v60 = vadd.f32 0.2548296, %v3294_v35  ;;  %v3311_v36 = vadd.f32 0.2548296, %v3295_v30  ;;  %v3264_v0 = vmul.f32 %v3248_v24, %v12299_v47  ;;  %v9368_v18 = vpack.c.bf16 %v12418_v9, %v12413_v7  ;;  %v15101_v35 = vld [vmem:[#allocation40_spill] sm:$0xff] }
 0x883   : > { %v3420_v41 = vsub.f32 1.0, %v3404_v46  ;;  %v3421_v6 = vsub.f32 1.0, %v3405_v45  ;;  %v3265_v43 = vmul.f32 %v3249_v31, %v12297_v2  ;;  %vm3056_vm14 = vcmp.lt.f32.partialorder %v15096_v62, 0.0  ;;  %v15107_v62 = vld [vmem:[#allocation10_spill] sm:$0xff] }
 0x884   : > { %v3326_v58 = vmul.f32 %v3310_v60, %v12278_v34  ;;  %v3327_v3 = vmul.f32 %v3311_v36, %v12233_v59  ;;  %v3280_v44 = vadd.f32 -0.28449672, %v3264_v0  ;;  %v3202_v19 = vmul.f32 1.0614054, %v12362_v10  ;;  %9369 = vmatprep.subr.bf16.mxu0 %v9368_v18  ;;  %v15102_v36 = vld [vmem:[#allocation18_spill] sm:$0xff] }
 0x885   : > { %v3436_v1 = vmul.f32 %v3420_v41, %v12373_v11  ;;  %v3437_v56 = vmul.f32 %v3421_v6, %v3069_v55  ;;  %v3281_v39 = vadd.f32 -0.28449672, %v3265_v43  ;;  %v3203_v14 = vmul.f32 1.0614054, %v12310_v28  ;;  %9371 = vmatpush3.bf16.msra.mxu0 %v9368_v18  ;;  %v15104_v0 = vld [vmem:[#allocation26_spill] sm:$0xff]  ;;  %v15105_v41 = vld [vmem:[#allocation17_spill] sm:$0xff] }
 0x886   : > { %v3406_v17 = vmul.f32 %v15097_v33, %v3326_v58  ;;  %v3407_v32 = vmul.f32 %v15098_v50, %v3327_v3  ;;  %v3296_v5 = vmul.f32 %v3280_v44, %v12299_v47  ;;  %v3218_v34 = vadd.f32 -1.4531521, %v3202_v19  ;;  %v15106_v33 = vld [vmem:[#allocation14_spill] sm:$0xff] }
 0x887   : > { %v3452_v61 = vadd.f32 1.0, %v3436_v1  ;;  %v3453_v59 = vadd.f32 1.0, %v3437_v56  ;;  %v3297_v8 = vmul.f32 %v3281_v39, %v12297_v2  ;;  %v3219_v53 = vadd.f32 -1.4531521, %v3203_v14 }
 0x888   : > { %v3422_v40 = vsub.f32 1.0, %v3406_v17  ;;  %v3423_v4 = vsub.f32 1.0, %v3407_v32  ;;  %v3312_v11 = vadd.f32 0.2548296, %v3296_v5  ;;  %v3234_v55 = vmul.f32 %v3218_v34, %v12362_v10 }
 0x889   : > { %v12441_v16 = vmul.f32 %v3452_v61, %v15099_v27  ;;  %v12444_v22 = vmul.f32 %v3453_v59, %v15100_v12  ;;  %v3313_v15 = vadd.f32 0.2548296, %v3297_v8  ;;  %v3235_v29 = vmul.f32 %v3219_v53, %v12310_v28  ;;  %v15109_v27 = vld [vmem:[#allocation20_spill] sm:$0xff] }
 0x88a   : > { %v3438_v26 = vmul.f32 %v3422_v40, %v12400_v48  ;;  %v3439_v13 = vmul.f32 %v3423_v4, %v3071_v57  ;;  %v3328_v42 = vmul.f32 %v3312_v11, %v12299_v47  ;;  %v3250_v38 = vadd.f32 1.4214138, %v3234_v55  ;;  %v15103_v48 = vld [vmem:[#allocation43_spill] sm:$0xff]  ;;  %v15108_v11 = vld [vmem:[#allocation32_spill] sm:$0xff] }
 0x88b   : > { %9961 = vpow2.f32 %v15101_v35  ;;  %v9372_v30 = vpack.c.bf16 %v12444_v22, %v12441_v16  ;;  %v3329_v24 = vmul.f32 %v3313_v15, %v12297_v2  ;;  %v3251_v51 = vadd.f32 1.4214138, %v3235_v29 }
 0x88c   : > { %v3454_v46 = vadd.f32 1.0, %v3438_v26  ;;  %v3455_v45 = vadd.f32 1.0, %v3439_v13  ;;  %v3408_v31 = vmul.f32 %v12282_v21, %v3328_v42  ;;  %v3266_v60 = vmul.f32 %v3250_v38, %v12362_v10  ;;  %v15110_v38 = vld [vmem:[#allocation27_spill] sm:$0xff] }
 0x88d   : > { %vm3057_vm15 = vcmp.lt.f32.partialorder %v15102_v36, 0.0  ;;  %9373 = vmatprep.subr.bf16.mxu0 %v9372_v30  ;;  %v3409_v47 = vmul.f32 %v15103_v48, %v3329_v24  ;;  %v3267_v57 = vmul.f32 %v3251_v51, %v12310_v28  ;;  %v3072_v21 = vsel %vm3056_vm14, -1.0, %v15059_v23  ;;  %v15111_v24 = vld [vmem:[#allocation15_spill] sm:$0xff]  ;;  %v3631_v36 = vld [vmem:[#allocation5 + $0x280] sm:$0xff] }
 0x88e   : > { %9375 = vmatpush3.bf16.msra.mxu0 %v9372_v30  ;;  %v12459_v18 = vmul.f32 %v3454_v46, %v15104_v0  ;;  %v12462_v2 = vmul.f32 %v3455_v45, %v15105_v41  ;;  %v3424_v6 = vsub.f32 1.0, %v3408_v31  ;;  %v3282_v43 = vadd.f32 -0.28449672, %v3266_v60  ;;  %v10237_v60 = vld [vmem:[%s14839_s1 + $0x8] sm:$0xff] }
 0x88f   : > { %v3425_v58 = vsub.f32 1.0, %v3409_v47  ;;  %v3283_v3 = vadd.f32 -0.28449672, %v3267_v57  ;;  %v3073_v19 = vsel %vm3057_vm15, -1.0, %v15059_v23  ;;  %v3024_v17 = vmul.f32 0.5, %v15106_v33  ;;  %v3632_v48 = vld [vmem:[#allocation5 + $0x288] sm:$0xff] }
 0x890   : > { %v9376_v44 = vpack.c.bf16 %v12462_v2, %v12459_v18  ;;  %v3440_v1 = vmul.f32 %v3424_v6, %v3072_v21  ;;  %v3298_v56 = vmul.f32 %v3282_v43, %v12362_v10  ;;  %v3025_v5 = vmul.f32 0.5, %v15107_v62  ;;  %v3598_v47 = vld [vmem:[#allocation3 + $0x280] sm:$0xff]  ;;  %v3599_v0 = vld [vmem:[#allocation3 + $0x288] sm:$0xff] }
 0x891   : > { %v3441_v39 = vmul.f32 %v3425_v58, %v3073_v19  ;;  %v3299_v14 = vmul.f32 %v3283_v3, %v12310_v28  ;;  %vm3058_vm0 = vcmp.lt.f32.partialorder %v15108_v11, 0.0  ;;  %vm3059_vm1 = vcmp.lt.f32.partialorder %v15109_v27, 0.0  ;;  %v3615_v41 = vld [vmem:[#allocation5 + $0x200] sm:$0xff]  ;;  %v3616_v6 = vld [vmem:[#allocation5 + $0x208] sm:$0xff] }
 0x892   : > { %9377 = vmatprep.subr.bf16.mxu0 %v9376_v44  ;;  %v3456_v50 = vadd.f32 1.0, %v3440_v1  ;;  %v3314_v32 = vadd.f32 0.2548296, %v3298_v56  ;;  %v3074_v26 = vsel %vm3058_vm0, -1.0, %v15059_v23  ;;  %v3075_v13 = vsel %vm3059_vm1, -1.0, %v15059_v23  ;;  %v3582_v58 = vld [vmem:[#allocation3 + $0x200] sm:$0xff] }
 0x893   : > { %9379 = vmatpush3.bf16.msra.mxu0 %v9376_v44  ;;  %v3457_v34 = vadd.f32 1.0, %v3441_v39  ;;  %v3315_v61 = vadd.f32 0.2548296, %v3299_v14  ;;  %v3026_v35 = vmul.f32 0.5, %v15110_v38  ;;  %v3027_v51 = vmul.f32 0.5, %v15111_v24  ;;  %v3583_v3 = vld [vmem:[#allocation3 + $0x208] sm:$0xff] }
 0x894   : > { %v12474_v59 = vmul.f32 %v3456_v50, %v3024_v17  ;;  %v3330_v8 = vmul.f32 %v3314_v32, %v12362_v10  ;;  %v12498_v57 = vpack.c.bf16 %v3632_v48, %v3631_v36  ;;  %v12500_v43 = vpack.c.bf16 %v3599_v0, %v3598_v47  ;;  %v3633_v44 = vld [vmem:[#allocation5 + $0x290] sm:$0xff]  ;;  %v3634_v1 = vld [vmem:[#allocation5 + $0x298] sm:$0xff]  ;;  %v3603_v11 = vld [vmem:[#allocation3 + $0x2a8] sm:$0xff] }
 0x895   : > { %v9962_v53 = vpop.eup %9961  ;;  %v12477_v40 = vmul.f32 %v3457_v34, %v3025_v5  ;;  %v3331_v4 = vmul.f32 %v3315_v61, %v12310_v28  ;;  %v12502_v21 = vpack.c.bf16 %v3616_v6, %v3615_v41  ;;  %v12505_v19 = vpack.c.bf16 %v3583_v3, %v3582_v58  ;;  %v3600_v56 = vld [vmem:[#allocation3 + $0x290] sm:$0xff]  ;;  %v3601_v39 = vld [vmem:[#allocation3 + $0x298] sm:$0xff]  ;;  %v3635_v34 = vld [vmem:[#allocation5 + $0x2a0] sm:$0xff] }
 0x896   : > { %v3410_v55 = vmul.f32 %v9962_v53, %v3330_v8  ;;  %9389 = vmatprep.subr.bf16.mxu1 %v12500_v43  ;;  %v12509_v14 = vpack.c.bf16 %v3634_v1, %v3633_v44  ;;  %v12511_v33 = vpack.c.bf16 %v3601_v39, %v3600_v56  ;;  %v3617_v17 = vld [vmem:[#allocation5 + $0x210] sm:$0xff]  ;;  %v3618_v50 = vld [vmem:[#allocation5 + $0x218] sm:$0xff]  ;;  %v3636_v61 = vld [vmem:[#allocation5 + $0x2a8] sm:$0xff] }
 0x897   : > { %v9380_v12 = vpack.c.bf16 %v12477_v40, %v12474_v59  ;;  %v3411_v15 = vmul.f32 %v12295_v63, %v3331_v4  ;;  %v3584_v32 = vld [vmem:[#allocation3 + $0x210] sm:$0xff]  ;;  %9391 = vmatpush3.bf16.msra.mxu1 %v12505_v19  ;;  %v12514_v62 = vpack.c.bf16 %v3618_v50, %v3617_v17  ;;  %v3585_v5 = vld [vmem:[#allocation3 + $0x218] sm:$0xff]  ;;  %v12520_v53 = vpack.c.bf16 %v3636_v61, %v3635_v34  ;;  %v3602_v4 = vld [vmem:[#allocation3 + $0x2a0] sm:$0xff] }
 0x898   : > { %v3426_v29 = vsub.f32 1.0, %v3410_v55  ;;  %9393 = vmatprep.subr.bf16.mxu1 %v12511_v33  ;;  %v12518_v8 = vpack.c.bf16 %v3585_v5, %v3584_v32  ;;  %v3619_v55 = vld [vmem:[#allocation5 + $0x220] sm:$0xff]  ;;  %v12522_v27 = vpack.c.bf16 %v3603_v11, %v3602_v4  ;;  %v3622_v24 = vld [vmem:[#allocation5 + $0x238] sm:$0xff]  ;;  %v3640_v36 = vld [vmem:[#allocation5 + $0x2c8] sm:$0xff] }
 0x899   : > { %9381 = vmatprep.subr.bf16.mxu0 %v9380_v12  ;;  %v3427_v10 = vsub.f32 1.0, %v3411_v15  ;;  %v3586_v15 = vld [vmem:[#allocation3 + $0x220] sm:$0xff]  ;;  %v3607_v47 = vld [vmem:[#allocation3 + $0x2c8] sm:$0xff]  ;;  %v3641_v39 = vld [vmem:[#allocation5 + $0x2d0] sm:$0xff] }
 0x89a   : > { %9383 = vmatpush3.bf16.msra.mxu0 %v9380_v12  ;;  %v3442_v42 = vmul.f32 %v3426_v29, %v3074_v26  ;;  %v3620_v12 = vld [vmem:[#allocation5 + $0x228] sm:$0xff]  ;;  %v3606_v48 = vld [vmem:[#allocation3 + $0x2c0] sm:$0xff]  ;;  %v3642_v17 = vld [vmem:[#allocation5 + $0x2d8] sm:$0xff] }
 0x89b   : > { %v3443_v28 = vmul.f32 %v3427_v10, %v3075_v13  ;;  %v3587_v29 = vld [vmem:[#allocation3 + $0x228] sm:$0xff]  ;;  %v12525_v26 = vpack.c.bf16 %v3620_v12, %v3619_v55  ;;  %v3637_v10 = vld [vmem:[#allocation5 + $0x2b0] sm:$0xff]  ;;  %v3638_v13 = vld [vmem:[#allocation5 + $0x2b8] sm:$0xff]  ;;  %9395 = vmatpush3.bf16.msra.mxu1 %v12518_v8  ;;  %v12546_v1 = vpack.c.bf16 %v3607_v47, %v3606_v48  ;;  %v12555_v5 = vpack.c.bf16 %v3642_v17, %v3641_v39 }
 0x89c   : > { %v3458_v30 = vadd.f32 1.0, %v3442_v42  ;;  %v3604_v42 = vld [vmem:[#allocation3 + $0x2b0] sm:$0xff]  ;;  %v12531_v38 = vpack.c.bf16 %v3638_v13, %v3637_v10  ;;  %9397 = vmatprep.subr.bf16.mxu1 %v12522_v27  ;;  %v3623_v58 = vld [vmem:[#allocation5 + $0x240] sm:$0xff]  ;;  %v3624_v3 = vld [vmem:[#allocation5 + $0x248] sm:$0xff] }
 0x89d   : > { %v3459_v46 = vadd.f32 1.0, %v3443_v28  ;;  %v12529_v28 = vpack.c.bf16 %v3587_v29, %v3586_v15  ;;  %v3590_v44 = vld [vmem:[#allocation3 + $0x240] sm:$0xff]  ;;  %v3591_v56 = vld [vmem:[#allocation3 + $0x248] sm:$0xff]  ;;  %v12549_v50 = vpack.c.bf16 %v3624_v3, %v3623_v58  ;;  %v3608_v34 = vld [vmem:[#allocation3 + $0x2d0] sm:$0xff] }
 0x89e   : > { %v12489_v45 = vmul.f32 %v3458_v30, %v3026_v35  ;;  %v3605_v35 = vld [vmem:[#allocation3 + $0x2b8] sm:$0xff]  ;;  %v3621_v30 = vld [vmem:[#allocation5 + $0x230] sm:$0xff]  ;;  %v12553_v32 = vpack.c.bf16 %v3591_v56, %v3590_v44  ;;  %v3643_v13 = vld [vmem:[#allocation5 + $0x2e0] sm:$0xff] }
 0x89f   : > { %v12491_v31 = vmul.f32 %v3459_v46, %v3027_v51  ;;  %v12534_v51 = vpack.c.bf16 %v3605_v35, %v3604_v42  ;;  %v3588_v46 = vld [vmem:[#allocation3 + $0x230] sm:$0xff]  ;;  %v12537_v0 = vpack.c.bf16 %v3622_v24, %v3621_v30  ;;  %9399 = vmatpush3.bf16.msra.mxu1 %v12529_v28  ;;  %v3609_v61 = vld [vmem:[#allocation3 + $0x2d8] sm:$0xff]  ;;  %v3644_v42 = vld [vmem:[#allocation5 + $0x2e8] sm:$0xff] }
 0x8a0   : > { %v3625_v4 = vld [vmem:[#allocation5 + $0x250] sm:$0xff]  ;;  %v12561_v11 = vpack.c.bf16 %v3609_v61, %v3608_v34  ;;  %v3626_v55 = vld [vmem:[#allocation5 + $0x258] sm:$0xff]  ;;  %v12568_v35 = vpack.c.bf16 %v3644_v42, %v3643_v13  ;;  %v3610_v30 = vld [vmem:[#allocation3 + $0x2e0] sm:$0xff] }
 0x8a1   : > { %15112 = vst [vmem:[#allocation34_spill] sm:$0xff] %v12491_v31  ;;  %v9384_v63 = vpack.c.bf16 %v12491_v31, %v12489_v45  ;;  %9401 = vmatprep.subr.bf16.mxu1 %v12534_v51  ;;  %v3592_v12 = vld [vmem:[#allocation3 + $0x250] sm:$0xff]  ;;  %v3593_v15 = vld [vmem:[#allocation3 + $0x258] sm:$0xff]  ;;  %v12563_v29 = vpack.c.bf16 %v3626_v55, %v3625_v4  ;;  %v3611_v24 = vld [vmem:[#allocation3 + $0x2e8] sm:$0xff] }
 0x8a2   : > { %v12565_v10 = vpack.c.bf16 %v3593_v15, %v3592_v12  ;;  %v3595_v48 = vld [vmem:[#allocation3 + $0x268] sm:$0xff]  ;;  %v3645_v3 = vld [vmem:[#allocation5 + $0x2f0] sm:$0xff]  ;;  %v3646_v44 = vld [vmem:[#allocation5 + $0x2f8] sm:$0xff] }
 0x8a3   : > { %9385 = vmatprep.subr.bf16.mxu0 %v9384_v63  ;;  %v12580_v56 = vpack.c.bf16 %v3646_v44, %v3645_v3  ;;  %v3612_v39 = vld [vmem:[#allocation3 + $0x2f0] sm:$0xff]  ;;  %v3613_v17 = vld [vmem:[#allocation3 + $0x2f8] sm:$0xff] }
 0x8a4   : > { %9387 = vmatpush3.bf16.msra.mxu0 %v9384_v63  ;;  %v3589_v63 = vld [vmem:[#allocation3 + $0x238] sm:$0xff]  ;;  %v3629_v34 = vld [vmem:[#allocation5 + $0x270] sm:$0xff]  ;;  %v12585_v61 = vpack.c.bf16 %v3613_v17, %v3612_v39 }
 0x8a5   : > { %9421 = vmatprep.subr.bf16.mxu0 %v12498_v57  ;;  %v12541_v41 = vpack.c.bf16 %v3589_v63, %v3588_v46  ;;  %v3627_v46 = vld [vmem:[#allocation5 + $0x260] sm:$0xff]  ;;  %v12573_v63 = vpack.c.bf16 %v3611_v24, %v3610_v30  ;;  %v3630_v4 = vld [vmem:[#allocation5 + $0x278] sm:$0xff]  ;;  %v3596_v55 = vld [vmem:[#allocation3 + $0x270] sm:$0xff] }
 0x8a6   : > { %v3597_v12 = vld [vmem:[#allocation3 + $0x278] sm:$0xff]  ;;  %v12587_v15 = vpack.c.bf16 %v3630_v4, %v3629_v34  ;;  %v15113_v34 = vld [vmem:[#allocation12_spill] sm:$0xff] }
 0x8a7   : > { %8823 = vmatmul.mubr.f32.vlgmr.msra.gmra.mrb[28].mxu0 %v10237_v60  ;;  %v3639_v60 = vld [vmem:[#allocation5 + $0x2c0] sm:$0xff]  ;;  %9403 = vmatpush3.bf16.msra.mxu1 %v12541_v41  ;;  %v12589_v13 = vpack.c.bf16 %v3597_v12, %v3596_v55  ;;  %v15114_v55 = vld [vmem:[#allocation13_spill] sm:$0xff] }
 0x8a8   : > { %9423 = vmatpush3.bf16.msra.mxu0 %v12502_v21  ;;  %v12543_v6 = vpack.c.bf16 %v3640_v36, %v3639_v60  ;;  %9405 = vmatprep.subr.bf16.mxu1 %v12546_v1  ;;  %v3628_v60 = vld [vmem:[#allocation5 + $0x268] sm:$0xff]  ;;  %v3594_v36 = vld [vmem:[#allocation3 + $0x260] sm:$0xff] }
 0x8a9   : > { %9425 = vmatprep.subr.bf16.mxu0 %v12509_v14  ;;  %v12575_v47 = vpack.c.bf16 %v3628_v60, %v3627_v46  ;;  %v12577_v58 = vpack.c.bf16 %v3595_v48, %v3594_v36 }
 0x8ab   : > { %9407 = vmatpush3.bf16.msra.mxu1 %v12553_v32 }
 0x8ac   : > { %9427 = vmatpush3.bf16.msra.mxu0 %v12514_v62  ;;  %9409 = vmatprep.subr.bf16.mxu1 %v12561_v11 }
 0x8ad   : > { %9429 = vmatprep.subr.bf16.mxu0 %v12520_v53 }
 0x8af   : > { %9411 = vmatpush3.bf16.msra.mxu1 %v12565_v10 }
 0x8b0   : > { %9431 = vmatpush3.bf16.msra.mxu0 %v12525_v26  ;;  %9413 = vmatprep.subr.bf16.mxu1 %v12573_v63 }
 0x8b1   : > { %9433 = vmatprep.subr.bf16.mxu0 %v12531_v38 }
 0x8b3   : > { %9415 = vmatpush3.bf16.msra.mxu1 %v12577_v58 }
 0x8b4   : > { %9435 = vmatpush3.bf16.msra.mxu0 %v12537_v0  ;;  %9417 = vmatprep.subr.bf16.mxu1 %v12585_v61 }
 0x8b5   : > { %9437 = vmatprep.subr.bf16.mxu0 %v12543_v6 }
 0x8b7   : > { %9419 = vmatpush3.bf16.msra.mxu1 %v12589_v13 }
 0x8b8   : > { %9439 = vmatpush3.bf16.msra.mxu0 %v12549_v50  ;;  %9453 = vmatprep.subr.bf16.mxu1 %v12500_v43 }
 0x8b9   : > { %9441 = vmatprep.subr.bf16.mxu0 %v12555_v5 }
 0x8bc   : > { %9443 = vmatpush3.bf16.msra.mxu0 %v12563_v29 }
 0x8bd   : > { %9445 = vmatprep.subr.bf16.mxu0 %v12568_v35 }
 0x8c0   : > { %9447 = vmatpush3.bf16.msra.mxu0 %v12575_v47 }
 0x8c1   : > { %9449 = vmatprep.subr.bf16.mxu0 %v12580_v56 }
 0x8c4   : > { %9451 = vmatpush3.bf16.msra.mxu0 %v12587_v15 }
 0x8c5   : > { %9485 = vmatprep.subr.bf16.mxu0 %v12498_v57 }
 0x97a   : > { %v8824_v42 = vpop.f32.mrb[28].mxu0 }
 0x97b   : > { %3567 = vrot.lane.b32.xlu0 %v8824_v42, %s10350_s22  ;;  %v3542_v30 = vpop.f32.mrb[29].mxu0 }
 0x97c   : > { %3552 = vrot.lane.b32.xlu1 %v3542_v30, %s10350_s22 }
 0x97f   : > { %3570 = vrot.lane.b32.xlu0 %v8824_v42, %s10351_s20 }
 0x980   : > { %3555 = vrot.lane.b32.xlu1 %v3542_v30, %s10351_s20 }
 0x983   : > { %3573 = vrot.lane.b32.xlu0 %v8824_v42, %s10352_s27 }
 0x984   : > { %3558 = vrot.lane.b32.xlu1 %v3542_v30, %s10352_s27 }
 0x9ed   : > { %v3568_v24 = vpop.permute.xlu0 %3567 }
 0x9ee   : > { %v3553_v46 = vpop.permute.xlu1 %3552  ;;  %v3576_v48 = vsel %vm883_vm5, %v8824_v42, %v3568_v24 }
 0x9ef   : > { %v3561_v3 = vsel %vm883_vm5, %v3542_v30, %v3553_v46 }
 0x9f1   : > { %v3571_v60 = vpop.permute.xlu0 %3570 }
 0x9f2   : > { %v3556_v36 = vpop.permute.xlu1 %3555  ;;  %v3577_v57 = vsel %vm885_vm7, %v3576_v48, %v3571_v60 }
 0x9f3   : > { %v3562_v43 = vsel %vm885_vm7, %v3561_v3, %v3556_v36  ;;  %v15118_v36 = vld [vmem:[#allocation28_spill] sm:$0xff] }
 0x9f4   : > { %v4298_v48 = vmul.f32 0.7, %v15118_v36  ;;  %v15119_v3 = vld [vmem:[#allocation24_spill] sm:$0xff] }
 0x9f5   : > { %v3574_v44 = vpop.permute.xlu0 %3573 }
 0x9f6   : > { %v3578_v39 = vsel %vm887_vm8, %v3577_v57, %v3574_v44  ;;  %v3559_v17 = vpop.permute.xlu1 %3558  ;;  %v4297_v57 = vmul.f32 0.7, %v15119_v3 }
 0x9f7   : > { %v3579_v4 = vmul.f32 %v3578_v39, %v15113_v34  ;;  %v3580_v12 = vmul.f32 %v3578_v39, %v15114_v55  ;;  %v3563_v23 = vsel %vm887_vm8, %v3562_v43, %v3559_v17  ;;  %v15120_v17 = vld [vmem:[#allocation31_spill] sm:$0xff] }
 0x9f8   : > { %v3564_v31 = vmul.f32 %v3563_v23, %v15113_v34  ;;  %v3565_v42 = vmul.f32 %v3563_v23, %v15114_v55  ;;  %v7698_v23 = vld [vmem:[%s14845_s7 + $0x40] sm:$0xff] }
 0x9f9   : > { %3781 = vmatprep.mubr.f32.mxu0 %v3580_v12 }
 0x9fa   : > { %3711 = vmatprep.mubr.f32.mxu1 %v3565_v42  ;;  %3782 = vmatmul.mubr.f32.vlgmr.msra.gmra.mrb[30].mxu0 %v3579_v4 }
 0x9fb   : > { %9487 = vmatpush3.bf16.msra.mxu0 %v12502_v21  ;;  %3712 = vmatmul.mubr.f32.vlgmr.msra.gmra.mrb[40].mxu1 %v3564_v31  ;;  %v7699_v21 = vld [vmem:[%s14845_s7 + $0x48] sm:$0xff] }
 0x9fc   : > { %9455 = vmatpush3.bf16.msra.mxu1 %v12505_v19  ;;  %3922 = vmatprep.mubr.f32.mxu0 %v3565_v42  ;;  %v9516_v19 = vpack.c.bf16 %v7699_v21, %v7698_v23  ;;  %v15121_v23 = vld [vmem:[#allocation30_spill] sm:$0xff] }
 0x9fd   : > { %3852 = vmatprep.mubr.f32.mxu1 %v3580_v12  ;;  %9489 = vmatprep.subr.bf16.mxu0 %v12509_v14  ;;  %v7700_v14 = vld [vmem:[%s14845_s7 + $0x50] sm:$0xff]  ;;  %v4299_v21 = vmul.f32 0.7, %v15121_v23 }
 0x9fe   : > { %9457 = vmatprep.subr.bf16.mxu1 %v12511_v33  ;;  %v7701_v33 = vld [vmem:[%s14845_s7 + $0x58] sm:$0xff] }
 0x9ff   : > { %9491 = vmatpush3.bf16.msra.mxu0 %v12514_v62  ;;  %v9520_v62 = vpack.c.bf16 %v7701_v33, %v7700_v14 }
 0xa00   : > { %9459 = vmatpush3.bf16.msra.mxu1 %v12518_v8  ;;  %9493 = vmatprep.subr.bf16.mxu0 %v12520_v53  ;;  %v10238_v8 = vld [vmem:[%s14839_s1] sm:$0xff] }
 0xa01   : > { %9461 = vmatprep.subr.bf16.mxu1 %v12522_v27  ;;  %v10240_v27 = vld [vmem:[%s14840_s2 + $0x8] sm:$0xff] }
 0xa03   : > { %9495 = vmatpush3.bf16.msra.mxu0 %v12525_v26  ;;  %v10241_v26 = vld [vmem:[%s14840_s2 + $0x10] sm:$0xff] }
 0xa04   : > { %9463 = vmatpush3.bf16.msra.mxu1 %v12529_v28  ;;  %9497 = vmatprep.subr.bf16.mxu0 %v12531_v38  ;;  %v10242_v28 = vld [vmem:[%s14840_s2 + $0x18] sm:$0xff]  ;;  %v10243_v38 = vld [vmem:[%s14840_s2 + $0x20] sm:$0xff] }
 0xa05   : > { %9465 = vmatprep.subr.bf16.mxu1 %v12534_v51  ;;  %v10244_v51 = vld [vmem:[%s14840_s2 + $0x28] sm:$0xff] }
 0xa07   : > { %9499 = vmatpush3.bf16.msra.mxu0 %v12537_v0  ;;  %v10245_v0 = vld [vmem:[%s14840_s2 + $0x30] sm:$0xff] }
 0xa08   : > { %9467 = vmatpush3.bf16.msra.mxu1 %v12541_v41  ;;  %9501 = vmatprep.subr.bf16.mxu0 %v12543_v6  ;;  %v10246_v41 = vld [vmem:[%s14840_s2 + $0x38] sm:$0xff]  ;;  %v10247_v6 = vld [vmem:[%s14840_s2 + $0x40] sm:$0xff] }
 0xa09   : > { %9469 = vmatprep.subr.bf16.mxu1 %v12546_v1  ;;  %v10248_v1 = vld [vmem:[%s14840_s2 + $0x48] sm:$0xff] }
 0xa0b   : > { %9503 = vmatpush3.bf16.msra.mxu0 %v12549_v50  ;;  %v10249_v50 = vld [vmem:[%s14840_s2 + $0x50] sm:$0xff] }
 0xa0c   : > { %9471 = vmatpush3.bf16.msra.mxu1 %v12553_v32  ;;  %9505 = vmatprep.subr.bf16.mxu0 %v12555_v5  ;;  %v10250_v32 = vld [vmem:[%s14840_s2 + $0x58] sm:$0xff]  ;;  %v10251_v5 = vld [vmem:[%s14840_s2 + $0x60] sm:$0xff] }
 0xa0d   : > { %9473 = vmatprep.subr.bf16.mxu1 %v12561_v11  ;;  %v10252_v11 = vld [vmem:[%s14840_s2 + $0x68] sm:$0xff] }
 0xa0f   : > { %9507 = vmatpush3.bf16.msra.mxu0 %v12563_v29  ;;  %v10253_v29 = vld [vmem:[%s14840_s2 + $0x70] sm:$0xff] }
 0xa10   : > { %9475 = vmatpush3.bf16.msra.mxu1 %v12565_v10  ;;  %9509 = vmatprep.subr.bf16.mxu0 %v12568_v35  ;;  %v10254_v10 = vld [vmem:[%s14840_s2 + $0x78] sm:$0xff]  ;;  %v12756_v35 = vld [vmem:[%s14846_s8 + $0x2] ss:$0 sm:$0xff] }
 0xa11   : > { %9477 = vmatprep.subr.bf16.mxu1 %v12573_v63 }
 0xa13   : > { %9511 = vmatpush3.bf16.msra.mxu0 %v12575_v47 }
 0xa14   : > { %9479 = vmatpush3.bf16.msra.mxu1 %v12577_v58  ;;  %9513 = vmatprep.subr.bf16.mxu0 %v12580_v56  ;;  %v15116_v58 = vld [vmem:[#allocation23_spill] sm:$0xff] }
 0xa15   : > { %9481 = vmatprep.subr.bf16.mxu1 %v12585_v61  ;;  %v4296_v56 = vmul.f32 0.7, %v15116_v58 }
 0xa17   : > { %9515 = vmatpush3.bf16.msra.mxu0 %v12587_v15 }
 0xa18   : > { %9483 = vmatpush3.bf16.msra.mxu1 %v12589_v13  ;;  %v15117_v13 = vld [vmem:[#allocation22_spill] sm:$0xff] }
 0xa19   : > { %9517 = vmatprep.subr.bf16.mxu1 %v9516_v19  ;;  %v4295_v30 = vmul.f32 0.7, %v15117_v13 }
 0xa1a   : > { %3923 = vmatmul.mubr.f32.vlgmr.msra.gmra.mrb[32].mxu0 %v3564_v31 }
 0xa1b   : > { %3853 = vmatmul.mubr.f32.vlgmr.msra.gmra.mrb[42].mxu1 %v3579_v4  ;;  %8917 = vmatprep.mubr.f32.mxu0 %v10238_v8  ;;  %v4300_v4 = vmul.f32 0.7, %v15120_v17  ;;  %v15123_v8 = vld [vmem:[#allocation36_spill] sm:$0xff] }
 0xa1c   : > { %9519 = vmatpush3.bf16.msra.mxu1 %v9516_v19  ;;  %8833 = vmatprep.mubr.msk.f32.mxu1 %vm883_vm5, %v12323_v49  ;;  %v15115_v49 = vld [vmem:[#allocation34_spill] sm:$0xff]  ;;  %v15122_v19 = vld [vmem:[#allocation29_spill] sm:$0xff] }
 0xa1d   : > { %9521 = vmatprep.subr.bf16.mxu1 %v9520_v62  ;;  %v12769_v14 = vmul.f32 0.7, %v15122_v19 }
 0xa20   : > { %9523 = vmatpush3.bf16.msra.mxu1 %v9520_v62 }
 0xa23   : > { %8834 = vmatmul.mubr.msk.f32.vlgmr.msra.gmra.mrb[44].mxu1 %vm883_vm5, %v12329_v25  ;;  %v10239_v25 = vld [vmem:[%s14840_s2] sm:$0xff] }
 0xa24   : > { %8836 = vmatprep.mubr.msk.f32.mxu1 %vm883_vm5, %v12344_v52 }
 0xa27   : > { %8837 = vmatmul.mubr.msk.f32.gmra.mrb[46].mxu1 %vm883_vm5, %v12347_v54 }
 0xa28   : > { %8839 = vmatprep.mubr.msk.f32.mxu1 %vm883_vm5, %v12377_v20 }
 0xa2b   : > { %8840 = vmatmul.mubr.msk.f32.gmra.mrb[48].mxu1 %vm883_vm5, %v12380_v37 }
 0xa2c   : > { %8842 = vmatprep.mubr.msk.f32.mxu1 %vm883_vm5, %v12413_v7 }
 0xa2f   : > { %8843 = vmatmul.mubr.msk.f32.gmra.mrb[50].mxu1 %vm883_vm5, %v12418_v9 }
 0xa30   : > { %8845 = vmatprep.mubr.msk.f32.mxu1 %vm883_vm5, %v12441_v16 }
 0xa33   : > { %8846 = vmatmul.mubr.msk.f32.gmra.mrb[52].mxu1 %vm883_vm5, %v12444_v22 }
 0xa34   : > { %8848 = vmatprep.mubr.msk.f32.mxu1 %vm883_vm5, %v12459_v18 }
 0xa37   : > { %8849 = vmatmul.mubr.msk.f32.gmra.mrb[54].mxu1 %vm883_vm5, %v12462_v2 }
 0xa38   : > { %8851 = vmatprep.mubr.msk.f32.mxu1 %vm883_vm5, %v12474_v59 }
 0xa3b   : > { %8852 = vmatmul.mubr.msk.f32.gmra.mrb[56].mxu1 %vm883_vm5, %v12477_v40 }
 0xa3c   : > { %8854 = vmatprep.mubr.msk.f32.mxu1 %vm883_vm5, %v12489_v45 }
 0xa3f   : > { %8855 = vmatmul.mubr.msk.f32.gmra.mrb[58].mxu1 %vm883_vm5, %v15115_v49  ;;  %v12772_v49 = vmul.f32 0.7, %v15123_v8 }
 0xa40   : > { %8861 = vmatprep.mubr.msk.f32.mxu1 %vm1448_vm9, %v10239_v25  ;;  %v15124_v25 = vld [vmem:[#allocation38_spill] sm:$0xff] }
 0xacd   : > { %v8273_v52 = vpop.f32.mrb[30].mxu0 }
 0xace   : > { %v8238_v54 = vpop.f32.mrb[40].mxu1  ;;  %v8274_v20 = vpop.f32.mrb[31].mxu0 }
 0xacf   : > { %v8275_v37 = vadd.f32 %v8274_v20, %v8273_v52  ;;  %v8239_v7 = vpop.f32.mrb[41].mxu1  ;;  %v12775_v52 = vmul.f32 0.7, %v15124_v25 }
 0xad0   : > { %v8240_v9 = vadd.f32 %v8239_v7, %v8238_v54  ;;  %v15125_v7 = vld [vmem:[#allocation37_spill] sm:$0xff] }
 0xad2   : > { %v3787_v16 = vsub.f32 %v8240_v9, %v8275_v37  ;;  %v12778_v9 = vmul.f32 0.7, %v15125_v7 }
 0xaed   : > { %v8343_v22 = vpop.f32.mrb[32].mxu0 }
 0xaee   : > { %v8308_v18 = vpop.f32.mrb[42].mxu1  ;;  %v8344_v2 = vpop.f32.mrb[33].mxu0 }
 0xaef   : > { %v8345_v59 = vadd.f32 %v8344_v2, %v8343_v22  ;;  %v8309_v40 = vpop.f32.mrb[43].mxu1 }
 0xaf0   : > { %v8310_v45 = vadd.f32 %v8309_v40, %v8308_v18  ;;  %v15126_v18 = vld [vmem:[#allocation41_spill] sm:$0xff] }
 0xaf1   : > { %v12781_v2 = vmul.f32 0.7, %v15126_v18 }
 0xaf2   : > { %v3925_v31 = vadd.f32 %v8345_v59, %v8310_v45  ;;  %v15127_v45 = vld [vmem:[#allocation44_spill] sm:$0xff] }
 0xaf4   : > { %v9524_v53 = vpack.c.bf16 %v3925_v31, %v3787_v16  ;;  %v12784_v31 = vmul.f32 0.7, %v15127_v45 }
 0xaf6   : > { %9525 = vmatprep.subr.bf16.mxu1 %v9524_v53 }
 0xaf7   : > { %9527 = vmatpush3.bf16.msra.mxu1 %v9524_v53 }
 0xafa   : > { %8862 = vmatmul.mubr.msk.f32.vlgmr.msra.gmra.mrb[44].mxu1 %vm1448_vm9, %v10240_v27 }
 0xafb   : > { %8864 = vmatprep.mubr.msk.f32.mxu1 %vm1448_vm9, %v10241_v26  ;;  %v15128_v26 = vld [vmem:[#allocation46_spill] sm:$0xff] }
 0xafe   : > { %8865 = vmatmul.mubr.msk.f32.gmra.mrb[46].mxu1 %vm1448_vm9, %v10242_v28  ;;  %v12790_v28 = vmul.f32 0.7, %v15128_v26 }
 0xaff   : > { %8867 = vmatprep.mubr.msk.f32.mxu1 %vm1448_vm9, %v10243_v38  ;;  %v15129_v38 = vld [vmem:[#allocation42_spill] sm:$0xff] }
 0xb02   : > { %8868 = vmatmul.mubr.msk.f32.gmra.mrb[48].mxu1 %vm1448_vm9, %v10244_v51  ;;  %v12793_v51 = vmul.f32 0.7, %v15129_v38 }
 0xb03   : > { %8870 = vmatprep.mubr.msk.f32.mxu1 %vm1448_vm9, %v10245_v0 }
 0xb06   : > { %8871 = vmatmul.mubr.msk.f32.gmra.mrb[50].mxu1 %vm1448_vm9, %v10246_v41 }
 0xb07   : > { %8873 = vmatprep.mubr.msk.f32.mxu1 %vm1448_vm9, %v10247_v6 }
 0xb0a   : > { %8874 = vmatmul.mubr.msk.f32.gmra.mrb[52].mxu1 %vm1448_vm9, %v10248_v1  ;;  %v15130_v1 = vld [vmem:[#allocation21_spill] sm:$0xff] }
 0xb0b   : > { %8876 = vmatprep.mubr.msk.f32.mxu1 %vm1448_vm9, %v10249_v50  ;;  %v12798_v50 = vmul.f32 0.7, %v15130_v1 }
 0xb0e   : > { %8877 = vmatmul.mubr.msk.f32.gmra.mrb[54].mxu1 %vm1448_vm9, %v10250_v32 }
 0xb0f   : > { %8879 = vmatprep.mubr.msk.f32.mxu1 %vm1448_vm9, %v10251_v5 }
 0xb12   : > { %8880 = vmatmul.mubr.msk.f32.gmra.mrb[56].mxu1 %vm1448_vm9, %v10252_v11 }
 0xb13   : > { %8882 = vmatprep.mubr.msk.f32.mxu1 %vm1448_vm9, %v10253_v29  ;;  %v15131_v29 = vld [vmem:[#allocation25_spill] sm:$0xff] }
 0xb16   : > { %8883 = vmatmul.mubr.msk.f32.gmra.mrb[58].mxu1 %vm1448_vm9, %v10254_v10  ;;  %v12803_v10 = vmul.f32 0.7, %v15131_v29 }
 0xbcd   : > { %v8863_v63 = vpop.f32.mrb[44].mxu1 }
 0xbce   : > { %v4280_v47 = vadd.f32 %v8863_v63, %v12756_v35  ;;  %v4192_v61 = vpop.f32.mrb[45].mxu1 }
 0xbcf   : > { %v4279_v15 = vadd.f32 %v12756_v35, %v4192_v61 }
 0xbd0   : > { %v4312_v24 = vadd.f32 %v4296_v56, %v4280_v47 }
 0xbd1   : > { %v4311_v46 = vadd.f32 %v4295_v30, %v4279_v15  ;;  %v8866_v60 = vpop.f32.mrb[46].mxu1 }
 0xbd2   : > { %v4344_v44 = vmul.f32 0.70710677, %v4312_v24  ;;  %v4282_v43 = vadd.f32 %v8866_v60, %v12756_v35  ;;  %v4202_v39 = vpop.f32.mrb[47].mxu1  ;;  %v12805_v63 = vmul.f32 0.5, %v4312_v24 }
 0xbd3   : > { %v4343_v12 = vmul.f32 0.70710677, %v4311_v46  ;;  %v4281_v42 = vadd.f32 %v12756_v35, %v4202_v39  ;;  %v12807_v47 = vmul.f32 0.5, %v4311_v46 }
 0xbd4   : > { %v4392_v33 = vand.u32 2147483647, %v4344_v44  ;;  %v4314_v62 = vadd.f32 %v4298_v48, %v4282_v43  ;;  %vm4360_vm2 = vcmp.lt.f32.partialorder %v4344_v44, 0.0 }
 0xbd5   : > { %v4391_v54 = vand.u32 2147483647, %v4343_v12  ;;  %v4313_v20 = vadd.f32 %v4297_v57, %v4281_v42  ;;  %v8869_v37 = vpop.f32.mrb[48].mxu1  ;;  %vm4359_vm3 = vcmp.lt.f32.partialorder %v4343_v12, 0.0 }
 0xbd6   : > { %v4408_v16 = vmul.f32 0.3275911, %v4392_v33  ;;  %v4212_v22 = vpop.f32.mrb[49].mxu1  ;;  %v4346_v40 = vmul.f32 0.70710677, %v4314_v62  ;;  %v4284_v27 = vadd.f32 %v8869_v37, %v12756_v35  ;;  %v4648_v32 = vsub.f32 0.0, %v4392_v33 }
 0xbd7   : > { %v4407_v59 = vmul.f32 0.3275911, %v4391_v54  ;;  %v12786_v53 = vmul.f32 0.70710677, %v4313_v20  ;;  %v4647_v56 = vsub.f32 0.0, %v4391_v54  ;;  %v4283_v57 = vadd.f32 %v12756_v35, %v4212_v22 }
 0xbd8   : > { %v12795_v0 = vadd.f32 1.0, %v4408_v16  ;;  %v4394_v41 = vand.u32 2147483647, %v4346_v40  ;;  %v4316_v60 = vadd.f32 %v4300_v4, %v4284_v27  ;;  %v4664_v24 = vmul.f32 %v4648_v32, %v4392_v33 }
 0xbd9   : > { %v8872_v6 = vpop.f32.mrb[50].mxu1  ;;  %v12800_v5 = vadd.f32 1.0, %v4407_v59  ;;  %v4393_v30 = vand.u32 2147483647, %v12786_v53  ;;  %v4663_v42 = vmul.f32 %v4647_v56, %v4391_v54  ;;  %v4315_v37 = vadd.f32 %v4299_v21, %v4283_v57 }
 0xbda   : > { %v4222_v11 = vpop.f32.mrb[51].mxu1  ;;  %v4410_v61 = vmul.f32 0.3275911, %v4394_v41  ;;  %v4650_v15 = vsub.f32 0.0, %v4394_v41  ;;  %9963 = vrcp.f32 %v12795_v0  ;;  %v4348_v39 = vmul.f32 0.70710677, %v4316_v60 }
 0xbdb   : > { %9965 = vrcp.f32 %v12800_v5  ;;  %v4409_v46 = vmul.f32 0.3275911, %v4393_v30  ;;  %v4286_v4 = vadd.f32 %v8872_v6, %v12756_v35  ;;  %v15132_v59 = vmov 1.0  }
 0xbdc   : > { %v12811_v48 = vadd.f32 1.0, %v4410_v61  ;;  %v12821_v27 = vsel %vm4360_vm2, -1.0, %v15132_v59  ;;  %v4666_v61 = vmul.f32 %v4650_v15, %v4394_v41  ;;  %v4396_v29 = vand.u32 2147483647, %v4348_v39 }
 0xbdd   : > { %v12814_v43 = vpop.f32.mrb[52].mxu1  ;;  %v12823_v22 = vadd.f32 1.0, %v4409_v46  ;;  %v12827_v33 = vsel %vm4359_vm3, -1.0, %v15132_v59  ;;  %vm4362_vm4 = vcmp.lt.f32.partialorder %v4346_v40, 0.0  ;;  %v4649_v54 = vsub.f32 0.0, %v4393_v30 }
 0xbde   : > { %9967 = vrcp.f32 %v12811_v48  ;;  %v4232_v16 = vpop.f32.mrb[53].mxu1  ;;  %v4347_v32 = vmul.f32 0.70710677, %v4315_v37  ;;  %v4681_v21 = vmul.f32 1.442695, %v4664_v24  ;;  %v12831_v6 = vmul.f32 0.5, %v4314_v62 }
 0xbdf   : > { %v4412_v57 = vmul.f32 0.3275911, %v4396_v29  ;;  %v4679_v1 = vmul.f32 1.442695, %v4663_v42  ;;  %v4318_v15 = vadd.f32 %v12769_v14, %v4286_v4  ;;  %v4285_v46 = vadd.f32 %v12756_v35, %v4222_v11 }
 0xbe0   : > { %v4395_v41 = vand.u32 2147483647, %v4347_v32  ;;  %v12838_v12 = vsel %vm4362_vm4, -1.0, %v15132_v59  ;;  %v4685_v40 = vmul.f32 1.442695, %v4666_v61  ;;  %v12840_v38 = vmul.f32 0.5, %v4313_v20 }
 0xbe1   : > { %v12829_v56 = vpop.f32.mrb[54].mxu1  ;;  %9969 = vrcp.f32 %v12823_v22  ;;  %vm4361_vm6 = vcmp.lt.f32.partialorder %v12786_v53, 0.0  ;;  %v4665_v62 = vmul.f32 %v4649_v54, %v4393_v30  ;;  %v12844_v24 = vadd.f32 1.0, %v4412_v57 }
 0xbe2   : > { %v12833_v44 = vpop.f32.mrb[55].mxu1  ;;  %v4411_v26 = vmul.f32 0.3275911, %v4395_v41  ;;  %9971 = vpow2.f32 %v4681_v21  ;;  %vm4364_vm10 = vcmp.lt.f32.partialorder %v4348_v39, 0.0  ;;  %v4652_v14 = vsub.f32 0.0, %v4396_v29 }
 0xbe3   : > { %v12848_v11 = vmul.f32 0.70710677, %v4318_v15  ;;  %9973 = vpow2.f32 %v4679_v1  ;;  %v4651_v45 = vsub.f32 0.0, %v4395_v41  ;;  %v4317_v18 = vadd.f32 %v12772_v49, %v4285_v46 }
 0xbe4   : > { %v9964_v61 = vpop.eup %9963  ;;  %v12852_v20 = vadd.f32 1.0, %v4411_v26  ;;  %9975 = vpow2.f32 %v4685_v40  ;;  %v12858_v54 = vsel %vm4361_vm6, -1.0, %v15132_v59  ;;  %v12860_v21 = vmul.f32 0.5, %v4316_v60 }
 0xbe5   : > { %v12846_v42 = vpop.f32.mrb[56].mxu1  ;;  %v9966_v30 = vpop.eup %9965  ;;  %v4398_v57 = vand.u32 2147483647, %v12848_v11  ;;  %v4683_v25 = vmul.f32 1.442695, %v4665_v62  ;;  %v12865_v26 = vsel %vm4364_vm10, -1.0, %v15132_v59  ;;  %9977 = vrcp.f32 %v12844_v24 }
 0xbe6   : > { %v12850_v4 = vpop.f32.mrb[57].mxu1  ;;  %vm4363_vm11 = vcmp.lt.f32.partialorder %v4347_v32, 0.0  ;;  %v4456_v1 = vmul.f32 %v9964_v61, %v12795_v0  ;;  %v4668_v53 = vmul.f32 %v4652_v14, %v4396_v29  ;;  %9979 = vrcp.f32 %v12852_v20 }
 0xbe7   : > { %v4414_v60 = vmul.f32 0.3275911, %v4398_v57  ;;  %v4455_v40 = vmul.f32 %v9966_v30, %v12800_v5  ;;  %v4667_v62 = vmul.f32 %v4651_v45, %v4395_v41  ;;  %v4349_v8 = vmul.f32 0.70710677, %v4317_v18 }
 0xbe8   : > { %v9968_v7 = vpop.eup %9967  ;;  %v4288_v39 = vadd.f32 %v12814_v43, %v12756_v35  ;;  %v12878_v23 = vmul.f32 0.5, %v4315_v37  ;;  %v4287_v0 = vadd.f32 %v12756_v35, %v4232_v16  ;;  %9981 = vpow2.f32 %v4683_v25 }
 0xbe9   : > { %v12868_v49 = vpop.f32.mrb[58].mxu1  ;;  %v4458_v19 = vmul.f32 %v9968_v7, %v12811_v48  ;;  %v12880_v17 = vadd.f32 1.0, %v4414_v60  ;;  %v4654_v29 = vsub.f32 0.0, %v4398_v57  ;;  %v4397_v14 = vand.u32 2147483647, %v4349_v8 }
 0xbea   : > { %v12872_v46 = vpop.f32.mrb[59].mxu1  ;;  %v4320_v3 = vadd.f32 %v12775_v52, %v4288_v39  ;;  %v4472_v5 = vsub.f32 2.0, %v4456_v1  ;;  %v4689_v45 = vmul.f32 1.442695, %v4668_v53  ;;  %v12886_v41 = vsel %vm4363_vm11, -1.0, %v15132_v59 }
 0xbeb   : > { %v9970_v36 = vpop.eup %9969  ;;  %v12888_v43 = vmul.f32 0.5, %v4318_v15  ;;  %v4471_v48 = vsub.f32 2.0, %v4455_v40  ;;  %v4687_v37 = vmul.f32 1.442695, %v4667_v62  ;;  %vm4366_vm12 = vcmp.lt.f32.partialorder %v12848_v11, 0.0 }
 0xbec   : > { %v4413_v60 = vmul.f32 0.3275911, %v4397_v14  ;;  %v12891_v16 = vpop.eup %9971  ;;  %v4474_v25 = vsub.f32 2.0, %v4458_v19  ;;  %9983 = vrcp.f32 %v12880_v17  ;;  %v4352_v52 = vmul.f32 0.70710677, %v4320_v3 }
 0xbed   : > { %15133 = vst [vmem:[#allocation48_spill] sm:$0xff] %v12888_v43  ;;  %v4319_v1 = vadd.f32 %v12778_v9, %v4287_v0  ;;  %v12895_v53 = vpop.eup %9973  ;;  %v4457_v32 = vmul.f32 %v9970_v36, %v12823_v22  ;;  %v4670_v39 = vmul.f32 %v4654_v29, %v4398_v57  ;;  %vm4365_vm13 = vcmp.lt.f32.partialorder %v4349_v8, 0.0 }
 0xbee   : > { %v4653_v15 = vsub.f32 0.0, %v4397_v14  ;;  %v12898_v40 = vpop.eup %9975  ;;  %v12900_v62 = vadd.f32 1.0, %v4413_v60  ;;  %v4400_v13 = vand.u32 2147483647, %v4352_v52  ;;  %v4290_v19 = vadd.f32 %v12829_v56, %v12756_v35 }
 0xbef   : > { %v12902_v58 = vmul.f32 0.70710677, %v4319_v1  ;;  %v9978_v55 = vpop.eup %9977  ;;  %v12906_v34 = vmul.f32 %v9964_v61, %v4472_v5  ;;  %v12908_v9 = vmul.f32 %v9966_v30, %v4471_v48  ;;  %9985 = vpow2.f32 %v4689_v45 }
 0xbf0   : > { %v12913_v22 = vsel %vm4366_vm12, -1.0, %v15132_v59  ;;  %v9980_v57 = vpop.eup %9979  ;;  %v12915_v0 = vmul.f32 %v9968_v7, %v4474_v25  ;;  %9987 = vpow2.f32 %v4687_v37  ;;  %v12917_v29 = vmul.f32 0.5, %v4317_v18 }
 0xbf1   : > { %15134 = vst [vmem:[#allocation49_spill] sm:$0xff] %v12913_v22  ;;  %v4416_v60 = vmul.f32 0.3275911, %v4400_v13  ;;  %v4473_v43 = vsub.f32 2.0, %v4457_v32  ;;  %v4693_v56 = vmul.f32 1.442695, %v4670_v39  ;;  %v4460_v5 = vmul.f32 %v9978_v55, %v12844_v24 }
 0xbf2   : > { %15135 = vst [vmem:[#allocation35_spill] sm:$0xff] %v12917_v29  ;;  %v12921_v61 = vsel %vm4365_vm13, -1.0, %v15132_v59  ;;  %v4399_v30 = vand.u32 2147483647, %v12902_v58  ;;  %9989 = vrcp.f32 %v12900_v62  ;;  %v4669_v11 = vmul.f32 %v4653_v15, %v4397_v14  ;;  %v12927_v45 = vpop.eup %9981 }
 0xbf3   : > { %v4322_v7 = vadd.f32 %v12781_v2, %v4290_v19  ;;  %v4459_v18 = vmul.f32 %v9980_v57, %v12852_v20  ;;  %v4289_v37 = vadd.f32 %v12756_v35, %v12833_v44  ;;  %v4292_v8 = vadd.f32 %v12846_v42, %v12756_v35 }
 0xbf4   : > { %v4415_v48 = vmul.f32 0.3275911, %v4399_v30  ;;  %v12934_v25 = vmul.f32 0.5, %v4320_v3  ;;  %vm4368_vm14 = vcmp.lt.f32.partialorder %v4352_v52, 0.0  ;;  %v12936_v24 = vadd.f32 1.0, %v4416_v60 }
 0xbf5   : > { %v4656_v32 = vsub.f32 0.0, %v4400_v13  ;;  %v12938_v14 = vmul.f32 %v9970_v36, %v4473_v43  ;;  %9991 = vpow2.f32 %v4693_v56  ;;  %v4354_v39 = vmul.f32 0.70710677, %v4322_v7 }
 0xbf6   : > { %15136 = vst [vmem:[#allocation47_spill] sm:$0xff] %v12934_v25  ;;  %v12940_v2 = vadd.f32 1.0, %v4415_v48  ;;  %v9984_v20 = vpop.eup %9983  ;;  %v4476_v15 = vsub.f32 2.0, %v4460_v5  ;;  %v12942_v19 = vmul.f32 0.5, %v4319_v1  ;;  %v4321_v44 = vadd.f32 %v12784_v31, %v4289_v37 }
 0xbf7   : > { %v12946_v42 = vadd.f32 %v12790_v28, %v4292_v8  ;;  %v4475_v3 = vsub.f32 2.0, %v4459_v18  ;;  %v4691_v52 = vmul.f32 1.442695, %v4669_v11  ;;  %v12949_v60 = vsel %vm4368_vm14, -1.0, %v15132_v59 }
 0xbf8   : > { %15137 = vst [vmem:[#allocation45_spill] sm:$0xff] %v12942_v19  ;;  %15139 = vst [vmem:[#allocation39_spill] sm:$0xff] %v12949_v60  ;;  %v4655_v36 = vsub.f32 0.0, %v4399_v30  ;;  %9993 = vrcp.f32 %v12936_v24  ;;  %v4672_v43 = vmul.f32 %v4656_v32, %v4400_v13  ;;  %v4402_v56 = vand.u32 2147483647, %v4354_v39 }
 0xbf9   : > { %15138 = vst [vmem:[#allocation19_spill] sm:$0xff] %v12946_v42  ;;  %v12952_v48 = vmul.f32 0.70710677, %v4321_v44  ;;  %v12954_v5 = vpop.eup %9985  ;;  %v4462_v1 = vmul.f32 %v9984_v20, %v12880_v17  ;;  %vm4367_vm15 = vcmp.lt.f32.partialorder %v12902_v58, 0.0  ;;  %9995 = vrcp.f32 %v12940_v2 }
 0xbfa   : > { %v12960_v31 = vmul.f32 0.70710677, %v12946_v42  ;;  %v12962_v28 = vpop.eup %9987  ;;  %v12964_v11 = vmul.f32 %v9978_v55, %v4476_v15  ;;  %v4418_v18 = vmul.f32 0.3275911, %v4402_v56  ;;  %v4658_v13 = vsub.f32 0.0, %v4402_v56 }
 0xbfb   : > { %v4291_v37 = vadd.f32 %v12756_v35, %v12850_v4  ;;  %9997 = vpow2.f32 %v4691_v52  ;;  %v4671_v8 = vmul.f32 %v4655_v36, %v4399_v30  ;;  %v4401_v17 = vand.u32 2147483647, %v12952_v48 }
 0xbfc   : > { %v4404_v58 = vand.u32 2147483647, %v12960_v31  ;;  %v12970_v32 = vpop.eup %9989  ;;  %v12972_v25 = vmul.f32 %v9980_v57, %v4475_v3  ;;  %v4697_v42 = vmul.f32 1.442695, %v4672_v43  ;;  %v12975_v19 = vsel %vm4367_vm15, -1.0, %v15132_v59 }
 0xbfd   : > { %15140 = vst [vmem:[#allocation33_spill] sm:$0xff] %v12975_v19  ;;  %v4434_v55 = vadd.f32 1.0, %v4418_v18  ;;  %v4478_v15 = vsub.f32 2.0, %v4462_v1  ;;  %v4417_v60 = vmul.f32 0.3275911, %v4401_v17  ;;  %v4657_v29 = vsub.f32 0.0, %v4401_v17 }
 0xbfe   : > { %v4420_v22 = vmul.f32 0.3275911, %v4404_v58  ;;  %vm4370_vm0 = vcmp.lt.f32.partialorder %v4354_v39, 0.0  ;;  %v4674_v4 = vmul.f32 %v4658_v13, %v4402_v56  ;;  %v12978_v30 = vadd.f32 %v12793_v51, %v4291_v37 }
 0xbff   : > { %9999 = vrcp.f32 %v4434_v55  ;;  %v12980_v52 = vpop.eup %9991  ;;  %v4695_v36 = vmul.f32 1.442695, %v4671_v8  ;;  %v4433_v57 = vadd.f32 1.0, %v4417_v60  ;;  %v4660_v43 = vsub.f32 0.0, %v4404_v58 }
 0xc00   : > { %15141 = vst [vmem:[#allocation16_spill] sm:$0xff] %v12978_v30  ;;  %v4436_v3 = vadd.f32 1.0, %v4420_v22  ;;  %v4461_v19 = vmul.f32 %v12970_v32, %v12900_v62  ;;  %10001 = vpow2.f32 %v4697_v42  ;;  %v4673_v1 = vmul.f32 %v4657_v29, %v4401_v17 }
 0xc01   : > { %v12985_v18 = vmul.f32 0.70710677, %v12978_v30  ;;  %v12987_v39 = vmul.f32 0.5, %v4322_v7  ;;  %v12990_v56 = vsel %vm4370_vm0, -1.0, %v15132_v59  ;;  %10003 = vrcp.f32 %v4433_v57 }
 0xc02   : > { %15144 = vst [vmem:[#allocation18_spill] sm:$0xff] %v12990_v56  ;;  %v4294_v51 = vadd.f32 %v12868_v49, %v12756_v35  ;;  %v9994_v60 = vpop.eup %9993  ;;  %v12994_v22 = vmul.f32 %v9984_v20, %v4478_v15  ;;  %v4701_v13 = vmul.f32 1.442695, %v4674_v4  ;;  %v12996_v37 = vmul.f32 0.5, %v4321_v44 }
 0xc03   : > { %15142 = vst [vmem:[#allocation50_spill] sm:$0xff] %v12985_v18  ;;  %15143 = vst [vmem:[#allocation40_spill] sm:$0xff] %v12987_v39  ;;  %10005 = vrcp.f32 %v4436_v3  ;;  %v9996_v62 = vpop.eup %9995  ;;  %vm4369_vm1 = vcmp.lt.f32.partialorder %v12952_v48, 0.0  ;;  %v4676_v29 = vmul.f32 %v4660_v43, %v4404_v58  ;;  %v4403_v7 = vand.u32 2147483647, %v12985_v18 }
 0xc04   : > { %15145 = vst [vmem:[#allocation43_spill] sm:$0xff] %v12996_v37  ;;  %10007 = vpow2.f32 %v4695_v36  ;;  %v4477_v42 = vsub.f32 2.0, %v4461_v19  ;;  %v4699_v8 = vmul.f32 1.442695, %v4673_v1  ;;  %v13001_v17 = vadd.f32 %v12798_v50, %v4294_v51 }
 0xc05   : > { %v4293_v49 = vadd.f32 %v12756_v35, %v12872_v46  ;;  %v13005_v20 = vpop.eup %9997  ;;  %v4464_v44 = vmul.f32 %v9994_v60, %v12936_v24  ;;  %v4419_v15 = vmul.f32 0.3275911, %v4403_v7  ;;  %v4659_v4 = vsub.f32 0.0, %v4403_v7 }
 0xc06   : > { %15146 = vst [vmem:[#allocation26_spill] sm:$0xff] %v13001_v17  ;;  %v4503_v36 = vmul.f32 1.0614054, %v12908_v9  ;;  %v4463_v58 = vmul.f32 %v9996_v62, %v12940_v2  ;;  %10009 = vpow2.f32 %v4701_v13  ;;  %v13011_v19 = vmul.f32 0.70710677, %v13001_v17 }
 0xc07   : > { %v13014_v50 = vadd.f32 %v12803_v10, %v4293_v49  ;;  %v4705_v43 = vmul.f32 1.442695, %v4676_v29  ;;  %v4435_v1 = vadd.f32 1.0, %v4419_v15  ;;  %v4675_v35 = vmul.f32 %v4659_v4, %v4403_v7 }
 0xc08   : > { %15147 = vst [vmem:[#allocation17_spill] sm:$0xff] %v13011_v19  ;;  %v4504_v46 = vmul.f32 1.0614054, %v12906_v34  ;;  %v13020_v24 = vsel %vm4369_vm1, -1.0, %v15132_v59  ;;  %10011 = vpow2.f32 %v4699_v8  ;;  %v4406_v2 = vand.u32 2147483647, %v13011_v19 }
 0xc09   : > { %15148 = vst [vmem:[#allocation14_spill] sm:$0xff] %v13014_v50  ;;  %v10000_v51 = vpop.eup %9999  ;;  %15149 = vst [vmem:[#allocation10_spill] sm:$0xff] %v13020_v24  ;;  %v13024_v13 = vmul.f32 0.70710677, %v13014_v50  ;;  %v4480_v17 = vsub.f32 2.0, %v4464_v44  ;;  %10013 = vrcp.f32 %v4435_v1  ;;  %v4479_v7 = vsub.f32 2.0, %v4463_v58 }
 0xc0a   : > { %v4466_v10 = vmul.f32 %v10000_v51, %v4434_v55  ;;  %v4519_v29 = vadd.f32 -1.4531521, %v4503_v36  ;;  %v13026_v49 = vpop.eup %10001  ;;  %v4422_v15 = vmul.f32 0.3275911, %v4406_v2  ;;  %v4662_v4 = vsub.f32 0.0, %v4406_v2 }
 0xc0b   : > { %15150 = vst [vmem:[#allocation32_spill] sm:$0xff] %v13024_v13  ;;  %15151 = vst [vmem:[#allocation20_spill] sm:$0xff] %v13026_v49  ;;  %v4405_v30 = vand.u32 2147483647, %v13024_v13  ;;  %v10004_v48 = vpop.eup %10003  ;;  %v13030_v39 = vmul.f32 %v12970_v32, %v4477_v42  ;;  %10015 = vpow2.f32 %v4705_v43  ;;  %v4703_v8 = vmul.f32 1.442695, %v4675_v35 }
 0xc0c   : > { %v4520_v19 = vadd.f32 -1.4531521, %v4504_v46  ;;  %v4482_v37 = vsub.f32 2.0, %v4466_v10  ;;  %v4465_v44 = vmul.f32 %v10004_v48, %v4433_v57  ;;  %v4438_v55 = vadd.f32 1.0, %v4422_v15 }
 0xc0d   : > { %v10006_v50 = vpop.eup %10005  ;;  %v4421_v59 = vmul.f32 0.3275911, %v4405_v30  ;;  %v4678_v58 = vmul.f32 %v4662_v4, %v4406_v2  ;;  %v4661_v24 = vsub.f32 0.0, %v4405_v30  ;;  %v4535_v18 = vmul.f32 %v4519_v29, %v12908_v9 }
 0xc0e   : > { %v13032_v36 = vpop.eup %10007  ;;  %v4468_v56 = vmul.f32 %v10006_v50, %v4436_v3  ;;  %v13035_v13 = vmul.f32 %v9994_v60, %v4480_v17  ;;  %v13037_v49 = vmul.f32 %v9996_v62, %v4479_v7  ;;  %10017 = vrcp.f32 %v4438_v55 }
 0xc0f   : > { %v4437_v32 = vadd.f32 1.0, %v4421_v59  ;;  %v4481_v42 = vsub.f32 2.0, %v4465_v44  ;;  %v4677_v43 = vmul.f32 %v4661_v24, %v4405_v30  ;;  %v4536_v35 = vmul.f32 %v4520_v19, %v12906_v34 }
 0xc10   : > { %v4551_v57 = vadd.f32 1.4214138, %v4535_v18  ;;  %v13040_v46 = vpop.eup %10009  ;;  %v13042_v10 = vmul.f32 %v10000_v51, %v4482_v37  ;;  %10019 = vpow2.f32 %v4703_v8  ;;  %v4505_v3 = vmul.f32 1.0614054, %v12938_v14 }
 0xc11   : > { %15152 = vst [vmem:[#allocation27_spill] sm:$0xff] %v13040_v46  ;;  %v4506_v2 = vmul.f32 1.0614054, %v12915_v0  ;;  %v4484_v60 = vsub.f32 2.0, %v4468_v56  ;;  %v13046_v17 = vmul.f32 1.442695, %v4678_v58  ;;  %10021 = vrcp.f32 %v4437_v32 }
 0xc12   : > { %v4552_v62 = vadd.f32 1.4214138, %v4536_v35  ;;  %v13048_v59 = vpop.eup %10011  ;;  %v4567_v30 = vmul.f32 %v4551_v57, %v12908_v9  ;;  %v4521_v19 = vadd.f32 -1.4531521, %v4505_v3  ;;  %v4507_v24 = vmul.f32 1.0614054, %v12972_v25 }
 0xc13   : > { %15153 = vst [vmem:[#allocation15_spill] sm:$0xff] %v13046_v17  ;;  %v4522_v18 = vadd.f32 -1.4531521, %v4506_v2  ;;  %v10014_v37 = vpop.eup %10013  ;;  %v13052_v51 = vmul.f32 %v10004_v48, %v4481_v42  ;;  %v13054_v29 = vmul.f32 1.442695, %v4677_v43  ;;  %v13062_v35 = vmul.f32 %v10006_v50, %v4484_v60 }
 0xc14   : > { %v4568_v7 = vmul.f32 %v4552_v62, %v12906_v34  ;;  %v4508_v56 = vmul.f32 1.0614054, %v12964_v11  ;;  %v4467_v15 = vmul.f32 %v10014_v37, %v4435_v1  ;;  %v4583_v4 = vadd.f32 -0.28449672, %v4567_v30 }
 0xc15   : > { %v4537_v8 = vmul.f32 %v4521_v19, %v12938_v14  ;;  %v4538_v44 = vmul.f32 %v4522_v18, %v12915_v0  ;;  %v13060_v58 = vpop.eup %10015  ;;  %v4523_v3 = vadd.f32 -1.4531521, %v4507_v24  ;;  %v4509_v19 = vmul.f32 1.0614054, %v13030_v39 }
 0xc16   : > { %15154 = vst [vmem:[#allocation34_spill] sm:$0xff] %v13060_v58  ;;  %v4584_v57 = vadd.f32 -0.28449672, %v4568_v7  ;;  %v4524_v48 = vadd.f32 -1.4531521, %v4508_v56  ;;  %v4483_v42 = vsub.f32 2.0, %v4467_v15  ;;  %v4599_v43 = vmul.f32 %v4583_v4, %v12908_v9 }
 0xc17   : > { %v4553_v2 = vadd.f32 1.4214138, %v4537_v8  ;;  %v4554_v62 = vadd.f32 1.4214138, %v4538_v44  ;;  %v4539_v1 = vmul.f32 %v4523_v3, %v12972_v25  ;;  %v4510_v24 = vmul.f32 1.0614054, %v12994_v22 }
 0xc18   : > { %v4600_v17 = vmul.f32 %v4584_v57, %v12906_v34  ;;  %v4540_v30 = vmul.f32 %v4524_v48, %v12964_v11  ;;  %v10018_v18 = vpop.eup %10017  ;;  %v4615_v58 = vadd.f32 0.2548296, %v4599_v43  ;;  %v13074_v44 = vmul.f32 %v10014_v37, %v4483_v42 }
 0xc19   : > { %v4569_v50 = vmul.f32 %v4553_v2, %v12938_v14  ;;  %v4570_v60 = vmul.f32 %v4554_v62, %v12915_v0  ;;  %v4470_v7 = vmul.f32 %v10018_v18, %v4438_v55  ;;  %v4555_v15 = vadd.f32 1.4214138, %v4539_v1 }
 0xc1a   : > { %v4616_v56 = vadd.f32 0.2548296, %v4600_v17  ;;  %v4556_v4 = vadd.f32 1.4214138, %v4540_v30  ;;  %v13072_v8 = vpop.eup %10019  ;;  %v4631_v57 = vmul.f32 %v4615_v58, %v12908_v9  ;;  %vm4372_vm2 = vcmp.lt.f32.partialorder %v12960_v31, 0.0  ;;  %v15171_v31 = vld [vmem:[#allocation19_spill] sm:$0xff] }
 0xc1b   : > { %v4585_v3 = vadd.f32 -0.28449672, %v4569_v50  ;;  %v4586_v48 = vadd.f32 -0.28449672, %v4570_v60  ;;  %v13077_v46 = vpop.eup %10021  ;;  %v4486_v43 = vsub.f32 2.0, %v4470_v7  ;;  %v4571_v62 = vmul.f32 %v4555_v15, %v12972_v25 }
 0xc1c   : > { %v4632_v2 = vmul.f32 %v4616_v56, %v12906_v34  ;;  %v4572_v55 = vmul.f32 %v4556_v4, %v12964_v11  ;;  %v13083_v17 = vmul.f32 %v13077_v46, %v4437_v32  ;;  %v4711_v1 = vmul.f32 %v12895_v53, %v4631_v57 }
 0xc1d   : > { %v4601_v37 = vmul.f32 %v4585_v3, %v12938_v14  ;;  %v4602_v9 = vmul.f32 %v4586_v48, %v12915_v0  ;;  %v4587_v42 = vadd.f32 -0.28449672, %v4571_v62  ;;  %v4525_v50 = vadd.f32 -1.4531521, %v4509_v19 }
 0xc1e   : > { %v4712_v58 = vmul.f32 %v12891_v16, %v4632_v2  ;;  %v4588_v30 = vadd.f32 -0.28449672, %v4572_v55  ;;  %v13089_v60 = vmul.f32 %v10018_v18, %v4486_v43  ;;  %v4727_v34 = vsub.f32 1.0, %v4711_v1 }
 0xc1f   : > { %v4617_v7 = vadd.f32 0.2548296, %v4601_v37  ;;  %v4618_v56 = vadd.f32 0.2548296, %v4602_v9  ;;  %v4603_v32 = vmul.f32 %v4587_v42, %v12972_v25  ;;  %v4526_v53 = vadd.f32 -1.4531521, %v4510_v24 }
 0xc20   : > { %v4728_v15 = vsub.f32 1.0, %v4712_v58  ;;  %v4604_v4 = vmul.f32 %v4588_v30, %v12964_v11  ;;  %v4485_v57 = vsub.f32 2.0, %v13083_v17  ;;  %v4743_v3 = vmul.f32 %v4727_v34, %v12827_v33 }
 0xc21   : > { %v4633_v16 = vmul.f32 %v4617_v7, %v12938_v14  ;;  %v4634_v48 = vmul.f32 %v4618_v56, %v12915_v0  ;;  %v4619_v18 = vadd.f32 0.2548296, %v4603_v32  ;;  %v4541_v2 = vmul.f32 %v4525_v50, %v13030_v39 }
 0xc22   : > { %v4744_v19 = vmul.f32 %v4728_v15, %v12821_v27  ;;  %v4620_v43 = vadd.f32 0.2548296, %v4604_v4  ;;  %v4759_v62 = vadd.f32 1.0, %v4743_v3  ;;  %v4542_v24 = vmul.f32 %v4526_v53, %v12994_v22 }
 0xc23   : > { %v4713_v55 = vmul.f32 %v12927_v45, %v4633_v16  ;;  %v4714_v1 = vmul.f32 %v12898_v40, %v4634_v48  ;;  %v4635_v33 = vmul.f32 %v4619_v18, %v12972_v25  ;;  %v4557_v9 = vadd.f32 1.4214138, %v4541_v2 }
 0xc24   : > { %v4760_v37 = vadd.f32 1.0, %v4744_v19  ;;  %v4636_v14 = vmul.f32 %v4620_v43, %v12964_v11  ;;  %v13105_v0 = vmul.f32 %v4759_v62, %v12807_v47  ;;  %v4558_v42 = vadd.f32 1.4214138, %v4542_v24 }
 0xc25   : > { %v4729_v27 = vsub.f32 1.0, %v4713_v55  ;;  %v4730_v58 = vsub.f32 1.0, %v4714_v1  ;;  %v4715_v45 = vmul.f32 %v12962_v28, %v4635_v33  ;;  %v4573_v50 = vmul.f32 %v4557_v9, %v13030_v39 }
 0xc26   : > { %v13108_v30 = vmul.f32 %v4760_v37, %v12805_v63  ;;  %v4716_v40 = vmul.f32 %v12954_v5, %v4636_v14  ;;  %v4574_v34 = vmul.f32 %v4558_v42, %v12994_v22  ;;  %v4511_v47 = vmul.f32 1.0614054, %v13037_v49 }
 0xc27   : > { %v4745_v25 = vmul.f32 %v4729_v27, %v12858_v54  ;;  %v4746_v11 = vmul.f32 %v4730_v58, %v12838_v12  ;;  %v4731_v56 = vsub.f32 1.0, %v4715_v45  ;;  %v4589_v15 = vadd.f32 -0.28449672, %v4573_v50 }
 0xc28   : > { %v9528_v7 = vpack.c.bf16 %v13108_v30, %v13105_v0  ;;  %v4732_v63 = vsub.f32 1.0, %v4716_v40  ;;  %v4590_v4 = vadd.f32 -0.28449672, %v4574_v34  ;;  %v4512_v5 = vmul.f32 1.0614054, %v13035_v13 }
 0xc29   : > { %v4761_v32 = vadd.f32 1.0, %v4745_v25  ;;  %v4762_v28 = vadd.f32 1.0, %v4746_v11  ;;  %v4747_v54 = vmul.f32 %v4731_v56, %v12886_v41  ;;  %v4605_v53 = vmul.f32 %v4589_v15, %v13030_v39 }
 0xc2a   : > { %9529 = vmatprep.subr.bf16.mxu0 %v9528_v7  ;;  %v4748_v12 = vmul.f32 %v4732_v63, %v12865_v26  ;;  %v4527_v3 = vadd.f32 -1.4531521, %v4511_v47  ;;  %v4606_v19 = vmul.f32 %v4590_v4, %v12994_v22  ;;  %v4528_v18 = vadd.f32 -1.4531521, %v4512_v5 }
 0xc2b   : > { %9531 = vmatpush3.bf16.msra.mxu0 %v9528_v7  ;;  %v13124_v16 = vmul.f32 %v4761_v32, %v12840_v38  ;;  %v13127_v48 = vmul.f32 %v4762_v28, %v12831_v6  ;;  %v4763_v43 = vadd.f32 1.0, %v4747_v54  ;;  %v4621_v62 = vadd.f32 0.2548296, %v4605_v53  ;;  %v15155_v28 = vld [vmem:[#allocation49_spill] sm:$0xff] }
 0xc2c   : > { %v4764_v2 = vadd.f32 1.0, %v4748_v12  ;;  %v4543_v41 = vmul.f32 %v4527_v3, %v13037_v49  ;;  %v4622_v55 = vadd.f32 0.2548296, %v4606_v19  ;;  %v4544_v1 = vmul.f32 %v4528_v18, %v13035_v13 }
 0xc2d   : > { %v9532_v26 = vpack.c.bf16 %v13127_v48, %v13124_v16  ;;  %v4513_v38 = vmul.f32 1.0614054, %v13052_v51  ;;  %v13136_v24 = vmul.f32 %v4763_v43, %v12878_v23  ;;  %v4637_v37 = vmul.f32 %v4621_v62, %v13030_v39 }
 0xc2e   : > { %v13139_v6 = vmul.f32 %v4764_v2, %v12860_v21  ;;  %v4559_v33 = vadd.f32 1.4214138, %v4543_v41  ;;  %v4638_v14 = vmul.f32 %v4622_v55, %v12994_v22  ;;  %v4560_v9 = vadd.f32 1.4214138, %v4544_v1  ;;  %v15156_v2 = vld [vmem:[#allocation35_spill] sm:$0xff]  ;;  %v15157_v1 = vld [vmem:[#allocation48_spill] sm:$0xff] }
 0xc2f   : > { %9533 = vmatprep.subr.bf16.mxu0 %v9532_v26  ;;  %v4514_v27 = vmul.f32 1.0614054, %v13042_v10  ;;  %v4529_v58 = vadd.f32 -1.4531521, %v4513_v38  ;;  %v4717_v23 = vmul.f32 %v13005_v20, %v4637_v37  ;;  %v4515_v21 = vmul.f32 1.0614054, %v13074_v44 }
 0xc30   : > { %9535 = vmatpush3.bf16.msra.mxu0 %v9532_v26  ;;  %v9536_v42 = vpack.c.bf16 %v13139_v6, %v13136_v24  ;;  %v4575_v45 = vmul.f32 %v4559_v33, %v13037_v49  ;;  %v4718_v39 = vmul.f32 %v12980_v52, %v4638_v14  ;;  %v4576_v40 = vmul.f32 %v4560_v9, %v13035_v13 }
 0xc31   : > { %v4530_v50 = vadd.f32 -1.4531521, %v4514_v27  ;;  %v4545_v22 = vmul.f32 %v4529_v58, %v13052_v51  ;;  %v13155_v25 = vmul.f32 %v13077_v46, %v4485_v57  ;;  %v4733_v11 = vsub.f32 1.0, %v4717_v23  ;;  %v15158_v23 = vld [vmem:[#allocation20_spill] sm:$0xff] }
 0xc32   : > { %9537 = vmatprep.subr.bf16.mxu0 %v9536_v42  ;;  %v4591_v34 = vadd.f32 -0.28449672, %v4575_v45  ;;  %v4516_v20 = vmul.f32 1.0614054, %v13062_v35  ;;  %v4734_v47 = vsub.f32 1.0, %v4718_v39  ;;  %v15159_v39 = vld [vmem:[#allocation50_spill] sm:$0xff]  ;;  %10023 = vpow2.f32 %v13054_v29 }
 0xc33   : > { %v4592_v7 = vadd.f32 -0.28449672, %v4576_v40  ;;  %v4546_v56 = vmul.f32 %v4530_v50, %v13042_v10  ;;  %v4561_v52 = vadd.f32 1.4214138, %v4545_v22  ;;  %v4749_v63 = vmul.f32 %v4733_v11, %v12921_v61 }
 0xc34   : > { %9539 = vmatpush3.bf16.msra.mxu0 %v9536_v42  ;;  %v4607_v15 = vmul.f32 %v4591_v34, %v13037_v49  ;;  %v4531_v32 = vadd.f32 -1.4531521, %v4515_v21  ;;  %v4532_v17 = vadd.f32 -1.4531521, %v4516_v20  ;;  %v4750_v46 = vmul.f32 %v4734_v47, %v15155_v28  ;;  %v15160_v47 = vld [vmem:[#allocation33_spill] sm:$0xff] }
 0xc35   : > { %v4608_v57 = vmul.f32 %v4592_v7, %v13035_v13  ;;  %v4562_v4 = vadd.f32 1.4214138, %v4546_v56  ;;  %v4577_v5 = vmul.f32 %v4561_v52, %v13052_v51  ;;  %v4765_v54 = vadd.f32 1.0, %v4749_v63 }
 0xc36   : > { %v4623_v12 = vadd.f32 0.2548296, %v4607_v15  ;;  %v4547_v53 = vmul.f32 %v4531_v32, %v13074_v44  ;;  %v4548_v3 = vmul.f32 %v4532_v17, %v13062_v35  ;;  %v4766_v19 = vadd.f32 1.0, %v4750_v46  ;;  %v15161_v15 = vld [vmem:[#allocation39_spill] sm:$0xff] }
 0xc37   : > { %v4624_v18 = vadd.f32 0.2548296, %v4608_v57  ;;  %v4578_v61 = vmul.f32 %v4562_v4, %v13042_v10  ;;  %v4593_v43 = vadd.f32 -0.28449672, %v4577_v5  ;;  %v13168_v62 = vmul.f32 %v4765_v54, %v15156_v2  ;;  %v15162_v54 = vld [vmem:[#allocation27_spill] sm:$0xff] }
 0xc38   : > { %v4639_v41 = vmul.f32 %v4623_v12, %v13037_v49  ;;  %v4563_v26 = vadd.f32 1.4214138, %v4547_v53  ;;  %v4564_v55 = vadd.f32 1.4214138, %v4548_v3  ;;  %v13172_v38 = vmul.f32 %v4766_v19, %v15157_v1  ;;  %v15163_v19 = vld [vmem:[#allocation45_spill] sm:$0xff] }
 0xc39   : > { %v4640_v37 = vmul.f32 %v4624_v18, %v13035_v13  ;;  %v4594_v33 = vadd.f32 -0.28449672, %v4578_v61  ;;  %v4609_v14 = vmul.f32 %v4593_v43, %v13052_v51  ;;  %v4517_v42 = vmul.f32 1.0614054, %v13155_v25  ;;  %v15164_v43 = vld [vmem:[#allocation47_spill] sm:$0xff] }
 0xc3a   : > { %v4719_v9 = vmul.f32 %v13032_v36, %v4639_v41  ;;  %v4579_v27 = vmul.f32 %v4563_v26, %v13074_v44  ;;  %v4580_v58 = vmul.f32 %v4564_v55, %v13062_v35  ;;  %v9540_v49 = vpack.c.bf16 %v13172_v38, %v13168_v62  ;;  %v15165_v26 = vld [vmem:[#allocation10_spill] sm:$0xff] }
 0xc3b   : > { %v4720_v45 = vmul.f32 %v15158_v23, %v4640_v37  ;;  %v4610_v13 = vmul.f32 %v4594_v33, %v13042_v10  ;;  %v4625_v21 = vadd.f32 0.2548296, %v4609_v14  ;;  %vm4371_vm3 = vcmp.lt.f32.partialorder %v15159_v39, 0.0  ;;  %v15166_v37 = vld [vmem:[#allocation15_spill] sm:$0xff]  ;;  %v15167_v14 = vld [vmem:[#allocation34_spill] sm:$0xff]  ;;  %v15173_v39 = vld [vmem:[#allocation16_spill] sm:$0xff] }
 0xc3c   : > { %v4735_v36 = vsub.f32 1.0, %v4719_v9  ;;  %v4595_v40 = vadd.f32 -0.28449672, %v4579_v27  ;;  %v4596_v50 = vadd.f32 -0.28449672, %v4580_v58  ;;  %9541 = vmatprep.subr.bf16.mxu0 %v9540_v49  ;;  %10025 = vpow2.f32 %v15166_v37  ;;  %v10024_v23 = vpop.eup %10023 }
 0xc3d   : > { %v4736_v22 = vsub.f32 1.0, %v4720_v45  ;;  %v4626_v11 = vadd.f32 0.2548296, %v4610_v13  ;;  %v4641_v34 = vmul.f32 %v4625_v21, %v13052_v51  ;;  %v4518_v20 = vmul.f32 1.0614054, %v13089_v60  ;;  %9543 = vmatpush3.bf16.msra.mxu0 %v9540_v49 }
 0xc3e   : > { %v4751_v7 = vmul.f32 %v4735_v36, %v15160_v47  ;;  %v4611_v56 = vmul.f32 %v4595_v40, %v13074_v44  ;;  %v4612_v52 = vmul.f32 %v4596_v50, %v13062_v35  ;;  %v4533_v63 = vadd.f32 -1.4531521, %v4517_v42 }
 0xc3f   : > { %v4752_v29 = vmul.f32 %v4736_v22, %v15161_v15  ;;  %v4642_v32 = vmul.f32 %v4626_v11, %v13042_v10  ;;  %v4721_v17 = vmul.f32 %v13048_v59, %v4641_v34  ;;  %v4534_v28 = vadd.f32 -1.4531521, %v4518_v20  ;;  %v15170_v22 = vld [vmem:[#allocation43_spill] sm:$0xff] }
 0xc40   : > { %v4767_v46 = vadd.f32 1.0, %v4751_v7  ;;  %v4627_v57 = vadd.f32 0.2548296, %v4611_v56  ;;  %v4628_v51 = vadd.f32 0.2548296, %v4612_v52  ;;  %v4549_v4 = vmul.f32 %v4533_v63, %v13155_v25  ;;  %v15172_v52 = vld [vmem:[#allocation40_spill] sm:$0xff] }
 0xc41   : > { %v4768_v5 = vadd.f32 1.0, %v4752_v29  ;;  %v4722_v12 = vmul.f32 %v15162_v54, %v4642_v32  ;;  %v4737_v53 = vsub.f32 1.0, %v4721_v17  ;;  %v4550_v3 = vmul.f32 %v4534_v28, %v13089_v60 }
 0xc42   : > { %v13199_v18 = vmul.f32 %v4767_v46, %v15163_v19  ;;  %v4643_v61 = vmul.f32 %v4627_v57, %v13074_v44  ;;  %v4644_v10 = vmul.f32 %v4628_v51, %v13062_v35  ;;  %v4565_v59 = vadd.f32 1.4214138, %v4549_v4  ;;  %v15168_v35 = vld [vmem:[#allocation18_spill] sm:$0xff] }
 0xc43   : > { %v13204_v2 = vmul.f32 %v4768_v5, %v15164_v43  ;;  %v4738_v41 = vsub.f32 1.0, %v4722_v12  ;;  %v4753_v55 = vmul.f32 %v4737_v53, %v15165_v26  ;;  %v4566_v1 = vadd.f32 1.4214138, %v4550_v3  ;;  %v15174_v53 = vld [vmem:[#allocation32_spill] sm:$0xff] }
 0xc44   : > { %v4723_v33 = vmul.f32 %v13072_v8, %v4643_v61  ;;  %v4724_v9 = vmul.f32 %v15167_v14, %v4644_v10  ;;  %v4581_v27 = vmul.f32 %v4565_v59, %v13155_v25  ;;  %v15169_v45 = vmov 1.0   ;;  %v15175_v61 = vld [vmem:[#allocation17_spill] sm:$0xff] }
 0xc45   : > { %v9544_v44 = vpack.c.bf16 %v13204_v2, %v13199_v18  ;;  %v4754_v58 = vmul.f32 %v4738_v41, %v15168_v35  ;;  %v4769_v42 = vadd.f32 1.0, %v4753_v55  ;;  %v4582_v49 = vmul.f32 %v4566_v1, %v13089_v60  ;;  %v15176_v55 = vld [vmem:[#allocation14_spill] sm:$0xff] }
 0xc46   : > { %v4388_v13 = vsel %vm4372_vm2, -1.0, %v15169_v45  ;;  %v4739_v21 = vsub.f32 1.0, %v4723_v33  ;;  %v4740_v36 = vsub.f32 1.0, %v4724_v9  ;;  %v4597_v8 = vadd.f32 -0.28449672, %v4581_v27  ;;  %v10026_v12 = vpop.eup %10025  ;;  %v15177_v33 = vld [vmem:[#allocation26_spill] sm:$0xff] }
 0xc47   : > { %v4387_v40 = vsel %vm4371_vm3, -1.0, %v15169_v45  ;;  %9545 = vmatprep.subr.bf16.mxu0 %v9544_v44  ;;  %v4770_v50 = vadd.f32 1.0, %v4754_v58  ;;  %v13222_v11 = vmul.f32 %v4769_v42, %v15170_v22  ;;  %v4598_v34 = vadd.f32 -0.28449672, %v4582_v49  ;;  %v10255_v58 = vld [vmem:[%s14839_s1 + $0x8] sm:$0xff] }
 0xc48   : > { %9547 = vmatpush3.bf16.msra.mxu0 %v9544_v44  ;;  %v4755_v20 = vmul.f32 %v4739_v21, %v4387_v40  ;;  %v4756_v47 = vmul.f32 %v4740_v36, %v4388_v13  ;;  %v4613_v7 = vmul.f32 %v4597_v8, %v13155_v25  ;;  %v4340_v56 = vmul.f32 0.5, %v15171_v31  ;;  %v4946_v42 = vld [vmem:[#allocation5 + $0x380] sm:$0xff]  ;;  %v4947_v49 = vld [vmem:[#allocation5 + $0x388] sm:$0xff]  ;;  %v4915_v31 = vld [vmem:[#allocation3 + $0x390] sm:$0xff] }
 0xc49   : > { %v13227_v63 = vmul.f32 %v4770_v50, %v15172_v52  ;;  %v4614_v15 = vmul.f32 %v4598_v34, %v13089_v60  ;;  %v4339_v29 = vmul.f32 0.5, %v15173_v39  ;;  %vm4373_vm4 = vcmp.lt.f32.partialorder %v15174_v53, 0.0  ;;  %v4914_v21 = vld [vmem:[#allocation3 + $0x388] sm:$0xff]  ;;  %v4930_v36 = vld [vmem:[#allocation5 + $0x300] sm:$0xff]  ;;  %v4932_v39 = vld [vmem:[#allocation5 + $0x310] sm:$0xff] }
 0xc4a   : > { %v4771_v32 = vadd.f32 1.0, %v4755_v20  ;;  %v4772_v17 = vadd.f32 1.0, %v4756_v47  ;;  %v4629_v28 = vadd.f32 0.2548296, %v4613_v7  ;;  %vm4374_vm6 = vcmp.lt.f32.partialorder %v15175_v61, 0.0  ;;  %v4931_v8 = vld [vmem:[#allocation5 + $0x308] sm:$0xff] }
 0xc4b   : > { %v9548_v46 = vpack.c.bf16 %v13227_v63, %v13222_v11  ;;  %v4630_v57 = vadd.f32 0.2548296, %v4614_v15  ;;  %v4389_v43 = vsel %vm4373_vm4, -1.0, %v15169_v45  ;;  %v4341_v1 = vmul.f32 0.5, %v15176_v55  ;;  %v4897_v22 = vld [vmem:[#allocation3 + $0x300] sm:$0xff]  ;;  %v4898_v34 = vld [vmem:[#allocation3 + $0x308] sm:$0xff] }
 0xc4c   : > { %v13233_v51 = vmul.f32 %v4771_v32, %v4339_v29  ;;  %v13235_v4 = vmul.f32 %v4772_v17, %v4340_v56  ;;  %v4645_v5 = vmul.f32 %v4629_v28, %v13155_v25  ;;  %v4390_v25 = vsel %vm4374_vm6, -1.0, %v15169_v45  ;;  %v4948_v20 = vld [vmem:[#allocation5 + $0x390] sm:$0xff]  ;;  %v4949_v7 = vld [vmem:[#allocation5 + $0x398] sm:$0xff]  ;;  %v4918_v53 = vld [vmem:[#allocation3 + $0x3a8] sm:$0xff] }
 0xc4d   : > { %9549 = vmatprep.subr.bf16.mxu0 %v9548_v46  ;;  %v4646_v54 = vmul.f32 %v4630_v57, %v13089_v60  ;;  %v4342_v14 = vmul.f32 0.5, %v15177_v33  ;;  %v13256_v13 = vpack.c.bf16 %v4947_v49, %v4946_v42  ;;  %v13260_v50 = vpack.c.bf16 %v4931_v8, %v4930_v36  ;;  %v4916_v56 = vld [vmem:[#allocation3 + $0x398] sm:$0xff]  ;;  %v4899_v32 = vld [vmem:[#allocation3 + $0x310] sm:$0xff]  ;;  %v4951_v57 = vld [vmem:[#allocation5 + $0x3a8] sm:$0xff] }
 0xc4e   : > { %9551 = vmatpush3.bf16.msra.mxu0 %v9548_v46  ;;  %v9552_v3 = vpack.c.bf16 %v13235_v4, %v13233_v51  ;;  %v4725_v19 = vmul.f32 %v10024_v23, %v4645_v5  ;;  %v4913_v23 = vld [vmem:[#allocation3 + $0x380] sm:$0xff]  ;;  %v13263_v47 = vpack.c.bf16 %v4898_v34, %v4897_v22  ;;  %v13267_v52 = vpack.c.bf16 %v4949_v7, %v4948_v20  ;;  %v4933_v29 = vld [vmem:[#allocation5 + $0x318] sm:$0xff]  ;;  %v4935_v61 = vld [vmem:[#allocation5 + $0x328] sm:$0xff] }
 0xc4f   : > { %v4726_v10 = vmul.f32 %v10026_v12, %v4646_v54  ;;  %v13258_v40 = vpack.c.bf16 %v4914_v21, %v4913_v23  ;;  %v13269_v15 = vpack.c.bf16 %v4916_v56, %v4915_v31  ;;  %v13272_v17 = vpack.c.bf16 %v4933_v29, %v4932_v39  ;;  %v4900_v28 = vld [vmem:[#allocation3 + $0x318] sm:$0xff]  ;;  %v4950_v46 = vld [vmem:[#allocation5 + $0x3a0] sm:$0xff]  ;;  %v4955_v42 = vld [vmem:[#allocation5 + $0x3c8] sm:$0xff] }
 0xc50   : > { %9553 = vmatprep.subr.bf16.mxu0 %v9552_v3  ;;  %v4741_v59 = vsub.f32 1.0, %v4725_v19  ;;  %v13276_v5 = vpack.c.bf16 %v4900_v28, %v4899_v32  ;;  %v13278_v54 = vpack.c.bf16 %v4951_v57, %v4950_v46  ;;  %v4917_v12 = vld [vmem:[#allocation3 + $0x3a0] sm:$0xff]  ;;  %v4937_v33 = vld [vmem:[#allocation5 + $0x338] sm:$0xff]  ;;  %v4922_v23 = vld [vmem:[#allocation3 + $0x3c8] sm:$0xff] }
 0xc51   : > { %v4742_v41 = vsub.f32 1.0, %v4726_v10  ;;  %9561 = vmatprep.subr.bf16.mxu1 %v13258_v40  ;;  %v13280_v19 = vpack.c.bf16 %v4918_v53, %v4917_v12  ;;  %v4901_v10 = vld [vmem:[#allocation3 + $0x320] sm:$0xff]  ;;  %v4939_v34 = vld [vmem:[#allocation5 + $0x348] sm:$0xff]  ;;  %v4956_v56 = vld [vmem:[#allocation5 + $0x3d0] sm:$0xff] }
 0xc52   : > { %9555 = vmatpush3.bf16.msra.mxu0 %v9552_v3  ;;  %v4757_v60 = vmul.f32 %v4741_v59, %v4389_v43  ;;  %9563 = vmatpush3.bf16.msra.mxu1 %v13263_v47  ;;  %v4934_v3 = vld [vmem:[#allocation5 + $0x320] sm:$0xff]  ;;  %v4902_v59 = vld [vmem:[#allocation3 + $0x328] sm:$0xff]  ;;  %v4957_v39 = vld [vmem:[#allocation5 + $0x3d8] sm:$0xff] }
 0xc53   : > { %v4758_v26 = vmul.f32 %v4742_v41, %v4390_v25  ;;  %9565 = vmatprep.subr.bf16.mxu1 %v13269_v15  ;;  %v13283_v43 = vpack.c.bf16 %v4935_v61, %v4934_v3  ;;  %v4952_v41 = vld [vmem:[#allocation5 + $0x3b0] sm:$0xff]  ;;  %v4953_v25 = vld [vmem:[#allocation5 + $0x3b8] sm:$0xff]  ;;  %v4921_v49 = vld [vmem:[#allocation3 + $0x3c0] sm:$0xff]  ;;  %v13313_v28 = vpack.c.bf16 %v4957_v39, %v4956_v56 }
 0xc54   : > { %v4773_v37 = vadd.f32 1.0, %v4757_v60  ;;  %v4919_v60 = vld [vmem:[#allocation3 + $0x3b0] sm:$0xff]  ;;  %v13289_v55 = vpack.c.bf16 %v4953_v25, %v4952_v41  ;;  %v4938_v22 = vld [vmem:[#allocation5 + $0x340] sm:$0xff]  ;;  %v13304_v7 = vpack.c.bf16 %v4922_v23, %v4921_v49  ;;  %v4906_v31 = vld [vmem:[#allocation3 + $0x348] sm:$0xff] }
 0xc55   : > { %v4774_v9 = vadd.f32 1.0, %v4758_v26  ;;  %v13287_v26 = vpack.c.bf16 %v4902_v59, %v4901_v10  ;;  %v4905_v20 = vld [vmem:[#allocation3 + $0x340] sm:$0xff]  ;;  %v13307_v29 = vpack.c.bf16 %v4939_v34, %v4938_v22  ;;  %v4923_v46 = vld [vmem:[#allocation3 + $0x3d0] sm:$0xff]  ;;  %v4924_v57 = vld [vmem:[#allocation3 + $0x3d8] sm:$0xff] }
 0xc56   : > { %v13247_v27 = vmul.f32 %v4773_v37, %v4341_v1  ;;  %9567 = vmatpush3.bf16.msra.mxu1 %v13276_v5  ;;  %v4920_v1 = vld [vmem:[#allocation3 + $0x3b8] sm:$0xff]  ;;  %v4936_v37 = vld [vmem:[#allocation5 + $0x330] sm:$0xff]  ;;  %v13311_v32 = vpack.c.bf16 %v4906_v31, %v4905_v20  ;;  %v13319_v53 = vpack.c.bf16 %v4924_v57, %v4923_v46  ;;  %v4958_v25 = vld [vmem:[#allocation5 + $0x3e0] sm:$0xff] }
 0xc57   : > { %v13249_v44 = vmul.f32 %v4774_v9, %v4342_v14  ;;  %9569 = vmatprep.subr.bf16.mxu1 %v13280_v19  ;;  %v13292_v14 = vpack.c.bf16 %v4920_v1, %v4919_v60  ;;  %v4903_v9 = vld [vmem:[#allocation3 + $0x330] sm:$0xff]  ;;  %v13295_v21 = vpack.c.bf16 %v4937_v33, %v4936_v37  ;;  %v4941_v3 = vld [vmem:[#allocation5 + $0x358] sm:$0xff]  ;;  %v4959_v60 = vld [vmem:[#allocation5 + $0x3e8] sm:$0xff] }
 0xc58   : > { %v4940_v12 = vld [vmem:[#allocation5 + $0x350] sm:$0xff]  ;;  %v4908_v10 = vld [vmem:[#allocation3 + $0x358] sm:$0xff]  ;;  %v13328_v1 = vpack.c.bf16 %v4959_v60, %v4958_v25  ;;  %v4925_v37 = vld [vmem:[#allocation3 + $0x3e0] sm:$0xff] }
 0xc59   : > { %15178 = vst [vmem:[#allocation49_spill] sm:$0xff] %v13249_v44  ;;  %v9556_v35 = vpack.c.bf16 %v13249_v44, %v13247_v27  ;;  %v4907_v61 = vld [vmem:[#allocation3 + $0x350] sm:$0xff]  ;;  %v13321_v59 = vpack.c.bf16 %v4941_v3, %v4940_v12  ;;  %v4926_v33 = vld [vmem:[#allocation3 + $0x3e8] sm:$0xff]  ;;  %v4961_v20 = vld [vmem:[#allocation5 + $0x3f8] sm:$0xff] }
 0xc5a   : > { %9571 = vmatpush3.bf16.msra.mxu1 %v13287_v26  ;;  %v13323_v41 = vpack.c.bf16 %v4908_v10, %v4907_v61  ;;  %v4910_v49 = vld [vmem:[#allocation3 + $0x368] sm:$0xff]  ;;  %v4960_v34 = vld [vmem:[#allocation5 + $0x3f0] sm:$0xff]  ;;  %v4928_v39 = vld [vmem:[#allocation3 + $0x3f8] sm:$0xff] }
 0xc5b   : > { %9557 = vmatprep.subr.bf16.mxu0 %v9556_v35  ;;  %9573 = vmatprep.subr.bf16.mxu1 %v13292_v14  ;;  %v13340_v31 = vpack.c.bf16 %v4961_v20, %v4960_v34  ;;  %v4927_v56 = vld [vmem:[#allocation3 + $0x3f0] sm:$0xff]  ;;  %v4945_v12 = vld [vmem:[#allocation5 + $0x378] sm:$0xff] }
 0xc5c   : > { %9559 = vmatpush3.bf16.msra.mxu0 %v9556_v35  ;;  %v4904_v35 = vld [vmem:[#allocation3 + $0x338] sm:$0xff]  ;;  %v4944_v46 = vld [vmem:[#allocation5 + $0x370] sm:$0xff]  ;;  %v13342_v57 = vpack.c.bf16 %v4928_v39, %v4927_v56 }
 0xc5d   : > { %9593 = vmatprep.subr.bf16.mxu0 %v13256_v13  ;;  %v13299_v36 = vpack.c.bf16 %v4904_v35, %v4903_v9  ;;  %v4942_v9 = vld [vmem:[#allocation5 + $0x360] sm:$0xff]  ;;  %v13330_v35 = vpack.c.bf16 %v4926_v33, %v4925_v37  ;;  %v4911_v3 = vld [vmem:[#allocation3 + $0x370] sm:$0xff]  ;;  %v4912_v61 = vld [vmem:[#allocation3 + $0x378] sm:$0xff]  ;;  %v13345_v10 = vpack.c.bf16 %v4945_v12, %v4944_v46 }
 0xc5e   : > { %v13347_v25 = vpack.c.bf16 %v4912_v61, %v4911_v3  ;;  %v15179_v46 = vld [vmem:[#allocation12_spill] sm:$0xff]  ;;  %v15180_v3 = vld [vmem:[#allocation13_spill] sm:$0xff] }
 0xc5f   : > { %8918 = vmatmul.mubr.f32.vlgmr.msra.gmra.mrb[34].mxu0 %v10255_v58  ;;  %v4954_v58 = vld [vmem:[#allocation5 + $0x3c0] sm:$0xff]  ;;  %9575 = vmatpush3.bf16.msra.mxu1 %v13299_v36 }
 0xc60   : > { %9595 = vmatpush3.bf16.msra.mxu0 %v13260_v50  ;;  %v13301_v8 = vpack.c.bf16 %v4955_v42, %v4954_v58  ;;  %9577 = vmatprep.subr.bf16.mxu1 %v13304_v7  ;;  %v4943_v58 = vld [vmem:[#allocation5 + $0x368] sm:$0xff]  ;;  %v4909_v42 = vld [vmem:[#allocation3 + $0x360] sm:$0xff] }
 0xc61   : > { %9597 = vmatprep.subr.bf16.mxu0 %v13267_v52  ;;  %v13333_v23 = vpack.c.bf16 %v4943_v58, %v4942_v9  ;;  %v13335_v22 = vpack.c.bf16 %v4910_v49, %v4909_v42 }
 0xc63   : > { %9579 = vmatpush3.bf16.msra.mxu1 %v13311_v32 }
 0xc64   : > { %9599 = vmatpush3.bf16.msra.mxu0 %v13272_v17  ;;  %9581 = vmatprep.subr.bf16.mxu1 %v13319_v53 }
 0xc65   : > { %9601 = vmatprep.subr.bf16.mxu0 %v13278_v54 }
 0xc67   : > { %9583 = vmatpush3.bf16.msra.mxu1 %v13323_v41 }
 0xc68   : > { %9603 = vmatpush3.bf16.msra.mxu0 %v13283_v43  ;;  %9585 = vmatprep.subr.bf16.mxu1 %v13330_v35 }
 0xc69   : > { %9605 = vmatprep.subr.bf16.mxu0 %v13289_v55 }
 0xc6b   : > { %9587 = vmatpush3.bf16.msra.mxu1 %v13335_v22 }
 0xc6c   : > { %9607 = vmatpush3.bf16.msra.mxu0 %v13295_v21  ;;  %9589 = vmatprep.subr.bf16.mxu1 %v13342_v57 }
 0xc6d   : > { %9609 = vmatprep.subr.bf16.mxu0 %v13301_v8 }
 0xc6f   : > { %9591 = vmatpush3.bf16.msra.mxu1 %v13347_v25 }
 0xc70   : > { %9611 = vmatpush3.bf16.msra.mxu0 %v13307_v29  ;;  %9625 = vmatprep.subr.bf16.mxu1 %v13258_v40 }
 0xc71   : > { %9613 = vmatprep.subr.bf16.mxu0 %v13313_v28 }
 0xc74   : > { %9615 = vmatpush3.bf16.msra.mxu0 %v13321_v59 }
 0xc75   : > { %9617 = vmatprep.subr.bf16.mxu0 %v13328_v1 }
 0xc78   : > { %9619 = vmatpush3.bf16.msra.mxu0 %v13333_v23 }
 0xc79   : > { %9621 = vmatprep.subr.bf16.mxu0 %v13340_v31 }
 0xc7c   : > { %9623 = vmatpush3.bf16.msra.mxu0 %v13345_v10 }
 0xc7d   : > { %9657 = vmatprep.subr.bf16.mxu0 %v13256_v13 }
 0xd32   : > { %v8919_v60 = vpop.f32.mrb[34].mxu0 }
 0xd33   : > { %4882 = vrot.lane.b32.xlu0 %v8919_v60, %s10350_s22  ;;  %v4857_v37 = vpop.f32.mrb[35].mxu0 }
 0xd34   : > { %4867 = vrot.lane.b32.xlu1 %v4857_v37, %s10350_s22  ;;  %s7625_s22 = sshll.u32 %s15205_s21, 1 }
 0xd35   : > { %s524_s24 = scalar_lea.vmem %s14853_s15, %s7625_s22 }
 0xd37   : > { %4885 = vrot.lane.b32.xlu0 %v8919_v60, %s10351_s20 }
 0xd38   : > { %4870 = vrot.lane.b32.xlu1 %v4857_v37, %s10351_s20 }
 0xd3b   : > { %4888 = vrot.lane.b32.xlu0 %v8919_v60, %s10352_s27 }
 0xd3c   : > { %4873 = vrot.lane.b32.xlu1 %v4857_v37, %s10352_s27 }
 0xda5   : > { %v4883_v33 = vpop.permute.xlu0 %4882 }
 0xda6   : > { %v4868_v9 = vpop.permute.xlu1 %4867  ;;  %v4891_v40 = vsel %vm883_vm5, %v8919_v60, %v4883_v33 }
 0xda7   : > { %v4876_v42 = vsel %vm883_vm5, %v4857_v37, %v4868_v9  ;;  %v15182_v37 = vld [vmem:[#allocation23_spill] sm:$0xff] }
 0xda8   : > { %v5611_v33 = vmul.f32 0.6, %v15182_v37 }
 0xda9   : > { %v4886_v58 = vpop.permute.xlu0 %4885 }
 0xdaa   : > { %v4871_v13 = vpop.permute.xlu1 %4870  ;;  %v4892_v49 = vsel %vm885_vm7, %v4891_v40, %v4886_v58 }
 0xdab   : > { %v4877_v20 = vsel %vm885_vm7, %v4876_v42, %v4871_v13  ;;  %v15183_v13 = vld [vmem:[#allocation22_spill] sm:$0xff] }
 0xdac   : > { %v5610_v40 = vmul.f32 0.6, %v15183_v13 }
 0xdad   : > { %v4889_v34 = vpop.permute.xlu0 %4888 }
 0xdae   : > { %v4893_v56 = vsel %vm887_vm8, %v4892_v49, %v4889_v34  ;;  %v4874_v39 = vpop.permute.xlu1 %4873 }
 0xdaf   : > { %v4894_v12 = vmul.f32 %v4893_v56, %v15179_v46  ;;  %v4895_v61 = vmul.f32 %v4893_v56, %v15180_v3  ;;  %v4878_v45 = vsel %vm887_vm8, %v4877_v20, %v4874_v39  ;;  %v15184_v39 = vld [vmem:[#allocation28_spill] sm:$0xff] }
 0xdb0   : > { %v4879_v44 = vmul.f32 %v4878_v45, %v15179_v46  ;;  %v4880_v60 = vmul.f32 %v4878_v45, %v15180_v3  ;;  %v7736_v45 = vld [vmem:[%s14845_s7 + $0x60] sm:$0xff]  ;;  %v5613_v46 = vmul.f32 0.6, %v15184_v39 }
 0xdb1   : > { %5096 = vmatprep.mubr.f32.mxu0 %v4895_v61 }
 0xdb2   : > { %5026 = vmatprep.mubr.f32.mxu1 %v4880_v60  ;;  %5097 = vmatmul.mubr.f32.vlgmr.msra.gmra.mrb[36].mxu0 %v4894_v12 }
 0xdb3   : > { %9659 = vmatpush3.bf16.msra.mxu0 %v13260_v50  ;;  %5027 = vmatmul.mubr.f32.vlgmr.msra.gmra.mrb[60].mxu1 %v4879_v44  ;;  %v7737_v50 = vld [vmem:[%s14845_s7 + $0x68] sm:$0xff] }
 0xdb4   : > { %9627 = vmatpush3.bf16.msra.mxu1 %v13263_v47  ;;  %5237 = vmatprep.mubr.f32.mxu0 %v4880_v60  ;;  %v9688_v47 = vpack.c.bf16 %v7737_v50, %v7736_v45  ;;  %v15185_v60 = vld [vmem:[#allocation24_spill] sm:$0xff] }
 0xdb5   : > { %5167 = vmatprep.mubr.f32.mxu1 %v4895_v61  ;;  %9661 = vmatprep.subr.bf16.mxu0 %v13267_v52  ;;  %v7738_v52 = vld [vmem:[%s14845_s7 + $0x70] sm:$0xff]  ;;  %v5612_v45 = vmul.f32 0.6, %v15185_v60 }
 0xdb6   : > { %9629 = vmatprep.subr.bf16.mxu1 %v13269_v15  ;;  %v7739_v15 = vld [vmem:[%s14845_s7 + $0x78] sm:$0xff] }
 0xdb7   : > { %9663 = vmatpush3.bf16.msra.mxu0 %v13272_v17  ;;  %v9692_v17 = vpack.c.bf16 %v7739_v15, %v7738_v52 }
 0xdb8   : > { %9631 = vmatpush3.bf16.msra.mxu1 %v13276_v5  ;;  %9665 = vmatprep.subr.bf16.mxu0 %v13278_v54  ;;  %v10257_v54 = vld [vmem:[%s14840_s2 + $0x8] sm:$0xff] }
 0xdb9   : > { %9633 = vmatprep.subr.bf16.mxu1 %v13280_v19  ;;  %v10258_v19 = vld [vmem:[%s14840_s2 + $0x10] sm:$0xff] }
 0xdbb   : > { %9667 = vmatpush3.bf16.msra.mxu0 %v13283_v43  ;;  %v10259_v43 = vld [vmem:[%s14840_s2 + $0x18] sm:$0xff] }
 0xdbc   : > { %9635 = vmatpush3.bf16.msra.mxu1 %v13287_v26  ;;  %9669 = vmatprep.subr.bf16.mxu0 %v13289_v55  ;;  %v10260_v26 = vld [vmem:[%s14840_s2 + $0x20] sm:$0xff]  ;;  %v10261_v55 = vld [vmem:[%s14840_s2 + $0x28] sm:$0xff] }
 0xdbd   : > { %9637 = vmatprep.subr.bf16.mxu1 %v13292_v14  ;;  %v10262_v14 = vld [vmem:[%s14840_s2 + $0x30] sm:$0xff] }
 0xdbf   : > { %9671 = vmatpush3.bf16.msra.mxu0 %v13295_v21  ;;  %v10263_v21 = vld [vmem:[%s14840_s2 + $0x38] sm:$0xff] }
 0xdc0   : > { %9639 = vmatpush3.bf16.msra.mxu1 %v13299_v36  ;;  %9673 = vmatprep.subr.bf16.mxu0 %v13301_v8  ;;  %v10264_v36 = vld [vmem:[%s14840_s2 + $0x40] sm:$0xff]  ;;  %v10265_v8 = vld [vmem:[%s14840_s2 + $0x48] sm:$0xff] }
 0xdc1   : > { %9641 = vmatprep.subr.bf16.mxu1 %v13304_v7  ;;  %v10266_v7 = vld [vmem:[%s14840_s2 + $0x50] sm:$0xff] }
 0xdc3   : > { %9675 = vmatpush3.bf16.msra.mxu0 %v13307_v29  ;;  %v10267_v29 = vld [vmem:[%s14840_s2 + $0x58] sm:$0xff] }
 0xdc4   : > { %9643 = vmatpush3.bf16.msra.mxu1 %v13311_v32  ;;  %9677 = vmatprep.subr.bf16.mxu0 %v13313_v28  ;;  %v10268_v32 = vld [vmem:[%s14840_s2 + $0x60] sm:$0xff]  ;;  %v10269_v28 = vld [vmem:[%s14840_s2 + $0x68] sm:$0xff] }
 0xdc5   : > { %9645 = vmatprep.subr.bf16.mxu1 %v13319_v53  ;;  %v10270_v53 = vld [vmem:[%s14840_s2 + $0x70] sm:$0xff] }
 0xdc7   : > { %9679 = vmatpush3.bf16.msra.mxu0 %v13321_v59  ;;  %v10271_v59 = vld [vmem:[%s14840_s2 + $0x78] sm:$0xff] }
 0xdc8   : > { %9647 = vmatpush3.bf16.msra.mxu1 %v13323_v41  ;;  %9681 = vmatprep.subr.bf16.mxu0 %v13328_v1  ;;  %v6106_v41 = vld [vmem:[%s14847_s9] sm:$0xff]  ;;  %v6107_v1 = vld [vmem:[%s14847_s9 + $0x8] sm:$0xff] }
 0xdc9   : > { %9649 = vmatprep.subr.bf16.mxu1 %v13330_v35  ;;  %v9700_v35 = vpack.c.bf16 %v6107_v1, %v6106_v41 }
 0xdcb   : > { %9683 = vmatpush3.bf16.msra.mxu0 %v13333_v23  ;;  %v6108_v23 = vld [vmem:[%s14847_s9 + $0x10] sm:$0xff] }
 0xdcc   : > { %9651 = vmatpush3.bf16.msra.mxu1 %v13335_v22  ;;  %9685 = vmatprep.subr.bf16.mxu0 %v13340_v31  ;;  %v6109_v22 = vld [vmem:[%s14847_s9 + $0x18] sm:$0xff] }
 0xdcd   : > { %9653 = vmatprep.subr.bf16.mxu1 %v13342_v57  ;;  %v9704_v31 = vpack.c.bf16 %v6109_v22, %v6108_v23  ;;  %v13523_v57 = vld [vmem:[%s14846_s8 + $0x3] ss:$0 sm:$0xff] }
 0xdcf   : > { %9687 = vmatpush3.bf16.msra.mxu0 %v13345_v10 }
 0xdd0   : > { %9655 = vmatpush3.bf16.msra.mxu1 %v13347_v25  ;;  %9701 = vmatprep.subr.bf16.mxu0 %v9700_v35 }
 0xdd1   : > { %9689 = vmatprep.subr.bf16.mxu1 %v9688_v47 }
 0xdd2   : > { %5238 = vmatmul.mubr.f32.vlgmr.msra.gmra.mrb[38].mxu0 %v4879_v44 }
 0xdd3   : > { %5168 = vmatmul.mubr.f32.vlgmr.msra.gmra.mrb[62].mxu1 %v4894_v12  ;;  %9703 = vmatpush3.bf16.msra.mxu0 %v9700_v35 }
 0xdd4   : > { %9691 = vmatpush3.bf16.msra.mxu1 %v9688_v47  ;;  %8928 = vmatprep.mubr.msk.f32.mxu1 %vm883_vm5, %v13105_v0  ;;  %v15181_v0 = vld [vmem:[#allocation49_spill] sm:$0xff] }
 0xdd5   : > { %9693 = vmatprep.subr.bf16.mxu1 %v9692_v17  ;;  %9705 = vmatprep.subr.bf16.mxu0 %v9704_v31 }
 0xdd7   : > { %9707 = vmatpush3.bf16.msra.mxu0 %v9704_v31 }
 0xdd8   : > { %9695 = vmatpush3.bf16.msra.mxu1 %v9692_v17 }
 0xddb   : > { %8929 = vmatmul.mubr.msk.f32.vlgmr.msra.gmra.mrb[64].mxu1 %vm883_vm5, %v13108_v30  ;;  %v10256_v30 = vld [vmem:[%s14840_s2] sm:$0xff] }
 0xddc   : > { %8931 = vmatprep.mubr.msk.f32.mxu1 %vm883_vm5, %v13124_v16 }
 0xddf   : > { %8932 = vmatmul.mubr.msk.f32.gmra.mrb[66].mxu1 %vm883_vm5, %v13127_v48 }
 0xde0   : > { %8934 = vmatprep.mubr.msk.f32.mxu1 %vm883_vm5, %v13136_v24 }
 0xde3   : > { %8935 = vmatmul.mubr.msk.f32.gmra.mrb[68].mxu1 %vm883_vm5, %v13139_v6 }
 0xde4   : > { %8937 = vmatprep.mubr.msk.f32.mxu1 %vm883_vm5, %v13168_v62 }
 0xde7   : > { %8938 = vmatmul.mubr.msk.f32.gmra.mrb[70].mxu1 %vm883_vm5, %v13172_v38 }
 0xde8   : > { %8940 = vmatprep.mubr.msk.f32.mxu1 %vm883_vm5, %v13199_v18 }
 0xdeb   : > { %8941 = vmatmul.mubr.msk.f32.gmra.mrb[72].mxu1 %vm883_vm5, %v13204_v2 }
 0xdec   : > { %8943 = vmatprep.mubr.msk.f32.mxu1 %vm883_vm5, %v13222_v11 }
 0xdef   : > { %8944 = vmatmul.mubr.msk.f32.gmra.mrb[74].mxu1 %vm883_vm5, %v13227_v63 }
 0xdf0   : > { %8946 = vmatprep.mubr.msk.f32.mxu1 %vm883_vm5, %v13233_v51 }
 0xdf3   : > { %8947 = vmatmul.mubr.msk.f32.gmra.mrb[76].mxu1 %vm883_vm5, %v13235_v4 }
 0xdf4   : > { %8949 = vmatprep.mubr.msk.f32.mxu1 %vm883_vm5, %v13247_v27 }
 0xdf7   : > { %8950 = vmatmul.mubr.msk.f32.gmra.mrb[78].mxu1 %vm883_vm5, %v15181_v0  ;;  %v15186_v0 = vld [vmem:[#allocation31_spill] sm:$0xff] }
 0xdf8   : > { %8956 = vmatprep.mubr.msk.f32.mxu1 %vm1448_vm9, %v10256_v30  ;;  %v5615_v30 = vmul.f32 0.6, %v15186_v0 }
 0xe85   : > { %v8469_v16 = vpop.f32.mrb[36].mxu0 }
 0xe86   : > { %v8434_v48 = vpop.f32.mrb[60].mxu1  ;;  %v8470_v24 = vpop.f32.mrb[37].mxu0 }
 0xe87   : > { %v8471_v6 = vadd.f32 %v8470_v24, %v8469_v16  ;;  %v8435_v62 = vpop.f32.mrb[61].mxu1  ;;  %v15187_v24 = vld [vmem:[#allocation30_spill] sm:$0xff] }
 0xe88   : > { %v8436_v38 = vadd.f32 %v8435_v62, %v8434_v48 }
 0xe8a   : > { %v5102_v18 = vsub.f32 %v8436_v38, %v8471_v6  ;;  %v5614_v6 = vmul.f32 0.6, %v15187_v24 }
 0xea5   : > { %v8539_v2 = vpop.f32.mrb[38].mxu0 }
 0xea6   : > { %v8504_v11 = vpop.f32.mrb[62].mxu1  ;;  %v8540_v63 = vpop.f32.mrb[39].mxu0 }
 0xea7   : > { %v8541_v51 = vadd.f32 %v8540_v63, %v8539_v2  ;;  %v8505_v4 = vpop.f32.mrb[63].mxu1 }
 0xea8   : > { %v8506_v27 = vadd.f32 %v8505_v4, %v8504_v11  ;;  %v15189_v4 = vld [vmem:[#allocation36_spill] sm:$0xff] }
 0xeaa   : > { %v5240_v44 = vadd.f32 %v8541_v51, %v8506_v27  ;;  %v13542_v27 = vmul.f32 0.6, %v15189_v4 }
 0xeac   : > { %v9696_v5 = vpack.c.bf16 %v5240_v44, %v5102_v18  ;;  %v15188_v18 = vld [vmem:[#allocation29_spill] sm:$0xff] }
 0xead   : > { %v5617_v2 = vmul.f32 0.6, %v15188_v18 }
 0xeae   : > { %9697 = vmatprep.subr.bf16.mxu1 %v9696_v5 }
 0xeaf   : > { %9699 = vmatpush3.bf16.msra.mxu1 %v9696_v5 }
 0xeb0   : > { %9708 = vmatprep.subr.bf16.mxu1 %v9700_v35 }
 0xeb2   : > { %8957 = vmatmul.mubr.msk.f32.vlgmr.msra.gmra.mrb[64].mxu1 %vm1448_vm9, %v10257_v54 }
 0xeb3   : > { %8959 = vmatprep.mubr.msk.f32.mxu1 %vm1448_vm9, %v10258_v19  ;;  %9710 = vmatpush3.bf16.msra.mxu1 %v9700_v35  ;;  %v15192_v35 = vmov 1.0  }
 0xeb4   : > { %9709 = vmatprep.subr.bf16.mxu1 %v9704_v31 }
 0xeb6   : > { %8960 = vmatmul.mubr.msk.f32.gmra.mrb[66].mxu1 %vm1448_vm9, %v10259_v43 }
 0xeb7   : > { %8962 = vmatprep.mubr.msk.f32.mxu1 %vm1448_vm9, %v10260_v26  ;;  %9711 = vmatpush3.bf16.msra.mxu1 %v9704_v31  ;;  %v15190_v26 = vld [vmem:[#allocation38_spill] sm:$0xff] }
 0xeba   : > { %8963 = vmatmul.mubr.msk.f32.gmra.mrb[68].mxu1 %vm1448_vm9, %v10261_v55  ;;  %v13546_v55 = vmul.f32 0.6, %v15190_v26 }
 0xebb   : > { %8965 = vmatprep.mubr.msk.f32.mxu1 %vm1448_vm9, %v10262_v14  ;;  %v15191_v14 = vld [vmem:[#allocation37_spill] sm:$0xff] }
 0xebe   : > { %8966 = vmatmul.mubr.msk.f32.gmra.mrb[70].mxu1 %vm1448_vm9, %v10263_v21  ;;  %v13549_v21 = vmul.f32 0.6, %v15191_v14 }
 0xebf   : > { %8968 = vmatprep.mubr.msk.f32.mxu1 %vm1448_vm9, %v10264_v36 }
 0xec2   : > { %8969 = vmatmul.mubr.msk.f32.gmra.mrb[72].mxu1 %vm1448_vm9, %v10265_v8 }
 0xec3   : > { %8971 = vmatprep.mubr.msk.f32.mxu1 %vm1448_vm9, %v10266_v7 }
 0xec6   : > { %8972 = vmatmul.mubr.msk.f32.gmra.mrb[74].mxu1 %vm1448_vm9, %v10267_v29 }
 0xec7   : > { %8974 = vmatprep.mubr.msk.f32.mxu1 %vm1448_vm9, %v10268_v32 }
 0xeca   : > { %8975 = vmatmul.mubr.msk.f32.gmra.mrb[76].mxu1 %vm1448_vm9, %v10269_v28 }
 0xecb   : > { %8977 = vmatprep.mubr.msk.f32.mxu1 %vm1448_vm9, %v10270_v53 }
 0xece   : > { %8978 = vmatmul.mubr.msk.f32.gmra.mrb[78].mxu1 %vm1448_vm9, %v10271_v59 }
 0xf85   : > { %v8958_v10 = vpop.f32.mrb[64].mxu1 }
 0xf86   : > { %v5595_v25 = vadd.f32 %v8958_v10, %v13523_v57  ;;  %v5507_v9 = vpop.f32.mrb[65].mxu1 }
 0xf87   : > { %v5594_v58 = vadd.f32 %v13523_v57, %v5507_v9 }
 0xf88   : > { %v5627_v42 = vadd.f32 %v5611_v33, %v5595_v25 }
 0xf89   : > { %v5626_v49 = vadd.f32 %v5610_v40, %v5594_v58  ;;  %v8961_v34 = vpop.f32.mrb[66].mxu1 }
 0xf8a   : > { %v5659_v20 = vmul.f32 0.70710677, %v5627_v42  ;;  %v5597_v56 = vadd.f32 %v8961_v34, %v13523_v57  ;;  %v5517_v12 = vpop.f32.mrb[67].mxu1  ;;  %v13551_v36 = vmul.f32 0.5, %v5627_v42 }
 0xf8b   : > { %v5658_v3 = vmul.f32 0.70710677, %v5626_v49  ;;  %v5596_v61 = vadd.f32 %v13523_v57, %v5517_v12  ;;  %v13556_v53 = vmul.f32 0.5, %v5626_v49 }
 0xf8c   : > { %v5707_v50 = vand.u32 2147483647, %v5659_v20  ;;  %v5629_v47 = vadd.f32 %v5613_v46, %v5597_v56  ;;  %vm5675_vm7 = vcmp.lt.f32.partialorder %v5659_v20, 0.0 }
 0xf8d   : > { %v5706_v52 = vand.u32 2147483647, %v5658_v3  ;;  %v5628_v15 = vadd.f32 %v5612_v45, %v5596_v61  ;;  %v8964_v17 = vpop.f32.mrb[68].mxu1  ;;  %vm5674_vm8 = vcmp.lt.f32.partialorder %v5658_v3, 0.0  ;;  %v13562_v23 = vsel %vm5675_vm7, -1.0, %v15192_v35 }
 0xf8e   : > { %v5723_v16 = vmul.f32 0.3275911, %v5707_v50  ;;  %v5527_v48 = vpop.f32.mrb[69].mxu1  ;;  %v13535_v38 = vmul.f32 0.70710677, %v5629_v47  ;;  %v5599_v51 = vadd.f32 %v8964_v17, %v13523_v57  ;;  %v5963_v44 = vsub.f32 0.0, %v5707_v50 }
 0xf8f   : > { %v5722_v62 = vmul.f32 0.3275911, %v5706_v52  ;;  %v13538_v63 = vmul.f32 0.70710677, %v5628_v15  ;;  %v5962_v7 = vsub.f32 0.0, %v5706_v52  ;;  %v5598_v41 = vadd.f32 %v13523_v57, %v5527_v48 }
 0xf90   : > { %v5739_v11 = vadd.f32 1.0, %v5723_v16  ;;  %v5709_v54 = vand.u32 2147483647, %v13535_v38  ;;  %v13554_v32 = vadd.f32 %v5615_v30, %v5599_v51  ;;  %v5979_v28 = vmul.f32 %v5963_v44, %v5707_v50 }
 0xf91   : > { %v5738_v5 = vadd.f32 1.0, %v5722_v62  ;;  %v8967_v19 = vpop.f32.mrb[70].mxu1  ;;  %v5708_v29 = vand.u32 2147483647, %v13538_v63  ;;  %v13568_v25 = vsel %vm5674_vm8, -1.0, %v15192_v35  ;;  %v13570_v37 = vadd.f32 %v5614_v6, %v5598_v41 }
 0xf92   : > { %10027 = vrcp.f32 %v5739_v11  ;;  %v5537_v43 = vpop.f32.mrb[71].mxu1  ;;  %v5725_v8 = vmul.f32 0.3275911, %v5709_v54  ;;  %v5965_v22 = vsub.f32 0.0, %v5709_v54  ;;  %v13565_v10 = vmul.f32 0.70710677, %v13554_v32 }
 0xf93   : > { %10029 = vrcp.f32 %v5738_v5  ;;  %v5724_v31 = vmul.f32 0.3275911, %v5708_v29  ;;  %v5601_v33 = vadd.f32 %v8967_v19, %v13523_v57  ;;  %v5978_v58 = vmul.f32 %v5962_v7, %v5706_v52 }
 0xf94   : > { %v5741_v59 = vadd.f32 1.0, %v5725_v8  ;;  %v13575_v13 = vmul.f32 0.5, %v5629_v47  ;;  %v5711_v42 = vand.u32 2147483647, %v13565_v10  ;;  %v5996_v49 = vmul.f32 1.442695, %v5979_v28 }
 0xf95   : > { %v13559_v1 = vpop.f32.mrb[72].mxu1  ;;  %v5740_v40 = vadd.f32 1.0, %v5724_v31  ;;  %v5964_v34 = vsub.f32 0.0, %v5708_v29  ;;  %v13579_v20 = vmul.f32 0.70710677, %v13570_v37  ;;  %v5981_v39 = vmul.f32 %v5965_v22, %v5709_v54 }
 0xf96   : > { %10031 = vrcp.f32 %v5741_v59  ;;  %v13573_v9 = vpop.f32.mrb[73].mxu1  ;;  %v13583_v46 = vmul.f32 0.5, %v5628_v15  ;;  %v5727_v12 = vmul.f32 0.3275911, %v5711_v42  ;;  %v5967_v61 = vsub.f32 0.0, %v5711_v42 }
 0xf97   : > { %10033 = vrcp.f32 %v5740_v40  ;;  %v5710_v60 = vand.u32 2147483647, %v13579_v20  ;;  %v13588_v45 = vadd.f32 %v5617_v2, %v5601_v33  ;;  %v5600_v50 = vadd.f32 %v13523_v57, %v5537_v43 }
 0xf98   : > { %v5994_v52 = vmul.f32 1.442695, %v5978_v58  ;;  %vm5677_vm9 = vcmp.lt.f32.partialorder %v13535_v38, 0.0  ;;  %vm5676_vm10 = vcmp.lt.f32.partialorder %v13538_v63, 0.0  ;;  %v5743_v17 = vadd.f32 1.0, %v5727_v12 }
 0xf99   : > { %v13581_v56 = vpop.f32.mrb[74].mxu1  ;;  %10035 = vpow2.f32 %v5996_v49  ;;  %v5980_v30 = vmul.f32 %v5964_v34, %v5708_v29  ;;  %v5726_v16 = vmul.f32 0.3275911, %v5710_v60  ;;  %v6000_v6 = vmul.f32 1.442695, %v5981_v39 }
 0xf9a   : > { %v13585_v3 = vpop.f32.mrb[75].mxu1  ;;  %10037 = vrcp.f32 %v5743_v17  ;;  %v13596_v62 = vmul.f32 0.70710677, %v13588_v45  ;;  %v5983_v51 = vmul.f32 %v5967_v61, %v5711_v42  ;;  %v13601_v44 = vadd.f32 %v13542_v27, %v5600_v50 }
 0xf9b   : > { %v5742_v4 = vadd.f32 1.0, %v5726_v16  ;;  %10039 = vpow2.f32 %v5994_v52  ;;  %v13606_v54 = vsel %vm5677_vm9, -1.0, %v15192_v35  ;;  %v13614_v26 = vsel %vm5676_vm10, -1.0, %v15192_v35 }
 0xf9c   : > { %v10028_v47 = vpop.eup %10027  ;;  %v5998_v14 = vmul.f32 1.442695, %v5980_v30  ;;  %v5966_v38 = vsub.f32 0.0, %v5710_v60  ;;  %v6004_v22 = vmul.f32 1.442695, %v5983_v51  ;;  %vm5679_vm11 = vcmp.lt.f32.partialorder %v13565_v10, 0.0 }
 0xf9d   : > { %v10030_v15 = vpop.eup %10029  ;;  %v5771_v0 = vmul.f32 %v10028_v47, %v5739_v11  ;;  %v13593_v48 = vpop.f32.mrb[76].mxu1  ;;  %10041 = vrcp.f32 %v5742_v4  ;;  %v13624_v31 = vmul.f32 0.70710677, %v13601_v44  ;;  %vm5678_vm12 = vcmp.lt.f32.partialorder %v13579_v20, 0.0 }
 0xf9e   : > { %v5770_v24 = vmul.f32 %v10030_v15, %v5738_v5  ;;  %v13598_v18 = vpop.f32.mrb[77].mxu1  ;;  %v5713_v5 = vand.u32 2147483647, %v13596_v62  ;;  %10043 = vpow2.f32 %v6000_v6  ;;  %v5982_v50 = vmul.f32 %v5966_v38, %v5710_v60 }
 0xf9f   : > { %v5787_v2 = vsub.f32 2.0, %v5771_v0  ;;  %10045 = vpow2.f32 %v5998_v14  ;;  %vm5681_vm13 = vcmp.lt.f32.partialorder %v13596_v62, 0.0  ;;  %v15195_v62 = vld [vmem:[#allocation46_spill] sm:$0xff]  ;;  %vm5680_vm14 = vcmp.lt.f32.partialorder %v13624_v31, 0.0 }
 0xfa0   : > { %v5786_v11 = vsub.f32 2.0, %v5770_v24  ;;  %v10032_v19 = vpop.eup %10031  ;;  %v5729_v29 = vmul.f32 0.3275911, %v5713_v5  ;;  %v5969_v49 = vsub.f32 0.0, %v5713_v5  ;;  %v6002_v38 = vmul.f32 1.442695, %v5982_v50 }
 0xfa1   : > { %v13609_v43 = vmul.f32 %v10028_v47, %v5787_v2  ;;  %v13616_v27 = vpop.f32.mrb[78].mxu1  ;;  %v5773_v7 = vmul.f32 %v10032_v19, %v5741_v59  ;;  %v10034_v63 = vpop.eup %10033  ;;  %v5712_v59 = vand.u32 2147483647, %v13624_v31 }
 0xfa2   : > { %v13618_v8 = vmul.f32 %v10030_v15, %v5786_v11  ;;  %v13620_v28 = vpop.f32.mrb[79].mxu1  ;;  %v5745_v42 = vadd.f32 1.0, %v5729_v29  ;;  %v5772_v39 = vmul.f32 %v10034_v63, %v5740_v40  ;;  %v5985_v24 = vmul.f32 %v5969_v49, %v5713_v5 }
 0xfa3   : > { %v5819_v41 = vmul.f32 1.0614054, %v13609_v43  ;;  %v5789_v58 = vsub.f32 2.0, %v5773_v7  ;;  %v13630_v47 = vpop.eup %10035  ;;  %v5728_v0 = vmul.f32 0.3275911, %v5712_v59  ;;  %v5968_v6 = vsub.f32 0.0, %v5712_v59 }
 0xfa4   : > { %v5818_v33 = vmul.f32 1.0614054, %v13618_v8  ;;  %10047 = vrcp.f32 %v5745_v42  ;;  %v5788_v15 = vsub.f32 2.0, %v5772_v39  ;;  %v10038_v30 = vpop.eup %10037 }
 0xfa5   : > { %v5835_v34 = vadd.f32 -1.4531521, %v5819_v41  ;;  %v13628_v61 = vmul.f32 %v10032_v19, %v5789_v58  ;;  %10049 = vpow2.f32 %v6004_v22  ;;  %v5775_v11 = vmul.f32 %v10038_v30, %v5743_v17  ;;  %v10040_v19 = vpop.eup %10039 }
 0xfa6   : > { %v5834_v12 = vadd.f32 -1.4531521, %v5818_v33  ;;  %v13635_v51 = vmul.f32 %v10034_v63, %v5788_v15  ;;  %v5744_v60 = vadd.f32 1.0, %v5728_v0  ;;  %v5984_v29 = vmul.f32 %v5968_v6, %v5712_v59 }
 0xfa7   : > { %v5851_v52 = vmul.f32 %v5835_v34, %v13609_v43  ;;  %v5821_v40 = vmul.f32 1.0614054, %v13628_v61  ;;  %v10042_v41 = vpop.eup %10041  ;;  %v5791_v58 = vsub.f32 2.0, %v5775_v11  ;;  %v5603_v17 = vadd.f32 %v13559_v1, %v13523_v57 }
 0xfa8   : > { %v5850_v16 = vmul.f32 %v5834_v12, %v13618_v8  ;;  %v5820_v33 = vmul.f32 1.0614054, %v13635_v51  ;;  %10051 = vrcp.f32 %v5744_v60  ;;  %v5774_v63 = vmul.f32 %v10042_v41, %v5742_v4  ;;  %v10044_v34 = vpop.eup %10043 }
 0xfa9   : > { %v5867_v2 = vadd.f32 1.4214138, %v5851_v52  ;;  %v5837_v7 = vadd.f32 -1.4531521, %v5821_v40  ;;  %v13643_v50 = vmul.f32 %v10038_v30, %v5791_v58  ;;  %v6008_v59 = vmul.f32 1.442695, %v5985_v24 }
 0xfaa   : > { %v5866_v14 = vadd.f32 1.4214138, %v5850_v16  ;;  %v5836_v12 = vadd.f32 -1.4531521, %v5820_v33  ;;  %v5790_v0 = vsub.f32 2.0, %v5774_v63  ;;  %10053 = vpow2.f32 %v6002_v38  ;;  %v13645_v16 = vpop.eup %10045 }
 0xfab   : > { %v5883_v22 = vmul.f32 %v5867_v2, %v13609_v43  ;;  %v5853_v49 = vmul.f32 %v5837_v7, %v13628_v61  ;;  %v5823_v4 = vmul.f32 1.0614054, %v13643_v50  ;;  %v13650_v2 = vmul.f32 1.442695, %v5984_v29 }
 0xfac   : > { %v5882_v5 = vmul.f32 %v5866_v14, %v13618_v8  ;;  %v5852_v6 = vmul.f32 %v5836_v12, %v13635_v51  ;;  %v13654_v24 = vmul.f32 %v10042_v41, %v5790_v0  ;;  %v13657_v14 = vadd.f32 %v13546_v55, %v5603_v17 }
 0xfad   : > { %v5899_v39 = vadd.f32 -0.28449672, %v5883_v22  ;;  %v5869_v15 = vadd.f32 1.4214138, %v5853_v49  ;;  %v5839_v33 = vadd.f32 -1.4531521, %v5823_v4  ;;  %10055 = vpow2.f32 %v6008_v59 }
 0xfae   : > { %v5898_v52 = vadd.f32 -0.28449672, %v5882_v5  ;;  %v10048_v1 = vpop.eup %10047  ;;  %v5868_v22 = vadd.f32 1.4214138, %v5852_v6  ;;  %v5822_v29 = vmul.f32 1.0614054, %v13654_v24  ;;  %10057 = vpow2.f32 %v13650_v2 }
 0xfaf   : > { %v5915_v40 = vmul.f32 %v5899_v39, %v13609_v43  ;;  %v5885_v30 = vmul.f32 %v5869_v15, %v13628_v61  ;;  %v13659_v7 = vpop.eup %10049  ;;  %v5777_v58 = vmul.f32 %v10048_v1, %v5745_v42  ;;  %v5855_v41 = vmul.f32 %v5839_v33, %v13643_v50 }
 0xfb0   : > { %v5914_v11 = vmul.f32 %v5898_v52, %v13618_v8  ;;  %v5884_v39 = vmul.f32 %v5868_v22, %v13635_v51  ;;  %v5838_v52 = vadd.f32 -1.4531521, %v5822_v29  ;;  %v13668_v15 = vmul.f32 0.70710677, %v13657_v14 }
 0xfb1   : > { %v5931_v38 = vadd.f32 0.2548296, %v5915_v40  ;;  %v5901_v49 = vadd.f32 -0.28449672, %v5885_v30  ;;  %v5793_v12 = vsub.f32 2.0, %v5777_v58  ;;  %v5694_v2 = vsel %vm5678_vm12, -1.0, %v15192_v35 }
 0xfb2   : > { %v5930_v5 = vadd.f32 0.2548296, %v5914_v11  ;;  %v10052_v42 = vpop.eup %10051  ;;  %v5900_v40 = vadd.f32 -0.28449672, %v5884_v39  ;;  %v5854_v11 = vmul.f32 %v5838_v52, %v13654_v24  ;;  %vm5683_vm15 = vcmp.lt.f32.partialorder %v13668_v15, 0.0 }
 0xfb3   : > { %v5947_v63 = vmul.f32 %v5931_v38, %v13609_v43  ;;  %v5917_v17 = vmul.f32 %v5901_v49, %v13628_v61  ;;  %v5871_v43 = vadd.f32 1.4214138, %v5855_v41  ;;  %v13672_v59 = vmul.f32 %v10048_v1, %v5793_v12 }
 0xfb4   : > { %v5946_v55 = vmul.f32 %v5930_v5, %v13618_v8  ;;  %v5776_v8 = vmul.f32 %v10052_v42, %v5744_v60  ;;  %v5916_v38 = vmul.f32 %v5900_v40, %v13635_v51  ;;  %v10054_v58 = vpop.eup %10053  ;;  %v5870_v49 = vadd.f32 1.4214138, %v5854_v11 }
 0xfb5   : > { %v6027_v0 = vmul.f32 %v13630_v47, %v5947_v63  ;;  %v5933_v4 = vadd.f32 0.2548296, %v5917_v17  ;;  %v5887_v22 = vmul.f32 %v5871_v43, %v13643_v50  ;;  %v5825_v33 = vmul.f32 1.0614054, %v13672_v59 }
 0xfb6   : > { %v6026_v6 = vmul.f32 %v10040_v19, %v5946_v55  ;;  %v5792_v29 = vsub.f32 2.0, %v5776_v8  ;;  %v5932_v19 = vadd.f32 0.2548296, %v5916_v38  ;;  %v5886_v12 = vmul.f32 %v5870_v49, %v13654_v24 }
 0xfb7   : > { %v6043_v30 = vsub.f32 1.0, %v6027_v0  ;;  %v5949_v5 = vmul.f32 %v5933_v4, %v13628_v61  ;;  %v5903_v63 = vadd.f32 -0.28449672, %v5887_v22  ;;  %v5841_v39 = vadd.f32 -1.4531521, %v5825_v33  ;;  %v10056_v40 = vpop.eup %10055 }
 0xfb8   : > { %v6042_v47 = vsub.f32 1.0, %v6026_v6  ;;  %v13682_v55 = vmul.f32 %v10052_v42, %v5792_v29  ;;  %v5948_v52 = vmul.f32 %v5932_v19, %v13635_v51  ;;  %v5902_v6 = vadd.f32 -0.28449672, %v5886_v12 }
 0xfb9   : > { %v6059_v1 = vmul.f32 %v6043_v30, %v13562_v23  ;;  %v6029_v41 = vmul.f32 %v10044_v34, %v5949_v5  ;;  %v5919_v0 = vmul.f32 %v5903_v63, %v13643_v50  ;;  %v5857_v61 = vmul.f32 %v5841_v39, %v13672_v59 }
 0xfba   : > { %v6058_v60 = vmul.f32 %v6042_v47, %v13568_v25  ;;  %v5824_v4 = vmul.f32 1.0614054, %v13682_v55  ;;  %v6028_v25 = vmul.f32 %v13645_v16, %v5948_v52  ;;  %v5602_v42 = vadd.f32 %v13523_v57, %v13573_v9 }
 0xfbb   : > { %v6075_v17 = vadd.f32 1.0, %v6059_v1  ;;  %v6045_v23 = vsub.f32 1.0, %v6029_v41  ;;  %v5935_v34 = vadd.f32 0.2548296, %v5919_v0  ;;  %v5873_v11 = vadd.f32 1.4214138, %v5857_v61 }
 0xfbc   : > { %v6074_v43 = vadd.f32 1.0, %v6058_v60  ;;  %v5918_v30 = vmul.f32 %v5902_v6, %v13654_v24  ;;  %v5840_v38 = vadd.f32 -1.4531521, %v5824_v4  ;;  %v6044_v33 = vsub.f32 1.0, %v6028_v25  ;;  %v15193_v6 = vld [vmem:[#allocation41_spill] sm:$0xff] }
 0xfbd   : > { %v6061_v51 = vmul.f32 %v6045_v23, %v13606_v54  ;;  %v6091_v22 = vmul.f32 %v6075_v17, %v13551_v36  ;;  %v5951_v47 = vmul.f32 %v5935_v34, %v13643_v50  ;;  %v5889_v5 = vmul.f32 %v5873_v11, %v13672_v59 }
 0xfbe   : > { %v6090_v8 = vmul.f32 %v6074_v43, %v13556_v53  ;;  %v5695_v16 = vsel %vm5679_vm11, -1.0, %v15192_v35  ;;  %v5934_v49 = vadd.f32 0.2548296, %v5918_v30  ;;  %v5856_v9 = vmul.f32 %v5840_v38, %v13682_v55 }
 0xfbf   : > { %v13702_v53 = vand.u32 2147483647, %v13668_v15  ;;  %v6077_v54 = vadd.f32 1.0, %v6061_v51  ;;  %v6060_v36 = vmul.f32 %v6044_v33, %v13614_v26  ;;  %v6031_v29 = vmul.f32 %v13659_v7, %v5951_v47 }
 0xfc0   : > { %8988 = vmatprep.mubr.msk.f32.mxu0 %vm883_vm5, %v6090_v8  ;;  %v5905_v50 = vadd.f32 -0.28449672, %v5889_v5  ;;  %v5950_v1 = vmul.f32 %v5934_v49, %v13654_v24  ;;  %v5872_v10 = vadd.f32 1.4214138, %v5856_v9  ;;  %v13711_v63 = vadd.f32 %v13549_v21, %v5602_v42 }
 0xfc1   : > { %8989 = vmatmul.mubr.msk.f32.vlgmr.msra.gmra.mrb[40].mxu0 %vm883_vm5, %v6091_v22  ;;  %v5731_v19 = vmul.f32 0.3275911, %v13702_v53  ;;  %v6076_v39 = vadd.f32 1.0, %v6060_v36  ;;  %v6047_v60 = vsub.f32 1.0, %v6031_v29  ;;  %v6093_v24 = vmul.f32 %v6077_v54, %v13575_v13 }
 0xfc2   : > { %v5921_v41 = vmul.f32 %v5905_v50, %v13672_v59  ;;  %v6030_v26 = vmul.f32 %v10054_v58, %v5950_v1  ;;  %v5888_v7 = vmul.f32 %v5872_v10, %v13682_v55  ;;  %v13720_v43 = vmul.f32 0.70710677, %v13711_v63 }
 0xfc3   : > { %v5747_v12 = vadd.f32 1.0, %v5731_v19  ;;  %v6092_v17 = vmul.f32 %v6076_v39, %v13583_v46  ;;  %v6063_v52 = vmul.f32 %v6047_v60, %v5695_v16  ;;  %v5605_v58 = vadd.f32 %v13581_v56, %v13523_v57 }
 0xfc4   : > { %v5937_v0 = vadd.f32 0.2548296, %v5921_v41  ;;  %v6046_v21 = vsub.f32 1.0, %v6030_v26  ;;  %v5904_v61 = vadd.f32 -0.28449672, %v5888_v7  ;;  %v5647_v25 = vmul.f32 0.5, %v13554_v32 }
 0xfc5   : > { %10059 = vrcp.f32 %v5747_v12  ;;  %8991 = vmatprep.mubr.msk.f32.mxu0 %vm883_vm5, %v6092_v17  ;;  %v13729_v23 = vand.u32 2147483647, %v13720_v43  ;;  %v5621_v4 = vmul.f32 0.6, %v15193_v6  ;;  %v6079_v34 = vadd.f32 1.0, %v6063_v52 }
 0xfc6   : > { %v5953_v20 = vmul.f32 %v5937_v0, %v13672_v59  ;;  %v6062_v13 = vmul.f32 %v6046_v21, %v5694_v2  ;;  %v5920_v46 = vmul.f32 %v5904_v61, %v13682_v55  ;;  %8992 = vmatmul.mubr.msk.f32.gmra.mrb[42].mxu0 %vm883_vm5, %v6093_v24  ;;  %v15194_v59 = vld [vmem:[#allocation44_spill] sm:$0xff]  ;;  %v5646_v56 = vmul.f32 0.5, %v13570_v37  ;;  %v10058_v37 = vpop.eup %10057 }
 0xfc7   : > { %v5620_v42 = vmul.f32 0.6, %v15194_v59  ;;  %v5730_v30 = vmul.f32 0.3275911, %v13729_v23  ;;  %v13738_v22 = vadd.f32 %v5621_v4, %v5605_v58  ;;  %v5604_v33 = vadd.f32 %v13523_v57, %v13585_v3 }
 0xfc8   : > { %v6033_v11 = vmul.f32 %v10056_v40, %v5953_v20  ;;  %v6078_v8 = vadd.f32 1.0, %v6062_v13  ;;  %v5936_v51 = vadd.f32 0.2548296, %v5920_v46  ;;  %v5607_v5 = vadd.f32 %v13593_v48, %v13523_v57  ;;  %v15196_v46 = vld [vmem:[#allocation42_spill] sm:$0xff] }
 0xfc9   : > { %v5746_v40 = vadd.f32 1.0, %v5730_v30  ;;  %v6095_v16 = vmul.f32 %v6079_v34, %v5647_v25  ;;  %v13746_v49 = vmul.f32 0.70710677, %v13738_v22  ;;  %v13748_v9 = vadd.f32 %v5620_v42, %v5604_v33 }
 0xfca   : > { %v6049_v38 = vsub.f32 1.0, %v6033_v11  ;;  %v6094_v47 = vmul.f32 %v6078_v8, %v5646_v56  ;;  %v5952_v32 = vmul.f32 %v5936_v51, %v13682_v55  ;;  %v5623_v54 = vmul.f32 0.6, %v15195_v62 }
 0xfcb   : > { %v5697_v36 = vsel %vm5681_vm13, -1.0, %v15192_v35  ;;  %10061 = vrcp.f32 %v5746_v40  ;;  %v13755_v48 = vand.u32 2147483647, %v13746_v49  ;;  %v13759_v1 = vmul.f32 0.70710677, %v13748_v9 }
 0xfcc   : > { %v6032_v3 = vmul.f32 %v10058_v37, %v5952_v32  ;;  %8994 = vmatprep.mubr.msk.f32.mxu0 %vm883_vm5, %v6094_v47  ;;  %v6065_v55 = vmul.f32 %v6049_v38, %v5697_v36  ;;  %v13761_v10 = vadd.f32 %v5623_v54, %v5607_v5  ;;  %v5696_v19 = vsel %vm5680_vm14, -1.0, %v15192_v35  ;;  %v15198_v37 = vld [vmem:[#allocation25_spill] sm:$0xff] }
 0xfcd   : > { %8995 = vmatmul.mubr.msk.f32.gmra.mrb[44].mxu0 %vm883_vm5, %v6095_v16  ;;  %v5733_v39 = vmul.f32 0.3275911, %v13755_v48  ;;  %v13766_v41 = vand.u32 2147483647, %v13759_v1  ;;  %v5971_v24 = vsub.f32 0.0, %v13702_v53  ;;  %v5648_v52 = vmul.f32 0.5, %v13601_v44 }
 0xfce   : > { %v6048_v50 = vsub.f32 1.0, %v6032_v3  ;;  %v6081_v26 = vadd.f32 1.0, %v6065_v55  ;;  %v13772_v61 = vmul.f32 0.70710677, %v13761_v10  ;;  %v5606_v20 = vadd.f32 %v13523_v57, %v13598_v18  ;;  %v15197_v18 = vld [vmem:[#allocation21_spill] sm:$0xff] }
 0xfcf   : > { %v10060_v29 = vpop.eup %10059  ;;  %v5749_v17 = vadd.f32 1.0, %v5733_v39  ;;  %v5732_v21 = vmul.f32 0.3275911, %v13766_v41  ;;  %v5622_v6 = vmul.f32 0.6, %v15196_v46  ;;  %v5987_v25 = vmul.f32 %v5971_v24, %v13702_v53 }
 0xfd0   : > { %v5779_v31 = vmul.f32 %v10060_v29, %v5747_v12  ;;  %v6064_v60 = vmul.f32 %v6048_v50, %v5696_v19  ;;  %v5649_v12 = vmul.f32 0.5, %v13588_v45  ;;  %v13783_v34 = vand.u32 2147483647, %v13772_v61 }
 0xfd1   : > { %10063 = vrcp.f32 %v5749_v17  ;;  %v5748_v13 = vadd.f32 1.0, %v5732_v21  ;;  %v13785_v45 = vadd.f32 %v5622_v6, %v5606_v20  ;;  %v5609_v59 = vadd.f32 %v13616_v27, %v13523_v57 }
 0xfd2   : > { %v5795_v7 = vsub.f32 2.0, %v5779_v31  ;;  %v6080_v0 = vadd.f32 1.0, %v6064_v60  ;;  %v6097_v4 = vmul.f32 %v6081_v26, %v5649_v12  ;;  %v5625_v42 = vmul.f32 0.6, %v15197_v18 }
 0xfd3   : > { %10065 = vrcp.f32 %v5748_v13  ;;  %v5970_v51 = vsub.f32 0.0, %v13729_v23  ;;  %v5735_v53 = vmul.f32 0.3275911, %v13783_v34  ;;  %v13796_v30 = vmul.f32 0.70710677, %v13785_v45 }
 0xfd4   : > { %v13775_v2 = vmul.f32 %v10060_v29, %v5795_v7  ;;  %v6096_v58 = vmul.f32 %v6080_v0, %v5648_v52  ;;  %v13798_v38 = vadd.f32 %v5625_v42, %v5609_v59  ;;  %v6012_v33 = vmul.f32 1.442695, %v5987_v25 }
 0xfd5   : > { %v10062_v11 = vpop.eup %10061  ;;  %v5751_v32 = vadd.f32 1.0, %v5735_v53  ;;  %v5624_v16 = vmul.f32 0.6, %v15198_v37  ;;  %v5986_v54 = vmul.f32 %v5970_v51, %v13729_v23  ;;  %v13812_v36 = vmul.f32 0.5, %v13657_v14 }
 0xfd6   : > { %v5827_v44 = vmul.f32 1.0614054, %v13775_v2  ;;  %8997 = vmatprep.mubr.msk.f32.mxu0 %vm883_vm5, %v6096_v58  ;;  %v5778_v8 = vmul.f32 %v10062_v11, %v5746_v40  ;;  %v13802_v40 = vand.u32 2147483647, %v13796_v30  ;;  %v13805_v5 = vmul.f32 0.70710677, %v13798_v38 }
 0xfd7   : > { %8998 = vmatmul.mubr.msk.f32.gmra.mrb[46].mxu0 %vm883_vm5, %v6097_v4  ;;  %10067 = vrcp.f32 %v5751_v32  ;;  %v13815_v3 = vsel %vm5683_vm15, -1.0, %v15192_v35  ;;  %v5973_v55 = vsub.f32 0.0, %v13755_v48  ;;  %v13821_v31 = vmul.f32 0.5, %v13711_v63 }
 0xfd8   : > { %v5843_v56 = vadd.f32 -1.4531521, %v5827_v44  ;;  %v5794_v47 = vsub.f32 2.0, %v5778_v8  ;;  %v5734_v29 = vmul.f32 0.3275911, %v13802_v40  ;;  %10069 = vpow2.f32 %v6012_v33 }
 0xfd9   : > { %vm5682_vm0 = vcmp.lt.f32.partialorder %v13720_v43, 0.0  ;;  %v13826_v60 = vand.u32 2147483647, %v13805_v5  ;;  %v6010_v24 = vmul.f32 1.442695, %v5986_v54  ;;  %v5608_v52 = vadd.f32 %v13523_v57, %v13620_v28 }
 0xfda   : > { %v5859_v27 = vmul.f32 %v5843_v56, %v13775_v2  ;;  %v13808_v15 = vmul.f32 %v10062_v11, %v5794_v47  ;;  %v5750_v39 = vadd.f32 1.0, %v5734_v29  ;;  %v5989_v63 = vmul.f32 %v5973_v55, %v13755_v48 }
 0xfdb   : > { %v10064_v50 = vpop.eup %10063  ;;  %v5737_v12 = vmul.f32 0.3275911, %v13826_v60  ;;  %v5972_v46 = vsub.f32 0.0, %v13766_v41  ;;  %v13838_v6 = vsel %vm5682_vm0, -1.0, %v15192_v35  ;;  %v13842_v4 = vadd.f32 %v5624_v16, %v5608_v52 }
 0xfdc   : > { %v5875_v62 = vadd.f32 1.4214138, %v5859_v27  ;;  %v5826_v23 = vmul.f32 1.0614054, %v13808_v15  ;;  %v5781_v14 = vmul.f32 %v10064_v50, %v5749_v17  ;;  %10071 = vrcp.f32 %v5750_v39 }
 0xfdd   : > { %v10066_v0 = vpop.eup %10065  ;;  %v5753_v28 = vadd.f32 1.0, %v5737_v12  ;;  %10073 = vpow2.f32 %v6010_v24  ;;  %v6016_v59 = vmul.f32 1.442695, %v5989_v63  ;;  %v5988_v8 = vmul.f32 %v5972_v46, %v13766_v41 }
 0xfde   : > { %v5891_v19 = vmul.f32 %v5875_v62, %v13775_v2  ;;  %v5842_v7 = vadd.f32 -1.4531521, %v5826_v23  ;;  %v5797_v21 = vsub.f32 2.0, %v5781_v14  ;;  %v5780_v58 = vmul.f32 %v10066_v0, %v5748_v13 }
 0xfdf   : > { %10075 = vrcp.f32 %v5753_v28  ;;  %v13846_v13 = vmul.f32 0.70710677, %v13842_v4  ;;  %v5975_v27 = vsub.f32 0.0, %v13783_v34  ;;  %vm5685_vm1 = vcmp.lt.f32.partialorder %v13746_v49, 0.0 }
 0xfe0   : > { %v5907_v26 = vadd.f32 -0.28449672, %v5891_v19  ;;  %v5858_v17 = vmul.f32 %v5842_v7, %v13808_v15  ;;  %v13840_v57 = vmul.f32 %v10064_v50, %v5797_v21  ;;  %v5796_v25 = vsub.f32 2.0, %v5780_v58 }
 0xfe1   : > { %v10068_v18 = vpop.eup %10067  ;;  %v13855_v33 = vand.u32 2147483647, %v13846_v13  ;;  %10077 = vpow2.f32 %v6016_v59  ;;  %v6014_v50 = vmul.f32 1.442695, %v5988_v8  ;;  %vm5684_vm2 = vcmp.lt.f32.partialorder %v13759_v1, 0.0 }
 0xfe2   : > { %v5923_v20 = vmul.f32 %v5907_v26, %v13775_v2  ;;  %v5874_v44 = vadd.f32 1.4214138, %v5858_v17  ;;  %v5829_v11 = vmul.f32 1.0614054, %v13840_v57  ;;  %v13850_v56 = vmul.f32 %v10066_v0, %v5796_v25  ;;  %v10070_v47 = vpop.eup %10069 }
 0xfe3   : > { %v5783_v53 = vmul.f32 %v10068_v18, %v5751_v32  ;;  %v5736_v41 = vmul.f32 0.3275911, %v13855_v33  ;;  %v5991_v26 = vmul.f32 %v5975_v27, %v13783_v34  ;;  %v5701_v34 = vsel %vm5685_vm1, -1.0, %v15192_v35 }
 0xfe4   : > { %v5939_v48 = vadd.f32 0.2548296, %v5923_v20  ;;  %v5890_v42 = vmul.f32 %v5874_v44, %v13808_v15  ;;  %v5845_v51 = vadd.f32 -1.4531521, %v5829_v11  ;;  %v5828_v16 = vmul.f32 1.0614054, %v13850_v56 }
 0xfe5   : > { %v5799_v55 = vsub.f32 2.0, %v5783_v53  ;;  %v5752_v7 = vadd.f32 1.0, %v5736_v41  ;;  %v5652_v1 = vmul.f32 0.5, %v13748_v9  ;;  %vm5687_vm3 = vcmp.lt.f32.partialorder %v13772_v61, 0.0 }
 0xfe6   : > { %v5955_v43 = vmul.f32 %v5939_v48, %v13775_v2  ;;  %v5906_v37 = vadd.f32 -0.28449672, %v5890_v42  ;;  %v5974_v2 = vsub.f32 0.0, %v13802_v40  ;;  %v5861_v54 = vmul.f32 %v5845_v51, %v13840_v57  ;;  %v10072_v19 = vpop.eup %10071 }
 0xfe7   : > { %v5844_v29 = vadd.f32 -1.4531521, %v5828_v16  ;;  %v13863_v14 = vmul.f32 %v10068_v18, %v5799_v55  ;;  %v5782_v0 = vmul.f32 %v10072_v19, %v5750_v39  ;;  %10079 = vrcp.f32 %v5752_v7  ;;  %v10074_v17 = vpop.eup %10073 }
 0xfe8   : > { %v6035_v62 = vmul.f32 %v10070_v47, %v5955_v43  ;;  %v5922_v32 = vmul.f32 %v5906_v37, %v13808_v15  ;;  %v5877_v23 = vadd.f32 1.4214138, %v5861_v54  ;;  %v5990_v21 = vmul.f32 %v5974_v2, %v13802_v40 }
 0xfe9   : > { %v5860_v52 = vmul.f32 %v5844_v29, %v13850_v56  ;;  %v5831_v20 = vmul.f32 1.0614054, %v13863_v14  ;;  %v5798_v48 = vsub.f32 2.0, %v5782_v0  ;;  %v10076_v44 = vpop.eup %10075  ;;  %10081 = vpow2.f32 %v6014_v50 }
 0xfea   : > { %v5938_v24 = vadd.f32 0.2548296, %v5922_v32  ;;  %v6051_v63 = vsub.f32 1.0, %v6035_v62  ;;  %v5893_v12 = vmul.f32 %v5877_v23, %v13840_v57  ;;  %v6020_v40 = vmul.f32 1.442695, %v5991_v26 }
 0xfeb   : > { %v5876_v46 = vadd.f32 1.4214138, %v5860_v52  ;;  %v5847_v39 = vadd.f32 -1.4531521, %v5831_v20  ;;  %v13875_v18 = vmul.f32 %v10072_v19, %v5798_v48  ;;  %v6018_v43 = vmul.f32 1.442695, %v5990_v21  ;;  %v10078_v62 = vpop.eup %10077 }
 0xfec   : > { %v5954_v58 = vmul.f32 %v5938_v24, %v13808_v15  ;;  %v5909_v25 = vadd.f32 -0.28449672, %v5893_v12  ;;  %v6067_v42 = vmul.f32 %v6051_v63, %v13815_v3  ;;  %v5785_v8 = vmul.f32 %v10076_v44, %v5753_v28 }
 0xfed   : > { %v5892_v59 = vmul.f32 %v5876_v46, %v13850_v56  ;;  %v5863_v49 = vmul.f32 %v5847_v39, %v13863_v14  ;;  %v5830_v27 = vmul.f32 1.0614054, %v13875_v18  ;;  %v5977_v47 = vsub.f32 0.0, %v13826_v60 }
 0xfee   : > { %v6034_v11 = vmul.f32 %v10074_v17, %v5954_v58  ;;  %v5925_v15 = vmul.f32 %v5909_v25, %v13840_v57  ;;  %10083 = vpow2.f32 %v6020_v40  ;;  %v5801_v2 = vsub.f32 2.0, %v5785_v8 }
 0xfef   : > { %v5908_v53 = vadd.f32 -0.28449672, %v5892_v59  ;;  %v5879_v16 = vadd.f32 1.4214138, %v5863_v49  ;;  %v5846_v55 = vadd.f32 -1.4531521, %v5830_v27  ;;  %10085 = vpow2.f32 %v6018_v43 }
 0xff0   : > { %v6050_v51 = vsub.f32 1.0, %v6034_v11  ;;  %v5941_v37 = vadd.f32 0.2548296, %v5925_v15  ;;  %v6083_v28 = vadd.f32 1.0, %v6067_v42  ;;  %v13887_v29 = vmul.f32 %v10076_v44, %v5801_v2 }
 0xff1   : > { %v5924_v54 = vmul.f32 %v5908_v53, %v13850_v56  ;;  %v5895_v32 = vmul.f32 %v5879_v16, %v13863_v14  ;;  %v5862_v23 = vmul.f32 %v5846_v55, %v13875_v18  ;;  %v5993_v26 = vmul.f32 %v5977_v47, %v13826_v60  ;;  %v10080_v24 = vpop.eup %10079 }
 0xff2   : > { %v6066_v3 = vmul.f32 %v6050_v51, %v13838_v6  ;;  %v5957_v41 = vmul.f32 %v5941_v37, %v13840_v57  ;;  %v5833_v0 = vmul.f32 1.0614054, %v13887_v29  ;;  %v5976_v21 = vsub.f32 0.0, %v13855_v33 }
 0xff3   : > { %v5940_v19 = vadd.f32 0.2548296, %v5924_v54  ;;  %v5911_v6 = vadd.f32 -0.28449672, %v5895_v32  ;;  %v5878_v12 = vadd.f32 1.4214138, %v5862_v23  ;;  %v5784_v20 = vmul.f32 %v10080_v24, %v5752_v7  ;;  %v10082_v17 = vpop.eup %10081 }
 0xff4   : > { %v6082_v50 = vadd.f32 1.0, %v6066_v3  ;;  %v6037_v52 = vmul.f32 %v10078_v62, %v5957_v41  ;;  %v6099_v58 = vmul.f32 %v6083_v28, %v13812_v36  ;;  %v5849_v60 = vadd.f32 -1.4531521, %v5833_v0 }
 0xff5   : > { %v5956_v57 = vmul.f32 %v5940_v19, %v13850_v56  ;;  %v5927_v48 = vmul.f32 %v5911_v6, %v13863_v14  ;;  %v5894_v25 = vmul.f32 %v5878_v12, %v13875_v18  ;;  %v6024_v39 = vmul.f32 1.442695, %v5993_v26 }
 0xff6   : > { %v6098_v63 = vmul.f32 %v6082_v50, %v13821_v31  ;;  %v6053_v46 = vsub.f32 1.0, %v6037_v52  ;;  %v5800_v40 = vsub.f32 2.0, %v5784_v20  ;;  %v5865_v56 = vmul.f32 %v5849_v60, %v13887_v29 }
 0xff7   : > { %v6036_v44 = vmul.f32 %v10082_v17, %v5956_v57  ;;  %v5943_v31 = vadd.f32 0.2548296, %v5927_v48  ;;  %v5910_v59 = vadd.f32 -0.28449672, %v5894_v25  ;;  %v5700_v42 = vsel %vm5684_vm2, -1.0, %v15192_v35 }
 0xff8   : > { %9000 = vmatprep.mubr.msk.f32.mxu0 %vm883_vm5, %v6098_v63  ;;  %v6069_v11 = vmul.f32 %v6053_v46, %v5701_v34  ;;  %v5816_v36 = vmul.f32 %v10080_v24, %v5800_v40  ;;  %v10084_v43 = vpop.eup %10083  ;;  %v5881_v49 = vadd.f32 1.4214138, %v5865_v56  ;;  %v5992_v8 = vmul.f32 %v5976_v21, %v13855_v33 }
 0xff9   : > { %9001 = vmatmul.mubr.msk.f32.gmra.mrb[48].mxu0 %vm883_vm5, %v6099_v58  ;;  %v6052_v7 = vsub.f32 1.0, %v6036_v44  ;;  %v5959_v15 = vmul.f32 %v5943_v31, %v13863_v14  ;;  %v10086_v51 = vpop.eup %10085  ;;  %v5926_v53 = vmul.f32 %v5910_v59, %v13875_v18  ;;  %10087 = vpow2.f32 %v6024_v39 }
 0xffa   : > { %v5832_v27 = vmul.f32 1.0614054, %v5816_v36  ;;  %v5653_v47 = vmul.f32 0.5, %v13738_v22  ;;  %v6085_v37 = vadd.f32 1.0, %v6069_v11  ;;  %v5897_v2 = vmul.f32 %v5881_v49, %v13887_v29 }
 0xffb   : > { %v6068_v34 = vmul.f32 %v6052_v7, %v5700_v42  ;;  %v6039_v16 = vmul.f32 %v10084_v43, %v5959_v15  ;;  %v5942_v3 = vadd.f32 0.2548296, %v5926_v53  ;;  %v6022_v55 = vmul.f32 1.442695, %v5992_v8 }
 0xffc   : > { %v5848_v14 = vadd.f32 -1.4531521, %v5832_v27  ;;  %v5913_v54 = vadd.f32 -0.28449672, %v5897_v2  ;;  %v6101_v50 = vmul.f32 %v6085_v37, %v5653_v47  ;;  %v5703_v19 = vsel %vm5687_vm3, -1.0, %v15192_v35 }
 0xffd   : > { %v6084_v62 = vadd.f32 1.0, %v6068_v34  ;;  %v6055_v33 = vsub.f32 1.0, %v6039_v16  ;;  %v5958_v41 = vmul.f32 %v5942_v3, %v13875_v18  ;;  %vm5686_vm4 = vcmp.lt.f32.partialorder %v13796_v30, 0.0 }
 0xffe   : > { %v5864_v32 = vmul.f32 %v5848_v14, %v5816_v36  ;;  %v5929_v22 = vmul.f32 %v5913_v54, %v13887_v29  ;;  %10089 = vpow2.f32 %v6022_v55  ;;  %v5702_v18 = vsel %vm5686_vm4, -1.0, %v15192_v35 }
 0xfff   : > { %v6100_v28 = vmul.f32 %v6084_v62, %v5652_v1  ;;  %v6038_v9 = vmul.f32 %v10086_v51, %v5958_v41  ;;  %v6071_v26 = vmul.f32 %v6055_v33, %v5703_v19  ;;  %v5654_v12 = vmul.f32 0.5, %v13785_v45 }
0x1000   : > { %v5880_v23 = vadd.f32 1.4214138, %v5864_v32  ;;  %v5945_v61 = vadd.f32 0.2548296, %v5929_v22  ;;  %v5655_v58 = vmul.f32 0.5, %v13761_v10  ;;  %vm5689_vm6 = vcmp.lt.f32.partialorder %v13805_v5, 0.0 }
0x1001   : > { %9003 = vmatprep.mubr.msk.f32.mxu0 %vm883_vm5, %v6100_v28  ;;  %v6054_v24 = vsub.f32 1.0, %v6038_v9  ;;  %v6087_v57 = vadd.f32 1.0, %v6071_v26  ;;  %v5705_v39 = vsel %vm5689_vm6, -1.0, %v15192_v35  ;;  %vm5688_vm7 = vcmp.lt.f32.partialorder %v13846_v13, 0.0  ;;  %v13934_v13 = vld [vmem:[%s14848_s10] ss:$0 sm:$0xff] }
0x1002   : > { %9004 = vmatmul.mubr.msk.f32.gmra.mrb[50].mxu0 %vm883_vm5, %v6101_v50  ;;  %v5896_v52 = vmul.f32 %v5880_v23, %v5816_v36  ;;  %v5961_v6 = vmul.f32 %v5945_v61, %v13887_v29  ;;  %v5704_v10 = vsel %vm5688_vm7, -1.0, %v15192_v35  ;;  %v5656_v5 = vmul.f32 0.5, %v13842_v4 }
0x1003   : > { %v10088_v0 = vpop.eup %10087  ;;  %v6070_v21 = vmul.f32 %v6054_v24, %v5702_v18  ;;  %v6103_v60 = vmul.f32 %v6087_v57, %v5655_v58  ;;  %v5657_v59 = vmul.f32 0.5, %v13798_v38 }
0x1004   : > { %v5912_v63 = vadd.f32 -0.28449672, %v5896_v52  ;;  %v6041_v30 = vmul.f32 %v10088_v0, %v5961_v6 }
0x1005   : > { %v6086_v20 = vadd.f32 1.0, %v6070_v21 }
0x1006   : > { %v5928_v17 = vmul.f32 %v5912_v63, %v5816_v36  ;;  %v6057_v44 = vsub.f32 1.0, %v6041_v30 }
0x1007   : > { %v6102_v46 = vmul.f32 %v6086_v20, %v5654_v12 }
0x1008   : > { %v5944_v48 = vadd.f32 0.2548296, %v5928_v17  ;;  %v10090_v29 = vpop.eup %10089  ;;  %v6073_v40 = vmul.f32 %v6057_v44, %v5705_v39 }
0x1009   : > { %9006 = vmatprep.mubr.msk.f32.mxu0 %vm883_vm5, %v6102_v46 }
0x100a   : > { %v5960_v25 = vmul.f32 %v5944_v48, %v5816_v36  ;;  %9007 = vmatmul.mubr.msk.f32.gmra.mrb[52].mxu0 %vm883_vm5, %v6103_v60  ;;  %v6089_v56 = vadd.f32 1.0, %v6073_v40 }
0x100c   : > { %v6040_v45 = vmul.f32 %v10090_v29, %v5960_v25  ;;  %v6105_v43 = vmul.f32 %v6089_v56, %v5657_v59 }
0x100e   : > { %v6056_v11 = vsub.f32 1.0, %v6040_v45 }
0x1010   : > { %v6072_v31 = vmul.f32 %v6056_v11, %v5704_v10 }
0x1012   : > { %v6088_v7 = vadd.f32 1.0, %v6072_v31 }
0x1014   : > { %v6104_v36 = vmul.f32 %v6088_v7, %v5656_v5 }
0x1016   : > { %9009 = vmatprep.mubr.msk.f32.mxu1 %vm883_vm5, %v6104_v36 }
0x1017   : > { %9010 = vmatmul.mubr.msk.f32.vlgmr.msra.gmra.mrb[80].mxu1 %vm883_vm5, %v6105_v43 }
0x1094   : > { %v8990_v42 = vpop.f32.mrb[40].mxu0 }
0x1095   : > { %v6237_v15 = vadd.f32 %v8990_v42, %v13934_v13  ;;  %v6231_v49 = vpop.f32.mrb[41].mxu0 }
0x1096   : > { %v6232_v4 = vadd.f32 %v13934_v13, %v6231_v49 }
0x1097   : > { %v6327_v8 = vmul.f32 0.70710677, %v6237_v15  ;;  %v13958_v6 = vmul.f32 0.5, %v6237_v15 }
0x1098   : > { %v6326_v51 = vmul.f32 0.70710677, %v6232_v4  ;;  %v13966_v30 = vmul.f32 0.5, %v6232_v4 }
0x1099   : > { %v6375_v38 = vand.u32 2147483647, %v6327_v8  ;;  %v8993_v27 = vpop.f32.mrb[42].mxu0  ;;  %vm6343_vm5 = vcmp.lt.f32.partialorder %v6327_v8, 0.0 }
0x109a   : > { %v6374_v34 = vand.u32 2147483647, %v6326_v51  ;;  %v6247_v37 = vadd.f32 %v8993_v27, %v13934_v13  ;;  %v6241_v16 = vpop.f32.mrb[43].mxu0  ;;  %vm6342_vm8 = vcmp.lt.f32.partialorder %v6326_v51, 0.0  ;;  %v13964_v57 = vsel %vm6343_vm5, -1.0, %v15192_v35 }
0x109b   : > { %v6391_v53 = vmul.f32 0.3275911, %v6375_v38  ;;  %v6242_v1 = vadd.f32 %v13934_v13, %v6241_v16  ;;  %v6631_v41 = vsub.f32 0.0, %v6375_v38  ;;  %v13969_v12 = vsel %vm6342_vm8, -1.0, %v15192_v35 }
0x109c   : > { %v6390_v47 = vmul.f32 0.3275911, %v6374_v34  ;;  %v6329_v3 = vmul.f32 0.70710677, %v6247_v37  ;;  %v6630_v19 = vsub.f32 0.0, %v6374_v34  ;;  %v13972_v46 = vmul.f32 0.5, %v6247_v37 }
0x109d   : > { %v6407_v2 = vadd.f32 1.0, %v6391_v53  ;;  %v13940_v14 = vmul.f32 0.70710677, %v6242_v1  ;;  %v6647_v52 = vmul.f32 %v6631_v41, %v6375_v38  ;;  %v13975_v11 = vmul.f32 0.5, %v6242_v1 }
0x109e   : > { %v6406_v62 = vadd.f32 1.0, %v6390_v47  ;;  %v6377_v33 = vand.u32 2147483647, %v6329_v3  ;;  %v6646_v0 = vmul.f32 %v6630_v19, %v6374_v34  ;;  %vm6345_vm9 = vcmp.lt.f32.partialorder %v6329_v3, 0.0 }
0x109f   : > { %10091 = vrcp.f32 %v6407_v2  ;;  %v6376_v54 = vand.u32 2147483647, %v13940_v14  ;;  %v6664_v44 = vmul.f32 1.442695, %v6647_v52  ;;  %vm6344_vm10 = vcmp.lt.f32.partialorder %v13940_v14, 0.0 }
0x10a0   : > { %10093 = vrcp.f32 %v6406_v62  ;;  %v6393_v55 = vmul.f32 0.3275911, %v6377_v33  ;;  %v8996_v28 = vpop.f32.mrb[44].mxu0  ;;  %v6633_v48 = vsub.f32 0.0, %v6377_v33  ;;  %v6662_v40 = vmul.f32 1.442695, %v6646_v0 }
0x10a1   : > { %v6392_v32 = vmul.f32 0.3275911, %v6376_v54  ;;  %v13944_v50 = vadd.f32 %v8996_v28, %v13934_v13  ;;  %v6251_v22 = vpop.f32.mrb[45].mxu0  ;;  %v6632_v29 = vsub.f32 0.0, %v6376_v54  ;;  %v13992_v8 = vsel %vm6345_vm9, -1.0, %v15192_v35 }
0x10a2   : > { %v6409_v9 = vadd.f32 1.0, %v6393_v55  ;;  %v13947_v23 = vadd.f32 %v13934_v13, %v6251_v22  ;;  %v6649_v36 = vmul.f32 %v6633_v48, %v6377_v33  ;;  %v14003_v16 = vsel %vm6344_vm10, -1.0, %v15192_v35 }
0x10a3   : > { %v6408_v26 = vadd.f32 1.0, %v6392_v32  ;;  %v13950_v61 = vmul.f32 0.70710677, %v13944_v50  ;;  %v6648_v15 = vmul.f32 %v6632_v29, %v6376_v54 }
0x10a4   : > { %10095 = vrcp.f32 %v6409_v9  ;;  %v13953_v24 = vmul.f32 0.70710677, %v13947_v23  ;;  %v6668_v37 = vmul.f32 1.442695, %v6649_v36 }
0x10a5   : > { %10097 = vrcp.f32 %v6408_v26  ;;  %v13956_v18 = vand.u32 2147483647, %v13950_v61  ;;  %v6666_v3 = vmul.f32 1.442695, %v6648_v15  ;;  %vm6347_vm11 = vcmp.lt.f32.partialorder %v13950_v61, 0.0 }
0x10a6   : > { %v13961_v21 = vand.u32 2147483647, %v13953_v24  ;;  %v14019_v0 = vsel %vm6347_vm11, -1.0, %v15192_v35  ;;  %vm6346_vm12 = vcmp.lt.f32.partialorder %v13953_v24, 0.0 }
0x10a7   : > { %v6395_v20 = vmul.f32 0.3275911, %v13956_v18  ;;  %v6635_v54 = vsub.f32 0.0, %v13956_v18 }
0x10a8   : > { %v6394_v60 = vmul.f32 0.3275911, %v13961_v21  ;;  %v6634_v32 = vsub.f32 0.0, %v13961_v21 }
0x10a9   : > { %v10092_v63 = vpop.eup %10091  ;;  %v6411_v39 = vadd.f32 1.0, %v6395_v20  ;;  %v6651_v48 = vmul.f32 %v6635_v54, %v13956_v18 }
0x10aa   : > { %v10094_v17 = vpop.eup %10093  ;;  %v6439_v58 = vmul.f32 %v10092_v63, %v6407_v2  ;;  %v6410_v10 = vadd.f32 1.0, %v6394_v60  ;;  %v8999_v31 = vpop.f32.mrb[46].mxu0 }
0x10ab   : > { %v6438_v25 = vmul.f32 %v10094_v17, %v6406_v62  ;;  %10099 = vrcp.f32 %v6411_v39  ;;  %v13978_v5 = vadd.f32 %v8999_v31, %v13934_v13  ;;  %v6261_v7 = vpop.f32.mrb[47].mxu0 }
0x10ac   : > { %v6455_v45 = vsub.f32 2.0, %v6439_v58  ;;  %10101 = vrcp.f32 %v6410_v10  ;;  %v13983_v43 = vadd.f32 %v13934_v13, %v6261_v7 }
0x10ad   : > { %v6454_v56 = vsub.f32 2.0, %v6438_v25  ;;  %v13989_v49 = vmul.f32 0.70710677, %v13978_v5  ;;  %10103 = vpow2.f32 %v6664_v44  ;;  %v6650_v25 = vmul.f32 %v6634_v32, %v13961_v21 }
0x10ae   : > { %v13980_v59 = vmul.f32 %v10092_v63, %v6455_v45  ;;  %v10096_v4 = vpop.eup %10095  ;;  %v13995_v51 = vmul.f32 0.70710677, %v13983_v43  ;;  %10105 = vpow2.f32 %v6662_v40  ;;  %v6672_v21 = vmul.f32 1.442695, %v6651_v48 }
0x10af   : > { %v13985_v42 = vmul.f32 %v10094_v17, %v6454_v56  ;;  %v10098_v34 = vpop.eup %10097  ;;  %v6441_v53 = vmul.f32 %v10096_v4, %v6409_v9  ;;  %v13999_v27 = vand.u32 2147483647, %v13989_v49  ;;  %10107 = vpow2.f32 %v6668_v37 }
0x10b0   : > { %v6487_v38 = vmul.f32 1.0614054, %v13980_v59  ;;  %v6440_v2 = vmul.f32 %v10098_v34, %v6408_v26  ;;  %v14006_v1 = vand.u32 2147483647, %v13995_v51  ;;  %vm6349_vm13 = vcmp.lt.f32.partialorder %v13989_v49, 0.0 }
0x10b1   : > { %v6486_v47 = vmul.f32 1.0614054, %v13985_v42  ;;  %v6457_v62 = vsub.f32 2.0, %v6441_v53  ;;  %v6397_v14 = vmul.f32 0.3275911, %v13999_v27  ;;  %vm6348_vm14 = vcmp.lt.f32.partialorder %v13995_v51, 0.0 }
0x10b2   : > { %v6456_v33 = vsub.f32 2.0, %v6440_v2  ;;  %v6396_v55 = vmul.f32 0.3275911, %v14006_v1  ;;  %v6503_v28 = vadd.f32 -1.4531521, %v6487_v38  ;;  %v14037_v2 = vsel %vm6346_vm12, -1.0, %v15192_v35 }
0x10b3   : > { %v14012_v41 = vmul.f32 %v10096_v4, %v6457_v62  ;;  %v6413_v22 = vadd.f32 1.0, %v6397_v14  ;;  %v6502_v19 = vadd.f32 -1.4531521, %v6486_v47  ;;  %v6670_v53 = vmul.f32 1.442695, %v6650_v25 }
0x10b4   : > { %v14015_v9 = vmul.f32 %v10098_v34, %v6456_v33  ;;  %v6412_v26 = vadd.f32 1.0, %v6396_v55  ;;  %v6519_v61 = vmul.f32 %v6503_v28, %v13980_v59  ;;  %v6637_v33 = vsub.f32 0.0, %v13999_v27 }
0x10b5   : > { %v10100_v52 = vpop.eup %10099  ;;  %10109 = vrcp.f32 %v6413_v22  ;;  %v6518_v63 = vmul.f32 %v6502_v19, %v13985_v42  ;;  %v6489_v20 = vmul.f32 1.0614054, %v14012_v41 }
0x10b6   : > { %v10102_v17 = vpop.eup %10101  ;;  %v6443_v58 = vmul.f32 %v10100_v52, %v6411_v39  ;;  %10111 = vrcp.f32 %v6412_v26  ;;  %v6535_v60 = vadd.f32 1.4214138, %v6519_v61  ;;  %v6488_v7 = vmul.f32 1.0614054, %v14015_v9 }
0x10b7   : > { %v6442_v44 = vmul.f32 %v10102_v17, %v6410_v10  ;;  %v6534_v29 = vadd.f32 1.4214138, %v6518_v63  ;;  %v6505_v45 = vadd.f32 -1.4531521, %v6489_v20  ;;  %v10104_v40 = vpop.eup %10103  ;;  %10113 = vpow2.f32 %v6666_v3 }
0x10b8   : > { %v6459_v31 = vsub.f32 2.0, %v6443_v58  ;;  %v6551_v56 = vmul.f32 %v6535_v60, %v13980_v59  ;;  %v10106_v36 = vpop.eup %10105  ;;  %v6504_v38 = vadd.f32 -1.4531521, %v6488_v7  ;;  %10115 = vpow2.f32 %v6672_v21 }
0x10b9   : > { %v6458_v39 = vsub.f32 2.0, %v6442_v44  ;;  %v6550_v18 = vmul.f32 %v6534_v29, %v13985_v42  ;;  %v6521_v15 = vmul.f32 %v6505_v45, %v14012_v41  ;;  %v10108_v32 = vpop.eup %10107  ;;  %10117 = vpow2.f32 %v6670_v53 }
0x10ba   : > { %v14030_v10 = vmul.f32 %v10100_v52, %v6459_v31  ;;  %v6567_v4 = vadd.f32 -0.28449672, %v6551_v56  ;;  %v6520_v3 = vmul.f32 %v6504_v38, %v14015_v9 }
0x10bb   : > { %v14032_v34 = vmul.f32 %v10102_v17, %v6458_v39  ;;  %v6566_v47 = vadd.f32 -0.28449672, %v6550_v18  ;;  %v6537_v37 = vadd.f32 1.4214138, %v6521_v15 }
0x10bc   : > { %v6583_v62 = vmul.f32 %v6567_v4, %v13980_v59  ;;  %v6491_v14 = vmul.f32 1.0614054, %v14030_v10  ;;  %v6536_v24 = vadd.f32 1.4214138, %v6520_v3 }
0x10bd   : > { %v6582_v54 = vmul.f32 %v6566_v47, %v13985_v42  ;;  %v6553_v55 = vmul.f32 %v6537_v37, %v14012_v41  ;;  %v6490_v28 = vmul.f32 1.0614054, %v14032_v34 }
0x10be   : > { %v6599_v19 = vadd.f32 0.2548296, %v6583_v62  ;;  %v6507_v61 = vadd.f32 -1.4531521, %v6491_v14  ;;  %v6552_v44 = vmul.f32 %v6536_v24, %v14015_v9 }
0x10bf   : > { %v10110_v52 = vpop.eup %10109  ;;  %v6598_v63 = vadd.f32 0.2548296, %v6582_v54  ;;  %v6569_v20 = vadd.f32 -0.28449672, %v6553_v55  ;;  %v6506_v17 = vadd.f32 -1.4531521, %v6490_v28 }
0x10c0   : > { %v10112_v58 = vpop.eup %10111  ;;  %v6445_v48 = vmul.f32 %v10110_v52, %v6413_v22  ;;  %v6615_v60 = vmul.f32 %v6599_v19, %v13980_v59  ;;  %v6523_v25 = vmul.f32 %v6507_v61, %v14030_v10  ;;  %v6568_v18 = vadd.f32 -0.28449672, %v6552_v44 }
0x10c1   : > { %v6444_v29 = vmul.f32 %v10112_v58, %v6412_v26  ;;  %v6614_v45 = vmul.f32 %v6598_v63, %v13985_v42  ;;  %v6585_v31 = vmul.f32 %v6569_v20, %v14012_v41  ;;  %v6522_v56 = vmul.f32 %v6506_v17, %v14032_v34  ;;  %v10114_v21 = vpop.eup %10113 }
0x10c2   : > { %v6461_v7 = vsub.f32 2.0, %v6445_v48  ;;  %v6695_v39 = vmul.f32 %v10104_v40, %v6615_v60  ;;  %v6539_v15 = vadd.f32 1.4214138, %v6523_v25  ;;  %v6584_v26 = vmul.f32 %v6568_v18, %v14015_v9 }
0x10c3   : > { %v6460_v4 = vsub.f32 2.0, %v6444_v29  ;;  %v6694_v22 = vmul.f32 %v10106_v36, %v6614_v45  ;;  %v6601_v38 = vadd.f32 0.2548296, %v6585_v31  ;;  %v6538_v59 = vadd.f32 1.4214138, %v6522_v56 }
0x10c4   : > { %v14052_v53 = vmul.f32 %v10110_v52, %v6461_v7  ;;  %v6711_v47 = vsub.f32 1.0, %v6695_v39  ;;  %v6555_v42 = vmul.f32 %v6539_v15, %v14030_v10  ;;  %v6600_v54 = vadd.f32 0.2548296, %v6584_v26  ;;  %v10116_v52 = vpop.eup %10115 }
0x10c5   : > { %v14056_v37 = vmul.f32 %v10112_v58, %v6460_v4  ;;  %v6710_v62 = vsub.f32 1.0, %v6694_v22  ;;  %v6617_v3 = vmul.f32 %v6601_v38, %v14012_v41  ;;  %v6554_v40 = vmul.f32 %v6538_v59, %v14032_v34  ;;  %v10118_v58 = vpop.eup %10117 }
0x10c6   : > { %v6727_v14 = vmul.f32 %v6711_v47, %v13964_v57  ;;  %v6571_v36 = vadd.f32 -0.28449672, %v6555_v42  ;;  %v6493_v55 = vmul.f32 1.0614054, %v14052_v53  ;;  %v6616_v20 = vmul.f32 %v6600_v54, %v14015_v9  ;;  %v14069_v57 = vld [vmem:[%s14849_s11] ss:$0 sm:$0xff] }
0x10c7   : > { %v6726_v28 = vmul.f32 %v6710_v62, %v13969_v12  ;;  %v6697_v19 = vmul.f32 %v10108_v32, %v6617_v3  ;;  %v6570_v24 = vadd.f32 -0.28449672, %v6554_v40  ;;  %v6492_v61 = vmul.f32 1.0614054, %v14056_v37 }
0x10c8   : > { %v6743_v63 = vadd.f32 1.0, %v6727_v14  ;;  %v6587_v41 = vmul.f32 %v6571_v36, %v14030_v10  ;;  %v6509_v17 = vadd.f32 -1.4531521, %v6493_v55  ;;  %v6696_v25 = vmul.f32 %v10114_v21, %v6616_v20 }
0x10c9   : > { %v6742_v48 = vadd.f32 1.0, %v6726_v28  ;;  %v6713_v60 = vsub.f32 1.0, %v6697_v19  ;;  %v6586_v12 = vmul.f32 %v6570_v24, %v14032_v34  ;;  %v6508_v32 = vadd.f32 -1.4531521, %v6492_v61 }
0x10ca   : > { %v6759_v44 = vmul.f32 %v6743_v63, %v13958_v6  ;;  %v6603_v29 = vadd.f32 0.2548296, %v6587_v41  ;;  %v6525_v9 = vmul.f32 %v6509_v17, %v14052_v53  ;;  %v6653_v45 = vmul.f32 %v6637_v33, %v13999_v27 }
0x10cb   : > { %v6758_v31 = vmul.f32 %v6742_v48, %v13966_v30  ;;  %v6729_v56 = vmul.f32 %v6713_v60, %v13992_v8  ;;  %v6602_v7 = vadd.f32 0.2548296, %v6586_v12  ;;  %v6712_v18 = vsub.f32 1.0, %v6696_v25 }
0x10cc   : > { %v6782_v39 = vmul.f32 %v14069_v57, %v6759_v44  ;;  %v6619_v15 = vmul.f32 %v6603_v29, %v14030_v10  ;;  %v6524_v6 = vmul.f32 %v6508_v32, %v14056_v37  ;;  %v6636_v21 = vsub.f32 0.0, %v14006_v1  ;;  %v9002_v4 = vpop.f32.mrb[48].mxu0 }
0x10cd   : > { %v6781_v22 = vmul.f32 %v14069_v57, %v6758_v31  ;;  %v6745_v38 = vadd.f32 1.0, %v6729_v56  ;;  %v6618_v27 = vmul.f32 %v6602_v7, %v14032_v34  ;;  %v14086_v30 = vadd.f32 %v9002_v4, %v13934_v13  ;;  %v6271_v8 = vpop.f32.mrb[49].mxu0 }
0x10ce   : > { %6799 = vadd.xlane.f32.xlu0 %v6782_v39  ;;  %v6728_v33 = vmul.f32 %v6712_v18, %v14003_v16  ;;  %v6699_v59 = vmul.f32 %v10116_v52, %v6619_v15  ;;  %v6541_v47 = vadd.f32 1.4214138, %v6525_v9  ;;  %v6676_v10 = vmul.f32 1.442695, %v6653_v45 }
0x10cf   : > { %v14090_v26 = vadd.f32 %v13934_v13, %v6271_v8  ;;  %6797 = vadd.xlane.f32.xlu1 %v6781_v22  ;;  %v6761_v42 = vmul.f32 %v6745_v38, %v13972_v46  ;;  %v6698_v62 = vmul.f32 %v10118_v58, %v6618_v27  ;;  %v14094_v3 = vmul.f32 0.70710677, %v14086_v30 }
0x10d0   : > { %v6744_v34 = vadd.f32 1.0, %v6728_v33  ;;  %v6715_v40 = vsub.f32 1.0, %v6699_v59  ;;  %v6540_v14 = vadd.f32 1.4214138, %v6524_v6  ;;  %v6652_v54 = vmul.f32 %v6636_v21, %v14006_v1 }
0x10d1   : > { %v14098_v16 = vmul.f32 0.70710677, %v14090_v26  ;;  %v6784_v36 = vmul.f32 %v14069_v57, %v6761_v42  ;;  %v6714_v55 = vsub.f32 1.0, %v6698_v62  ;;  %v6383_v28 = vand.u32 2147483647, %v14094_v3 }
0x10d2   : > { %v6760_v19 = vmul.f32 %v6744_v34, %v13975_v11  ;;  %v6731_v46 = vmul.f32 %v6715_v40, %v14019_v0  ;;  %v6557_v24 = vmul.f32 %v6541_v47, %v14052_v53  ;;  %v6315_v61 = vmul.f32 0.5, %v13944_v50 }
0x10d3   : > { %v6382_v52 = vand.u32 2147483647, %v14098_v16  ;;  %6803 = vadd.xlane.f32.xlu1 %v6784_v36  ;;  %v6730_v1 = vmul.f32 %v6714_v55, %v14037_v2  ;;  %10119 = vpow2.f32 %v6676_v10  ;;  %v6399_v63 = vmul.f32 0.3275911, %v6383_v28 }
0x10d4   : > { %v6783_v20 = vmul.f32 %v14069_v57, %v6760_v19  ;;  %v6556_v41 = vmul.f32 %v6540_v14, %v14056_v37  ;;  %v6314_v17 = vmul.f32 0.5, %v13947_v23  ;;  %v6747_v58 = vadd.f32 1.0, %v6731_v46 }
0x10d5   : > { %v6398_v11 = vmul.f32 0.3275911, %v6382_v52  ;;  %v6746_v0 = vadd.f32 1.0, %v6730_v1  ;;  %v6674_v48 = vmul.f32 1.442695, %v6652_v54  ;;  %v6415_v60 = vadd.f32 1.0, %v6399_v63 }
0x10d6   : > { %6801 = vadd.xlane.f32.xlu0 %v6783_v20  ;;  %v6573_v50 = vadd.f32 -0.28449672, %v6557_v24  ;;  %v9005_v32 = vpop.f32.mrb[50].mxu0  ;;  %v6763_v44 = vmul.f32 %v6747_v58, %v6315_v61  ;;  %v6572_v45 = vadd.f32 -0.28449672, %v6556_v41  ;;  %v6639_v38 = vsub.f32 0.0, %v6383_v28 }
0x10d7   : > { %v6414_v12 = vadd.f32 1.0, %v6398_v11  ;;  %v6762_v25 = vmul.f32 %v6746_v0, %v6314_v17  ;;  %10121 = vrcp.f32 %v6415_v60  ;;  %v14112_v2 = vadd.f32 %v9005_v32, %v13934_v13  ;;  %v6281_v29 = vpop.f32.mrb[51].mxu0 }
0x10d8   : > { %v6589_v9 = vmul.f32 %v6573_v50, %v14052_v53  ;;  %v14116_v23 = vadd.f32 %v13934_v13, %v6281_v29  ;;  %v6786_v31 = vmul.f32 %v14069_v57, %v6763_v44  ;;  %v6588_v6 = vmul.f32 %v6572_v45, %v14056_v37 }
0x10d9   : > { %10123 = vrcp.f32 %v6414_v12  ;;  %v14120_v56 = vmul.f32 0.70710677, %v14112_v2  ;;  %v6785_v7 = vmul.f32 %v14069_v57, %v6762_v25  ;;  %v6638_v33 = vsub.f32 0.0, %v6382_v52 }
0x10da   : > { %10125 = vpow2.f32 %v6674_v48  ;;  %v14124_v39 = vmul.f32 0.70710677, %v14116_v23  ;;  %6807 = vadd.xlane.f32.xlu1 %v6786_v31  ;;  %v6605_v18 = vadd.f32 0.2548296, %v6589_v9  ;;  %v6604_v8 = vadd.f32 0.2548296, %v6588_v6 }
0x10db   : > { %v14127_v15 = vand.u32 2147483647, %v14120_v56  ;;  %6805 = vadd.xlane.f32.xlu0 %v6785_v7  ;;  %v6317_v10 = vmul.f32 0.5, %v13978_v5  ;;  %v14138_v42 = vmul.f32 0.5, %v13983_v43  ;;  %v6655_v54 = vmul.f32 %v6639_v38, %v6383_v28 }
0x10dc   : > { %v14131_v21 = vand.u32 2147483647, %v14124_v39  ;;  %v6621_v4 = vmul.f32 %v6605_v18, %v14052_v53  ;;  %v6620_v40 = vmul.f32 %v6604_v8, %v14056_v37  ;;  %v6654_v46 = vmul.f32 %v6638_v33, %v6382_v52 }
0x10dd   : > { %v10120_v22 = vpop.eup %10119  ;;  %v6401_v27 = vmul.f32 0.3275911, %v14127_v15  ;;  %v9008_v34 = vpop.f32.mrb[52].mxu0  ;;  %v6365_v37 = vsel %vm6349_vm13, -1.0, %v15192_v35  ;;  %v6364_v28 = vsel %vm6348_vm14, -1.0, %v15192_v35  ;;  %vm6351_vm15 = vcmp.lt.f32.partialorder %v14094_v3, 0.0 }
0x10de   : > { %v6400_v59 = vmul.f32 0.3275911, %v14131_v21  ;;  %v6701_v47 = vmul.f32 %v10120_v22, %v6621_v4  ;;  %v14146_v36 = vadd.f32 %v9008_v34, %v13934_v13  ;;  %v6291_v5 = vpop.f32.mrb[53].mxu0  ;;  %v6680_v17 = vmul.f32 1.442695, %v6655_v54 }
0x10df   : > { %v6417_v62 = vadd.f32 1.0, %v6401_v27  ;;  %v14150_v24 = vadd.f32 %v13934_v13, %v6291_v5  ;;  %vm6350_vm0 = vcmp.lt.f32.partialorder %v14098_v16, 0.0  ;;  %v6678_v51 = vmul.f32 1.442695, %v6654_v46 }
0x10e0   : > { %v14142_v53 = vadd.f32 1.0, %v6400_v59  ;;  %v6717_v55 = vsub.f32 1.0, %v6701_v47  ;;  %v14159_v63 = vmul.f32 0.70710677, %v14146_v36  ;;  %v14178_v50 = vmul.f32 0.5, %v14090_v26 }
0x10e1   : > { %v10122_v14 = vpop.eup %10121  ;;  %10127 = vrcp.f32 %v6417_v62  ;;  %v14163_v20 = vmul.f32 0.70710677, %v14150_v24  ;;  %v14186_v44 = vsel %vm6351_vm15, -1.0, %v15192_v35  ;;  %v14194_v3 = vmul.f32 0.5, %v14112_v2 }
0x10e2   : > { %v6447_v19 = vmul.f32 %v10122_v14, %v6415_v60  ;;  %10129 = vrcp.f32 %v14142_v53  ;;  %v14166_v49 = vand.u32 2147483647, %v14159_v63  ;;  %v6733_v58 = vmul.f32 %v6717_v55, %v6365_v37 }
0x10e3   : > { %v10124_v43 = vpop.eup %10123  ;;  %v14172_v48 = vand.u32 2147483647, %v14163_v20  ;;  %v14175_v60 = vmul.f32 0.5, %v14086_v30  ;;  %10131 = vpow2.f32 %v6680_v17  ;;  %v14190_v30 = vsel %vm6350_vm0, -1.0, %v15192_v35 }
0x10e4   : > { %v10126_v61 = vpop.eup %10125  ;;  %v6446_v1 = vmul.f32 %v10124_v43, %v6414_v12  ;;  %v6463_v52 = vsub.f32 2.0, %v6447_v19  ;;  %v6403_v32 = vmul.f32 0.3275911, %v14166_v49  ;;  %v6749_v25 = vadd.f32 1.0, %v6733_v58 }
0x10e5   : > { %v6700_v41 = vmul.f32 %v10126_v61, %v6620_v40  ;;  %v6402_v16 = vmul.f32 0.3275911, %v14172_v48  ;;  %10133 = vpow2.f32 %v6678_v51  ;;  %v6641_v27 = vsub.f32 0.0, %v14127_v15 }
0x10e6   : > { %v6462_v11 = vsub.f32 2.0, %v6446_v1  ;;  %v14168_v0 = vmul.f32 %v10122_v14, %v6463_v52  ;;  %v6419_v9 = vadd.f32 1.0, %v6403_v32  ;;  %v6765_v31 = vmul.f32 %v6749_v25, %v6317_v10 }
0x10e7   : > { %v6716_v29 = vsub.f32 1.0, %v6700_v41  ;;  %v6418_v45 = vadd.f32 1.0, %v6402_v16  ;;  %vm6353_vm1 = vcmp.lt.f32.partialorder %v14120_v56, 0.0  ;;  %v14201_v59 = vmul.f32 0.5, %v14116_v23 }
0x10e8   : > { %v14180_v12 = vmul.f32 %v10124_v43, %v6462_v11  ;;  %v6495_v26 = vmul.f32 1.0614054, %v14168_v0  ;;  %10135 = vrcp.f32 %v6419_v9  ;;  %v6788_v33 = vmul.f32 %v14069_v57, %v6765_v31 }
0x10e9   : > { %v6732_v7 = vmul.f32 %v6716_v29, %v6364_v28  ;;  %10137 = vrcp.f32 %v6418_v45  ;;  %vm6352_vm2 = vcmp.lt.f32.partialorder %v14124_v39, 0.0  ;;  %v6657_v55 = vmul.f32 %v6641_v27, %v14127_v15 }
0x10ea   : > { %v6511_v6 = vadd.f32 -1.4531521, %v6495_v26  ;;  %v6494_v4 = vmul.f32 1.0614054, %v14180_v12  ;;  %v9011_v8 = vpop.f32.mrb[80].mxu1  ;;  %6811 = vadd.xlane.f32.xlu1 %v6788_v33  ;;  %v6640_v43 = vsub.f32 0.0, %v14131_v21 }
0x10eb   : > { %v10128_v18 = vpop.eup %10127  ;;  %v14204_v2 = vadd.f32 %v9011_v8, %v13934_v13  ;;  %v6301_v47 = vpop.f32.mrb[81].mxu1  ;;  %v6748_v10 = vadd.f32 1.0, %v6732_v7  ;;  %v6643_v46 = vsub.f32 0.0, %v14166_v49  ;;  %v14240_v41 = vsel %vm6352_vm2, -1.0, %v15192_v35 }
0x10ec   : > { %v10130_v22 = vpop.eup %10129  ;;  %v6449_v38 = vmul.f32 %v10128_v18, %v6417_v62  ;;  %v14208_v62 = vadd.f32 %v13934_v13, %v6301_v47  ;;  %v6527_v14 = vmul.f32 %v6511_v6, %v14168_v0  ;;  %v6510_v5 = vadd.f32 -1.4531521, %v6494_v4 }
0x10ed   : > { %v6448_v40 = vmul.f32 %v10130_v22, %v14142_v53  ;;  %v14213_v54 = vmul.f32 0.70710677, %v14204_v2  ;;  %v6764_v23 = vmul.f32 %v6748_v10, %v14138_v42  ;;  %v14231_v42 = vsel %vm6353_vm1, -1.0, %v15192_v35  ;;  %v10132_v52 = vpop.eup %10131 }
0x10ee   : > { %v6465_v34 = vsub.f32 2.0, %v6449_v38  ;;  %v14219_v53 = vmul.f32 0.70710677, %v14208_v62  ;;  %v6543_v13 = vadd.f32 1.4214138, %v6527_v14  ;;  %v6642_v17 = vsub.f32 0.0, %v14172_v48 }
0x10ef   : > { %v14225_v61 = vand.u32 2147483647, %v14213_v54  ;;  %v6787_v37 = vmul.f32 %v14069_v57, %v6764_v23  ;;  %v6464_v15 = vsub.f32 2.0, %v6448_v40  ;;  %v6526_v56 = vmul.f32 %v6510_v5, %v14180_v12  ;;  %v10134_v58 = vpop.eup %10133 }
0x10f0   : > { %v14221_v19 = vmul.f32 %v10128_v18, %v6465_v34  ;;  %v14234_v28 = vand.u32 2147483647, %v14219_v53  ;;  %v6559_v1 = vmul.f32 %v6543_v13, %v14168_v0  ;;  %v6684_v51 = vmul.f32 1.442695, %v6657_v55 }
0x10f1   : > { %v6405_v11 = vmul.f32 0.3275911, %v14225_v61  ;;  %6809 = vadd.xlane.f32.xlu0 %v6787_v37  ;;  %v6656_v32 = vmul.f32 %v6640_v43, %v14131_v21  ;;  %v6659_v26 = vmul.f32 %v6643_v46, %v14166_v49  ;;  %v6542_v31 = vadd.f32 1.4214138, %v6526_v56 }
0x10f2   : > { %v6404_v16 = vmul.f32 0.3275911, %v14234_v28  ;;  %v6575_v25 = vadd.f32 -0.28449672, %v6559_v1  ;;  %v10136_v29 = vpop.eup %10135  ;;  %v6497_v7 = vmul.f32 1.0614054, %v14221_v19  ;;  %v14249_v6 = vmul.f32 %v10130_v22, %v6464_v15 }
0x10f3   : > { %v6421_v39 = vadd.f32 1.0, %v6405_v11  ;;  %v10138_v18 = vpop.eup %10137  ;;  %v6451_v4 = vmul.f32 %v10136_v29, %v6419_v9  ;;  %v6658_v21 = vmul.f32 %v6642_v17, %v14172_v48  ;;  %v6558_v33 = vmul.f32 %v6542_v31, %v14180_v12 }
0x10f4   : > { %v6420_v38 = vadd.f32 1.0, %v6404_v16  ;;  %v6591_v27 = vmul.f32 %v6575_v25, %v14168_v0  ;;  %v6450_v8 = vmul.f32 %v10138_v18, %v6418_v45  ;;  %v6682_v47 = vmul.f32 1.442695, %v6656_v32 }
0x10f5   : > { %10139 = vrcp.f32 %v6421_v39  ;;  %v6467_v10 = vsub.f32 2.0, %v6451_v4  ;;  %v6574_v40 = vadd.f32 -0.28449672, %v6558_v33  ;;  %v6513_v14 = vadd.f32 -1.4531521, %v6497_v7 }
0x10f6   : > { %10141 = vrcp.f32 %v6420_v38  ;;  %v6607_v49 = vadd.f32 0.2548296, %v6591_v27  ;;  %v6466_v34 = vsub.f32 2.0, %v6450_v8  ;;  %v6688_v9 = vmul.f32 1.442695, %v6659_v26 }
0x10f7   : > { %10143 = vpow2.f32 %v6684_v51  ;;  %v14254_v22 = vmul.f32 %v10136_v29, %v6467_v10  ;;  %v6496_v45 = vmul.f32 1.0614054, %v14249_v6  ;;  %v6686_v48 = vmul.f32 1.442695, %v6658_v21 }
0x10f8   : > { %v6623_v23 = vmul.f32 %v6607_v49, %v14168_v0  ;;  %v14258_v5 = vmul.f32 %v10138_v18, %v6466_v34  ;;  %v6590_v55 = vmul.f32 %v6574_v40, %v14180_v12  ;;  %v6529_v43 = vmul.f32 %v6513_v14, %v14221_v19 }
0x10f9   : > { %v6645_v13 = vsub.f32 0.0, %v14225_v61  ;;  %v6512_v37 = vadd.f32 -1.4531521, %v6496_v45  ;;  %v6499_v15 = vmul.f32 1.0614054, %v14254_v22  ;;  %10145 = vpow2.f32 %v6682_v47 }
0x10fa   : > { %v6703_v46 = vmul.f32 %v10132_v52, %v6623_v23  ;;  %v6606_v1 = vadd.f32 0.2548296, %v6590_v55  ;;  %v6545_v17 = vadd.f32 1.4214138, %v6529_v43  ;;  %v6498_v0 = vmul.f32 1.0614054, %v14258_v5 }
0x10fb   : > { %10147 = vpow2.f32 %v6688_v9  ;;  %v6528_v56 = vmul.f32 %v6512_v37, %v14249_v6  ;;  %v6515_v51 = vadd.f32 -1.4531521, %v6499_v15  ;;  %v6644_v52 = vsub.f32 0.0, %v14234_v28 }
0x10fc   : > { %v6719_v11 = vsub.f32 1.0, %v6703_v46  ;;  %10149 = vpow2.f32 %v6686_v48  ;;  %v6622_v32 = vmul.f32 %v6606_v1, %v14180_v12  ;;  %v6561_v16 = vmul.f32 %v6545_v17, %v14221_v19 }
0x10fd   : > { %v6514_v25 = vadd.f32 -1.4531521, %v6498_v0  ;;  %v6544_v26 = vadd.f32 1.4214138, %v6528_v56  ;;  %v6531_v31 = vmul.f32 %v6515_v51, %v14254_v22  ;;  %v6661_v18 = vmul.f32 %v6645_v13, %v14225_v61 }
0x10fe   : > { %v6735_v29 = vmul.f32 %v6719_v11, %v14186_v44  ;;  %v6702_v4 = vmul.f32 %v10134_v58, %v6622_v32  ;;  %v6577_v27 = vadd.f32 -0.28449672, %v6561_v16  ;;  %vm6355_vm3 = vcmp.lt.f32.partialorder %v14159_v63, 0.0 }
0x10ff   : > { %v10140_v7 = vpop.eup %10139  ;;  %v6530_v8 = vmul.f32 %v6514_v25, %v14258_v5  ;;  %v6560_v47 = vmul.f32 %v6544_v26, %v14249_v6  ;;  %v6547_v10 = vadd.f32 1.4214138, %v6531_v31  ;;  %v6692_v31 = vmul.f32 1.442695, %v6661_v18 }
0x1100   : > { %v10142_v21 = vpop.eup %10141  ;;  %v6453_v33 = vmul.f32 %v10140_v7, %v6421_v39  ;;  %v6751_v12 = vadd.f32 1.0, %v6735_v29  ;;  %v6718_v40 = vsub.f32 1.0, %v6702_v4  ;;  %v6593_v44 = vmul.f32 %v6577_v27, %v14221_v19 }
0x1101   : > { %v10144_v49 = vpop.eup %10143  ;;  %v6452_v34 = vmul.f32 %v10142_v21, %v6420_v38  ;;  %v6546_v14 = vadd.f32 1.4214138, %v6530_v8  ;;  %v6576_v61 = vadd.f32 -0.28449672, %v6560_v47  ;;  %v6563_v58 = vmul.f32 %v6547_v10, %v14254_v22 }
0x1102   : > { %v6469_v9 = vsub.f32 2.0, %v6453_v33  ;;  %v6767_v23 = vmul.f32 %v6751_v12, %v14175_v60  ;;  %v6734_v48 = vmul.f32 %v6718_v40, %v14190_v30  ;;  %v6609_v39 = vadd.f32 0.2548296, %v6593_v44 }
0x1103   : > { %v6468_v45 = vsub.f32 2.0, %v6452_v34  ;;  %v6562_v55 = vmul.f32 %v6546_v14, %v14258_v5  ;;  %v6592_v13 = vmul.f32 %v6576_v61, %v14249_v6  ;;  %v6579_v46 = vadd.f32 -0.28449672, %v6563_v58  ;;  %v10146_v37 = vpop.eup %10145 }
0x1104   : > { %v14279_v43 = vmul.f32 %v10140_v7, %v6469_v9  ;;  %v6790_v38 = vmul.f32 %v14069_v57, %v6767_v23  ;;  %v6750_v60 = vadd.f32 1.0, %v6734_v48  ;;  %v6625_v1 = vmul.f32 %v6609_v39, %v14221_v19 }
0x1105   : > { %v14283_v15 = vmul.f32 %v10142_v21, %v6468_v45  ;;  %v6578_v17 = vadd.f32 -0.28449672, %v6562_v55  ;;  %v10148_v0 = vpop.eup %10147  ;;  %v6660_v30 = vmul.f32 %v6644_v52, %v14234_v28  ;;  %v6608_v11 = vadd.f32 0.2548296, %v6592_v13 }
0x1106   : > { %6815 = vadd.xlane.f32.xlu1 %v6790_v38  ;;  %v6595_v56 = vmul.f32 %v6579_v46, %v14254_v22  ;;  %v6501_v51 = vmul.f32 1.0614054, %v14279_v43  ;;  %v10150_v32 = vpop.eup %10149  ;;  %v6766_v16 = vmul.f32 %v6750_v60, %v14178_v50  ;;  %v6705_v25 = vmul.f32 %v10144_v49, %v6625_v1 }
0x1107   : > { %v6594_v29 = vmul.f32 %v6578_v17, %v14258_v5  ;;  %v6500_v26 = vmul.f32 1.0614054, %v14283_v15  ;;  %v6624_v19 = vmul.f32 %v6608_v11, %v14249_v6  ;;  %v6690_v21 = vmul.f32 1.442695, %v6660_v30 }
0x1108   : > { %v6611_v7 = vadd.f32 0.2548296, %v6595_v56  ;;  %v6517_v4 = vadd.f32 -1.4531521, %v6501_v51  ;;  %v6789_v28 = vmul.f32 %v14069_v57, %v6766_v16  ;;  %v6721_v52 = vsub.f32 1.0, %v6705_v25 }
0x1109   : > { %v6610_v27 = vadd.f32 0.2548296, %v6594_v29  ;;  %v6516_v8 = vadd.f32 -1.4531521, %v6500_v26  ;;  %v6704_v33 = vmul.f32 %v10146_v37, %v6624_v19  ;;  %vm6354_vm4 = vcmp.lt.f32.partialorder %v14163_v20, 0.0 }
0x110a   : > { %v6627_v12 = vmul.f32 %v6611_v7, %v14254_v22  ;;  %v6533_v50 = vmul.f32 %v6517_v4, %v14279_v43  ;;  %6813 = vadd.xlane.f32.xlu0 %v6789_v28  ;;  %v6737_v18 = vmul.f32 %v6721_v52, %v14231_v42  ;;  %10151 = vpow2.f32 %v6692_v31 }
0x110b   : > { %v6626_v6 = vmul.f32 %v6610_v27, %v14258_v5  ;;  %v6532_v47 = vmul.f32 %v6516_v8, %v14283_v15  ;;  %v6720_v10 = vsub.f32 1.0, %v6704_v33  ;;  %10153 = vpow2.f32 %v6690_v21  ;;  %v14330_v33 = vld [vmem:[#allocation2] ss:$0 sm:$0xff] }
0x110c   : > { %v6707_v49 = vmul.f32 %v10148_v0, %v6627_v12  ;;  %v6549_v34 = vadd.f32 1.4214138, %v6533_v50  ;;  %v6753_v40 = vadd.f32 1.0, %v6737_v18  ;;  %v6371_v42 = vsel %vm6355_vm3, -1.0, %v15192_v35 }
0x110d   : > { %v6706_v44 = vmul.f32 %v10150_v32, %v6626_v6  ;;  %v6548_v22 = vadd.f32 1.4214138, %v6532_v47  ;;  %v6736_v14 = vmul.f32 %v6720_v10, %v14240_v41  ;;  %v6370_v45 = vsel %vm6354_vm4, -1.0, %v15192_v35 }
0x110e   : > { %v6723_v9 = vsub.f32 1.0, %v6707_v49  ;;  %v6565_v23 = vmul.f32 %v6549_v34, %v14279_v43  ;;  %v6769_v5 = vmul.f32 %v6753_v40, %v14194_v3  ;;  %v6323_v46 = vmul.f32 0.5, %v14146_v36 }
0x110f   : > { %v6722_v61 = vsub.f32 1.0, %v6706_v44  ;;  %v6564_v58 = vmul.f32 %v6548_v22, %v14283_v15  ;;  %v6752_v48 = vadd.f32 1.0, %v6736_v14  ;;  %v6322_v60 = vmul.f32 0.5, %v14150_v24 }
0x1110   : > { %v6739_v39 = vmul.f32 %v6723_v9, %v6371_v42  ;;  %v6581_v55 = vadd.f32 -0.28449672, %v6565_v23  ;;  %v6792_v41 = vmul.f32 %v14069_v57, %v6769_v5  ;;  %vm6357_vm6 = vcmp.lt.f32.partialorder %v14213_v54, 0.0 }
0x1111   : > { %v6738_v38 = vmul.f32 %v6722_v61, %v6370_v45  ;;  %v6580_v13 = vadd.f32 -0.28449672, %v6564_v58  ;;  %v6768_v63 = vmul.f32 %v6752_v48, %v14201_v59  ;;  %vm6356_vm7 = vcmp.lt.f32.partialorder %v14219_v53, 0.0 }
0x1112   : > { %v6755_v37 = vadd.f32 1.0, %v6739_v39  ;;  %v6597_v3 = vmul.f32 %v6581_v55, %v14279_v43  ;;  %6819 = vadd.xlane.f32.xlu1 %v6792_v41  ;;  %v6373_v31 = vsel %vm6357_vm6, -1.0, %v15192_v35  ;;  %v6325_v28 = vmul.f32 0.5, %v14204_v2 }
0x1113   : > { %v6754_v1 = vadd.f32 1.0, %v6738_v38  ;;  %v6596_v20 = vmul.f32 %v6580_v13, %v14283_v15  ;;  %v6791_v17 = vmul.f32 %v14069_v57, %v6768_v63  ;;  %v6324_v52 = vmul.f32 0.5, %v14208_v62 }
0x1114   : > { %v6771_v0 = vmul.f32 %v6755_v37, %v6323_v46  ;;  %v6613_v30 = vadd.f32 0.2548296, %v6597_v3  ;;  %v10152_v51 = vpop.eup %10151 }
0x1115   : > { %v6770_v11 = vmul.f32 %v6754_v1, %v6322_v60  ;;  %v6612_v56 = vadd.f32 0.2548296, %v6596_v20  ;;  %6817 = vadd.xlane.f32.xlu0 %v6791_v17  ;;  %v10154_v16 = vpop.eup %10153 }
0x1116   : > { %v6794_v36 = vmul.f32 %v14069_v57, %v6771_v0  ;;  %v6629_v59 = vmul.f32 %v6613_v30, %v14279_v43  ;;  %v6372_v43 = vsel %vm6356_vm7, -1.0, %v15192_v35 }
0x1117   : > { %v6793_v32 = vmul.f32 %v14069_v57, %v6770_v11  ;;  %v6628_v24 = vmul.f32 %v6612_v56, %v14283_v15 }
0x1118   : > { %6823 = vadd.xlane.f32.xlu1 %v6794_v36  ;;  %v6709_v25 = vmul.f32 %v10152_v51, %v6629_v59 }
0x1119   : > { %v6708_v29 = vmul.f32 %v10154_v16, %v6628_v24  ;;  %6821 = vadd.xlane.f32.xlu0 %v6793_v32 }
0x111a   : > { %v6725_v26 = vsub.f32 1.0, %v6709_v25 }
0x111b   : > { %v6724_v19 = vsub.f32 1.0, %v6708_v29 }
0x111c   : > { %v6741_v7 = vmul.f32 %v6725_v26, %v6373_v31 }
0x111d   : > { %v6740_v4 = vmul.f32 %v6724_v19, %v6372_v43 }
0x111e   : > { %v6757_v15 = vadd.f32 1.0, %v6741_v7 }
0x111f   : > { %v6756_v54 = vadd.f32 1.0, %v6740_v4 }
0x1120   : > { %v6773_v27 = vmul.f32 %v6757_v15, %v6325_v28 }
0x1121   : > { %v6772_v8 = vmul.f32 %v6756_v54, %v6324_v52 }
0x1122   : > { %v6796_v53 = vmul.f32 %v14069_v57, %v6773_v27 }
0x1123   : > { %v6795_v21 = vmul.f32 %v14069_v57, %v6772_v8 }
0x1124   : > { %6827 = vadd.xlane.f32.xlu1 %v6796_v53 }
0x1125   : > { %6825 = vadd.xlane.f32.xlu0 %v6795_v21 }
0x115b   : > { %v6800_v12 = vpop.xlane.xlu0 %6799 }
0x115c   : > { %v14333_v50 = vadd.f32 %v14330_v33, %v6800_v12  ;;  %v6798_v18 = vpop.xlane.xlu1 %6797 }
0x115d   : > { %v14336_v2 = vadd.f32 %v14330_v33, %v6798_v18 }
0x115e   : > { %v14339_v62 = vmul.f32 0.70710677, %v14333_v50  ;;  %v14393_v18 = vmul.f32 0.5, %v14333_v50 }
0x115f   : > { %v14342_v6 = vmul.f32 0.70710677, %v14336_v2 }
0x1160   : > { %v6917_v57 = vand.u32 2147483647, %v14339_v62  ;;  %v6804_v47 = vpop.xlane.xlu1 %6803  ;;  %vm6885_vm5 = vcmp.lt.f32.partialorder %v14339_v62, 0.0 }
0x1161   : > { %v6916_v10 = vand.u32 2147483647, %v14342_v6  ;;  %v14347_v49 = vadd.f32 %v14330_v33, %v6804_v47  ;;  %vm6884_vm8 = vcmp.lt.f32.partialorder %v14342_v6, 0.0 }
0x1162   : > { %v6933_v34 = vmul.f32 0.3275911, %v6917_v57  ;;  %v7173_v0 = vsub.f32 0.0, %v6917_v57 }
0x1163   : > { %v6932_v40 = vmul.f32 0.3275911, %v6916_v10  ;;  %v14350_v44 = vmul.f32 0.70710677, %v14347_v49  ;;  %v6802_v22 = vpop.xlane.xlu0 %6801  ;;  %v7172_v56 = vsub.f32 0.0, %v6916_v10 }
0x1164   : > { %v6949_v14 = vadd.f32 1.0, %v6933_v34  ;;  %v14353_v9 = vadd.f32 %v14330_v33, %v6802_v22  ;;  %v7189_v25 = vmul.f32 %v7173_v0, %v6917_v57 }
0x1165   : > { %v6948_v23 = vadd.f32 1.0, %v6932_v40  ;;  %v6919_v42 = vand.u32 2147483647, %v14350_v44  ;;  %v7188_v26 = vmul.f32 %v7172_v56, %v6916_v10  ;;  %vm6887_vm9 = vcmp.lt.f32.partialorder %v14350_v44, 0.0 }
0x1166   : > { %10155 = vrcp.f32 %v6949_v14  ;;  %v14357_v61 = vmul.f32 0.70710677, %v14353_v9  ;;  %v7206_v28 = vmul.f32 1.442695, %v7189_v25 }
0x1167   : > { %10157 = vrcp.f32 %v6948_v23  ;;  %v6935_v5 = vmul.f32 0.3275911, %v6919_v42  ;;  %v6808_v58 = vpop.xlane.xlu1 %6807  ;;  %v7175_v19 = vsub.f32 0.0, %v6919_v42  ;;  %v7204_v54 = vmul.f32 1.442695, %v7188_v26 }
0x1168   : > { %v14360_v48 = vadd.f32 %v14330_v33, %v6808_v58  ;;  %v6806_v39 = vpop.xlane.xlu0 %6805  ;;  %v14363_v55 = vand.u32 2147483647, %v14357_v61  ;;  %vm6886_vm10 = vcmp.lt.f32.partialorder %v14357_v61, 0.0 }
0x1169   : > { %v6951_v45 = vadd.f32 1.0, %v6935_v5  ;;  %v14366_v41 = vadd.f32 %v14330_v33, %v6806_v39  ;;  %v7191_v53 = vmul.f32 %v7175_v19, %v6919_v42 }
0x116a   : > { %v6934_v38 = vmul.f32 0.3275911, %v14363_v55  ;;  %v14370_v13 = vmul.f32 0.70710677, %v14360_v48 }
0x116b   : > { %10159 = vrcp.f32 %v6951_v45  ;;  %v14373_v46 = vmul.f32 0.70710677, %v14366_v41  ;;  %v7210_v58 = vmul.f32 1.442695, %v7191_v53 }
0x116c   : > { %v6950_v63 = vadd.f32 1.0, %v6934_v38  ;;  %v14376_v37 = vand.u32 2147483647, %v14370_v13  ;;  %vm6889_vm11 = vcmp.lt.f32.partialorder %v14370_v13, 0.0 }
0x116d   : > { %v14379_v3 = vand.u32 2147483647, %v14373_v46  ;;  %v6905_v13 = vsel %vm6889_vm11, -1.0, %v15192_v35  ;;  %vm6888_vm12 = vcmp.lt.f32.partialorder %v14373_v46, 0.0 }
0x116e   : > { %10161 = vrcp.f32 %v6950_v63  ;;  %v6937_v1 = vmul.f32 0.3275911, %v14376_v37 }
0x116f   : > { %v6936_v30 = vmul.f32 0.3275911, %v14379_v3 }
0x1170   : > { %v10156_v60 = vpop.eup %10155  ;;  %v6953_v36 = vadd.f32 1.0, %v6937_v1 }
0x1171   : > { %v10158_v20 = vpop.eup %10157  ;;  %v6981_v17 = vmul.f32 %v10156_v60, %v6949_v14  ;;  %v6952_v51 = vadd.f32 1.0, %v6936_v30 }
0x1172   : > { %v6980_v11 = vmul.f32 %v10158_v20, %v6948_v23  ;;  %10163 = vrcp.f32 %v6953_v36  ;;  %v14401_v23 = vmul.f32 0.5, %v14336_v2 }
0x1173   : > { %v6997_v59 = vsub.f32 2.0, %v6981_v17  ;;  %10165 = vrcp.f32 %v6952_v51 }
0x1174   : > { %v6996_v32 = vsub.f32 2.0, %v6980_v11  ;;  %10167 = vpow2.f32 %v7206_v28  ;;  %v7177_v11 = vsub.f32 0.0, %v14376_v37 }
0x1175   : > { %v10160_v24 = vpop.eup %10159  ;;  %v14383_v16 = vmul.f32 %v10156_v60, %v6997_v59  ;;  %10169 = vpow2.f32 %v7204_v54 }
0x1176   : > { %v14385_v29 = vmul.f32 %v10158_v20, %v6996_v32  ;;  %v6983_v31 = vmul.f32 %v10160_v24, %v6951_v45  ;;  %v7174_v45 = vsub.f32 0.0, %v14363_v55  ;;  %10171 = vpow2.f32 %v7210_v58 }
0x1177   : > { %v7029_v43 = vmul.f32 1.0614054, %v14383_v16  ;;  %v6812_v57 = vpop.xlane.xlu1 %6811  ;;  %v7193_v28 = vmul.f32 %v7177_v11, %v14376_v37 }
0x1178   : > { %v6999_v7 = vsub.f32 2.0, %v6983_v31  ;;  %v7028_v4 = vmul.f32 1.0614054, %v14385_v29  ;;  %v10162_v52 = vpop.eup %10161  ;;  %v14398_v40 = vadd.f32 %v14330_v33, %v6812_v57 }
0x1179   : > { %v7045_v15 = vadd.f32 -1.4531521, %v7029_v43  ;;  %v6982_v21 = vmul.f32 %v10162_v52, %v6950_v63 }
0x117a   : > { %v14389_v27 = vmul.f32 %v10160_v24, %v6999_v7  ;;  %v7044_v8 = vadd.f32 -1.4531521, %v7028_v4  ;;  %v14405_v38 = vmul.f32 0.70710677, %v14398_v40  ;;  %v7190_v24 = vmul.f32 %v7174_v45, %v14363_v55 }
0x117b   : > { %v7061_v12 = vmul.f32 %v7045_v15, %v14383_v16  ;;  %v6998_v34 = vsub.f32 2.0, %v6982_v21  ;;  %v7176_v15 = vsub.f32 0.0, %v14379_v3 }
0x117c   : > { %v7060_v47 = vmul.f32 %v7044_v8, %v14385_v29  ;;  %v7031_v10 = vmul.f32 1.0614054, %v14389_v27  ;;  %v10164_v14 = vpop.eup %10163  ;;  %v14413_v17 = vand.u32 2147483647, %v14405_v38  ;;  %v6901_v8 = vsel %vm6885_vm5, -1.0, %v15192_v35 }
0x117d   : > { %v7077_v22 = vadd.f32 1.4214138, %v7061_v12  ;;  %v10166_v50 = vpop.eup %10165  ;;  %v6985_v39 = vmul.f32 %v10164_v14, %v6953_v36  ;;  %v14407_v63 = vmul.f32 %v10162_v52, %v6998_v34  ;;  %v7208_v57 = vmul.f32 1.442695, %v7190_v24 }
0x117e   : > { %v7076_v42 = vadd.f32 1.4214138, %v7060_v47  ;;  %v7047_v5 = vadd.f32 -1.4531521, %v7031_v10  ;;  %v6984_v60 = vmul.f32 %v10166_v50, %v6952_v51  ;;  %v6810_v0 = vpop.xlane.xlu0 %6809  ;;  %v6939_v51 = vmul.f32 0.3275911, %v14413_v17  ;;  %v10168_v54 = vpop.eup %10167 }
0x117f   : > { %v7093_v1 = vmul.f32 %v7077_v22, %v14383_v16  ;;  %v7001_v2 = vsub.f32 2.0, %v6985_v39  ;;  %v14419_v56 = vadd.f32 %v14330_v33, %v6810_v0  ;;  %v7030_v31 = vmul.f32 1.0614054, %v14407_v63  ;;  %v10170_v12 = vpop.eup %10169 }
0x1180   : > { %v7092_v20 = vmul.f32 %v7076_v42, %v14385_v29  ;;  %v7063_v30 = vmul.f32 %v7047_v5, %v14389_v27  ;;  %v7000_v59 = vsub.f32 2.0, %v6984_v60  ;;  %v6955_v43 = vadd.f32 1.0, %v6939_v51 }
0x1181   : > { %v7109_v36 = vadd.f32 -0.28449672, %v7093_v1  ;;  %v14424_v25 = vmul.f32 0.70710677, %v14419_v56  ;;  %v14428_v19 = vmul.f32 %v10164_v14, %v7001_v2  ;;  %v6900_v34 = vsel %vm6884_vm8, -1.0, %v15192_v35 }
0x1182   : > { %v7108_v32 = vadd.f32 -0.28449672, %v7092_v20  ;;  %v7079_v4 = vadd.f32 1.4214138, %v7063_v30  ;;  %v14439_v53 = vmul.f32 %v10166_v50, %v7000_v59  ;;  %10173 = vrcp.f32 %v6955_v43  ;;  %v10172_v20 = vpop.eup %10171 }
0x1183   : > { %v7125_v26 = vmul.f32 %v7109_v36, %v14383_v16  ;;  %v14434_v52 = vand.u32 2147483647, %v14424_v25  ;;  %v7046_v62 = vadd.f32 -1.4531521, %v7030_v31  ;;  %v7033_v14 = vmul.f32 1.0614054, %v14428_v19 }
0x1184   : > { %v7124_v7 = vmul.f32 %v7108_v32, %v14385_v29  ;;  %v7095_v10 = vmul.f32 %v7079_v4, %v14389_v27  ;;  %v7214_v42 = vmul.f32 1.442695, %v7193_v28  ;;  %v7192_v5 = vmul.f32 %v7176_v15, %v14379_v3 }
0x1185   : > { %v7141_v55 = vadd.f32 0.2548296, %v7125_v26  ;;  %v6938_v47 = vmul.f32 0.3275911, %v14434_v52  ;;  %v7062_v39 = vmul.f32 %v7046_v62, %v14407_v63  ;;  %v7032_v60 = vmul.f32 1.0614054, %v14439_v53 }
0x1186   : > { %v7140_v21 = vadd.f32 0.2548296, %v7124_v7  ;;  %v7111_v58 = vadd.f32 -0.28449672, %v7095_v10  ;;  %10175 = vpow2.f32 %v7208_v57  ;;  %v7212_v11 = vmul.f32 1.442695, %v7192_v5 }
0x1187   : > { %v7157_v37 = vmul.f32 %v7141_v55, %v14383_v16  ;;  %v7049_v16 = vadd.f32 -1.4531521, %v7033_v14  ;;  %v14452_v1 = vadd.f32 1.0, %v6938_v47  ;;  %v7078_v0 = vadd.f32 1.4214138, %v7062_v39 }
0x1188   : > { %v7156_v22 = vmul.f32 %v7140_v21, %v14385_v29  ;;  %v7127_v29 = vmul.f32 %v7111_v58, %v14389_v27  ;;  %v7048_v3 = vadd.f32 -1.4531521, %v7032_v60  ;;  %10177 = vpow2.f32 %v7214_v42 }
0x1189   : > { %v7237_v50 = vmul.f32 %v10168_v54, %v7157_v37  ;;  %v7065_v30 = vmul.f32 %v7049_v16, %v14428_v19  ;;  %v7094_v32 = vmul.f32 %v7078_v0, %v14407_v63  ;;  %10179 = vrcp.f32 %v14452_v1 }
0x118a   : > { %v7236_v45 = vmul.f32 %v10170_v12, %v7156_v22  ;;  %v7143_v59 = vadd.f32 0.2548296, %v7127_v29  ;;  %v7064_v26 = vmul.f32 %v7048_v3, %v14439_v53  ;;  %10181 = vpow2.f32 %v7212_v11 }
0x118b   : > { %v7253_v6 = vsub.f32 1.0, %v7237_v50  ;;  %v7081_v24 = vadd.f32 1.4214138, %v7065_v30  ;;  %v7110_v15 = vadd.f32 -0.28449672, %v7094_v32  ;;  %v6903_v22 = vsel %vm6887_vm9, -1.0, %v15192_v35 }
0x118c   : > { %v7252_v2 = vsub.f32 1.0, %v7236_v45  ;;  %v7159_v7 = vmul.f32 %v7143_v59, %v14389_v27  ;;  %v10174_v4 = vpop.eup %10173  ;;  %v7080_v54 = vadd.f32 1.4214138, %v7064_v26  ;;  %v6855_v50 = vmul.f32 0.5, %v14347_v49 }
0x118d   : > { %v7269_v36 = vmul.f32 %v7253_v6, %v6901_v8  ;;  %v7097_v55 = vmul.f32 %v7081_v24, %v14428_v19  ;;  %v6987_v8 = vmul.f32 %v10174_v4, %v6955_v43  ;;  %v7126_v47 = vmul.f32 %v7110_v15, %v14407_v63 }
0x118e   : > { %v7268_v51 = vmul.f32 %v7252_v2, %v6900_v34  ;;  %v7239_v12 = vmul.f32 %v10172_v20, %v7159_v7  ;;  %v7096_v10 = vmul.f32 %v7080_v54, %v14439_v53  ;;  %v6854_v6 = vmul.f32 0.5, %v14353_v9 }
0x118f   : > { %v7285_v31 = vadd.f32 1.0, %v7269_v36  ;;  %v7113_v37 = vadd.f32 -0.28449672, %v7097_v55  ;;  %v7003_v34 = vsub.f32 2.0, %v6987_v8  ;;  %v7142_v62 = vadd.f32 0.2548296, %v7126_v47 }
0x1190   : > { %v7284_v28 = vadd.f32 1.0, %v7268_v51  ;;  %v7255_v27 = vsub.f32 1.0, %v7239_v12  ;;  %v10176_v14 = vpop.eup %10175  ;;  %v6902_v29 = vsel %vm6886_vm10, -1.0, %v15192_v35  ;;  %v7179_v11 = vsub.f32 0.0, %v14413_v17 }
0x1191   : > { %v7301_v21 = vmul.f32 %v7285_v31, %v14393_v18  ;;  %v7129_v43 = vmul.f32 %v7113_v37, %v14428_v19  ;;  %v7112_v18 = vadd.f32 -0.28449672, %v7096_v10  ;;  %v7158_v44 = vmul.f32 %v7142_v62, %v14407_v63 }
0x1192   : > { %v7300_v57 = vmul.f32 %v7284_v28, %v14401_v23  ;;  %v14471_v23 = vmul.f32 %v10174_v4, %v7003_v34  ;;  %v7271_v5 = vmul.f32 %v7255_v27, %v6903_v22  ;;  %v10178_v39 = vpop.eup %10177  ;;  %v7178_v32 = vsub.f32 0.0, %v14434_v52 }
0x1193   : > { %7355 = vperm.xlu1 %9834, %v7301_v21   ;;  %v6816_v42 = vpop.xlane.xlu1 %6815  ;;  %v7145_v45 = vadd.f32 0.2548296, %v7129_v43  ;;  %v7128_v60 = vmul.f32 %v7112_v18, %v14439_v53  ;;  %v7238_v20 = vmul.f32 %v10176_v14, %v7158_v44  ;;  %v10180_v2 = vpop.eup %10179  ;;  %v7195_v8 = vmul.f32 %v7179_v11, %v14413_v17 }
0x1194   : > { %7350 = vperm.xlu0 %9833, %v7300_v57   ;;  %v14475_v58 = vadd.f32 %v14330_v33, %v6816_v42  ;;  %v7287_v16 = vadd.f32 1.0, %v7271_v5  ;;  %v7035_v61 = vmul.f32 1.0614054, %v14471_v23  ;;  %v10182_v51 = vpop.eup %10181  ;;  %v6986_v28 = vmul.f32 %v10180_v2, %v14452_v1 }
0x1195   : > { %v7161_v63 = vmul.f32 %v7145_v45, %v14428_v19  ;;  %v7144_v30 = vadd.f32 0.2548296, %v7128_v60  ;;  %v7254_v59 = vsub.f32 1.0, %v7238_v20  ;;  %v6857_v34 = vmul.f32 0.5, %v14360_v48 }
0x1196   : > { %v14484_v49 = vmul.f32 0.70710677, %v14475_v58  ;;  %v7303_v0 = vmul.f32 %v7287_v16, %v6855_v50  ;;  %v7051_v3 = vadd.f32 -1.4531521, %v7035_v61  ;;  %v6904_v1 = vsel %vm6888_vm12, -1.0, %v15192_v35 }
0x1197   : > { %v6814_v9 = vpop.xlane.xlu0 %6813  ;;  %v7241_v26 = vmul.f32 %v10178_v39, %v7161_v63  ;;  %v7160_v19 = vmul.f32 %v7144_v30, %v14439_v53  ;;  %v7270_v7 = vmul.f32 %v7254_v59, %v6902_v29  ;;  %v7194_v53 = vmul.f32 %v7178_v32, %v14434_v52 }
0x1198   : > { %v14490_v36 = vand.u32 2147483647, %v14484_v49  ;;  %v14494_v24 = vadd.f32 %v14330_v33, %v6814_v9  ;;  %7365 = vperm.xlu1 %9834, %v7303_v0   ;;  %v7067_v4 = vmul.f32 %v7051_v3, %v14471_v23  ;;  %v7002_v22 = vsub.f32 2.0, %v6986_v28 }
0x1199   : > { %v7257_v55 = vsub.f32 1.0, %v7241_v26  ;;  %v7240_v54 = vmul.f32 %v10182_v51, %v7160_v19  ;;  %v7286_v12 = vadd.f32 1.0, %v7270_v7  ;;  %v6856_v18 = vmul.f32 0.5, %v14366_v41 }
0x119a   : > { %v6941_v31 = vmul.f32 0.3275911, %v14490_v36  ;;  %v14502_v15 = vmul.f32 0.70710677, %v14494_v24  ;;  %v7083_v57 = vadd.f32 1.4214138, %v7067_v4  ;;  %v14526_v39 = vmul.f32 %v10180_v2, %v7002_v22 }
0x119b   : > { %v7273_v37 = vmul.f32 %v7257_v55, %v6905_v13  ;;  %v7256_v10 = vsub.f32 1.0, %v7240_v54  ;;  %v7302_v27 = vmul.f32 %v7286_v12, %v6854_v6  ;;  %vm6891_vm13 = vcmp.lt.f32.partialorder %v14405_v38, 0.0 }
0x119c   : > { %v6957_v21 = vadd.f32 1.0, %v6941_v31  ;;  %v6924_v47 = vand.u32 2147483647, %v14502_v15  ;;  %v7218_v52 = vmul.f32 1.442695, %v7195_v8  ;;  %v7099_v42 = vmul.f32 %v7083_v57, %v14471_v23 }
0x119d   : > { %v7289_v17 = vadd.f32 1.0, %v7273_v37  ;;  %v7272_v43 = vmul.f32 %v7256_v10, %v6904_v1  ;;  %7360 = vperm.xlu1 %9834, %v7302_v27   ;;  %v14515_v48 = vmul.f32 0.5, %v14398_v40  ;;  %vm6890_vm14 = vcmp.lt.f32.partialorder %v14424_v25, 0.0 }
0x119e   : > { %10183 = vrcp.f32 %v6957_v21  ;;  %v6940_v62 = vmul.f32 0.3275911, %v6924_v47  ;;  %v7216_v46 = vmul.f32 1.442695, %v7194_v53  ;;  %v7115_v45 = vadd.f32 -0.28449672, %v7099_v42 }
0x119f   : > { %v6820_v14 = vpop.xlane.xlu1 %6819  ;;  %v7305_v44 = vmul.f32 %v7289_v17, %v6857_v34  ;;  %v7288_v41 = vadd.f32 1.0, %v7272_v43  ;;  %v14524_v38 = vsel %vm6891_vm13, -1.0, %v15192_v35  ;;  %v7181_v16 = vsub.f32 0.0, %v14490_v36 }
0x11a0   : > { %v14519_v5 = vadd.f32 %v14330_v33, %v6820_v14  ;;  %v14521_v50 = vadd.f32 1.0, %v6940_v62  ;;  %10185 = vpow2.f32 %v7218_v52  ;;  %v14533_v61 = vmul.f32 0.5, %v14419_v56 }
0x11a1   : > { %v7180_v6 = vsub.f32 0.0, %v6924_v47  ;;  %7375 = vperm.xlu1 %9834, %v7305_v44   ;;  %v14541_v20 = vsel %vm6890_vm14, -1.0, %v15192_v35  ;;  %10187 = vpow2.f32 %v7216_v46  ;;  %v7131_v63 = vmul.f32 %v7115_v45, %v14471_v23 }
0x11a2   : > { %v14530_v40 = vmul.f32 0.70710677, %v14519_v5  ;;  %v6818_v60 = vpop.xlane.xlu0 %6817  ;;  %10189 = vrcp.f32 %v14521_v50  ;;  %v7304_v3 = vmul.f32 %v7288_v41, %v6856_v18  ;;  %v14553_v13 = vmul.f32 0.5, %v14475_v58 }
0x11a3   : > { %v14536_v29 = vadd.f32 %v14330_v33, %v6818_v60  ;;  %v7197_v25 = vmul.f32 %v7181_v16, %v14490_v36  ;;  %v7034_v9 = vmul.f32 1.0614054, %v14526_v39  ;;  %v7196_v51 = vmul.f32 %v7180_v6, %v6924_v47 }
0x11a4   : > { %v6927_v2 = vand.u32 2147483647, %v14530_v40  ;;  %vm6893_vm15 = vcmp.lt.f32.partialorder %v14484_v49, 0.0  ;;  %v7147_v58 = vadd.f32 0.2548296, %v7131_v63  ;;  %vm6892_vm0 = vcmp.lt.f32.partialorder %v14502_v15, 0.0 }
0x11a5   : > { %v6824_v0 = vpop.xlane.xlu1 %6823  ;;  %v14547_v56 = vmul.f32 0.70710677, %v14536_v29  ;;  %7370 = vperm.xlu1 %9834, %v7304_v3   ;;  %v7222_v8 = vmul.f32 1.442695, %v7197_v25  ;;  %v7050_v12 = vadd.f32 -1.4531521, %v7034_v9 }
0x11a6   : > { %v14550_v30 = vadd.f32 %v14330_v33, %v6824_v0  ;;  %v6943_v11 = vmul.f32 0.3275911, %v6927_v2  ;;  %v7183_v32 = vsub.f32 0.0, %v6927_v2  ;;  %v6822_v55 = vpop.xlane.xlu0 %6821  ;;  %v7220_v57 = vmul.f32 1.442695, %v7196_v51 }
0x11a7   : > { %v6926_v26 = vand.u32 2147483647, %v14547_v56  ;;  %v14572_v1 = vadd.f32 %v14330_v33, %v6822_v55  ;;  %v14575_v22 = vmul.f32 0.5, %v14494_v24  ;;  %v7163_v17 = vmul.f32 %v7147_v58, %v14471_v23 }
0x11a8   : > { %v10184_v59 = vpop.eup %10183  ;;  %v14559_v19 = vmul.f32 0.70710677, %v14550_v30  ;;  %v6959_v7 = vadd.f32 1.0, %v6943_v11  ;;  %v7199_v53 = vmul.f32 %v7183_v32, %v6927_v2  ;;  %v14585_v49 = vsel %vm6892_vm0, -1.0, %v15192_v35 }
0x11a9   : > { %v6989_v31 = vmul.f32 %v10184_v59, %v6957_v21  ;;  %v6942_v36 = vmul.f32 0.3275911, %v6926_v26  ;;  %v7182_v4 = vsub.f32 0.0, %v6926_v26  ;;  %v14567_v21 = vsel %vm6893_vm15, -1.0, %v15192_v35 }
0x11aa   : > { %v6929_v28 = vand.u32 2147483647, %v14559_v19  ;;  %10191 = vrcp.f32 %v6959_v7  ;;  %v10186_v27 = vpop.eup %10185  ;;  %v14588_v18 = vmul.f32 0.70710677, %v14572_v1  ;;  %v14592_v14 = vmul.f32 0.5, %v14519_v5 }
0x11ab   : > { %v7005_v54 = vsub.f32 2.0, %v6989_v31  ;;  %v6958_v47 = vadd.f32 1.0, %v6942_v36  ;;  %v7198_v34 = vmul.f32 %v7182_v4, %v6926_v26  ;;  %v14580_v43 = vpop.eup %10187  ;;  %v7226_v42 = vmul.f32 1.442695, %v7199_v53 }
0x11ac   : > { %v6945_v37 = vmul.f32 0.3275911, %v6929_v28  ;;  %v10190_v24 = vpop.eup %10189  ;;  %v7066_v23 = vmul.f32 %v7050_v12, %v14526_v39  ;;  %v7185_v44 = vsub.f32 0.0, %v6929_v28  ;;  %v6928_v15 = vand.u32 2147483647, %v14588_v18 }
0x11ad   : > { %v14569_v10 = vmul.f32 %v10184_v59, %v7005_v54  ;;  %10193 = vrcp.f32 %v6958_v47  ;;  %v7224_v46 = vmul.f32 1.442695, %v7198_v34  ;;  %vm6895_vm1 = vcmp.lt.f32.partialorder %v14530_v40, 0.0 }
0x11ae   : > { %v14577_v62 = vadd.f32 1.0, %v6945_v37  ;;  %10195 = vpow2.f32 %v7222_v8  ;;  %v7243_v6 = vmul.f32 %v10186_v27, %v7163_v17  ;;  %v6988_v5 = vmul.f32 %v10190_v24, %v14521_v50 }
0x11af   : > { %v7037_v52 = vmul.f32 1.0614054, %v14569_v10  ;;  %10197 = vpow2.f32 %v7220_v57  ;;  %vm6894_vm2 = vcmp.lt.f32.partialorder %v14547_v56, 0.0  ;;  %v6944_v2 = vmul.f32 0.3275911, %v6928_v15 }
0x11b0   : > { %10199 = vrcp.f32 %v14577_v62  ;;  %v7184_v63 = vsub.f32 0.0, %v6928_v15  ;;  %v7201_v9 = vmul.f32 %v7185_v44, %v6929_v28  ;;  %v7004_v31 = vsub.f32 2.0, %v6988_v5 }
0x11b1   : > { %v6828_v41 = vpop.xlane.xlu1 %6827  ;;  %v7053_v60 = vadd.f32 -1.4531521, %v7037_v52  ;;  %10201 = vpow2.f32 %v7226_v42  ;;  %v6960_v59 = vadd.f32 1.0, %v6944_v2  ;;  %v14617_v58 = vsel %vm6895_vm1, -1.0, %v15192_v35 }
0x11b2   : > { %v14599_v45 = vadd.f32 %v14330_v33, %v6828_v41  ;;  %v6826_v16 = vpop.xlane.xlu0 %6825  ;;  %10203 = vpow2.f32 %v7224_v46  ;;  %v14622_v36 = vsel %vm6894_vm2, -1.0, %v15192_v35  ;;  %v7200_v55 = vmul.f32 %v7184_v63, %v6928_v15 }
0x11b3   : > { %v14604_v0 = vadd.f32 %v14330_v33, %v6826_v16  ;;  %v7069_v25 = vmul.f32 %v7053_v60, %v14569_v10  ;;  %v7259_v33 = vsub.f32 1.0, %v7243_v6  ;;  %10205 = vrcp.f32 %v6960_v59 }
0x11b4   : > { %v14607_v3 = vmul.f32 0.70710677, %v14599_v45  ;;  %v10192_v11 = vpop.eup %10191  ;;  %v7082_v54 = vadd.f32 1.4214138, %v7066_v23  ;;  %v7230_v56 = vmul.f32 1.442695, %v7201_v9  ;;  %v14631_v42 = vmul.f32 %v10190_v24, %v7004_v31 }
0x11b5   : > { %v14611_v51 = vmul.f32 0.70710677, %v14604_v0  ;;  %v6991_v50 = vmul.f32 %v10192_v11, %v6959_v7  ;;  %v7085_v26 = vadd.f32 1.4214138, %v7069_v25  ;;  %v7275_v17 = vmul.f32 %v7259_v33, %v14524_v38 }
0x11b6   : > { %v6931_v32 = vand.u32 2147483647, %v14607_v3  ;;  %v7228_v15 = vmul.f32 1.442695, %v7200_v55  ;;  %v7098_v9 = vmul.f32 %v7082_v54, %v14526_v39  ;;  %vm6897_vm3 = vcmp.lt.f32.partialorder %v14559_v19, 0.0 }
0x11b7   : > { %v10194_v4 = vpop.eup %10193  ;;  %v7007_v28 = vsub.f32 2.0, %v6991_v50  ;;  %v6930_v53 = vand.u32 2147483647, %v14611_v51  ;;  %v7101_v40 = vmul.f32 %v7085_v26, %v14569_v10  ;;  %v7291_v41 = vadd.f32 1.0, %v7275_v17 }
0x11b8   : > { %v6947_v7 = vmul.f32 0.3275911, %v6931_v32  ;;  %v10196_v8 = vpop.eup %10195  ;;  %v6990_v12 = vmul.f32 %v10194_v4, %v6958_v47  ;;  %v7187_v57 = vsub.f32 0.0, %v6931_v32  ;;  %v7036_v26 = vmul.f32 1.0614054, %v14631_v42 }
0x11b9   : > { %v14626_v37 = vpop.eup %10197  ;;  %v14628_v34 = vmul.f32 %v10192_v11, %v7007_v28  ;;  %v6946_v23 = vmul.f32 0.3275911, %v6930_v53  ;;  %v7117_v44 = vadd.f32 -0.28449672, %v7101_v40  ;;  %v7307_v24 = vmul.f32 %v7291_v41, %v14515_v48 }
0x11ba   : > { %v6963_v27 = vadd.f32 1.0, %v6947_v7  ;;  %v10200_v52 = vpop.eup %10199  ;;  %v7006_v46 = vsub.f32 2.0, %v6990_v12  ;;  %v7203_v60 = vmul.f32 %v7187_v57, %v6931_v32  ;;  %v7114_v28 = vadd.f32 -0.28449672, %v7098_v9 }
0x11bb   : > { %v6993_v47 = vmul.f32 %v10200_v52, %v14577_v62  ;;  %v6962_v6 = vadd.f32 1.0, %v6946_v23  ;;  %v7133_v5 = vmul.f32 %v7117_v44, %v14569_v10  ;;  %v14637_v2 = vpop.eup %10201  ;;  %v7039_v63 = vmul.f32 1.0614054, %v14628_v34  ;;  %7385 = vperm.xlu1 %9834, %v7307_v24  }
0x11bc   : > { %10207 = vrcp.f32 %v6963_v27  ;;  %v14634_v16 = vmul.f32 %v10194_v4, %v7006_v46  ;;  %v14641_v25 = vpop.eup %10203  ;;  %v7186_v62 = vsub.f32 0.0, %v6930_v53  ;;  %v7234_v48 = vmul.f32 1.442695, %v7203_v60 }
0x11bd   : > { %v7009_v38 = vsub.f32 2.0, %v6993_v47  ;;  %10209 = vpow2.f32 %v7230_v56  ;;  %v7149_v11 = vadd.f32 0.2548296, %v7133_v5  ;;  %v7055_v32 = vadd.f32 -1.4531521, %v7039_v63  ;;  %v10206_v31 = vpop.eup %10205 }
0x11be   : > { %10211 = vrcp.f32 %v6962_v6  ;;  %v7038_v33 = vmul.f32 1.0614054, %v14634_v16  ;;  %v6992_v55 = vmul.f32 %v10206_v31, %v6960_v59  ;;  %v7052_v54 = vadd.f32 -1.4531521, %v7036_v26 }
0x11bf   : > { %v14644_v50 = vmul.f32 %v10200_v52, %v7009_v38  ;;  %10213 = vpow2.f32 %v7228_v15  ;;  %v7165_v4 = vmul.f32 %v7149_v11, %v14569_v10  ;;  %v7071_v7 = vmul.f32 %v7055_v32, %v14628_v34 }
0x11c0   : > { %v14651_v57 = vmul.f32 %v7186_v62, %v6930_v53  ;;  %v7130_v56 = vmul.f32 %v7114_v28, %v14526_v39  ;;  %v7054_v17 = vadd.f32 -1.4531521, %v7038_v33  ;;  %v7008_v52 = vsub.f32 2.0, %v6992_v55 }
0x11c1   : > { %v7041_v12 = vmul.f32 1.0614054, %v14644_v50  ;;  %v7245_v40 = vmul.f32 %v10196_v8, %v7165_v4  ;;  %v7087_v46 = vadd.f32 1.4214138, %v7071_v7  ;;  %v7068_v44 = vmul.f32 %v7052_v54, %v14631_v42 }
0x11c2   : > { %10215 = vpow2.f32 %v7234_v48  ;;  %v7146_v47 = vadd.f32 0.2548296, %v7130_v56  ;;  %v7070_v59 = vmul.f32 %v7054_v17, %v14634_v16  ;;  %v14656_v41 = vmul.f32 %v10206_v31, %v7008_v52 }
0x11c3   : > { %v7057_v23 = vadd.f32 -1.4531521, %v7041_v12  ;;  %v7261_v10 = vsub.f32 1.0, %v7245_v40  ;;  %v7103_v53 = vmul.f32 %v7087_v46, %v14628_v34  ;;  %v7084_v60 = vadd.f32 1.4214138, %v7068_v44 }
0x11c4   : > { %v7162_v24 = vmul.f32 %v7146_v47, %v14526_v39  ;;  %v7086_v63 = vadd.f32 1.4214138, %v7070_v59  ;;  %v7040_v26 = vmul.f32 1.0614054, %v14656_v41  ;;  %vm6896_vm4 = vcmp.lt.f32.partialorder %v14588_v18, 0.0 }
0x11c5   : > { %v7073_v8 = vmul.f32 %v7057_v23, %v14644_v50  ;;  %v7277_v38 = vmul.f32 %v7261_v10, %v14567_v21  ;;  %v7119_v11 = vadd.f32 -0.28449672, %v7103_v53  ;;  %v7100_v32 = vmul.f32 %v7084_v60, %v14631_v42 }
0x11c6   : > { %v10208_v15 = vpop.eup %10207  ;;  %v7242_v4 = vmul.f32 %v14580_v43, %v7162_v24  ;;  %v7102_v28 = vmul.f32 %v7086_v63, %v14634_v16  ;;  %v7056_v10 = vadd.f32 -1.4531521, %v7040_v26  ;;  %vm6899_vm6 = vcmp.lt.f32.partialorder %v14607_v3, 0.0 }
0x11c7   : > { %v6995_v5 = vmul.f32 %v10208_v15, %v6963_v27  ;;  %v10210_v62 = vpop.eup %10209  ;;  %v7089_v9 = vadd.f32 1.4214138, %v7073_v8  ;;  %v7293_v48 = vadd.f32 1.0, %v7277_v38  ;;  %v7135_v39 = vmul.f32 %v7119_v11, %v14628_v34 }
0x11c8   : > { %v10212_v33 = vpop.eup %10211  ;;  %v7116_v55 = vadd.f32 -0.28449672, %v7100_v32  ;;  %v7258_v40 = vsub.f32 1.0, %v7242_v4  ;;  %v7118_v56 = vadd.f32 -0.28449672, %v7102_v28  ;;  %v7072_v38 = vmul.f32 %v7056_v10, %v14656_v41 }
0x11c9   : > { %v7011_v31 = vsub.f32 2.0, %v6995_v5  ;;  %v6994_v21 = vmul.f32 %v10212_v33, %v6962_v6  ;;  %v7105_v27 = vmul.f32 %v7089_v9, %v14644_v50  ;;  %v14669_v7 = vpop.eup %10213  ;;  %v7309_v54 = vmul.f32 %v7293_v48, %v14553_v13 }
0x11ca   : > { %v7151_v43 = vadd.f32 0.2548296, %v7135_v39  ;;  %v7132_v46 = vmul.f32 %v7116_v55, %v14631_v42  ;;  %v7274_v6 = vmul.f32 %v7258_v40, %v14541_v20  ;;  %v7134_v44 = vmul.f32 %v7118_v56, %v14634_v16 }
0x11cb   : > { %v14671_v12 = vmul.f32 %v10208_v15, %v7011_v31  ;;  %v7010_v17 = vsub.f32 2.0, %v6994_v21  ;;  %v7121_v52 = vadd.f32 -0.28449672, %v7105_v27  ;;  %7395 = vperm.xlu0 %9833, %v7309_v54   ;;  %v7088_v26 = vadd.f32 1.4214138, %v7072_v38 }
0x11cc   : > { %v7167_v59 = vmul.f32 %v7151_v43, %v14628_v34  ;;  %v7148_v15 = vadd.f32 0.2548296, %v7132_v46  ;;  %v14682_v53 = vpop.eup %10215  ;;  %v7290_v8 = vadd.f32 1.0, %v7274_v6  ;;  %v7150_v5 = vadd.f32 0.2548296, %v7134_v44 }
0x11cd   : > { %v7043_v23 = vmul.f32 1.0614054, %v14671_v12  ;;  %v14678_v47 = vmul.f32 %v10212_v33, %v7010_v17  ;;  %v7137_v13 = vmul.f32 %v7121_v52, %v14644_v50  ;;  %v7232_v28 = vmul.f32 1.442695, %v14651_v57 }
0x11ce   : > { %v7247_v24 = vmul.f32 %v14637_v2, %v7167_v59  ;;  %v7164_v11 = vmul.f32 %v7148_v15, %v14631_v42  ;;  %v7306_v9 = vmul.f32 %v7290_v8, %v14533_v61  ;;  %v7166_v32 = vmul.f32 %v7150_v5, %v14634_v16 }
0x11cf   : > { %v7059_v60 = vadd.f32 -1.4531521, %v7043_v23  ;;  %v7042_v20 = vmul.f32 1.0614054, %v14678_v47  ;;  %v7153_v63 = vadd.f32 0.2548296, %v7137_v13  ;;  %v7104_v42 = vmul.f32 %v7088_v26, %v14656_v41 }
0x11d0   : > { %v7263_v31 = vsub.f32 1.0, %v7247_v24  ;;  %v7244_v4 = vmul.f32 %v14626_v37, %v7164_v11  ;;  %7380 = vperm.xlu1 %9834, %v7306_v9   ;;  %v7246_v21 = vmul.f32 %v14641_v25, %v7166_v32  ;;  %10217 = vpow2.f32 %v7232_v28 }
0x11d1   : > { %v7075_v34 = vmul.f32 %v7059_v60, %v14671_v12  ;;  %v7058_v33 = vadd.f32 -1.4531521, %v7042_v20  ;;  %v7169_v48 = vmul.f32 %v7153_v63, %v14644_v50  ;;  %v6913_v50 = vsel %vm6897_vm3, -1.0, %v15192_v35 }
0x11d2   : > { %v7279_v39 = vmul.f32 %v7263_v31, %v14617_v58  ;;  %v7260_v27 = vsub.f32 1.0, %v7244_v4  ;;  %v7262_v55 = vsub.f32 1.0, %v7246_v21  ;;  %v7120_v57 = vadd.f32 -0.28449672, %v7104_v42 }
0x11d3   : > { %v7091_v2 = vadd.f32 1.4214138, %v7075_v34  ;;  %v7074_v61 = vmul.f32 %v7058_v33, %v14678_v47  ;;  %v7249_v16 = vmul.f32 %v10210_v62, %v7169_v48  ;;  %v6865_v6 = vmul.f32 0.5, %v14550_v30 }
0x11d4   : > { %v7295_v40 = vadd.f32 1.0, %v7279_v39  ;;  %v7276_v25 = vmul.f32 %v7260_v27, %v14585_v49  ;;  %v7278_v43 = vmul.f32 %v7262_v55, %v14622_v36  ;;  %v7136_v58 = vmul.f32 %v7120_v57, %v14656_v41  ;;  %v7321_v27 = vld [vmem:[%s14851_s13 + $0x28] sm:$0xff] }
0x11d5   : > { %v7107_v37 = vmul.f32 %v7091_v2, %v14671_v12  ;;  %v7090_v54 = vadd.f32 1.4214138, %v7074_v61  ;;  %v7265_v56 = vsub.f32 1.0, %v7249_v16  ;;  %v6862_v8 = vmul.f32 0.5, %v14536_v29  ;;  %v7317_v61 = vld [vmem:[%s14851_s13 + $0x8] sm:$0xff]  ;;  %v7320_v16 = vld [vmem:[%s14851_s13 + $0x20] sm:$0xff] }
0x11d6   : > { %v7311_v19 = vmul.f32 %v7295_v40, %v14592_v14  ;;  %v7292_v46 = vadd.f32 1.0, %v7276_v25  ;;  %v7152_v44 = vadd.f32 0.2548296, %v7136_v58  ;;  %v7294_v13 = vadd.f32 1.0, %v7278_v43  ;;  %v7322_v43 = vld [vmem:[%s14851_s13 + $0x30] sm:$0xff]  ;;  %v7323_v58 = vld [vmem:[%s14851_s13 + $0x38] sm:$0xff] }
0x11d7   : > { %v7123_v17 = vadd.f32 -0.28449672, %v7107_v37  ;;  %v7106_v62 = vmul.f32 %v7090_v54, %v14678_v47  ;;  %v7281_v52 = vmul.f32 %v7265_v56, %v6913_v50  ;;  %v6912_v29 = vsel %vm6896_vm4, -1.0, %v15192_v35 }
0x11d8   : > { %7405 = vperm.xlu0 %9833, %v7311_v19   ;;  %v7308_v59 = vmul.f32 %v7292_v46, %v14575_v22  ;;  %v7168_v15 = vmul.f32 %v7152_v44, %v14656_v41  ;;  %v7310_v20 = vmul.f32 %v7294_v13, %v6862_v8  ;;  %vm6898_vm7 = vcmp.lt.f32.partialorder %v14611_v51, 0.0  ;;  %v7325_v19 = vld [vmem:[%s14851_s13 + $0x48] sm:$0xff] }
0x11d9   : > { %v7139_v23 = vmul.f32 %v7123_v17, %v14671_v12  ;;  %v7122_v10 = vadd.f32 -0.28449672, %v7106_v62  ;;  %v7297_v49 = vadd.f32 1.0, %v7281_v52  ;;  %v6864_v9 = vmul.f32 0.5, %v14572_v1  ;;  %v7324_v62 = vld [vmem:[%s14851_s13 + $0x40] sm:$0xff] }
0x11da   : > { %7390 = vperm.xlu1 %9834, %v7308_v59   ;;  %v7248_v5 = vmul.f32 %v14669_v7, %v7168_v15  ;;  %v10218_v63 = vpop.eup %10217  ;;  %v6914_v26 = vsel %vm6898_vm7, -1.0, %v15192_v35  ;;  %v6866_v4 = vmul.f32 0.5, %v14604_v0  ;;  %v7316_v0 = vld [vmem:[%s14851_s13] sm:$0xff]  ;;  %v7327_v15 = vld [vmem:[%s14851_s13 + $0x58] sm:$0xff] }
0x11db   : > { %v7155_v36 = vadd.f32 0.2548296, %v7139_v23  ;;  %v7138_v14 = vmul.f32 %v7122_v10, %v14678_v47  ;;  %v7313_v60 = vmul.f32 %v7297_v49, %v6865_v6 }
0x11dc   : > { %v7264_v41 = vsub.f32 1.0, %v7248_v5 }
0x11dd   : > { %v7171_v30 = vmul.f32 %v7155_v36, %v14671_v12  ;;  %v7154_v38 = vadd.f32 0.2548296, %v7138_v14  ;;  %7415 = vperm.xlu0 %9833, %v7313_v60   ;;  %v6915_v12 = vsel %vm6899_vm6, -1.0, %v15192_v35  ;;  %v7319_v35 = vld [vmem:[%s14851_s13 + $0x18] sm:$0xff]  ;;  %v7326_v36 = vld [vmem:[%s14851_s13 + $0x50] sm:$0xff]  ;;  %v7328_v60 = vld [vmem:[%s14851_s13 + $0x60] sm:$0xff] }
0x11de   : > { %7400 = vperm.xlu1 %9834, %v7310_v20   ;;  %v7280_v18 = vmul.f32 %v7264_v41, %v6912_v29 }
0x11df   : > { %v7251_v22 = vmul.f32 %v14682_v53, %v7171_v30  ;;  %v7170_v24 = vmul.f32 %v7154_v38, %v14678_v47  ;;  %v6867_v53 = vmul.f32 0.5, %v14599_v45  ;;  %v7318_v45 = vld [vmem:[%s14851_s13 + $0x10] sm:$0xff]  ;;  %v7329_v30 = vld [vmem:[%s14851_s13 + $0x68] sm:$0xff] }
0x11e0   : > { %v7296_v3 = vadd.f32 1.0, %v7280_v18 }
0x11e1   : > { %v7267_v11 = vsub.f32 1.0, %v7251_v22  ;;  %v7250_v7 = vmul.f32 %v10218_v63, %v7170_v24  ;;  %v7330_v63 = vld [vmem:[%s14851_s13 + $0x70] sm:$0xff] }
0x11e2   : > { %v7312_v47 = vmul.f32 %v7296_v3, %v6864_v9  ;;  %v7332_v3 = vld [vmem:[%s14851_s13 + $0x80] sm:$0xff] }
0x11e3   : > { %v7283_v34 = vmul.f32 %v7267_v11, %v6915_v12  ;;  %v7266_v32 = vsub.f32 1.0, %v7250_v7  ;;  %v7331_v11 = vld [vmem:[%s14851_s13 + $0x78] sm:$0xff] }
0x11e4   : > { %7410 = vperm.xlu1 %9834, %v7312_v47   ;;  %v7335_v47 = vld [vmem:[%s14851_s13 + $0x98] sm:$0xff] }
0x11e5   : > { %v7299_v33 = vadd.f32 1.0, %v7283_v34  ;;  %v7282_v31 = vmul.f32 %v7266_v32, %v6914_v26  ;;  %v7333_v32 = vld [vmem:[%s14851_s13 + $0x88] sm:$0xff] }
0x11e7   : > { %v7315_v48 = vmul.f32 %v7299_v33, %v6867_v53  ;;  %v7298_v28 = vadd.f32 1.0, %v7282_v31  ;;  %v7334_v33 = vld [vmem:[%s14851_s13 + $0x90] sm:$0xff] }
0x11e9   : > { %7425 = vperm.xlu0 %9833, %v7315_v48   ;;  %v7314_v51 = vmul.f32 %v7298_v28, %v6866_v4  ;;  %v7336_v28 = vld [vmem:[%s14851_s13 + $0xa0] sm:$0xff] }
0x11eb   : > { %7420 = vperm.xlu1 %9834, %v7314_v51   ;;  %v7337_v51 = vld [vmem:[%s14851_s13 + $0xa8] sm:$0xff] }
0x1212   : > { %v7356_v2 = vpop.permute.xlu1 %7355 }
0x1213   : > { %v7351_v39 = vpop.permute.xlu0 %7350  ;;  %v7430_v50 = vmul.f32 %v7356_v2, %v7318_v45  ;;  %v7431_v37 = vmul.f32 %v7356_v2, %v7319_v35 }
0x1214   : > { %v7428_v55 = vmul.f32 %v7351_v39, %v7316_v0  ;;  %v7429_v57 = vmul.f32 %v7351_v39, %v7317_v61  ;;  %v7338_v0 = vld [vmem:[%s14851_s13 + $0xb0] sm:$0xff]  ;;  %v7339_v61 = vld [vmem:[%s14851_s13 + $0xb8] sm:$0xff] }
0x1216   : > { %v7460_v25 = vadd.f32 %v7430_v50, %v7428_v55  ;;  %v7481_v17 = vadd.f32 %v7431_v37, %v7429_v57 }
0x1217   : > { %v7366_v1 = vpop.permute.xlu1 %7365 }
0x1218   : > { %v7434_v6 = vmul.f32 %v7366_v1, %v7322_v43  ;;  %v7435_v23 = vmul.f32 %v7366_v1, %v7323_v58  ;;  %v7342_v58 = vld [vmem:[%s14851_s13 + $0xd0] sm:$0xff] }
0x121c   : > { %v7361_v21 = vpop.permute.xlu1 %7360 }
0x121d   : > { %v7432_v54 = vmul.f32 %v7361_v21, %v7320_v16  ;;  %v7433_v40 = vmul.f32 %v7361_v21, %v7321_v27 }
0x121f   : > { %v7461_v52 = vadd.f32 %v7460_v25, %v7432_v54  ;;  %v7482_v46 = vadd.f32 %v7481_v17, %v7433_v40  ;;  %v7340_v40 = vld [vmem:[%s14851_s13 + $0xc0] sm:$0xff] }
0x1220   : > { %v7376_v42 = vpop.permute.xlu1 %7375 }
0x1221   : > { %v7462_v59 = vadd.f32 %v7461_v52, %v7434_v6  ;;  %v7483_v13 = vadd.f32 %v7482_v46, %v7435_v23  ;;  %v7438_v5 = vmul.f32 %v7376_v42, %v7326_v36  ;;  %v7439_v38 = vmul.f32 %v7376_v42, %v7327_v15  ;;  %v7347_v36 = vld [vmem:[%s14851_s13 + $0xf8] sm:$0xff] }
0x1224   : > { %v7371_v56 = vpop.permute.xlu1 %7370 }
0x1225   : > { %v7436_v44 = vmul.f32 %v7371_v56, %v7324_v62  ;;  %v7437_v10 = vmul.f32 %v7371_v56, %v7325_v19  ;;  %v7341_v56 = vld [vmem:[%s14851_s13 + $0xc8] sm:$0xff]  ;;  %v7343_v62 = vld [vmem:[%s14851_s13 + $0xd8] sm:$0xff] }
0x1227   : > { %v7463_v8 = vadd.f32 %v7462_v59, %v7436_v44  ;;  %v7484_v14 = vadd.f32 %v7483_v13, %v7437_v10  ;;  %v7345_v59 = vld [vmem:[%s14851_s13 + $0xe8] sm:$0xff]  ;;  %v7346_v13 = vld [vmem:[%s14851_s13 + $0xf0] sm:$0xff] }
0x1229   : > { %v7464_v29 = vadd.f32 %v7463_v8, %v7438_v5  ;;  %v7485_v24 = vadd.f32 %v7484_v14, %v7439_v38 }
0x123a   : > { %v7386_v49 = vpop.permute.xlu1 %7385 }
0x123b   : > { %v7442_v7 = vmul.f32 %v7386_v49, %v7330_v63  ;;  %v7443_v9 = vmul.f32 %v7386_v49, %v7331_v11  ;;  %v7344_v49 = vld [vmem:[%s14851_s13 + $0xe0] sm:$0xff] }
0x124a   : > { %v7396_v34 = vpop.permute.xlu0 %7395 }
0x124b   : > { %v7446_v2 = vmul.f32 %v7396_v34, %v7334_v33  ;;  %v7447_v1 = vmul.f32 %v7396_v34, %v7335_v47  ;;  %v15199_v33 = vld [vmem:[#allocation11_spill] sm:$0xff] }
0x124c   : > { %v15200_v47 = vsub.s32 0, %v15199_v33 }
0x124f   : > { %v7381_v20 = vpop.permute.xlu1 %7380 }
0x1250   : > { %v7440_v22 = vmul.f32 %v7381_v20, %v7328_v60  ;;  %v7441_v41 = vmul.f32 %v7381_v20, %v7329_v30 }
0x1252   : > { %v7465_v18 = vadd.f32 %v7464_v29, %v7440_v22  ;;  %v7486_v12 = vadd.f32 %v7485_v24, %v7441_v41 }
0x1254   : > { %v7466_v53 = vadd.f32 %v7465_v18, %v7442_v7  ;;  %v7487_v26 = vadd.f32 %v7486_v12, %v7443_v9  ;;  %v7502_v7 = vld [vmem:[%s14852_s14] sm:$0x3]  ;;  %v10355_v9 = vmov 1966171168  }
0x1255   : > { %v7520_v34 = vunpack.c.l.s4 %v10355_v9 }
0x1257   : > { %v7406_v42 = vpop.permute.xlu0 %7405 }
0x1258   : > { %v7450_v57 = vmul.f32 %v7406_v42, %v7338_v0  ;;  %v7451_v54 = vmul.f32 %v7406_v42, %v7339_v61 }
0x1259   : > { %v7391_v31 = vpop.permute.xlu1 %7390 }
0x125a   : > { %v7444_v48 = vmul.f32 %v7391_v31, %v7332_v3  ;;  %v7445_v4 = vmul.f32 %v7391_v31, %v7333_v32  ;;  %v7507_v31 = vrot.slane %v7502_v7, %v15200_v47 }
0x125c   : > { %v7467_v21 = vadd.f32 %v7466_v53, %v7444_v48  ;;  %v7488_v45 = vadd.f32 %v7487_v26, %v7445_v4  ;;  %v7416_v25 = vpop.permute.xlu0 %7415  ;;  %v15201_v48 = vsub.s32 1, %v15199_v33 }
0x125d   : > { %v7401_v35 = vpop.permute.xlu1 %7400  ;;  %v7454_v6 = vmul.f32 %v7416_v25, %v7342_v58  ;;  %v7455_v23 = vmul.f32 %v7416_v25, %v7343_v62 }
0x125e   : > { %v7448_v39 = vmul.f32 %v7401_v35, %v7336_v28  ;;  %v7449_v16 = vmul.f32 %v7401_v35, %v7337_v51  ;;  %v7468_v27 = vadd.f32 %v7467_v21, %v7446_v2  ;;  %v7489_v50 = vadd.f32 %v7488_v45, %v7447_v1 }
0x125f   : > { %v7511_v4 = vrot.slane %v7502_v7, %v15201_v48  ;;  %v7521_v28 = vunpack.c.0.s8 %v7520_v34 }
0x1260   : > { %v7469_v37 = vadd.f32 %v7468_v27, %v7448_v39  ;;  %v7490_v55 = vadd.f32 %v7489_v50, %v7449_v16  ;;  %v15202_v39 = vlaneseq }
0x1261   : > { %v7524_v45 = vsub.s32 %v7521_v28, %v15199_v33 }
0x1262   : > { %v7470_v17 = vadd.f32 %v7469_v37, %v7450_v57  ;;  %v7491_v43 = vadd.f32 %v7490_v55, %v7451_v54  ;;  %vm7536_vm5 = vcmp.lt.s32.totalorder %v15202_v39, 256 }
0x1263   : > { %v7411_v19 = vpop.permute.xlu1 %7410 }
0x1264   : > { %v7452_v52 = vmul.f32 %v7411_v19, %v7340_v40  ;;  %v7453_v46 = vmul.f32 %v7411_v19, %v7341_v56 }
0x1266   : > { %v7471_v44 = vadd.f32 %v7470_v17, %v7452_v52  ;;  %v7492_v10 = vadd.f32 %v7491_v43, %v7453_v46 }
0x1268   : > { %v7426_v15 = vpop.permute.xlu0 %7425  ;;  %v7472_v14 = vadd.f32 %v7471_v44, %v7454_v6  ;;  %v7493_v60 = vadd.f32 %v7492_v10, %v7455_v23 }
0x1269   : > { %v7458_v38 = vmul.f32 %v7426_v15, %v7346_v13  ;;  %v7459_v20 = vmul.f32 %v7426_v15, %v7347_v36 }
0x126a   : > { %v7421_v8 = vpop.permute.xlu1 %7420 }
0x126b   : > { %v7456_v30 = vmul.f32 %v7421_v8, %v7344_v49  ;;  %v7457_v5 = vmul.f32 %v7421_v8, %v7345_v59 }
0x126d   : > { %v7473_v22 = vadd.f32 %v7472_v14, %v7456_v30  ;;  %v7494_v41 = vadd.f32 %v7493_v60, %v7457_v5 }
0x126f   : > { %v7474_v29 = vadd.f32 %v7473_v22, %v7458_v38  ;;  %v7495_v24 = vadd.f32 %v7494_v41, %v7459_v20 }
0x1271   : > { %v7475_v63 = vrot.slane %v7474_v29, 4  ;;  %v7496_v11 = vrot.slane %v7495_v24, 4 }
0x1273   : > { %v7476_v18 = vadd.f32 %v7475_v63, %v7474_v29  ;;  %v7497_v12 = vadd.f32 %v7496_v11, %v7495_v24 }
0x1275   : > { %v7477_v3 = vrot.slane %v7476_v18, 2  ;;  %v7498_v32 = vrot.slane %v7497_v12, 2 }
0x1277   : > { %v7478_v53 = vadd.f32 %v7477_v3, %v7476_v18  ;;  %v7499_v26 = vadd.f32 %v7498_v32, %v7497_v12 }
0x1279   : > { %v7479_v51 = vrot.slane %v7478_v53, 1  ;;  %v7500_v2 = vrot.slane %v7499_v26, 1 }
0x127b   : > { %v7480_v1 = vadd.f32 %v7479_v51, %v7478_v53  ;;  %v7501_v21 = vadd.f32 %v7500_v2, %v7499_v26 }
0x127d   : > { %v7514_v42 = vadd.f32 %v7507_v31, %v7480_v1  ;;  %v7515_v35 = vadd.f32 %v7511_v4, %v7501_v21 }
0x127f   : > { %v7518_v0 = vcombine.low %v7514_v42, %v7515_v35 }
0x1281   : > { %v7525_v61 = vrot.slane %v7518_v0, %v7524_v45 }
0x1283   : > { %v7532_v16 = vrot.slane %v7525_v61, %v7524_v45 }
0x1285   : > { %7538 = vst.msk [vmem:[%s524_s24] sm:$0x3] %vm7536_vm5, %v7532_v16 }
0x1286 PF: > { %s15203_s28 = sld [smem:[#allocation9_spill]] }
0x128c   : > { %s29_s20 = sadd.s32 1, %s15203_s28  }
0x128d   : > { %p26_p5 = scmp.ge.s32.totalorder %s29_s20, 4  }
0x128f   :  { %28 = sbr.rel (!%p26_p5) target bundleno = 5 (0x5), region = 131 }
0x1296   :  { %7558 = vsyncpa [#allocation4], 1 }
0x1297   :  { %7560 = vsyncpa [#allocation4 + $0x1], 1 }
0x1298   :  { %7561 = vsyncpa [#allocation6], 1 }

</bundles_post_ra>
